<compile_context>
chip_gen: v7x
topology: tpu7x:2x2x1
jax: 0.10.0
libtpu: 0.0.40
codegen_flags: <defaults>
</compile_context>

<pallas_src>
import functools
import math

import jax
import jax.numpy as jnp
from jax.experimental import pallas as pl
from jax.experimental.pallas import tpu as pltpu

OUT_CHANNELS = 2  # real channels of the final conv (rest is lane padding)


# ----------------------------------------------------------------------------
# In-kernel helpers (traced inside the fused kernel)
# ----------------------------------------------------------------------------
def _conv3x3_flat(a, pf_ref, w_ref, b_ref, *, H, W, act):
    """3x3 conv (padding=1) on a spatially-flattened (H*W, Cin) f32 activation.

    pf_ref : (H*W + 2*W + 2, Cin) f32 VMEM scratch.  The activation is stored
      at rows [W+1, W+1+H*W) with zero rows on both sides, so tap (dy, dx) is
      the static slice pf[dy*W+dx : dy*W+dx + H*W].  Vertical out-of-range taps
      land in the zero pad; only the horizontal wrap (dx=0 at col 0, dx=2 at
      col W-1) needs a mask.
    w_ref  : (9, Cin, Cout) bf16 (tap-major),  b_ref : (1, Cout) f32.
    Returns the (H*W, Cout) f32 activation after bias + ReLU / Tanh.
    """
    M = H * W
    Cout = w_ref.shape[2]

    pf_ref[...] = jnp.zeros_like(pf_ref)
    pf_ref[W + 1:W + 1 + M, :] = a

    col = jax.lax.broadcasted_iota(jnp.int32, (M, 1), 0) % W
    acc = jnp.zeros((M, Cout), jnp.float32)
    for dy in range(3):
        for dx in range(3):
            off = dy * W + dx
            tap = pf_ref[off:off + M, :]                      # (M, Cin) f32
            if dx == 0:            # would read the left neighbour of column 0
                tap = jnp.where(col >= 1, tap, 0.0)
            elif dx == 2:          # would read the right neighbour of col W-1
                tap = jnp.where(col < W - 1, tap, 0.0)
            acc = acc + jnp.dot(tap.astype(jnp.bfloat16), w_ref[dy * 3 + dx],
                                preferred_element_type=jnp.float32)
    acc = acc + b_ref[...]
    return jnp.maximum(acc, 0.0) if act == "relu" else jnp.tanh(acc)


def _upsample2(a, u_ref):
    """Nearest x2 upsample of a flattened (H*W, C) activation via a 0/1 matmul."""
    return jnp.dot(u_ref[...], a.astype(jnp.bfloat16),
                   preferred_element_type=jnp.float32)


def _decoder_kernel(x_ref, w1, b1, w2, b2, u1, w3, b3, w4, b4, u2,
                    w5, b5, w6, b6, u3, o_ref,
                    pf2, pf3, pf4, pf5, pf6, *, H0, W0):
    H1, W1 = 2 * H0, 2 * W0
    H2, W2 = 2 * H1, 2 * W1

    # conv1: 1x1 pointwise + ReLU  -- one (H0*W0, Kpad) x (Kpad, 256) matmul.
    a = jnp.dot(x_ref[0], w1[...], preferred_element_type=jnp.float32)
    a = jnp.maximum(a + b1[...], 0.0)                               # (16, 256)

    a = _conv3x3_flat(a, pf2, w2, b2, H=H0, W=W0, act="relu")       # (16, 128)
    a = _upsample2(a, u1)                                           # (64, 128)
    a = _conv3x3_flat(a, pf3, w3, b3, H=H1, W=W1, act="relu")       # (64, 64)
    a = _conv3x3_flat(a, pf4, w4, b4, H=H1, W=W1, act="relu")       # (64, 64)
    a = _upsample2(a, u2)                                           # (256, 64)
    a = _conv3x3_flat(a, pf5, w5, b5, H=H2, W=W2, act="relu")       # (256, 32)
    a = _conv3x3_flat(a, pf6, w6, b6, H=H2, W=W2, act="tanh")       # (256, 128)
    a = _upsample2(a, u3)                                           # (1024, 128)

    o_ref[0] = a                       # lane-dense (1024, 128) f32 store


# ----------------------------------------------------------------------------
# Wrapper: NCHW in / NCHW out, one pallas_call for the whole decoder
# ----------------------------------------------------------------------------
def decoder_forward(x_nchw, params):
    N, C, H0, W0 = x_nchw.shape
    cin_pad = params["w1"].shape[0]
    cout_pad = params["w6"].shape[2]
    H1, W1 = 2 * H0, 2 * W0
    H2, W2 = 2 * H1, 2 * W1
    H3, W3 = 2 * H2, 2 * W2

    # NCHW -> spatially-flattened channels-last; K zero-padded to 128 multiple.
    x = jnp.transpose(x_nchw, (0, 2, 3, 1)).reshape(N, H0 * W0, C)
    x = jnp.pad(x, ((0, 0), (0, 0), (0, cin_pad - C))).astype(jnp.bfloat16)

    def const_spec(arr):
        nd = arr.ndim
        return pl.BlockSpec(arr.shape, lambda n, _nd=nd: (0,) * _nd)

    order = ("w1", "b1", "w2", "b2", "u1", "w3", "b3", "w4", "b4", "u2",
             "w5", "b5", "w6", "b6", "u3")
    weight_args = [params[k] for k in order]

    pad_rows = lambda h, w: h * w + 2 * w + 2
    out = pl.pallas_call(
        functools.partial(_decoder_kernel, H0=H0, W0=W0),
        out_shape=jax.ShapeDtypeStruct((N, H3 * W3, cout_pad), jnp.float32),
        grid=(N,),
        in_specs=[pl.BlockSpec((1, H0 * W0, cin_pad), lambda n: (n, 0, 0))]
                + [const_spec(a) for a in weight_args],
        out_specs=pl.BlockSpec((1, H3 * W3, cout_pad), lambda n: (n, 0, 0)),
        scratch_shapes=[
            pltpu.VMEM((pad_rows(H0, W0), params["w2"].shape[1]), jnp.float32),
            pltpu.VMEM((pad_rows(H1, W1), params["w3"].shape[1]), jnp.float32),
            pltpu.VMEM((pad_rows(H1, W1), params["w4"].shape[1]), jnp.float32),
            pltpu.VMEM((pad_rows(H2, W2), params["w5"].shape[1]), jnp.float32),
            pltpu.VMEM((pad_rows(H2, W2), params["w6"].shape[1]), jnp.float32),
        ],
        compiler_params=pltpu.CompilerParams(
            dimension_semantics=("parallel",)),
    )(x, *weight_args)

    out = out[:, :, :OUT_CHANNELS].reshape(N, H3, W3, OUT_CHANNELS)
    return jnp.transpose(out, (0, 3, 1, 2))            # NHWC -> NCHW


# ----------------------------------------------------------------------------
# Parameters (deterministic PyTorch-style uniform init, pre-packed for the
# kernel: bf16 tap-major weights, lane/K padding, 0/1 upsample matrices)
# ----------------------------------------------------------------------------
def _upsample2_matrix(h, w, dtype=jnp.bfloat16):
    """(4*h*w, h*w) 0/1 matrix doing nearest x2 upsampling on a row-major
    flattened (h, w) grid."""
    i = jnp.arange(4 * h * w)
    src = (i // (2 * w) // 2) * w + (i % (2 * w)) // 2
    return (src[:, None] == jnp.arange(h * w)[None, :]).astype(dtype)


def init_params(key, cin=1257, h=4, w=4):
    def conv_wb(k, kh, kw, cin_, cout, cout_pad=None):
        bound = 1.0 / math.sqrt(cin_ * kh * kw)
        wgt = jax.random.uniform(k, (kh, kw, cin_, cout), jnp.float32,
                                 -bound, bound)
        bias = jax.random.uniform(jax.random.fold_in(k, 1), (cout,),
                                  jnp.float32, -bound, bound)
        if cout_pad is not None and cout_pad > cout:
            wgt = jnp.pad(wgt, ((0, 0), (0, 0), (0, 0), (0, cout_pad - cout)))
            bias = jnp.pad(bias, ((0, cout_pad - cout),))
        return wgt, bias

    def conv3(k, cin_, cout, cout_pad=None):
        wgt, bias = conv_wb(k, 3, 3, cin_, cout, cout_pad)
        cp = wgt.shape[-1]
        # (3, 3, Cin, Cout) -> tap-major (9, Cin, Cout) bf16 for the kernel.
        return wgt.reshape(9, cin_, cp).astype(jnp.bfloat16), bias.reshape(1, cp)

    cin_pad = -(-cin // 128) * 128                      # 1257 -> 1280
    ks = jax.random.split(key, 6)

    w1, b1 = conv_wb(ks[0], 1, 1, cin, 256)
    w1 = jnp.pad(w1.reshape(cin, 256), ((0, cin_pad - cin), (0, 0)))

    w2, b2 = conv3(ks[1], 256, 128)
    w3, b3 = conv3(ks[2], 128, 64)
    w4, b4 = conv3(ks[3], 64, 64)
    w5, b5 = conv3(ks[4], 64, 32)
    w6, b6 = conv3(ks[5], 32, OUT_CHANNELS, cout_pad=128)  # lane-dense store

    return {
        "w1": w1.astype(jnp.bfloat16), "b1": b1.reshape(1, 256),
        "w2": w2, "b2": b2, "w3": w3, "b3": b3, "w4": w4, "b4": b4,
        "w5": w5, "b5": b5, "w6": w6, "b6": b6,
        "u1": _upsample2_matrix(h, w),
        "u2": _upsample2_matrix(2 * h, 2 * w),
        "u3": _upsample2_matrix(4 * h, 4 * w),
    }


# ----------------------------------------------------------------------------
# Pure-JAX reference (f32 math) for a correctness cross-check
# ----------------------------------------------------------------------------
def decoder_reference(x_nchw, params):
    f32 = jnp.float32
    x = jnp.transpose(x_nchw, (0, 2, 3, 1)).astype(f32)            # NHWC
    cin = x.shape[-1]
    x = jnp.einsum("nhwc,cd->nhwd", x, params["w1"].astype(f32)[:cin])
    x = jnp.maximum(x + params["b1"][0], 0.0)

    def conv3(x, wk, bk, cout, act):
        wgt = wk.astype(f32).reshape(3, 3, wk.shape[1], wk.shape[2])[..., :cout]
        y = jax.lax.conv_general_dilated(
            x, wgt, window_strides=(1, 1), padding="SAME",
            dimension_numbers=("NHWC", "HWIO", "NHWC"))
        y = y + bk.astype(f32)[0, :cout]
        return jnp.maximum(y, 0.0) if act == "relu" else jnp.tanh(y)

    def up2(x):
        return jnp.repeat(jnp.repeat(x, 2, axis=1), 2, axis=2)

    x = conv3(x, params["w2"], params["b2"], 128, "relu")
    x = up2(x)
    x = conv3(x, params["w3"], params["b3"], 64, "relu")
    x = conv3(x, params["w4"], params["b4"], 64, "relu")
    x = up2(x)
    x = conv3(x, params["w5"], params["b5"], 32, "relu")
    x = conv3(x, params["w6"], params["b6"], OUT_CHANNELS, "tanh")
    x = up2(x)
    return jnp.transpose(x, (0, 3, 1, 2))


if __name__ == "__main__":
    key = jax.random.PRNGKey(0)
    kx, kp = jax.random.split(key)
    N, C, H, W = 2, 1257, 4, 4                 # fusion-layer-like feature map
    x = jax.random.normal(kx, (N, C, H, W), jnp.float32)
    params = init_params(kp, cin=C, h=H, w=W)

    out = jax.block_until_ready(jax.jit(decoder_forward)(x, params))

    assert out.shape == (N, OUT_CHANNELS, H * 8, W * 8), out.shape
    assert bool(jnp.all(jnp.isfinite(out)))
    assert bool(jnp.all(out >= -1.0)) and bool(jnp.all(out <= 1.0))  # post-tanh

    ref = jax.block_until_ready(jax.jit(decoder_reference)(x, params))
    max_err = float(jnp.max(jnp.abs(out - ref)))
    assert max_err < 5e-2, f"max |pallas - ref| = {max_err}"

    print("KERNEL_OK")
</pallas_src>

<mosaic_0001>
module attributes {stable_mosaic.version = 11 : i64} {
  func.func @_decoder_kernel(%arg0: i32, %arg1: memref<1x16x1280xbf16, #tpu.memory_space<vmem>>, %arg2: memref<1280x256xbf16, #tpu.memory_space<vmem>>, %arg3: memref<1x256xf32, #tpu.memory_space<vmem>>, %arg4: memref<9x256x128xbf16, #tpu.memory_space<vmem>>, %arg5: memref<1x128xf32, #tpu.memory_space<vmem>>, %arg6: memref<64x16xbf16, #tpu.memory_space<vmem>>, %arg7: memref<9x128x64xbf16, #tpu.memory_space<vmem>>, %arg8: memref<1x64xf32, #tpu.memory_space<vmem>>, %arg9: memref<9x64x64xbf16, #tpu.memory_space<vmem>>, %arg10: memref<1x64xf32, #tpu.memory_space<vmem>>, %arg11: memref<256x64xbf16, #tpu.memory_space<vmem>>, %arg12: memref<9x64x32xbf16, #tpu.memory_space<vmem>>, %arg13: memref<1x32xf32, #tpu.memory_space<vmem>>, %arg14: memref<9x32x128xbf16, #tpu.memory_space<vmem>>, %arg15: memref<1x128xf32, #tpu.memory_space<vmem>>, %arg16: memref<1024x256xbf16, #tpu.memory_space<vmem>>, %arg17: memref<1x1024x128xf32, #tpu.memory_space<vmem>>, %arg18: memref<26x256xf32, #tpu.memory_space<vmem>>, %arg19: memref<82x128xf32, #tpu.memory_space<vmem>>, %arg20: memref<82x64xf32, #tpu.memory_space<vmem>>, %arg21: memref<290x64xf32, #tpu.memory_space<vmem>>, %arg22: memref<290x32xf32, #tpu.memory_space<vmem>>) attributes {dimension_semantics = [#tpu.dimension_semantics<parallel>], iteration_bounds = array<i64: 2>, scalar_prefetch = 0 : i64, scratch_operands = 5 : i64, tpu.core_type = #tpu.core_type<tc>, window_params = [{transform_indices = @transform_0, window_bounds = array<i64: 1, 16, 1280>}, {pipeline_mode = #tpu.pipeline_mode<synchronous>, transform_indices = @transform_1, window_bounds = array<i64: 1280, 256>}, {pipeline_mode = #tpu.pipeline_mode<synchronous>, transform_indices = @transform_2, window_bounds = array<i64: 1, 256>}, {pipeline_mode = #tpu.pipeline_mode<synchronous>, transform_indices = @transform_3, window_bounds = array<i64: 9, 256, 128>}, {pipeline_mode = #tpu.pipeline_mode<synchronous>, transform_indices = @transform_4, window_bounds = array<i64: 1, 128>}, {pipeline_mode = #tpu.pipeline_mode<synchronous>, transform_indices = @transform_5, window_bounds = array<i64: 64, 16>}, {pipeline_mode = #tpu.pipeline_mode<synchronous>, transform_indices = @transform_6, window_bounds = array<i64: 9, 128, 64>}, {pipeline_mode = #tpu.pipeline_mode<synchronous>, transform_indices = @transform_7, window_bounds = array<i64: 1, 64>}, {pipeline_mode = #tpu.pipeline_mode<synchronous>, transform_indices = @transform_8, window_bounds = array<i64: 9, 64, 64>}, {pipeline_mode = #tpu.pipeline_mode<synchronous>, transform_indices = @transform_9, window_bounds = array<i64: 1, 64>}, {pipeline_mode = #tpu.pipeline_mode<synchronous>, transform_indices = @transform_10, window_bounds = array<i64: 256, 64>}, {pipeline_mode = #tpu.pipeline_mode<synchronous>, transform_indices = @transform_11, window_bounds = array<i64: 9, 64, 32>}, {pipeline_mode = #tpu.pipeline_mode<synchronous>, transform_indices = @transform_12, window_bounds = array<i64: 1, 32>}, {pipeline_mode = #tpu.pipeline_mode<synchronous>, transform_indices = @transform_13, window_bounds = array<i64: 9, 32, 128>}, {pipeline_mode = #tpu.pipeline_mode<synchronous>, transform_indices = @transform_14, window_bounds = array<i64: 1, 128>}, {pipeline_mode = #tpu.pipeline_mode<synchronous>, transform_indices = @transform_15, window_bounds = array<i64: 1024, 256>}, {transform_indices = @transform_16, window_bounds = array<i64: 1, 1024, 128>}]} {
    %c0 = arith.constant 0 : index
    %c0_0 = arith.constant 0 : index
    %c0_1 = arith.constant 0 : index
    %0 = vector.load %arg1[%c0, %c0_0, %c0_1] : memref<1x16x1280xbf16, #tpu.memory_space<vmem>>, vector<1x16x1280xbf16>
    %1 = vector.shape_cast %0 : vector<1x16x1280xbf16> to vector<16x1280xbf16>
    %c0_2 = arith.constant 0 : index
    %c0_3 = arith.constant 0 : index
    %2 = vector.load %arg2[%c0_2, %c0_3] : memref<1280x256xbf16, #tpu.memory_space<vmem>>, vector<1280x256xbf16>
    %cst = arith.constant dense<0.000000e+00> : vector<16x256xf32>
    %3 = tpu.matmul %1, %2, %cst {dimension_numbers = #tpu.dot_dimension_numbers<[1], [0], [0], [1], [0, 0, 1, 1], [], []>} : vector<16x1280xbf16>, vector<1280x256xbf16>, vector<16x256xf32> -> vector<16x256xf32>
    %c0_4 = arith.constant 0 : index
    %c0_5 = arith.constant 0 : index
    %4 = vector.load %arg3[%c0_4, %c0_5] : memref<1x256xf32, #tpu.memory_space<vmem>>, vector<1x256xf32>
    %5 = vector.broadcast %4 : vector<1x256xf32> to vector<16x256xf32>
    %6 = arith.addf %3, %5 : vector<16x256xf32>
    %cst_6 = arith.constant 0.000000e+00 : f32
    %7 = vector.broadcast %cst_6 : f32 to vector<16x256xf32>
    %8 = arith.maximumf %6, %7 : vector<16x256xf32>
    %cst_7 = arith.constant 0.000000e+00 : f32
    %9 = vector.broadcast %cst_7 : f32 to vector<26x256xf32>
    %c0_8 = arith.constant 0 : index
    %c0_9 = arith.constant 0 : index
    %10 = vector.load %arg18[%c0_8, %c0_9] : memref<26x256xf32, #tpu.memory_space<vmem>>, vector<26x256xf32>
    tpu.vector_store %arg18[%c0_8, %c0_9], %9 {strides = array<i32>} : memref<26x256xf32, #tpu.memory_space<vmem>>, vector<26x256xf32>,
    %c5 = arith.constant 5 : index
    %c0_10 = arith.constant 0 : index
    %11 = vector.load %arg18[%c5, %c0_10] : memref<26x256xf32, #tpu.memory_space<vmem>>, vector<16x256xf32>
    tpu.vector_store %arg18[%c5, %c0_10], %8 {strides = array<i32>} : memref<26x256xf32, #tpu.memory_space<vmem>>, vector<16x256xf32>,
    %12 = tpu.iota {dimensions = array<i32: 0>} : vector<16x1xi32>
    %c4_i32 = arith.constant 4 : i32
    %c0_i32 = arith.constant 0 : i32
    %13 = arith.cmpi eq, %c4_i32, %c0_i32 : i32
    %c1_i32 = arith.constant 1 : i32
    %14 = arith.select %13, %c1_i32, %c4_i32 : i32
    %15 = vector.broadcast %14 : i32 to vector<16x1xi32>
    %16 = arith.remsi %12, %15 : vector<16x1xi32>
    %c0_i32_11 = arith.constant 0 : i32
    %17 = vector.broadcast %c0_i32_11 : i32 to vector<16x1xi32>
    %18 = arith.cmpi ne, %16, %17 : vector<16x1xi32>
    %c0_i32_12 = arith.constant 0 : i32
    %19 = vector.broadcast %c0_i32_12 : i32 to vector<16x1xi32>
    %20 = arith.cmpi slt, %16, %19 : vector<16x1xi32>
    %c0_i32_13 = arith.constant 0 : i32
    %21 = arith.cmpi slt, %14, %c0_i32_13 : i32
    %22 = vector.broadcast %21 : i1 to vector<16x1xi1>
    %23 = vector.broadcast %22 : vector<16x1xi1> to vector<16x1xi1>
    %24 = arith.xori %20, %23 : vector<16x1xi1>
    %25 = arith.andi %24, %18 : vector<16x1xi1>
    %26 = vector.broadcast %14 : i32 to vector<16x1xi32>
    %27 = arith.addi %16, %26 : vector<16x1xi32>
    %28 = arith.select %25, %27, %16 : vector<16x1xi1>, vector<16x1xi32>
    %cst_14 = arith.constant 0.000000e+00 : f32
    %29 = vector.broadcast %cst_14 : f32 to vector<16x128xf32>
    %c0_15 = arith.constant 0 : index
    %c0_16 = arith.constant 0 : index
    %30 = vector.load %arg18[%c0_15, %c0_16] : memref<26x256xf32, #tpu.memory_space<vmem>>, vector<16x256xf32>
    %c1_i32_17 = arith.constant 1 : i32
    %31 = vector.broadcast %c1_i32_17 : i32 to vector<16x1xi32>
    %32 = arith.cmpi sge, %28, %31 : vector<16x1xi32>
    %cst_18 = arith.constant 0.000000e+00 : f32
    %33 = vector.shape_cast %32 : vector<16x1xi1> to vector<16x1xi1>
    %34 = vector.broadcast %33 : vector<16x1xi1> to vector<16x256xi1>
    %35 = vector.broadcast %cst_18 : f32 to vector<16x256xf32>
    %36 = arith.select %34, %30, %35 : vector<16x256xi1>, vector<16x256xf32>
    %37 = arith.truncf %36 : vector<16x256xf32> to vector<16x256xbf16>
    %c0_19 = arith.constant 0 : index
    %c0_20 = arith.constant 0 : index
    %c0_21 = arith.constant 0 : index
    %38 = vector.load %arg4[%c0_19, %c0_20, %c0_21] : memref<9x256x128xbf16, #tpu.memory_space<vmem>>, vector<1x256x128xbf16>
    %39 = vector.shape_cast %38 : vector<1x256x128xbf16> to vector<256x128xbf16>
    %cst_22 = arith.constant dense<0.000000e+00> : vector<16x128xf32>
    %40 = tpu.matmul %37, %39, %cst_22 {dimension_numbers = #tpu.dot_dimension_numbers<[1], [0], [0], [1], [0, 0, 1, 1], [], []>} : vector<16x256xbf16>, vector<256x128xbf16>, vector<16x128xf32> -> vector<16x128xf32>
    %41 = arith.addf %29, %40 : vector<16x128xf32>
    %c1 = arith.constant 1 : index
    %c0_23 = arith.constant 0 : index
    %42 = vector.load %arg18[%c1, %c0_23] : memref<26x256xf32, #tpu.memory_space<vmem>>, vector<16x256xf32>
    %43 = arith.truncf %42 : vector<16x256xf32> to vector<16x256xbf16>
    %c1_24 = arith.constant 1 : index
    %c0_25 = arith.constant 0 : index
    %c0_26 = arith.constant 0 : index
    %44 = vector.load %arg4[%c1_24, %c0_25, %c0_26] : memref<9x256x128xbf16, #tpu.memory_space<vmem>>, vector<1x256x128xbf16>
    %45 = vector.shape_cast %44 : vector<1x256x128xbf16> to vector<256x128xbf16>
    %cst_27 = arith.constant dense<0.000000e+00> : vector<16x128xf32>
    %46 = tpu.matmul %43, %45, %cst_27 {dimension_numbers = #tpu.dot_dimension_numbers<[1], [0], [0], [1], [0, 0, 1, 1], [], []>} : vector<16x256xbf16>, vector<256x128xbf16>, vector<16x128xf32> -> vector<16x128xf32>
    %47 = arith.addf %41, %46 : vector<16x128xf32>
    %c2 = arith.constant 2 : index
    %c0_28 = arith.constant 0 : index
    %48 = vector.load %arg18[%c2, %c0_28] : memref<26x256xf32, #tpu.memory_space<vmem>>, vector<16x256xf32>
    %c3_i32 = arith.constant 3 : i32
    %49 = vector.broadcast %c3_i32 : i32 to vector<16x1xi32>
    %50 = arith.cmpi slt, %28, %49 : vector<16x1xi32>
    %cst_29 = arith.constant 0.000000e+00 : f32
    %51 = vector.shape_cast %50 : vector<16x1xi1> to vector<16x1xi1>
    %52 = vector.broadcast %51 : vector<16x1xi1> to vector<16x256xi1>
    %53 = vector.broadcast %cst_29 : f32 to vector<16x256xf32>
    %54 = arith.select %52, %48, %53 : vector<16x256xi1>, vector<16x256xf32>
    %55 = arith.truncf %54 : vector<16x256xf32> to vector<16x256xbf16>
    %c2_30 = arith.constant 2 : index
    %c0_31 = arith.constant 0 : index
    %c0_32 = arith.constant 0 : index
    %56 = vector.load %arg4[%c2_30, %c0_31, %c0_32] : memref<9x256x128xbf16, #tpu.memory_space<vmem>>, vector<1x256x128xbf16>
    %57 = vector.shape_cast %56 : vector<1x256x128xbf16> to vector<256x128xbf16>
    %cst_33 = arith.constant dense<0.000000e+00> : vector<16x128xf32>
    %58 = tpu.matmul %55, %57, %cst_33 {dimension_numbers = #tpu.dot_dimension_numbers<[1], [0], [0], [1], [0, 0, 1, 1], [], []>} : vector<16x256xbf16>, vector<256x128xbf16>, vector<16x128xf32> -> vector<16x128xf32>
    %59 = arith.addf %47, %58 : vector<16x128xf32>
    %c4 = arith.constant 4 : index
    %c0_34 = arith.constant 0 : index
    %60 = vector.load %arg18[%c4, %c0_34] : memref<26x256xf32, #tpu.memory_space<vmem>>, vector<16x256xf32>
    %c1_i32_35 = arith.constant 1 : i32
    %61 = vector.broadcast %c1_i32_35 : i32 to vector<16x1xi32>
    %62 = arith.cmpi sge, %28, %61 : vector<16x1xi32>
    %cst_36 = arith.constant 0.000000e+00 : f32
    %63 = vector.shape_cast %62 : vector<16x1xi1> to vector<16x1xi1>
    %64 = vector.broadcast %63 : vector<16x1xi1> to vector<16x256xi1>
    %65 = vector.broadcast %cst_36 : f32 to vector<16x256xf32>
    %66 = arith.select %64, %60, %65 : vector<16x256xi1>, vector<16x256xf32>
    %67 = arith.truncf %66 : vector<16x256xf32> to vector<16x256xbf16>
    %c3 = arith.constant 3 : index
    %c0_37 = arith.constant 0 : index
    %c0_38 = arith.constant 0 : index
    %68 = vector.load %arg4[%c3, %c0_37, %c0_38] : memref<9x256x128xbf16, #tpu.memory_space<vmem>>, vector<1x256x128xbf16>
    %69 = vector.shape_cast %68 : vector<1x256x128xbf16> to vector<256x128xbf16>
    %cst_39 = arith.constant dense<0.000000e+00> : vector<16x128xf32>
    %70 = tpu.matmul %67, %69, %cst_39 {dimension_numbers = #tpu.dot_dimension_numbers<[1], [0], [0], [1], [0, 0, 1, 1], [], []>} : vector<16x256xbf16>, vector<256x128xbf16>, vector<16x128xf32> -> vector<16x128xf32>
    %71 = arith.addf %59, %70 : vector<16x128xf32>
    %c5_40 = arith.constant 5 : index
    %c0_41 = arith.constant 0 : index
    %72 = vector.load %arg18[%c5_40, %c0_41] : memref<26x256xf32, #tpu.memory_space<vmem>>, vector<16x256xf32>
    %73 = arith.truncf %72 : vector<16x256xf32> to vector<16x256xbf16>
    %c4_42 = arith.constant 4 : index
    %c0_43 = arith.constant 0 : index
    %c0_44 = arith.constant 0 : index
    %74 = vector.load %arg4[%c4_42, %c0_43, %c0_44] : memref<9x256x128xbf16, #tpu.memory_space<vmem>>, vector<1x256x128xbf16>
    %75 = vector.shape_cast %74 : vector<1x256x128xbf16> to vector<256x128xbf16>
    %cst_45 = arith.constant dense<0.000000e+00> : vector<16x128xf32>
    %76 = tpu.matmul %73, %75, %cst_45 {dimension_numbers = #tpu.dot_dimension_numbers<[1], [0], [0], [1], [0, 0, 1, 1], [], []>} : vector<16x256xbf16>, vector<256x128xbf16>, vector<16x128xf32> -> vector<16x128xf32>
    %77 = arith.addf %71, %76 : vector<16x128xf32>
    %c6 = arith.constant 6 : index
    %c0_46 = arith.constant 0 : index
    %78 = vector.load %arg18[%c6, %c0_46] : memref<26x256xf32, #tpu.memory_space<vmem>>, vector<16x256xf32>
    %c3_i32_47 = arith.constant 3 : i32
    %79 = vector.broadcast %c3_i32_47 : i32 to vector<16x1xi32>
    %80 = arith.cmpi slt, %28, %79 : vector<16x1xi32>
    %cst_48 = arith.constant 0.000000e+00 : f32
    %81 = vector.shape_cast %80 : vector<16x1xi1> to vector<16x1xi1>
    %82 = vector.broadcast %81 : vector<16x1xi1> to vector<16x256xi1>
    %83 = vector.broadcast %cst_48 : f32 to vector<16x256xf32>
    %84 = arith.select %82, %78, %83 : vector<16x256xi1>, vector<16x256xf32>
    %85 = arith.truncf %84 : vector<16x256xf32> to vector<16x256xbf16>
    %c5_49 = arith.constant 5 : index
    %c0_50 = arith.constant 0 : index
    %c0_51 = arith.constant 0 : index
    %86 = vector.load %arg4[%c5_49, %c0_50, %c0_51] : memref<9x256x128xbf16, #tpu.memory_space<vmem>>, vector<1x256x128xbf16>
    %87 = vector.shape_cast %86 : vector<1x256x128xbf16> to vector<256x128xbf16>
    %cst_52 = arith.constant dense<0.000000e+00> : vector<16x128xf32>
    %88 = tpu.matmul %85, %87, %cst_52 {dimension_numbers = #tpu.dot_dimension_numbers<[1], [0], [0], [1], [0, 0, 1, 1], [], []>} : vector<16x256xbf16>, vector<256x128xbf16>, vector<16x128xf32> -> vector<16x128xf32>
    %89 = arith.addf %77, %88 : vector<16x128xf32>
    %c8 = arith.constant 8 : index
    %c0_53 = arith.constant 0 : index
    %90 = vector.load %arg18[%c8, %c0_53] : memref<26x256xf32, #tpu.memory_space<vmem>>, vector<16x256xf32>
    %c1_i32_54 = arith.constant 1 : i32
    %91 = vector.broadcast %c1_i32_54 : i32 to vector<16x1xi32>
    %92 = arith.cmpi sge, %28, %91 : vector<16x1xi32>
    %cst_55 = arith.constant 0.000000e+00 : f32
    %93 = vector.shape_cast %92 : vector<16x1xi1> to vector<16x1xi1>
    %94 = vector.broadcast %93 : vector<16x1xi1> to vector<16x256xi1>
    %95 = vector.broadcast %cst_55 : f32 to vector<16x256xf32>
    %96 = arith.select %94, %90, %95 : vector<16x256xi1>, vector<16x256xf32>
    %97 = arith.truncf %96 : vector<16x256xf32> to vector<16x256xbf16>
    %c6_56 = arith.constant 6 : index
    %c0_57 = arith.constant 0 : index
    %c0_58 = arith.constant 0 : index
    %98 = vector.load %arg4[%c6_56, %c0_57, %c0_58] : memref<9x256x128xbf16, #tpu.memory_space<vmem>>, vector<1x256x128xbf16>
    %99 = vector.shape_cast %98 : vector<1x256x128xbf16> to vector<256x128xbf16>
    %cst_59 = arith.constant dense<0.000000e+00> : vector<16x128xf32>
    %100 = tpu.matmul %97, %99, %cst_59 {dimension_numbers = #tpu.dot_dimension_numbers<[1], [0], [0], [1], [0, 0, 1, 1], [], []>} : vector<16x256xbf16>, vector<256x128xbf16>, vector<16x128xf32> -> vector<16x128xf32>
    %101 = arith.addf %89, %100 : vector<16x128xf32>
    %c9 = arith.constant 9 : index
    %c0_60 = arith.constant 0 : index
    %102 = vector.load %arg18[%c9, %c0_60] : memref<26x256xf32, #tpu.memory_space<vmem>>, vector<16x256xf32>
    %103 = arith.truncf %102 : vector<16x256xf32> to vector<16x256xbf16>
    %c7 = arith.constant 7 : index
    %c0_61 = arith.constant 0 : index
    %c0_62 = arith.constant 0 : index
    %104 = vector.load %arg4[%c7, %c0_61, %c0_62] : memref<9x256x128xbf16, #tpu.memory_space<vmem>>, vector<1x256x128xbf16>
    %105 = vector.shape_cast %104 : vector<1x256x128xbf16> to vector<256x128xbf16>
    %cst_63 = arith.constant dense<0.000000e+00> : vector<16x128xf32>
    %106 = tpu.matmul %103, %105, %cst_63 {dimension_numbers = #tpu.dot_dimension_numbers<[1], [0], [0], [1], [0, 0, 1, 1], [], []>} : vector<16x256xbf16>, vector<256x128xbf16>, vector<16x128xf32> -> vector<16x128xf32>
    %107 = arith.addf %101, %106 : vector<16x128xf32>
    %c10 = arith.constant 10 : index
    %c0_64 = arith.constant 0 : index
    %108 = vector.load %arg18[%c10, %c0_64] : memref<26x256xf32, #tpu.memory_space<vmem>>, vector<16x256xf32>
    %c3_i32_65 = arith.constant 3 : i32
    %109 = vector.broadcast %c3_i32_65 : i32 to vector<16x1xi32>
    %110 = arith.cmpi slt, %28, %109 : vector<16x1xi32>
    %cst_66 = arith.constant 0.000000e+00 : f32
    %111 = vector.shape_cast %110 : vector<16x1xi1> to vector<16x1xi1>
    %112 = vector.broadcast %111 : vector<16x1xi1> to vector<16x256xi1>
    %113 = vector.broadcast %cst_66 : f32 to vector<16x256xf32>
    %114 = arith.select %112, %108, %113 : vector<16x256xi1>, vector<16x256xf32>
    %115 = arith.truncf %114 : vector<16x256xf32> to vector<16x256xbf16>
    %c8_67 = arith.constant 8 : index
    %c0_68 = arith.constant 0 : index
    %c0_69 = arith.constant 0 : index
    %116 = vector.load %arg4[%c8_67, %c0_68, %c0_69] : memref<9x256x128xbf16, #tpu.memory_space<vmem>>, vector<1x256x128xbf16>
    %117 = vector.shape_cast %116 : vector<1x256x128xbf16> to vector<256x128xbf16>
    %cst_70 = arith.constant dense<0.000000e+00> : vector<16x128xf32>
    %118 = tpu.matmul %115, %117, %cst_70 {dimension_numbers = #tpu.dot_dimension_numbers<[1], [0], [0], [1], [0, 0, 1, 1], [], []>} : vector<16x256xbf16>, vector<256x128xbf16>, vector<16x128xf32> -> vector<16x128xf32>
    %119 = arith.addf %107, %118 : vector<16x128xf32>
    %c0_71 = arith.constant 0 : index
    %c0_72 = arith.constant 0 : index
    %120 = vector.load %arg5[%c0_71, %c0_72] : memref<1x128xf32, #tpu.memory_space<vmem>>, vector<1x128xf32>
    %121 = vector.broadcast %120 : vector<1x128xf32> to vector<16x128xf32>
    %122 = arith.addf %119, %121 : vector<16x128xf32>
    %cst_73 = arith.constant 0.000000e+00 : f32
    %123 = vector.broadcast %cst_73 : f32 to vector<16x128xf32>
    %124 = arith.maximumf %122, %123 : vector<16x128xf32>
    %c0_74 = arith.constant 0 : index
    %c0_75 = arith.constant 0 : index
    %125 = vector.load %arg6[%c0_74, %c0_75] : memref<64x16xbf16, #tpu.memory_space<vmem>>, vector<64x16xbf16>
    %126 = arith.truncf %124 : vector<16x128xf32> to vector<16x128xbf16>
    %cst_76 = arith.constant dense<0.000000e+00> : vector<64x128xf32>
    %127 = tpu.matmul %125, %126, %cst_76 {dimension_numbers = #tpu.dot_dimension_numbers<[1], [0], [0], [1], [0, 0, 1, 1], [], []>} : vector<64x16xbf16>, vector<16x128xbf16>, vector<64x128xf32> -> vector<64x128xf32>
    %cst_77 = arith.constant 0.000000e+00 : f32
    %128 = vector.broadcast %cst_77 : f32 to vector<82x128xf32>
    %c0_78 = arith.constant 0 : index
    %c0_79 = arith.constant 0 : index
    %129 = vector.load %arg19[%c0_78, %c0_79] : memref<82x128xf32, #tpu.memory_space<vmem>>, vector<82x128xf32>
    tpu.vector_store %arg19[%c0_78, %c0_79], %128 {strides = array<i32>} : memref<82x128xf32, #tpu.memory_space<vmem>>, vector<82x128xf32>,
    %c9_80 = arith.constant 9 : index
    %c0_81 = arith.constant 0 : index
    %130 = vector.load %arg19[%c9_80, %c0_81] : memref<82x128xf32, #tpu.memory_space<vmem>>, vector<64x128xf32>
    tpu.vector_store %arg19[%c9_80, %c0_81], %127 {strides = array<i32>} : memref<82x128xf32, #tpu.memory_space<vmem>>, vector<64x128xf32>,
    %131 = tpu.iota {dimensions = array<i32: 0>} : vector<64x1xi32>
    %c8_i32 = arith.constant 8 : i32
    %c0_i32_82 = arith.constant 0 : i32
    %132 = arith.cmpi eq, %c8_i32, %c0_i32_82 : i32
    %c1_i32_83 = arith.constant 1 : i32
    %133 = arith.select %132, %c1_i32_83, %c8_i32 : i32
    %134 = vector.broadcast %133 : i32 to vector<64x1xi32>
    %135 = arith.remsi %131, %134 : vector<64x1xi32>
    %c0_i32_84 = arith.constant 0 : i32
    %136 = vector.broadcast %c0_i32_84 : i32 to vector<64x1xi32>
    %137 = arith.cmpi ne, %135, %136 : vector<64x1xi32>
    %c0_i32_85 = arith.constant 0 : i32
    %138 = vector.broadcast %c0_i32_85 : i32 to vector<64x1xi32>
    %139 = arith.cmpi slt, %135, %138 : vector<64x1xi32>
    %c0_i32_86 = arith.constant 0 : i32
    %140 = arith.cmpi slt, %133, %c0_i32_86 : i32
    %141 = vector.broadcast %140 : i1 to vector<64x1xi1>
    %142 = vector.broadcast %141 : vector<64x1xi1> to vector<64x1xi1>
    %143 = arith.xori %139, %142 : vector<64x1xi1>
    %144 = arith.andi %143, %137 : vector<64x1xi1>
    %145 = vector.broadcast %133 : i32 to vector<64x1xi32>
    %146 = arith.addi %135, %145 : vector<64x1xi32>
    %147 = arith.select %144, %146, %135 : vector<64x1xi1>, vector<64x1xi32>
    %cst_87 = arith.constant 0.000000e+00 : f32
    %148 = vector.broadcast %cst_87 : f32 to vector<64x64xf32>
    %c0_88 = arith.constant 0 : index
    %c0_89 = arith.constant 0 : index
    %149 = vector.load %arg19[%c0_88, %c0_89] : memref<82x128xf32, #tpu.memory_space<vmem>>, vector<64x128xf32>
    %c1_i32_90 = arith.constant 1 : i32
    %150 = vector.broadcast %c1_i32_90 : i32 to vector<64x1xi32>
    %151 = arith.cmpi sge, %147, %150 : vector<64x1xi32>
    %cst_91 = arith.constant 0.000000e+00 : f32
    %152 = vector.shape_cast %151 : vector<64x1xi1> to vector<64x1xi1>
    %153 = vector.broadcast %152 : vector<64x1xi1> to vector<64x128xi1>
    %154 = vector.broadcast %cst_91 : f32 to vector<64x128xf32>
    %155 = arith.select %153, %149, %154 : vector<64x128xi1>, vector<64x128xf32>
    %156 = arith.truncf %155 : vector<64x128xf32> to vector<64x128xbf16>
    %c0_92 = arith.constant 0 : index
    %c0_93 = arith.constant 0 : index
    %c0_94 = arith.constant 0 : index
    %157 = vector.load %arg7[%c0_92, %c0_93, %c0_94] : memref<9x128x64xbf16, #tpu.memory_space<vmem>>, vector<1x128x64xbf16>
    %158 = vector.shape_cast %157 : vector<1x128x64xbf16> to vector<128x64xbf16>
    %cst_95 = arith.constant dense<0.000000e+00> : vector<64x64xf32>
    %159 = tpu.matmul %156, %158, %cst_95 {dimension_numbers = #tpu.dot_dimension_numbers<[1], [0], [0], [1], [0, 0, 1, 1], [], []>} : vector<64x128xbf16>, vector<128x64xbf16>, vector<64x64xf32> -> vector<64x64xf32>
    %160 = arith.addf %148, %159 : vector<64x64xf32>
    %c1_96 = arith.constant 1 : index
    %c0_97 = arith.constant 0 : index
    %161 = vector.load %arg19[%c1_96, %c0_97] : memref<82x128xf32, #tpu.memory_space<vmem>>, vector<64x128xf32>
    %162 = arith.truncf %161 : vector<64x128xf32> to vector<64x128xbf16>
    %c1_98 = arith.constant 1 : index
    %c0_99 = arith.constant 0 : index
    %c0_100 = arith.constant 0 : index
    %163 = vector.load %arg7[%c1_98, %c0_99, %c0_100] : memref<9x128x64xbf16, #tpu.memory_space<vmem>>, vector<1x128x64xbf16>
    %164 = vector.shape_cast %163 : vector<1x128x64xbf16> to vector<128x64xbf16>
    %cst_101 = arith.constant dense<0.000000e+00> : vector<64x64xf32>
    %165 = tpu.matmul %162, %164, %cst_101 {dimension_numbers = #tpu.dot_dimension_numbers<[1], [0], [0], [1], [0, 0, 1, 1], [], []>} : vector<64x128xbf16>, vector<128x64xbf16>, vector<64x64xf32> -> vector<64x64xf32>
    %166 = arith.addf %160, %165 : vector<64x64xf32>
    %c2_102 = arith.constant 2 : index
    %c0_103 = arith.constant 0 : index
    %167 = vector.load %arg19[%c2_102, %c0_103] : memref<82x128xf32, #tpu.memory_space<vmem>>, vector<64x128xf32>
    %c7_i32 = arith.constant 7 : i32
    %168 = vector.broadcast %c7_i32 : i32 to vector<64x1xi32>
    %169 = arith.cmpi slt, %147, %168 : vector<64x1xi32>
    %cst_104 = arith.constant 0.000000e+00 : f32
    %170 = vector.shape_cast %169 : vector<64x1xi1> to vector<64x1xi1>
    %171 = vector.broadcast %170 : vector<64x1xi1> to vector<64x128xi1>
    %172 = vector.broadcast %cst_104 : f32 to vector<64x128xf32>
    %173 = arith.select %171, %167, %172 : vector<64x128xi1>, vector<64x128xf32>
    %174 = arith.truncf %173 : vector<64x128xf32> to vector<64x128xbf16>
    %c2_105 = arith.constant 2 : index
    %c0_106 = arith.constant 0 : index
    %c0_107 = arith.constant 0 : index
    %175 = vector.load %arg7[%c2_105, %c0_106, %c0_107] : memref<9x128x64xbf16, #tpu.memory_space<vmem>>, vector<1x128x64xbf16>
    %176 = vector.shape_cast %175 : vector<1x128x64xbf16> to vector<128x64xbf16>
    %cst_108 = arith.constant dense<0.000000e+00> : vector<64x64xf32>
    %177 = tpu.matmul %174, %176, %cst_108 {dimension_numbers = #tpu.dot_dimension_numbers<[1], [0], [0], [1], [0, 0, 1, 1], [], []>} : vector<64x128xbf16>, vector<128x64xbf16>, vector<64x64xf32> -> vector<64x64xf32>
    %178 = arith.addf %166, %177 : vector<64x64xf32>
    %c8_109 = arith.constant 8 : index
    %c0_110 = arith.constant 0 : index
    %179 = vector.load %arg19[%c8_109, %c0_110] : memref<82x128xf32, #tpu.memory_space<vmem>>, vector<64x128xf32>
    %c1_i32_111 = arith.constant 1 : i32
    %180 = vector.broadcast %c1_i32_111 : i32 to vector<64x1xi32>
    %181 = arith.cmpi sge, %147, %180 : vector<64x1xi32>
    %cst_112 = arith.constant 0.000000e+00 : f32
    %182 = vector.shape_cast %181 : vector<64x1xi1> to vector<64x1xi1>
    %183 = vector.broadcast %182 : vector<64x1xi1> to vector<64x128xi1>
    %184 = vector.broadcast %cst_112 : f32 to vector<64x128xf32>
    %185 = arith.select %183, %179, %184 : vector<64x128xi1>, vector<64x128xf32>
    %186 = arith.truncf %185 : vector<64x128xf32> to vector<64x128xbf16>
    %c3_113 = arith.constant 3 : index
    %c0_114 = arith.constant 0 : index
    %c0_115 = arith.constant 0 : index
    %187 = vector.load %arg7[%c3_113, %c0_114, %c0_115] : memref<9x128x64xbf16, #tpu.memory_space<vmem>>, vector<1x128x64xbf16>
    %188 = vector.shape_cast %187 : vector<1x128x64xbf16> to vector<128x64xbf16>
    %cst_116 = arith.constant dense<0.000000e+00> : vector<64x64xf32>
    %189 = tpu.matmul %186, %188, %cst_116 {dimension_numbers = #tpu.dot_dimension_numbers<[1], [0], [0], [1], [0, 0, 1, 1], [], []>} : vector<64x128xbf16>, vector<128x64xbf16>, vector<64x64xf32> -> vector<64x64xf32>
    %190 = arith.addf %178, %189 : vector<64x64xf32>
    %c9_117 = arith.constant 9 : index
    %c0_118 = arith.constant 0 : index
    %191 = vector.load %arg19[%c9_117, %c0_118] : memref<82x128xf32, #tpu.memory_space<vmem>>, vector<64x128xf32>
    %192 = arith.truncf %191 : vector<64x128xf32> to vector<64x128xbf16>
    %c4_119 = arith.constant 4 : index
    %c0_120 = arith.constant 0 : index
    %c0_121 = arith.constant 0 : index
    %193 = vector.load %arg7[%c4_119, %c0_120, %c0_121] : memref<9x128x64xbf16, #tpu.memory_space<vmem>>, vector<1x128x64xbf16>
    %194 = vector.shape_cast %193 : vector<1x128x64xbf16> to vector<128x64xbf16>
    %cst_122 = arith.constant dense<0.000000e+00> : vector<64x64xf32>
    %195 = tpu.matmul %192, %194, %cst_122 {dimension_numbers = #tpu.dot_dimension_numbers<[1], [0], [0], [1], [0, 0, 1, 1], [], []>} : vector<64x128xbf16>, vector<128x64xbf16>, vector<64x64xf32> -> vector<64x64xf32>
    %196 = arith.addf %190, %195 : vector<64x64xf32>
    %c10_123 = arith.constant 10 : index
    %c0_124 = arith.constant 0 : index
    %197 = vector.load %arg19[%c10_123, %c0_124] : memref<82x128xf32, #tpu.memory_space<vmem>>, vector<64x128xf32>
    %c7_i32_125 = arith.constant 7 : i32
    %198 = vector.broadcast %c7_i32_125 : i32 to vector<64x1xi32>
    %199 = arith.cmpi slt, %147, %198 : vector<64x1xi32>
    %cst_126 = arith.constant 0.000000e+00 : f32
    %200 = vector.shape_cast %199 : vector<64x1xi1> to vector<64x1xi1>
    %201 = vector.broadcast %200 : vector<64x1xi1> to vector<64x128xi1>
    %202 = vector.broadcast %cst_126 : f32 to vector<64x128xf32>
    %203 = arith.select %201, %197, %202 : vector<64x128xi1>, vector<64x128xf32>
    %204 = arith.truncf %203 : vector<64x128xf32> to vector<64x128xbf16>
    %c5_127 = arith.constant 5 : index
    %c0_128 = arith.constant 0 : index
    %c0_129 = arith.constant 0 : index
    %205 = vector.load %arg7[%c5_127, %c0_128, %c0_129] : memref<9x128x64xbf16, #tpu.memory_space<vmem>>, vector<1x128x64xbf16>
    %206 = vector.shape_cast %205 : vector<1x128x64xbf16> to vector<128x64xbf16>
    %cst_130 = arith.constant dense<0.000000e+00> : vector<64x64xf32>
    %207 = tpu.matmul %204, %206, %cst_130 {dimension_numbers = #tpu.dot_dimension_numbers<[1], [0], [0], [1], [0, 0, 1, 1], [], []>} : vector<64x128xbf16>, vector<128x64xbf16>, vector<64x64xf32> -> vector<64x64xf32>
    %208 = arith.addf %196, %207 : vector<64x64xf32>
    %c16 = arith.constant 16 : index
    %c0_131 = arith.constant 0 : index
    %209 = vector.load %arg19[%c16, %c0_131] : memref<82x128xf32, #tpu.memory_space<vmem>>, vector<64x128xf32>
    %c1_i32_132 = arith.constant 1 : i32
    %210 = vector.broadcast %c1_i32_132 : i32 to vector<64x1xi32>
    %211 = arith.cmpi sge, %147, %210 : vector<64x1xi32>
    %cst_133 = arith.constant 0.000000e+00 : f32
    %212 = vector.shape_cast %211 : vector<64x1xi1> to vector<64x1xi1>
    %213 = vector.broadcast %212 : vector<64x1xi1> to vector<64x128xi1>
    %214 = vector.broadcast %cst_133 : f32 to vector<64x128xf32>
    %215 = arith.select %213, %209, %214 : vector<64x128xi1>, vector<64x128xf32>
    %216 = arith.truncf %215 : vector<64x128xf32> to vector<64x128xbf16>
    %c6_134 = arith.constant 6 : index
    %c0_135 = arith.constant 0 : index
    %c0_136 = arith.constant 0 : index
    %217 = vector.load %arg7[%c6_134, %c0_135, %c0_136] : memref<9x128x64xbf16, #tpu.memory_space<vmem>>, vector<1x128x64xbf16>
    %218 = vector.shape_cast %217 : vector<1x128x64xbf16> to vector<128x64xbf16>
    %cst_137 = arith.constant dense<0.000000e+00> : vector<64x64xf32>
    %219 = tpu.matmul %216, %218, %cst_137 {dimension_numbers = #tpu.dot_dimension_numbers<[1], [0], [0], [1], [0, 0, 1, 1], [], []>} : vector<64x128xbf16>, vector<128x64xbf16>, vector<64x64xf32> -> vector<64x64xf32>
    %220 = arith.addf %208, %219 : vector<64x64xf32>
    %c17 = arith.constant 17 : index
    %c0_138 = arith.constant 0 : index
    %221 = vector.load %arg19[%c17, %c0_138] : memref<82x128xf32, #tpu.memory_space<vmem>>, vector<64x128xf32>
    %222 = arith.truncf %221 : vector<64x128xf32> to vector<64x128xbf16>
    %c7_139 = arith.constant 7 : index
    %c0_140 = arith.constant 0 : index
    %c0_141 = arith.constant 0 : index
    %223 = vector.load %arg7[%c7_139, %c0_140, %c0_141] : memref<9x128x64xbf16, #tpu.memory_space<vmem>>, vector<1x128x64xbf16>
    %224 = vector.shape_cast %223 : vector<1x128x64xbf16> to vector<128x64xbf16>
    %cst_142 = arith.constant dense<0.000000e+00> : vector<64x64xf32>
    %225 = tpu.matmul %222, %224, %cst_142 {dimension_numbers = #tpu.dot_dimension_numbers<[1], [0], [0], [1], [0, 0, 1, 1], [], []>} : vector<64x128xbf16>, vector<128x64xbf16>, vector<64x64xf32> -> vector<64x64xf32>
    %226 = arith.addf %220, %225 : vector<64x64xf32>
    %c18 = arith.constant 18 : index
    %c0_143 = arith.constant 0 : index
    %227 = vector.load %arg19[%c18, %c0_143] : memref<82x128xf32, #tpu.memory_space<vmem>>, vector<64x128xf32>
    %c7_i32_144 = arith.constant 7 : i32
    %228 = vector.broadcast %c7_i32_144 : i32 to vector<64x1xi32>
    %229 = arith.cmpi slt, %147, %228 : vector<64x1xi32>
    %cst_145 = arith.constant 0.000000e+00 : f32
    %230 = vector.shape_cast %229 : vector<64x1xi1> to vector<64x1xi1>
    %231 = vector.broadcast %230 : vector<64x1xi1> to vector<64x128xi1>
    %232 = vector.broadcast %cst_145 : f32 to vector<64x128xf32>
    %233 = arith.select %231, %227, %232 : vector<64x128xi1>, vector<64x128xf32>
    %234 = arith.truncf %233 : vector<64x128xf32> to vector<64x128xbf16>
    %c8_146 = arith.constant 8 : index
    %c0_147 = arith.constant 0 : index
    %c0_148 = arith.constant 0 : index
    %235 = vector.load %arg7[%c8_146, %c0_147, %c0_148] : memref<9x128x64xbf16, #tpu.memory_space<vmem>>, vector<1x128x64xbf16>
    %236 = vector.shape_cast %235 : vector<1x128x64xbf16> to vector<128x64xbf16>
    %cst_149 = arith.constant dense<0.000000e+00> : vector<64x64xf32>
    %237 = tpu.matmul %234, %236, %cst_149 {dimension_numbers = #tpu.dot_dimension_numbers<[1], [0], [0], [1], [0, 0, 1, 1], [], []>} : vector<64x128xbf16>, vector<128x64xbf16>, vector<64x64xf32> -> vector<64x64xf32>
    %238 = arith.addf %226, %237 : vector<64x64xf32>
    %c0_150 = arith.constant 0 : index
    %c0_151 = arith.constant 0 : index
    %239 = vector.load %arg8[%c0_150, %c0_151] : memref<1x64xf32, #tpu.memory_space<vmem>>, vector<1x64xf32>
    %240 = vector.broadcast %239 : vector<1x64xf32> to vector<64x64xf32>
    %241 = arith.addf %238, %240 : vector<64x64xf32>
    %cst_152 = arith.constant 0.000000e+00 : f32
    %242 = vector.broadcast %cst_152 : f32 to vector<64x64xf32>
    %243 = arith.maximumf %241, %242 : vector<64x64xf32>
    %cst_153 = arith.constant 0.000000e+00 : f32
    %244 = vector.broadcast %cst_153 : f32 to vector<82x64xf32>
    %c0_154 = arith.constant 0 : index
    %c0_155 = arith.constant 0 : index
    %245 = vector.load %arg20[%c0_154, %c0_155] : memref<82x64xf32, #tpu.memory_space<vmem>>, vector<82x64xf32>
    tpu.vector_store %arg20[%c0_154, %c0_155], %244 {strides = array<i32>} : memref<82x64xf32, #tpu.memory_space<vmem>>, vector<82x64xf32>,
    %c9_156 = arith.constant 9 : index
    %c0_157 = arith.constant 0 : index
    %246 = vector.load %arg20[%c9_156, %c0_157] : memref<82x64xf32, #tpu.memory_space<vmem>>, vector<64x64xf32>
    tpu.vector_store %arg20[%c9_156, %c0_157], %243 {strides = array<i32>} : memref<82x64xf32, #tpu.memory_space<vmem>>, vector<64x64xf32>,
    %247 = tpu.iota {dimensions = array<i32: 0>} : vector<64x1xi32>
    %c8_i32_158 = arith.constant 8 : i32
    %c0_i32_159 = arith.constant 0 : i32
    %248 = arith.cmpi eq, %c8_i32_158, %c0_i32_159 : i32
    %c1_i32_160 = arith.constant 1 : i32
    %249 = arith.select %248, %c1_i32_160, %c8_i32_158 : i32
    %250 = vector.broadcast %249 : i32 to vector<64x1xi32>
    %251 = arith.remsi %247, %250 : vector<64x1xi32>
    %c0_i32_161 = arith.constant 0 : i32
    %252 = vector.broadcast %c0_i32_161 : i32 to vector<64x1xi32>
    %253 = arith.cmpi ne, %251, %252 : vector<64x1xi32>
    %c0_i32_162 = arith.constant 0 : i32
    %254 = vector.broadcast %c0_i32_162 : i32 to vector<64x1xi32>
    %255 = arith.cmpi slt, %251, %254 : vector<64x1xi32>
    %c0_i32_163 = arith.constant 0 : i32
    %256 = arith.cmpi slt, %249, %c0_i32_163 : i32
    %257 = vector.broadcast %256 : i1 to vector<64x1xi1>
    %258 = vector.broadcast %257 : vector<64x1xi1> to vector<64x1xi1>
    %259 = arith.xori %255, %258 : vector<64x1xi1>
    %260 = arith.andi %259, %253 : vector<64x1xi1>
    %261 = vector.broadcast %249 : i32 to vector<64x1xi32>
    %262 = arith.addi %251, %261 : vector<64x1xi32>
    %263 = arith.select %260, %262, %251 : vector<64x1xi1>, vector<64x1xi32>
    %cst_164 = arith.constant 0.000000e+00 : f32
    %264 = vector.broadcast %cst_164 : f32 to vector<64x64xf32>
    %c0_165 = arith.constant 0 : index
    %c0_166 = arith.constant 0 : index
    %265 = vector.load %arg20[%c0_165, %c0_166] : memref<82x64xf32, #tpu.memory_space<vmem>>, vector<64x64xf32>
    %c1_i32_167 = arith.constant 1 : i32
    %266 = vector.broadcast %c1_i32_167 : i32 to vector<64x1xi32>
    %267 = arith.cmpi sge, %263, %266 : vector<64x1xi32>
    %cst_168 = arith.constant 0.000000e+00 : f32
    %268 = vector.shape_cast %267 : vector<64x1xi1> to vector<64x1xi1>
    %269 = vector.broadcast %268 : vector<64x1xi1> to vector<64x64xi1>
    %270 = vector.broadcast %cst_168 : f32 to vector<64x64xf32>
    %271 = arith.select %269, %265, %270 : vector<64x64xi1>, vector<64x64xf32>
    %272 = arith.truncf %271 : vector<64x64xf32> to vector<64x64xbf16>
    %c0_169 = arith.constant 0 : index
    %c0_170 = arith.constant 0 : index
    %c0_171 = arith.constant 0 : index
    %273 = vector.load %arg9[%c0_169, %c0_170, %c0_171] : memref<9x64x64xbf16, #tpu.memory_space<vmem>>, vector<1x64x64xbf16>
    %274 = vector.shape_cast %273 : vector<1x64x64xbf16> to vector<64x64xbf16>
    %cst_172 = arith.constant dense<0.000000e+00> : vector<64x64xf32>
    %275 = tpu.matmul %272, %274, %cst_172 {dimension_numbers = #tpu.dot_dimension_numbers<[1], [0], [0], [1], [0, 0, 1, 1], [], []>} : vector<64x64xbf16>, vector<64x64xbf16>, vector<64x64xf32> -> vector<64x64xf32>
    %276 = arith.addf %264, %275 : vector<64x64xf32>
    %c1_173 = arith.constant 1 : index
    %c0_174 = arith.constant 0 : index
    %277 = vector.load %arg20[%c1_173, %c0_174] : memref<82x64xf32, #tpu.memory_space<vmem>>, vector<64x64xf32>
    %278 = arith.truncf %277 : vector<64x64xf32> to vector<64x64xbf16>
    %c1_175 = arith.constant 1 : index
    %c0_176 = arith.constant 0 : index
    %c0_177 = arith.constant 0 : index
    %279 = vector.load %arg9[%c1_175, %c0_176, %c0_177] : memref<9x64x64xbf16, #tpu.memory_space<vmem>>, vector<1x64x64xbf16>
    %280 = vector.shape_cast %279 : vector<1x64x64xbf16> to vector<64x64xbf16>
    %cst_178 = arith.constant dense<0.000000e+00> : vector<64x64xf32>
    %281 = tpu.matmul %278, %280, %cst_178 {dimension_numbers = #tpu.dot_dimension_numbers<[1], [0], [0], [1], [0, 0, 1, 1], [], []>} : vector<64x64xbf16>, vector<64x64xbf16>, vector<64x64xf32> -> vector<64x64xf32>
    %282 = arith.addf %276, %281 : vector<64x64xf32>
    %c2_179 = arith.constant 2 : index
    %c0_180 = arith.constant 0 : index
    %283 = vector.load %arg20[%c2_179, %c0_180] : memref<82x64xf32, #tpu.memory_space<vmem>>, vector<64x64xf32>
    %c7_i32_181 = arith.constant 7 : i32
    %284 = vector.broadcast %c7_i32_181 : i32 to vector<64x1xi32>
    %285 = arith.cmpi slt, %263, %284 : vector<64x1xi32>
    %cst_182 = arith.constant 0.000000e+00 : f32
    %286 = vector.shape_cast %285 : vector<64x1xi1> to vector<64x1xi1>
    %287 = vector.broadcast %286 : vector<64x1xi1> to vector<64x64xi1>
    %288 = vector.broadcast %cst_182 : f32 to vector<64x64xf32>
    %289 = arith.select %287, %283, %288 : vector<64x64xi1>, vector<64x64xf32>
    %290 = arith.truncf %289 : vector<64x64xf32> to vector<64x64xbf16>
    %c2_183 = arith.constant 2 : index
    %c0_184 = arith.constant 0 : index
    %c0_185 = arith.constant 0 : index
    %291 = vector.load %arg9[%c2_183, %c0_184, %c0_185] : memref<9x64x64xbf16, #tpu.memory_space<vmem>>, vector<1x64x64xbf16>
    %292 = vector.shape_cast %291 : vector<1x64x64xbf16> to vector<64x64xbf16>
    %cst_186 = arith.constant dense<0.000000e+00> : vector<64x64xf32>
    %293 = tpu.matmul %290, %292, %cst_186 {dimension_numbers = #tpu.dot_dimension_numbers<[1], [0], [0], [1], [0, 0, 1, 1], [], []>} : vector<64x64xbf16>, vector<64x64xbf16>, vector<64x64xf32> -> vector<64x64xf32>
    %294 = arith.addf %282, %293 : vector<64x64xf32>
    %c8_187 = arith.constant 8 : index
    %c0_188 = arith.constant 0 : index
    %295 = vector.load %arg20[%c8_187, %c0_188] : memref<82x64xf32, #tpu.memory_space<vmem>>, vector<64x64xf32>
    %c1_i32_189 = arith.constant 1 : i32
    %296 = vector.broadcast %c1_i32_189 : i32 to vector<64x1xi32>
    %297 = arith.cmpi sge, %263, %296 : vector<64x1xi32>
    %cst_190 = arith.constant 0.000000e+00 : f32
    %298 = vector.shape_cast %297 : vector<64x1xi1> to vector<64x1xi1>
    %299 = vector.broadcast %298 : vector<64x1xi1> to vector<64x64xi1>
    %300 = vector.broadcast %cst_190 : f32 to vector<64x64xf32>
    %301 = arith.select %299, %295, %300 : vector<64x64xi1>, vector<64x64xf32>
    %302 = arith.truncf %301 : vector<64x64xf32> to vector<64x64xbf16>
    %c3_191 = arith.constant 3 : index
    %c0_192 = arith.constant 0 : index
    %c0_193 = arith.constant 0 : index
    %303 = vector.load %arg9[%c3_191, %c0_192, %c0_193] : memref<9x64x64xbf16, #tpu.memory_space<vmem>>, vector<1x64x64xbf16>
    %304 = vector.shape_cast %303 : vector<1x64x64xbf16> to vector<64x64xbf16>
    %cst_194 = arith.constant dense<0.000000e+00> : vector<64x64xf32>
    %305 = tpu.matmul %302, %304, %cst_194 {dimension_numbers = #tpu.dot_dimension_numbers<[1], [0], [0], [1], [0, 0, 1, 1], [], []>} : vector<64x64xbf16>, vector<64x64xbf16>, vector<64x64xf32> -> vector<64x64xf32>
    %306 = arith.addf %294, %305 : vector<64x64xf32>
    %c9_195 = arith.constant 9 : index
    %c0_196 = arith.constant 0 : index
    %307 = vector.load %arg20[%c9_195, %c0_196] : memref<82x64xf32, #tpu.memory_space<vmem>>, vector<64x64xf32>
    %308 = arith.truncf %307 : vector<64x64xf32> to vector<64x64xbf16>
    %c4_197 = arith.constant 4 : index
    %c0_198 = arith.constant 0 : index
    %c0_199 = arith.constant 0 : index
    %309 = vector.load %arg9[%c4_197, %c0_198, %c0_199] : memref<9x64x64xbf16, #tpu.memory_space<vmem>>, vector<1x64x64xbf16>
    %310 = vector.shape_cast %309 : vector<1x64x64xbf16> to vector<64x64xbf16>
    %cst_200 = arith.constant dense<0.000000e+00> : vector<64x64xf32>
    %311 = tpu.matmul %308, %310, %cst_200 {dimension_numbers = #tpu.dot_dimension_numbers<[1], [0], [0], [1], [0, 0, 1, 1], [], []>} : vector<64x64xbf16>, vector<64x64xbf16>, vector<64x64xf32> -> vector<64x64xf32>
    %312 = arith.addf %306, %311 : vector<64x64xf32>
    %c10_201 = arith.constant 10 : index
    %c0_202 = arith.constant 0 : index
    %313 = vector.load %arg20[%c10_201, %c0_202] : memref<82x64xf32, #tpu.memory_space<vmem>>, vector<64x64xf32>
    %c7_i32_203 = arith.constant 7 : i32
    %314 = vector.broadcast %c7_i32_203 : i32 to vector<64x1xi32>
    %315 = arith.cmpi slt, %263, %314 : vector<64x1xi32>
    %cst_204 = arith.constant 0.000000e+00 : f32
    %316 = vector.shape_cast %315 : vector<64x1xi1> to vector<64x1xi1>
    %317 = vector.broadcast %316 : vector<64x1xi1> to vector<64x64xi1>
    %318 = vector.broadcast %cst_204 : f32 to vector<64x64xf32>
    %319 = arith.select %317, %313, %318 : vector<64x64xi1>, vector<64x64xf32>
    %320 = arith.truncf %319 : vector<64x64xf32> to vector<64x64xbf16>
    %c5_205 = arith.constant 5 : index
    %c0_206 = arith.constant 0 : index
    %c0_207 = arith.constant 0 : index
    %321 = vector.load %arg9[%c5_205, %c0_206, %c0_207] : memref<9x64x64xbf16, #tpu.memory_space<vmem>>, vector<1x64x64xbf16>
    %322 = vector.shape_cast %321 : vector<1x64x64xbf16> to vector<64x64xbf16>
    %cst_208 = arith.constant dense<0.000000e+00> : vector<64x64xf32>
    %323 = tpu.matmul %320, %322, %cst_208 {dimension_numbers = #tpu.dot_dimension_numbers<[1], [0], [0], [1], [0, 0, 1, 1], [], []>} : vector<64x64xbf16>, vector<64x64xbf16>, vector<64x64xf32> -> vector<64x64xf32>
    %324 = arith.addf %312, %323 : vector<64x64xf32>
    %c16_209 = arith.constant 16 : index
    %c0_210 = arith.constant 0 : index
    %325 = vector.load %arg20[%c16_209, %c0_210] : memref<82x64xf32, #tpu.memory_space<vmem>>, vector<64x64xf32>
    %c1_i32_211 = arith.constant 1 : i32
    %326 = vector.broadcast %c1_i32_211 : i32 to vector<64x1xi32>
    %327 = arith.cmpi sge, %263, %326 : vector<64x1xi32>
    %cst_212 = arith.constant 0.000000e+00 : f32
    %328 = vector.shape_cast %327 : vector<64x1xi1> to vector<64x1xi1>
    %329 = vector.broadcast %328 : vector<64x1xi1> to vector<64x64xi1>
    %330 = vector.broadcast %cst_212 : f32 to vector<64x64xf32>
    %331 = arith.select %329, %325, %330 : vector<64x64xi1>, vector<64x64xf32>
    %332 = arith.truncf %331 : vector<64x64xf32> to vector<64x64xbf16>
    %c6_213 = arith.constant 6 : index
    %c0_214 = arith.constant 0 : index
    %c0_215 = arith.constant 0 : index
    %333 = vector.load %arg9[%c6_213, %c0_214, %c0_215] : memref<9x64x64xbf16, #tpu.memory_space<vmem>>, vector<1x64x64xbf16>
    %334 = vector.shape_cast %333 : vector<1x64x64xbf16> to vector<64x64xbf16>
    %cst_216 = arith.constant dense<0.000000e+00> : vector<64x64xf32>
    %335 = tpu.matmul %332, %334, %cst_216 {dimension_numbers = #tpu.dot_dimension_numbers<[1], [0], [0], [1], [0, 0, 1, 1], [], []>} : vector<64x64xbf16>, vector<64x64xbf16>, vector<64x64xf32> -> vector<64x64xf32>
    %336 = arith.addf %324, %335 : vector<64x64xf32>
    %c17_217 = arith.constant 17 : index
    %c0_218 = arith.constant 0 : index
    %337 = vector.load %arg20[%c17_217, %c0_218] : memref<82x64xf32, #tpu.memory_space<vmem>>, vector<64x64xf32>
    %338 = arith.truncf %337 : vector<64x64xf32> to vector<64x64xbf16>
    %c7_219 = arith.constant 7 : index
    %c0_220 = arith.constant 0 : index
    %c0_221 = arith.constant 0 : index
    %339 = vector.load %arg9[%c7_219, %c0_220, %c0_221] : memref<9x64x64xbf16, #tpu.memory_space<vmem>>, vector<1x64x64xbf16>
    %340 = vector.shape_cast %339 : vector<1x64x64xbf16> to vector<64x64xbf16>
    %cst_222 = arith.constant dense<0.000000e+00> : vector<64x64xf32>
    %341 = tpu.matmul %338, %340, %cst_222 {dimension_numbers = #tpu.dot_dimension_numbers<[1], [0], [0], [1], [0, 0, 1, 1], [], []>} : vector<64x64xbf16>, vector<64x64xbf16>, vector<64x64xf32> -> vector<64x64xf32>
    %342 = arith.addf %336, %341 : vector<64x64xf32>
    %c18_223 = arith.constant 18 : index
    %c0_224 = arith.constant 0 : index
    %343 = vector.load %arg20[%c18_223, %c0_224] : memref<82x64xf32, #tpu.memory_space<vmem>>, vector<64x64xf32>
    %c7_i32_225 = arith.constant 7 : i32
    %344 = vector.broadcast %c7_i32_225 : i32 to vector<64x1xi32>
    %345 = arith.cmpi slt, %263, %344 : vector<64x1xi32>
    %cst_226 = arith.constant 0.000000e+00 : f32
    %346 = vector.shape_cast %345 : vector<64x1xi1> to vector<64x1xi1>
    %347 = vector.broadcast %346 : vector<64x1xi1> to vector<64x64xi1>
    %348 = vector.broadcast %cst_226 : f32 to vector<64x64xf32>
    %349 = arith.select %347, %343, %348 : vector<64x64xi1>, vector<64x64xf32>
    %350 = arith.truncf %349 : vector<64x64xf32> to vector<64x64xbf16>
    %c8_227 = arith.constant 8 : index
    %c0_228 = arith.constant 0 : index
    %c0_229 = arith.constant 0 : index
    %351 = vector.load %arg9[%c8_227, %c0_228, %c0_229] : memref<9x64x64xbf16, #tpu.memory_space<vmem>>, vector<1x64x64xbf16>
    %352 = vector.shape_cast %351 : vector<1x64x64xbf16> to vector<64x64xbf16>
    %cst_230 = arith.constant dense<0.000000e+00> : vector<64x64xf32>
    %353 = tpu.matmul %350, %352, %cst_230 {dimension_numbers = #tpu.dot_dimension_numbers<[1], [0], [0], [1], [0, 0, 1, 1], [], []>} : vector<64x64xbf16>, vector<64x64xbf16>, vector<64x64xf32> -> vector<64x64xf32>
    %354 = arith.addf %342, %353 : vector<64x64xf32>
    %c0_231 = arith.constant 0 : index
    %c0_232 = arith.constant 0 : index
    %355 = vector.load %arg10[%c0_231, %c0_232] : memref<1x64xf32, #tpu.memory_space<vmem>>, vector<1x64xf32>
    %356 = vector.broadcast %355 : vector<1x64xf32> to vector<64x64xf32>
    %357 = arith.addf %354, %356 : vector<64x64xf32>
    %cst_233 = arith.constant 0.000000e+00 : f32
    %358 = vector.broadcast %cst_233 : f32 to vector<64x64xf32>
    %359 = arith.maximumf %357, %358 : vector<64x64xf32>
    %c0_234 = arith.constant 0 : index
    %c0_235 = arith.constant 0 : index
    %360 = vector.load %arg11[%c0_234, %c0_235] : memref<256x64xbf16, #tpu.memory_space<vmem>>, vector<256x64xbf16>
    %361 = arith.truncf %359 : vector<64x64xf32> to vector<64x64xbf16>
    %cst_236 = arith.constant dense<0.000000e+00> : vector<256x64xf32>
    %362 = tpu.matmul %360, %361, %cst_236 {dimension_numbers = #tpu.dot_dimension_numbers<[1], [0], [0], [1], [0, 0, 1, 1], [], []>} : vector<256x64xbf16>, vector<64x64xbf16>, vector<256x64xf32> -> vector<256x64xf32>
    %cst_237 = arith.constant 0.000000e+00 : f32
    %363 = vector.broadcast %cst_237 : f32 to vector<290x64xf32>
    %c0_238 = arith.constant 0 : index
    %c0_239 = arith.constant 0 : index
    %364 = vector.load %arg21[%c0_238, %c0_239] : memref<290x64xf32, #tpu.memory_space<vmem>>, vector<290x64xf32>
    tpu.vector_store %arg21[%c0_238, %c0_239], %363 {strides = array<i32>} : memref<290x64xf32, #tpu.memory_space<vmem>>, vector<290x64xf32>,
    %c17_240 = arith.constant 17 : index
    %c0_241 = arith.constant 0 : index
    %365 = vector.load %arg21[%c17_240, %c0_241] : memref<290x64xf32, #tpu.memory_space<vmem>>, vector<256x64xf32>
    tpu.vector_store %arg21[%c17_240, %c0_241], %362 {strides = array<i32>} : memref<290x64xf32, #tpu.memory_space<vmem>>, vector<256x64xf32>,
    %366 = tpu.iota {dimensions = array<i32: 0>} : vector<256x1xi32>
    %c16_i32 = arith.constant 16 : i32
    %c0_i32_242 = arith.constant 0 : i32
    %367 = arith.cmpi eq, %c16_i32, %c0_i32_242 : i32
    %c1_i32_243 = arith.constant 1 : i32
    %368 = arith.select %367, %c1_i32_243, %c16_i32 : i32
    %369 = vector.broadcast %368 : i32 to vector<256x1xi32>
    %370 = arith.remsi %366, %369 : vector<256x1xi32>
    %c0_i32_244 = arith.constant 0 : i32
    %371 = vector.broadcast %c0_i32_244 : i32 to vector<256x1xi32>
    %372 = arith.cmpi ne, %370, %371 : vector<256x1xi32>
    %c0_i32_245 = arith.constant 0 : i32
    %373 = vector.broadcast %c0_i32_245 : i32 to vector<256x1xi32>
    %374 = arith.cmpi slt, %370, %373 : vector<256x1xi32>
    %c0_i32_246 = arith.constant 0 : i32
    %375 = arith.cmpi slt, %368, %c0_i32_246 : i32
    %376 = vector.broadcast %375 : i1 to vector<256x1xi1>
    %377 = vector.broadcast %376 : vector<256x1xi1> to vector<256x1xi1>
    %378 = arith.xori %374, %377 : vector<256x1xi1>
    %379 = arith.andi %378, %372 : vector<256x1xi1>
    %380 = vector.broadcast %368 : i32 to vector<256x1xi32>
    %381 = arith.addi %370, %380 : vector<256x1xi32>
    %382 = arith.select %379, %381, %370 : vector<256x1xi1>, vector<256x1xi32>
    %cst_247 = arith.constant 0.000000e+00 : f32
    %383 = vector.broadcast %cst_247 : f32 to vector<256x32xf32>
    %c0_248 = arith.constant 0 : index
    %c0_249 = arith.constant 0 : index
    %384 = vector.load %arg21[%c0_248, %c0_249] : memref<290x64xf32, #tpu.memory_space<vmem>>, vector<256x64xf32>
    %c1_i32_250 = arith.constant 1 : i32
    %385 = vector.broadcast %c1_i32_250 : i32 to vector<256x1xi32>
    %386 = arith.cmpi sge, %382, %385 : vector<256x1xi32>
    %cst_251 = arith.constant 0.000000e+00 : f32
    %387 = vector.shape_cast %386 : vector<256x1xi1> to vector<256x1xi1>
    %388 = vector.broadcast %387 : vector<256x1xi1> to vector<256x64xi1>
    %389 = vector.broadcast %cst_251 : f32 to vector<256x64xf32>
    %390 = arith.select %388, %384, %389 : vector<256x64xi1>, vector<256x64xf32>
    %391 = arith.truncf %390 : vector<256x64xf32> to vector<256x64xbf16>
    %c0_252 = arith.constant 0 : index
    %c0_253 = arith.constant 0 : index
    %c0_254 = arith.constant 0 : index
    %392 = vector.load %arg12[%c0_252, %c0_253, %c0_254] : memref<9x64x32xbf16, #tpu.memory_space<vmem>>, vector<1x64x32xbf16>
    %393 = vector.shape_cast %392 : vector<1x64x32xbf16> to vector<64x32xbf16>
    %cst_255 = arith.constant dense<0.000000e+00> : vector<256x32xf32>
    %394 = tpu.matmul %391, %393, %cst_255 {dimension_numbers = #tpu.dot_dimension_numbers<[1], [0], [0], [1], [0, 0, 1, 1], [], []>} : vector<256x64xbf16>, vector<64x32xbf16>, vector<256x32xf32> -> vector<256x32xf32>
    %395 = arith.addf %383, %394 : vector<256x32xf32>
    %c1_256 = arith.constant 1 : index
    %c0_257 = arith.constant 0 : index
    %396 = vector.load %arg21[%c1_256, %c0_257] : memref<290x64xf32, #tpu.memory_space<vmem>>, vector<256x64xf32>
    %397 = arith.truncf %396 : vector<256x64xf32> to vector<256x64xbf16>
    %c1_258 = arith.constant 1 : index
    %c0_259 = arith.constant 0 : index
    %c0_260 = arith.constant 0 : index
    %398 = vector.load %arg12[%c1_258, %c0_259, %c0_260] : memref<9x64x32xbf16, #tpu.memory_space<vmem>>, vector<1x64x32xbf16>
    %399 = vector.shape_cast %398 : vector<1x64x32xbf16> to vector<64x32xbf16>
    %cst_261 = arith.constant dense<0.000000e+00> : vector<256x32xf32>
    %400 = tpu.matmul %397, %399, %cst_261 {dimension_numbers = #tpu.dot_dimension_numbers<[1], [0], [0], [1], [0, 0, 1, 1], [], []>} : vector<256x64xbf16>, vector<64x32xbf16>, vector<256x32xf32> -> vector<256x32xf32>
    %401 = arith.addf %395, %400 : vector<256x32xf32>
    %c2_262 = arith.constant 2 : index
    %c0_263 = arith.constant 0 : index
    %402 = vector.load %arg21[%c2_262, %c0_263] : memref<290x64xf32, #tpu.memory_space<vmem>>, vector<256x64xf32>
    %c15_i32 = arith.constant 15 : i32
    %403 = vector.broadcast %c15_i32 : i32 to vector<256x1xi32>
    %404 = arith.cmpi slt, %382, %403 : vector<256x1xi32>
    %cst_264 = arith.constant 0.000000e+00 : f32
    %405 = vector.shape_cast %404 : vector<256x1xi1> to vector<256x1xi1>
    %406 = vector.broadcast %405 : vector<256x1xi1> to vector<256x64xi1>
    %407 = vector.broadcast %cst_264 : f32 to vector<256x64xf32>
    %408 = arith.select %406, %402, %407 : vector<256x64xi1>, vector<256x64xf32>
    %409 = arith.truncf %408 : vector<256x64xf32> to vector<256x64xbf16>
    %c2_265 = arith.constant 2 : index
    %c0_266 = arith.constant 0 : index
    %c0_267 = arith.constant 0 : index
    %410 = vector.load %arg12[%c2_265, %c0_266, %c0_267] : memref<9x64x32xbf16, #tpu.memory_space<vmem>>, vector<1x64x32xbf16>
    %411 = vector.shape_cast %410 : vector<1x64x32xbf16> to vector<64x32xbf16>
    %cst_268 = arith.constant dense<0.000000e+00> : vector<256x32xf32>
    %412 = tpu.matmul %409, %411, %cst_268 {dimension_numbers = #tpu.dot_dimension_numbers<[1], [0], [0], [1], [0, 0, 1, 1], [], []>} : vector<256x64xbf16>, vector<64x32xbf16>, vector<256x32xf32> -> vector<256x32xf32>
    %413 = arith.addf %401, %412 : vector<256x32xf32>
    %c16_269 = arith.constant 16 : index
    %c0_270 = arith.constant 0 : index
    %414 = vector.load %arg21[%c16_269, %c0_270] : memref<290x64xf32, #tpu.memory_space<vmem>>, vector<256x64xf32>
    %c1_i32_271 = arith.constant 1 : i32
    %415 = vector.broadcast %c1_i32_271 : i32 to vector<256x1xi32>
    %416 = arith.cmpi sge, %382, %415 : vector<256x1xi32>
    %cst_272 = arith.constant 0.000000e+00 : f32
    %417 = vector.shape_cast %416 : vector<256x1xi1> to vector<256x1xi1>
    %418 = vector.broadcast %417 : vector<256x1xi1> to vector<256x64xi1>
    %419 = vector.broadcast %cst_272 : f32 to vector<256x64xf32>
    %420 = arith.select %418, %414, %419 : vector<256x64xi1>, vector<256x64xf32>
    %421 = arith.truncf %420 : vector<256x64xf32> to vector<256x64xbf16>
    %c3_273 = arith.constant 3 : index
    %c0_274 = arith.constant 0 : index
    %c0_275 = arith.constant 0 : index
    %422 = vector.load %arg12[%c3_273, %c0_274, %c0_275] : memref<9x64x32xbf16, #tpu.memory_space<vmem>>, vector<1x64x32xbf16>
    %423 = vector.shape_cast %422 : vector<1x64x32xbf16> to vector<64x32xbf16>
    %cst_276 = arith.constant dense<0.000000e+00> : vector<256x32xf32>
    %424 = tpu.matmul %421, %423, %cst_276 {dimension_numbers = #tpu.dot_dimension_numbers<[1], [0], [0], [1], [0, 0, 1, 1], [], []>} : vector<256x64xbf16>, vector<64x32xbf16>, vector<256x32xf32> -> vector<256x32xf32>
    %425 = arith.addf %413, %424 : vector<256x32xf32>
    %c17_277 = arith.constant 17 : index
    %c0_278 = arith.constant 0 : index
    %426 = vector.load %arg21[%c17_277, %c0_278] : memref<290x64xf32, #tpu.memory_space<vmem>>, vector<256x64xf32>
    %427 = arith.truncf %426 : vector<256x64xf32> to vector<256x64xbf16>
    %c4_279 = arith.constant 4 : index
    %c0_280 = arith.constant 0 : index
    %c0_281 = arith.constant 0 : index
    %428 = vector.load %arg12[%c4_279, %c0_280, %c0_281] : memref<9x64x32xbf16, #tpu.memory_space<vmem>>, vector<1x64x32xbf16>
    %429 = vector.shape_cast %428 : vector<1x64x32xbf16> to vector<64x32xbf16>
    %cst_282 = arith.constant dense<0.000000e+00> : vector<256x32xf32>
    %430 = tpu.matmul %427, %429, %cst_282 {dimension_numbers = #tpu.dot_dimension_numbers<[1], [0], [0], [1], [0, 0, 1, 1], [], []>} : vector<256x64xbf16>, vector<64x32xbf16>, vector<256x32xf32> -> vector<256x32xf32>
    %431 = arith.addf %425, %430 : vector<256x32xf32>
    %c18_283 = arith.constant 18 : index
    %c0_284 = arith.constant 0 : index
    %432 = vector.load %arg21[%c18_283, %c0_284] : memref<290x64xf32, #tpu.memory_space<vmem>>, vector<256x64xf32>
    %c15_i32_285 = arith.constant 15 : i32
    %433 = vector.broadcast %c15_i32_285 : i32 to vector<256x1xi32>
    %434 = arith.cmpi slt, %382, %433 : vector<256x1xi32>
    %cst_286 = arith.constant 0.000000e+00 : f32
    %435 = vector.shape_cast %434 : vector<256x1xi1> to vector<256x1xi1>
    %436 = vector.broadcast %435 : vector<256x1xi1> to vector<256x64xi1>
    %437 = vector.broadcast %cst_286 : f32 to vector<256x64xf32>
    %438 = arith.select %436, %432, %437 : vector<256x64xi1>, vector<256x64xf32>
    %439 = arith.truncf %438 : vector<256x64xf32> to vector<256x64xbf16>
    %c5_287 = arith.constant 5 : index
    %c0_288 = arith.constant 0 : index
    %c0_289 = arith.constant 0 : index
    %440 = vector.load %arg12[%c5_287, %c0_288, %c0_289] : memref<9x64x32xbf16, #tpu.memory_space<vmem>>, vector<1x64x32xbf16>
    %441 = vector.shape_cast %440 : vector<1x64x32xbf16> to vector<64x32xbf16>
    %cst_290 = arith.constant dense<0.000000e+00> : vector<256x32xf32>
    %442 = tpu.matmul %439, %441, %cst_290 {dimension_numbers = #tpu.dot_dimension_numbers<[1], [0], [0], [1], [0, 0, 1, 1], [], []>} : vector<256x64xbf16>, vector<64x32xbf16>, vector<256x32xf32> -> vector<256x32xf32>
    %443 = arith.addf %431, %442 : vector<256x32xf32>
    %c32 = arith.constant 32 : index
    %c0_291 = arith.constant 0 : index
    %444 = vector.load %arg21[%c32, %c0_291] : memref<290x64xf32, #tpu.memory_space<vmem>>, vector<256x64xf32>
    %c1_i32_292 = arith.constant 1 : i32
    %445 = vector.broadcast %c1_i32_292 : i32 to vector<256x1xi32>
    %446 = arith.cmpi sge, %382, %445 : vector<256x1xi32>
    %cst_293 = arith.constant 0.000000e+00 : f32
    %447 = vector.shape_cast %446 : vector<256x1xi1> to vector<256x1xi1>
    %448 = vector.broadcast %447 : vector<256x1xi1> to vector<256x64xi1>
    %449 = vector.broadcast %cst_293 : f32 to vector<256x64xf32>
    %450 = arith.select %448, %444, %449 : vector<256x64xi1>, vector<256x64xf32>
    %451 = arith.truncf %450 : vector<256x64xf32> to vector<256x64xbf16>
    %c6_294 = arith.constant 6 : index
    %c0_295 = arith.constant 0 : index
    %c0_296 = arith.constant 0 : index
    %452 = vector.load %arg12[%c6_294, %c0_295, %c0_296] : memref<9x64x32xbf16, #tpu.memory_space<vmem>>, vector<1x64x32xbf16>
    %453 = vector.shape_cast %452 : vector<1x64x32xbf16> to vector<64x32xbf16>
    %cst_297 = arith.constant dense<0.000000e+00> : vector<256x32xf32>
    %454 = tpu.matmul %451, %453, %cst_297 {dimension_numbers = #tpu.dot_dimension_numbers<[1], [0], [0], [1], [0, 0, 1, 1], [], []>} : vector<256x64xbf16>, vector<64x32xbf16>, vector<256x32xf32> -> vector<256x32xf32>
    %455 = arith.addf %443, %454 : vector<256x32xf32>
    %c33 = arith.constant 33 : index
    %c0_298 = arith.constant 0 : index
    %456 = vector.load %arg21[%c33, %c0_298] : memref<290x64xf32, #tpu.memory_space<vmem>>, vector<256x64xf32>
    %457 = arith.truncf %456 : vector<256x64xf32> to vector<256x64xbf16>
    %c7_299 = arith.constant 7 : index
    %c0_300 = arith.constant 0 : index
    %c0_301 = arith.constant 0 : index
    %458 = vector.load %arg12[%c7_299, %c0_300, %c0_301] : memref<9x64x32xbf16, #tpu.memory_space<vmem>>, vector<1x64x32xbf16>
    %459 = vector.shape_cast %458 : vector<1x64x32xbf16> to vector<64x32xbf16>
    %cst_302 = arith.constant dense<0.000000e+00> : vector<256x32xf32>
    %460 = tpu.matmul %457, %459, %cst_302 {dimension_numbers = #tpu.dot_dimension_numbers<[1], [0], [0], [1], [0, 0, 1, 1], [], []>} : vector<256x64xbf16>, vector<64x32xbf16>, vector<256x32xf32> -> vector<256x32xf32>
    %461 = arith.addf %455, %460 : vector<256x32xf32>
    %c34 = arith.constant 34 : index
    %c0_303 = arith.constant 0 : index
    %462 = vector.load %arg21[%c34, %c0_303] : memref<290x64xf32, #tpu.memory_space<vmem>>, vector<256x64xf32>
    %c15_i32_304 = arith.constant 15 : i32
    %463 = vector.broadcast %c15_i32_304 : i32 to vector<256x1xi32>
    %464 = arith.cmpi slt, %382, %463 : vector<256x1xi32>
    %cst_305 = arith.constant 0.000000e+00 : f32
    %465 = vector.shape_cast %464 : vector<256x1xi1> to vector<256x1xi1>
    %466 = vector.broadcast %465 : vector<256x1xi1> to vector<256x64xi1>
    %467 = vector.broadcast %cst_305 : f32 to vector<256x64xf32>
    %468 = arith.select %466, %462, %467 : vector<256x64xi1>, vector<256x64xf32>
    %469 = arith.truncf %468 : vector<256x64xf32> to vector<256x64xbf16>
    %c8_306 = arith.constant 8 : index
    %c0_307 = arith.constant 0 : index
    %c0_308 = arith.constant 0 : index
    %470 = vector.load %arg12[%c8_306, %c0_307, %c0_308] : memref<9x64x32xbf16, #tpu.memory_space<vmem>>, vector<1x64x32xbf16>
    %471 = vector.shape_cast %470 : vector<1x64x32xbf16> to vector<64x32xbf16>
    %cst_309 = arith.constant dense<0.000000e+00> : vector<256x32xf32>
    %472 = tpu.matmul %469, %471, %cst_309 {dimension_numbers = #tpu.dot_dimension_numbers<[1], [0], [0], [1], [0, 0, 1, 1], [], []>} : vector<256x64xbf16>, vector<64x32xbf16>, vector<256x32xf32> -> vector<256x32xf32>
    %473 = arith.addf %461, %472 : vector<256x32xf32>
    %c0_310 = arith.constant 0 : index
    %c0_311 = arith.constant 0 : index
    %474 = vector.load %arg13[%c0_310, %c0_311] : memref<1x32xf32, #tpu.memory_space<vmem>>, vector<1x32xf32>
    %475 = vector.broadcast %474 : vector<1x32xf32> to vector<256x32xf32>
    %476 = arith.addf %473, %475 : vector<256x32xf32>
    %cst_312 = arith.constant 0.000000e+00 : f32
    %477 = vector.broadcast %cst_312 : f32 to vector<256x32xf32>
    %478 = arith.maximumf %476, %477 : vector<256x32xf32>
    %cst_313 = arith.constant 0.000000e+00 : f32
    %479 = vector.broadcast %cst_313 : f32 to vector<290x32xf32>
    %c0_314 = arith.constant 0 : index
    %c0_315 = arith.constant 0 : index
    %480 = vector.load %arg22[%c0_314, %c0_315] : memref<290x32xf32, #tpu.memory_space<vmem>>, vector<290x32xf32>
    tpu.vector_store %arg22[%c0_314, %c0_315], %479 {strides = array<i32>} : memref<290x32xf32, #tpu.memory_space<vmem>>, vector<290x32xf32>,
    %c17_316 = arith.constant 17 : index
    %c0_317 = arith.constant 0 : index
    %481 = vector.load %arg22[%c17_316, %c0_317] : memref<290x32xf32, #tpu.memory_space<vmem>>, vector<256x32xf32>
    tpu.vector_store %arg22[%c17_316, %c0_317], %478 {strides = array<i32>} : memref<290x32xf32, #tpu.memory_space<vmem>>, vector<256x32xf32>,
    %482 = tpu.iota {dimensions = array<i32: 0>} : vector<256x1xi32>
    %c16_i32_318 = arith.constant 16 : i32
    %c0_i32_319 = arith.constant 0 : i32
    %483 = arith.cmpi eq, %c16_i32_318, %c0_i32_319 : i32
    %c1_i32_320 = arith.constant 1 : i32
    %484 = arith.select %483, %c1_i32_320, %c16_i32_318 : i32
    %485 = vector.broadcast %484 : i32 to vector<256x1xi32>
    %486 = arith.remsi %482, %485 : vector<256x1xi32>
    %c0_i32_321 = arith.constant 0 : i32
    %487 = vector.broadcast %c0_i32_321 : i32 to vector<256x1xi32>
    %488 = arith.cmpi ne, %486, %487 : vector<256x1xi32>
    %c0_i32_322 = arith.constant 0 : i32
    %489 = vector.broadcast %c0_i32_322 : i32 to vector<256x1xi32>
    %490 = arith.cmpi slt, %486, %489 : vector<256x1xi32>
    %c0_i32_323 = arith.constant 0 : i32
    %491 = arith.cmpi slt, %484, %c0_i32_323 : i32
    %492 = vector.broadcast %491 : i1 to vector<256x1xi1>
    %493 = vector.broadcast %492 : vector<256x1xi1> to vector<256x1xi1>
    %494 = arith.xori %490, %493 : vector<256x1xi1>
    %495 = arith.andi %494, %488 : vector<256x1xi1>
    %496 = vector.broadcast %484 : i32 to vector<256x1xi32>
    %497 = arith.addi %486, %496 : vector<256x1xi32>
    %498 = arith.select %495, %497, %486 : vector<256x1xi1>, vector<256x1xi32>
    %cst_324 = arith.constant 0.000000e+00 : f32
    %499 = vector.broadcast %cst_324 : f32 to vector<256x128xf32>
    %c0_325 = arith.constant 0 : index
    %c0_326 = arith.constant 0 : index
    %500 = vector.load %arg22[%c0_325, %c0_326] : memref<290x32xf32, #tpu.memory_space<vmem>>, vector<256x32xf32>
    %c1_i32_327 = arith.constant 1 : i32
    %501 = vector.broadcast %c1_i32_327 : i32 to vector<256x1xi32>
    %502 = arith.cmpi sge, %498, %501 : vector<256x1xi32>
    %cst_328 = arith.constant 0.000000e+00 : f32
    %503 = vector.shape_cast %502 : vector<256x1xi1> to vector<256x1xi1>
    %504 = vector.broadcast %503 : vector<256x1xi1> to vector<256x32xi1>
    %505 = vector.broadcast %cst_328 : f32 to vector<256x32xf32>
    %506 = arith.select %504, %500, %505 : vector<256x32xi1>, vector<256x32xf32>
    %507 = arith.truncf %506 : vector<256x32xf32> to vector<256x32xbf16>
    %c0_329 = arith.constant 0 : index
    %c0_330 = arith.constant 0 : index
    %c0_331 = arith.constant 0 : index
    %508 = vector.load %arg14[%c0_329, %c0_330, %c0_331] : memref<9x32x128xbf16, #tpu.memory_space<vmem>>, vector<1x32x128xbf16>
    %509 = vector.shape_cast %508 : vector<1x32x128xbf16> to vector<32x128xbf16>
    %cst_332 = arith.constant dense<0.000000e+00> : vector<256x128xf32>
    %510 = tpu.matmul %507, %509, %cst_332 {dimension_numbers = #tpu.dot_dimension_numbers<[1], [0], [0], [1], [0, 0, 1, 1], [], []>} : vector<256x32xbf16>, vector<32x128xbf16>, vector<256x128xf32> -> vector<256x128xf32>
    %511 = arith.addf %499, %510 : vector<256x128xf32>
    %c1_333 = arith.constant 1 : index
    %c0_334 = arith.constant 0 : index
    %512 = vector.load %arg22[%c1_333, %c0_334] : memref<290x32xf32, #tpu.memory_space<vmem>>, vector<256x32xf32>
    %513 = arith.truncf %512 : vector<256x32xf32> to vector<256x32xbf16>
    %c1_335 = arith.constant 1 : index
    %c0_336 = arith.constant 0 : index
    %c0_337 = arith.constant 0 : index
    %514 = vector.load %arg14[%c1_335, %c0_336, %c0_337] : memref<9x32x128xbf16, #tpu.memory_space<vmem>>, vector<1x32x128xbf16>
    %515 = vector.shape_cast %514 : vector<1x32x128xbf16> to vector<32x128xbf16>
    %cst_338 = arith.constant dense<0.000000e+00> : vector<256x128xf32>
    %516 = tpu.matmul %513, %515, %cst_338 {dimension_numbers = #tpu.dot_dimension_numbers<[1], [0], [0], [1], [0, 0, 1, 1], [], []>} : vector<256x32xbf16>, vector<32x128xbf16>, vector<256x128xf32> -> vector<256x128xf32>
    %517 = arith.addf %511, %516 : vector<256x128xf32>
    %c2_339 = arith.constant 2 : index
    %c0_340 = arith.constant 0 : index
    %518 = vector.load %arg22[%c2_339, %c0_340] : memref<290x32xf32, #tpu.memory_space<vmem>>, vector<256x32xf32>
    %c15_i32_341 = arith.constant 15 : i32
    %519 = vector.broadcast %c15_i32_341 : i32 to vector<256x1xi32>
    %520 = arith.cmpi slt, %498, %519 : vector<256x1xi32>
    %cst_342 = arith.constant 0.000000e+00 : f32
    %521 = vector.shape_cast %520 : vector<256x1xi1> to vector<256x1xi1>
    %522 = vector.broadcast %521 : vector<256x1xi1> to vector<256x32xi1>
    %523 = vector.broadcast %cst_342 : f32 to vector<256x32xf32>
    %524 = arith.select %522, %518, %523 : vector<256x32xi1>, vector<256x32xf32>
    %525 = arith.truncf %524 : vector<256x32xf32> to vector<256x32xbf16>
    %c2_343 = arith.constant 2 : index
    %c0_344 = arith.constant 0 : index
    %c0_345 = arith.constant 0 : index
    %526 = vector.load %arg14[%c2_343, %c0_344, %c0_345] : memref<9x32x128xbf16, #tpu.memory_space<vmem>>, vector<1x32x128xbf16>
    %527 = vector.shape_cast %526 : vector<1x32x128xbf16> to vector<32x128xbf16>
    %cst_346 = arith.constant dense<0.000000e+00> : vector<256x128xf32>
    %528 = tpu.matmul %525, %527, %cst_346 {dimension_numbers = #tpu.dot_dimension_numbers<[1], [0], [0], [1], [0, 0, 1, 1], [], []>} : vector<256x32xbf16>, vector<32x128xbf16>, vector<256x128xf32> -> vector<256x128xf32>
    %529 = arith.addf %517, %528 : vector<256x128xf32>
    %c16_347 = arith.constant 16 : index
    %c0_348 = arith.constant 0 : index
    %530 = vector.load %arg22[%c16_347, %c0_348] : memref<290x32xf32, #tpu.memory_space<vmem>>, vector<256x32xf32>
    %c1_i32_349 = arith.constant 1 : i32
    %531 = vector.broadcast %c1_i32_349 : i32 to vector<256x1xi32>
    %532 = arith.cmpi sge, %498, %531 : vector<256x1xi32>
    %cst_350 = arith.constant 0.000000e+00 : f32
    %533 = vector.shape_cast %532 : vector<256x1xi1> to vector<256x1xi1>
    %534 = vector.broadcast %533 : vector<256x1xi1> to vector<256x32xi1>
    %535 = vector.broadcast %cst_350 : f32 to vector<256x32xf32>
    %536 = arith.select %534, %530, %535 : vector<256x32xi1>, vector<256x32xf32>
    %537 = arith.truncf %536 : vector<256x32xf32> to vector<256x32xbf16>
    %c3_351 = arith.constant 3 : index
    %c0_352 = arith.constant 0 : index
    %c0_353 = arith.constant 0 : index
    %538 = vector.load %arg14[%c3_351, %c0_352, %c0_353] : memref<9x32x128xbf16, #tpu.memory_space<vmem>>, vector<1x32x128xbf16>
    %539 = vector.shape_cast %538 : vector<1x32x128xbf16> to vector<32x128xbf16>
    %cst_354 = arith.constant dense<0.000000e+00> : vector<256x128xf32>
    %540 = tpu.matmul %537, %539, %cst_354 {dimension_numbers = #tpu.dot_dimension_numbers<[1], [0], [0], [1], [0, 0, 1, 1], [], []>} : vector<256x32xbf16>, vector<32x128xbf16>, vector<256x128xf32> -> vector<256x128xf32>
    %541 = arith.addf %529, %540 : vector<256x128xf32>
    %c17_355 = arith.constant 17 : index
    %c0_356 = arith.constant 0 : index
    %542 = vector.load %arg22[%c17_355, %c0_356] : memref<290x32xf32, #tpu.memory_space<vmem>>, vector<256x32xf32>
    %543 = arith.truncf %542 : vector<256x32xf32> to vector<256x32xbf16>
    %c4_357 = arith.constant 4 : index
    %c0_358 = arith.constant 0 : index
    %c0_359 = arith.constant 0 : index
    %544 = vector.load %arg14[%c4_357, %c0_358, %c0_359] : memref<9x32x128xbf16, #tpu.memory_space<vmem>>, vector<1x32x128xbf16>
    %545 = vector.shape_cast %544 : vector<1x32x128xbf16> to vector<32x128xbf16>
    %cst_360 = arith.constant dense<0.000000e+00> : vector<256x128xf32>
    %546 = tpu.matmul %543, %545, %cst_360 {dimension_numbers = #tpu.dot_dimension_numbers<[1], [0], [0], [1], [0, 0, 1, 1], [], []>} : vector<256x32xbf16>, vector<32x128xbf16>, vector<256x128xf32> -> vector<256x128xf32>
    %547 = arith.addf %541, %546 : vector<256x128xf32>
    %c18_361 = arith.constant 18 : index
    %c0_362 = arith.constant 0 : index
    %548 = vector.load %arg22[%c18_361, %c0_362] : memref<290x32xf32, #tpu.memory_space<vmem>>, vector<256x32xf32>
    %c15_i32_363 = arith.constant 15 : i32
    %549 = vector.broadcast %c15_i32_363 : i32 to vector<256x1xi32>
    %550 = arith.cmpi slt, %498, %549 : vector<256x1xi32>
    %cst_364 = arith.constant 0.000000e+00 : f32
    %551 = vector.shape_cast %550 : vector<256x1xi1> to vector<256x1xi1>
    %552 = vector.broadcast %551 : vector<256x1xi1> to vector<256x32xi1>
    %553 = vector.broadcast %cst_364 : f32 to vector<256x32xf32>
    %554 = arith.select %552, %548, %553 : vector<256x32xi1>, vector<256x32xf32>
    %555 = arith.truncf %554 : vector<256x32xf32> to vector<256x32xbf16>
    %c5_365 = arith.constant 5 : index
    %c0_366 = arith.constant 0 : index
    %c0_367 = arith.constant 0 : index
    %556 = vector.load %arg14[%c5_365, %c0_366, %c0_367] : memref<9x32x128xbf16, #tpu.memory_space<vmem>>, vector<1x32x128xbf16>
    %557 = vector.shape_cast %556 : vector<1x32x128xbf16> to vector<32x128xbf16>
    %cst_368 = arith.constant dense<0.000000e+00> : vector<256x128xf32>
    %558 = tpu.matmul %555, %557, %cst_368 {dimension_numbers = #tpu.dot_dimension_numbers<[1], [0], [0], [1], [0, 0, 1, 1], [], []>} : vector<256x32xbf16>, vector<32x128xbf16>, vector<256x128xf32> -> vector<256x128xf32>
    %559 = arith.addf %547, %558 : vector<256x128xf32>
    %c32_369 = arith.constant 32 : index
    %c0_370 = arith.constant 0 : index
    %560 = vector.load %arg22[%c32_369, %c0_370] : memref<290x32xf32, #tpu.memory_space<vmem>>, vector<256x32xf32>
    %c1_i32_371 = arith.constant 1 : i32
    %561 = vector.broadcast %c1_i32_371 : i32 to vector<256x1xi32>
    %562 = arith.cmpi sge, %498, %561 : vector<256x1xi32>
    %cst_372 = arith.constant 0.000000e+00 : f32
    %563 = vector.shape_cast %562 : vector<256x1xi1> to vector<256x1xi1>
    %564 = vector.broadcast %563 : vector<256x1xi1> to vector<256x32xi1>
    %565 = vector.broadcast %cst_372 : f32 to vector<256x32xf32>
    %566 = arith.select %564, %560, %565 : vector<256x32xi1>, vector<256x32xf32>
    %567 = arith.truncf %566 : vector<256x32xf32> to vector<256x32xbf16>
    %c6_373 = arith.constant 6 : index
    %c0_374 = arith.constant 0 : index
    %c0_375 = arith.constant 0 : index
    %568 = vector.load %arg14[%c6_373, %c0_374, %c0_375] : memref<9x32x128xbf16, #tpu.memory_space<vmem>>, vector<1x32x128xbf16>
    %569 = vector.shape_cast %568 : vector<1x32x128xbf16> to vector<32x128xbf16>
    %cst_376 = arith.constant dense<0.000000e+00> : vector<256x128xf32>
    %570 = tpu.matmul %567, %569, %cst_376 {dimension_numbers = #tpu.dot_dimension_numbers<[1], [0], [0], [1], [0, 0, 1, 1], [], []>} : vector<256x32xbf16>, vector<32x128xbf16>, vector<256x128xf32> -> vector<256x128xf32>
    %571 = arith.addf %559, %570 : vector<256x128xf32>
    %c33_377 = arith.constant 33 : index
    %c0_378 = arith.constant 0 : index
    %572 = vector.load %arg22[%c33_377, %c0_378] : memref<290x32xf32, #tpu.memory_space<vmem>>, vector<256x32xf32>
    %573 = arith.truncf %572 : vector<256x32xf32> to vector<256x32xbf16>
    %c7_379 = arith.constant 7 : index
    %c0_380 = arith.constant 0 : index
    %c0_381 = arith.constant 0 : index
    %574 = vector.load %arg14[%c7_379, %c0_380, %c0_381] : memref<9x32x128xbf16, #tpu.memory_space<vmem>>, vector<1x32x128xbf16>
    %575 = vector.shape_cast %574 : vector<1x32x128xbf16> to vector<32x128xbf16>
    %cst_382 = arith.constant dense<0.000000e+00> : vector<256x128xf32>
    %576 = tpu.matmul %573, %575, %cst_382 {dimension_numbers = #tpu.dot_dimension_numbers<[1], [0], [0], [1], [0, 0, 1, 1], [], []>} : vector<256x32xbf16>, vector<32x128xbf16>, vector<256x128xf32> -> vector<256x128xf32>
    %577 = arith.addf %571, %576 : vector<256x128xf32>
    %c34_383 = arith.constant 34 : index
    %c0_384 = arith.constant 0 : index
    %578 = vector.load %arg22[%c34_383, %c0_384] : memref<290x32xf32, #tpu.memory_space<vmem>>, vector<256x32xf32>
    %c15_i32_385 = arith.constant 15 : i32
    %579 = vector.broadcast %c15_i32_385 : i32 to vector<256x1xi32>
    %580 = arith.cmpi slt, %498, %579 : vector<256x1xi32>
    %cst_386 = arith.constant 0.000000e+00 : f32
    %581 = vector.shape_cast %580 : vector<256x1xi1> to vector<256x1xi1>
    %582 = vector.broadcast %581 : vector<256x1xi1> to vector<256x32xi1>
    %583 = vector.broadcast %cst_386 : f32 to vector<256x32xf32>
    %584 = arith.select %582, %578, %583 : vector<256x32xi1>, vector<256x32xf32>
    %585 = arith.truncf %584 : vector<256x32xf32> to vector<256x32xbf16>
    %c8_387 = arith.constant 8 : index
    %c0_388 = arith.constant 0 : index
    %c0_389 = arith.constant 0 : index
    %586 = vector.load %arg14[%c8_387, %c0_388, %c0_389] : memref<9x32x128xbf16, #tpu.memory_space<vmem>>, vector<1x32x128xbf16>
    %587 = vector.shape_cast %586 : vector<1x32x128xbf16> to vector<32x128xbf16>
    %cst_390 = arith.constant dense<0.000000e+00> : vector<256x128xf32>
    %588 = tpu.matmul %585, %587, %cst_390 {dimension_numbers = #tpu.dot_dimension_numbers<[1], [0], [0], [1], [0, 0, 1, 1], [], []>} : vector<256x32xbf16>, vector<32x128xbf16>, vector<256x128xf32> -> vector<256x128xf32>
    %589 = arith.addf %577, %588 : vector<256x128xf32>
    %c0_391 = arith.constant 0 : index
    %c0_392 = arith.constant 0 : index
    %590 = vector.load %arg15[%c0_391, %c0_392] : memref<1x128xf32, #tpu.memory_space<vmem>>, vector<1x128xf32>
    %591 = vector.broadcast %590 : vector<1x128xf32> to vector<256x128xf32>
    %592 = arith.addf %589, %591 : vector<256x128xf32>
    %593 = math.tanh %592 : vector<256x128xf32>
    %c0_393 = arith.constant 0 : index
    %c0_394 = arith.constant 0 : index
    %594 = vector.load %arg16[%c0_393, %c0_394] : memref<1024x256xbf16, #tpu.memory_space<vmem>>, vector<1024x256xbf16>
    %595 = arith.truncf %593 : vector<256x128xf32> to vector<256x128xbf16>
    %cst_395 = arith.constant dense<0.000000e+00> : vector<1024x128xf32>
    %596 = tpu.matmul %594, %595, %cst_395 {dimension_numbers = #tpu.dot_dimension_numbers<[1], [0], [0], [1], [0, 0, 1, 1], [], []>} : vector<1024x256xbf16>, vector<256x128xbf16>, vector<1024x128xf32> -> vector<1024x128xf32>
    %c0_396 = arith.constant 0 : index
    %c0_397 = arith.constant 0 : index
    %c0_398 = arith.constant 0 : index
    %597 = vector.load %arg17[%c0_396, %c0_397, %c0_398] : memref<1x1024x128xf32, #tpu.memory_space<vmem>>, vector<1x1024x128xf32>
    %598 = vector.shape_cast %597 : vector<1x1024x128xf32> to vector<1024x128xf32>
    %599 = vector.shape_cast %596 : vector<1024x128xf32> to vector<1x1024x128xf32>
    tpu.vector_store %arg17[%c0_396, %c0_397, %c0_398], %599 {strides = array<i32>} : memref<1x1024x128xf32, #tpu.memory_space<vmem>>, vector<1x1024x128xf32>,
    return
  }
  func.func @transform_0(%arg0: i32) -> (i32, i32, i32) {
    %c0_i32 = arith.constant 0 : i32
    %c0_i32_0 = arith.constant 0 : i32
    %c0_i32_1 = arith.constant 0 : i32
    return %arg0, %c0_i32, %c0_i32_0 : i32, i32, i32
  }
  func.func @transform_1(%arg0: i32) -> (i32, i32) {
    %c0_i32 = arith.constant 0 : i32
    %c0_i32_0 = arith.constant 0 : i32
    %c0_i32_1 = arith.constant 0 : i32
    return %c0_i32, %c0_i32_0 : i32, i32
  }
  func.func @transform_2(%arg0: i32) -> (i32, i32) {
    %c0_i32 = arith.constant 0 : i32
    %c0_i32_0 = arith.constant 0 : i32
    %c0_i32_1 = arith.constant 0 : i32
    return %c0_i32, %c0_i32_0 : i32, i32
  }
  func.func @transform_3(%arg0: i32) -> (i32, i32, i32) {
    %c0_i32 = arith.constant 0 : i32
    %c0_i32_0 = arith.constant 0 : i32
    %c0_i32_1 = arith.constant 0 : i32
    %c0_i32_2 = arith.constant 0 : i32
    return %c0_i32, %c0_i32_0, %c0_i32_1 : i32, i32, i32
  }
  func.func @transform_4(%arg0: i32) -> (i32, i32) {
    %c0_i32 = arith.constant 0 : i32
    %c0_i32_0 = arith.constant 0 : i32
    %c0_i32_1 = arith.constant 0 : i32
    return %c0_i32, %c0_i32_0 : i32, i32
  }
  func.func @transform_5(%arg0: i32) -> (i32, i32) {
    %c0_i32 = arith.constant 0 : i32
    %c0_i32_0 = arith.constant 0 : i32
    %c0_i32_1 = arith.constant 0 : i32
    return %c0_i32, %c0_i32_0 : i32, i32
  }
  func.func @transform_6(%arg0: i32) -> (i32, i32, i32) {
    %c0_i32 = arith.constant 0 : i32
    %c0_i32_0 = arith.constant 0 : i32
    %c0_i32_1 = arith.constant 0 : i32
    %c0_i32_2 = arith.constant 0 : i32
    return %c0_i32, %c0_i32_0, %c0_i32_1 : i32, i32, i32
  }
  func.func @transform_7(%arg0: i32) -> (i32, i32) {
    %c0_i32 = arith.constant 0 : i32
    %c0_i32_0 = arith.constant 0 : i32
    %c0_i32_1 = arith.constant 0 : i32
    return %c0_i32, %c0_i32_0 : i32, i32
  }
  func.func @transform_8(%arg0: i32) -> (i32, i32, i32) {
    %c0_i32 = arith.constant 0 : i32
    %c0_i32_0 = arith.constant 0 : i32
    %c0_i32_1 = arith.constant 0 : i32
    %c0_i32_2 = arith.constant 0 : i32
    return %c0_i32, %c0_i32_0, %c0_i32_1 : i32, i32, i32
  }
  func.func @transform_9(%arg0: i32) -> (i32, i32) {
    %c0_i32 = arith.constant 0 : i32
    %c0_i32_0 = arith.constant 0 : i32
    %c0_i32_1 = arith.constant 0 : i32
    return %c0_i32, %c0_i32_0 : i32, i32
  }
  func.func @transform_10(%arg0: i32) -> (i32, i32) {
    %c0_i32 = arith.constant 0 : i32
    %c0_i32_0 = arith.constant 0 : i32
    %c0_i32_1 = arith.constant 0 : i32
    return %c0_i32, %c0_i32_0 : i32, i32
  }
  func.func @transform_11(%arg0: i32) -> (i32, i32, i32) {
    %c0_i32 = arith.constant 0 : i32
    %c0_i32_0 = arith.constant 0 : i32
    %c0_i32_1 = arith.constant 0 : i32
    %c0_i32_2 = arith.constant 0 : i32
    return %c0_i32, %c0_i32_0, %c0_i32_1 : i32, i32, i32
  }
  func.func @transform_12(%arg0: i32) -> (i32, i32) {
    %c0_i32 = arith.constant 0 : i32
    %c0_i32_0 = arith.constant 0 : i32
    %c0_i32_1 = arith.constant 0 : i32
    return %c0_i32, %c0_i32_0 : i32, i32
  }
  func.func @transform_13(%arg0: i32) -> (i32, i32, i32) {
    %c0_i32 = arith.constant 0 : i32
    %c0_i32_0 = arith.constant 0 : i32
    %c0_i32_1 = arith.constant 0 : i32
    %c0_i32_2 = arith.constant 0 : i32
    return %c0_i32, %c0_i32_0, %c0_i32_1 : i32, i32, i32
  }
  func.func @transform_14(%arg0: i32) -> (i32, i32) {
    %c0_i32 = arith.constant 0 : i32
    %c0_i32_0 = arith.constant 0 : i32
    %c0_i32_1 = arith.constant 0 : i32
    return %c0_i32, %c0_i32_0 : i32, i32
  }
  func.func @transform_15(%arg0: i32) -> (i32, i32) {
    %c0_i32 = arith.constant 0 : i32
    %c0_i32_0 = arith.constant 0 : i32
    %c0_i32_1 = arith.constant 0 : i32
    return %c0_i32, %c0_i32_0 : i32, i32
  }
  func.func @transform_16(%arg0: i32) -> (i32, i32, i32) {
    %c0_i32 = arith.constant 0 : i32
    %c0_i32_0 = arith.constant 0 : i32
    %c0_i32_1 = arith.constant 0 : i32
    return %arg0, %c0_i32, %c0_i32_0 : i32, i32, i32
  }
}

</mosaic_0001>

<bundles_post_ra>
// kernel: decoder_forward.1
= control target key start
LH: loop header
LB: loop body
LE: loop exit
PB: predicated region body
PF: predicated region fallthrough
CT: control target
= control target key end

     0   :  { %s24897_s0 = inlined_call_operand.vmem [shape: bf16[2,16,1280], index: 0, kind: input, shape index: {}]   ;;  %s24898_s1 = inlined_call_operand.vmem [shape: bf16[1280,256], index: 1, kind: input, shape index: {}]   ;;  %s24899_s2 = inlined_call_operand.vmem [shape: f32[1,256], index: 2, kind: input, shape index: {}]   ;;  %s24900_s3 = inlined_call_operand.vmem [shape: bf16[9,256,128], index: 3, kind: input, shape index: {}]   ;;  %s24901_s4 = inlined_call_operand.vmem [shape: f32[1,128], index: 4, kind: input, shape index: {}]   ;;  %s24902_s5 = inlined_call_operand.vmem [shape: bf16[64,16], index: 5, kind: input, shape index: {}]   ;;  %s24903_s6 = inlined_call_operand.vmem [shape: bf16[9,128,64], index: 6, kind: input, shape index: {}]   ;;  %s24904_s7 = inlined_call_operand.vmem [shape: f32[1,64], index: 7, kind: input, shape index: {}]   ;;  %s24905_s8 = inlined_call_operand.hbm [shape: bf16[9,64,64], index: 8, kind: input, shape index: {}]   ;;  %s24906_s9 = inlined_call_operand.vmem [shape: f32[1,64], index: 9, kind: input, shape index: {}]   ;;  %s24907_s10 = inlined_call_operand.vmem [shape: bf16[256,64], index: 10, kind: input, shape index: {}]   ;;  %s24908_s11 = inlined_call_operand.vmem [shape: bf16[9,64,32], index: 11, kind: input, shape index: {}]   ;;  %s24909_s12 = inlined_call_operand.vmem [shape: f32[1,32], index: 12, kind: input, shape index: {}]   ;;  %s24910_s13 = inlined_call_operand.hbm [shape: bf16[9,32,128], index: 13, kind: input, shape index: {}]   ;;  %s24911_s14 = inlined_call_operand.vmem [shape: f32[1,128], index: 14, kind: input, shape index: {}]   ;;  %s24912_s15 = inlined_call_operand.hbm [shape: bf16[1024,256], index: 15, kind: input, shape index: {}]   ;;  %s24913_s16 = inlined_call_operand.vmem [shape: f32[2,1024,128], index: 16, kind: output, shape index: {}]  }
   0x1   :  { %25137 = sst [smem:[#allocation133_spill]] %s24897_s0 }
   0x2   :  { %25138 = sst [smem:[#allocation134_spill]] %s24909_s12 }
   0x3   :  { %25139 = sst [smem:[#allocation135_spill]] %s24911_s14 }
   0x4   :  { %25140 = sst [smem:[#allocation136_spill]] %s24913_s16 }
   0x5   :  { %21 = vsyncpa [#allocation8], 0 }
   0x6   :  { %22 = vsyncpa [#allocation10], 0  ;;  %s20433_s21 = smov 0  }
   0x7 LB: > { %25141 = sst [smem:[#allocation14_spill]] %s20337_s21  ;;  %s20439_s22 = sadd.s32 4294967295, %s20337_s21   ;;  %s20337_s21 = sphi %s20433_s21, %s28_s21  }
   0x8   : > { %p15278_p0 = scmp.ge.s32.totalorder %s20337_s21, 1  ;;  %p400_p1 = scmp.lt.s32.totalorder %s20337_s21, 3 }
   0x9   : > { %p19376_p2 = scmp.eq.s32.totalorder %s20439_s22, 0  ;;  %s20339_s24 = smov [#allocation9]  }
   0xa   : > { %p20444_p3 = pnand %p15278_p0, %p400_p1  ;;  %s458_s25 = sshll.u32 %s20339_s24, 4  ;;  %s20448_s25 = int_to_ptr.vmem [resolvable:$true] %s458_s25 }
   0xb   : > { %s20340_s26 = smov [#allocation7]   ;;  %s20341_s29 = smov [#allocation11]  }
   0xc   : > { %p19366_p4 = pneg %p20444_p3  ;;  %s433_s27 = sshll.u32 %s20340_s26, 4  ;;  %s20452_s27 = int_to_ptr.vmem [resolvable:$true] %s433_s27 }
   0xd   : > { %s474_s30 = sshll.u32 %s20341_s29, 4  ;;  %s20239_s18 = scalar_lea.hbm %s24910_s13, 2304  ;;  %s20460_s30 = int_to_ptr.vmem [resolvable:$true] %s474_s30 }
   0xe   : > { %p20456_p5 = pnand %p19376_p2, %p19366_p4  ;;  %p20240_p6 = scmp.ne.s32.totalorder %s24910_s13, %s20239_s18 }
   0xf   : > { %p20246_p10 = scmp.lt.u32.totalorder %s20239_s18, %s24910_s13 }
  0x10   : > { %p20470_p7 = pneg %p20456_p5 }
  0x12   : > { %p20242_p8 = pnand %p20470_p7, %p20240_p6 }
  0x14   : > { %p20243_p9 = pneg %p20242_p8 }
  0x16   : > { %p20248_p11 = pnand %p20246_p10, %p20243_p9 }
  0x18   : > { %20251 = shalt.err (!%p20248_p11)
}
  0x19   : > { %s20252_s0 = scalar_lea.vmem %s20448_s25, 2304  ;;  %p20260_p1 = scmp.lt.s32.totalorder %s20448_s25, %s20448_s25 }
  0x1a   : > { %p20253_p12 = scmp.ne.s32.totalorder %s20448_s25, %s20252_s0  ;;  %p20261_p4 = scmp.lt.s32.totalorder %s20252_s0, %s20252_s0 }
  0x1c   : > { %p20255_p13 = pnand %p20253_p12, %p20470_p7  ;;  %p20262_p6 = por %p20261_p4, %p20260_p1 }
  0x1e   : > { %p20256_p0 = pneg %p20255_p13 }
  0x20   : > { %p20263_p8 = pnand %p20262_p6, %p20256_p0 }
  0x22   : > { %20266 = shalt.err (!%p20263_p8)
}
  0x23   : > { %s20342_s17 = smov 64   ;;  %s20343_s18 = smov 4  }
  0x24   : > { %19372 = dma.hbm_to_vmem [thread:$0]  (!%p20456_p5), %s24910_s13, 2304, %s20448_s25, [#allocation10], %s20342_s17, %s20342_s17, %s20343_s18  }
  0x25   : > { %s20267_s21 = scalar_lea.hbm %s24905_s8, 4608 }
  0x26   : > { %p20268_p9 = scmp.ne.s32.totalorder %s24905_s8, %s20267_s21  ;;  %p20274_p12 = scmp.lt.u32.totalorder %s20267_s21, %s24905_s8 }
  0x28   : > { %p20270_p10 = pnand %p20268_p9, %p20470_p7 }
  0x2a   : > { %p20271_p11 = pneg %p20270_p10 }
  0x2c   : > { %p20276_p13 = pnand %p20274_p12, %p20271_p11 }
  0x2e   : > { %20279 = shalt.err (!%p20276_p13)
}
  0x2f   : > { %s20280_s25 = scalar_lea.vmem %s20452_s27, 4608  ;;  %p20288_p6 = scmp.lt.s32.totalorder %s20452_s27, %s20452_s27 }
  0x30   : > { %p20281_p0 = scmp.ne.s32.totalorder %s20452_s27, %s20280_s25  ;;  %p20289_p8 = scmp.lt.s32.totalorder %s20280_s25, %s20280_s25 }
  0x32   : > { %p20283_p1 = pnand %p20281_p0, %p20470_p7  ;;  %p20290_p9 = por %p20289_p8, %p20288_p6 }
  0x34   : > { %p20284_p4 = pneg %p20283_p1 }
  0x36   : > { %p20291_p10 = pnand %p20290_p9, %p20284_p4 }
  0x38   : > { %20294 = shalt.err (!%p20291_p10)
}
  0x39   : > { %19369 = dma.hbm_to_vmem [thread:$0]  (!%p20456_p5), %s24905_s8, 4608, %s20452_s27, [#allocation8], %s20342_s17, %s20342_s17, %s20343_s18  }
  0x3a   : > { %s20295_s19 = scalar_lea.hbm %s24912_s15, 16384 }
  0x3b   : > { %p20296_p11 = scmp.ne.s32.totalorder %s24912_s15, %s20295_s19  ;;  %p20302_p0 = scmp.lt.u32.totalorder %s20295_s19, %s24912_s15 }
  0x3d   : > { %p20298_p12 = pnand %p20296_p11, %p20470_p7 }
  0x3f   : > { %p20299_p13 = pneg %p20298_p12 }
  0x41   : > { %p20304_p1 = pnand %p20302_p0, %p20299_p13 }
  0x43   : > { %20307 = shalt.err (!%p20304_p1)
}
  0x44   : > { %s20308_s27 = scalar_lea.vmem %s20460_s30, 16384  ;;  %p20316_p9 = scmp.lt.s32.totalorder %s20460_s30, %s20460_s30 }
  0x45   : > { %p20309_p4 = scmp.ne.s32.totalorder %s20460_s30, %s20308_s27  ;;  %p20317_p10 = scmp.lt.s32.totalorder %s20308_s27, %s20308_s27 }
  0x47   : > { %p20311_p6 = pnand %p20309_p4, %p20470_p7  ;;  %p20318_p11 = por %p20317_p10, %p20316_p9 }
  0x49   : > { %p20312_p8 = pneg %p20311_p6 }
  0x4b   : > { %p20319_p12 = pnand %p20318_p11, %p20312_p8 }
  0x4d   : > { %20322 = shalt.err (!%p20319_p12)
}
  0x4e   : > { %s20344_s17 = smov 128   ;;  %s20345_s18 = smov 8  }
  0x4f   : > { %19375 = dma.hbm_to_vmem [thread:$0]  (!%p20456_p5), %s24912_s15, 16384, %s20460_s30, [#allocation10], %s20344_s17, %s20344_s17, %s20345_s18  }
  0x50   : > { %498 = sbr.rel (%p20444_p3) target bundleno = 4480 (0x1180), region = 84 }
  0x57   : > { %20328 = dma.done.wait (%p19376_p2), [#allocation8], 4608  }
  0x58   : > { %20330 = vsyncadd (%p19376_p2), [#allocation8], 4294962688 }
  0x59   : > { %20332 = dma.done.wait (%p19376_p2), [#allocation10], 18688  }
  0x5a   : > { %20334 = vsyncadd (%p19376_p2), [#allocation10], 4294948608  ;;  %v19399_v0 = vld [vmem:[%s24898_s1 + $0x4] ss:$8 sps:$4 sm:$0xff]   ;;  %v19401_v1 = vld [vmem:[%s24898_s1] ss:$8 sps:$4 sm:$0xff]  }
  0x5b   : > { %1599 = vmatprep.subr.bf16.mxu0 %v19399_v0  ;;  %v19402_v2 = vld [vmem:[%s24898_s1 + $0x14] ss:$8 sps:$4 sm:$0xff]   ;;  %v19404_v3 = vld [vmem:[%s24898_s1 + $0x10] ss:$8 sps:$4 sm:$0xff]   ;;  %v19405_v4 = vld [vmem:[%s24898_s1 + $0x24] ss:$8 sps:$4 sm:$0xff]  }
  0x5c   : > { %1600 = vmatpush1.bf16.msra.mxu0 %v19401_v1  ;;  %v19407_v5 = vld [vmem:[%s24898_s1 + $0x20] ss:$8 sps:$4 sm:$0xff]   ;;  %p556_p2 = scmp.lt.s32.totalorder %s20439_s22, 1  ;;  %v19408_v6 = vld [vmem:[%s24898_s1 + $0x34] ss:$8 sps:$4 sm:$0xff]   ;;  %s25145_s29 = sld [smem:[#allocation133_spill]] }
  0x5d   : > { %1601 = vmatprep.subr.bf16.mxu0 %v19402_v2  ;;  %v19410_v7 = vld [vmem:[%s24898_s1 + $0x30] ss:$8 sps:$4 sm:$0xff]   ;;  %v19411_v8 = vld [vmem:[%s24898_s1 + $0x44] ss:$8 sps:$4 sm:$0xff]   ;;  %v19413_v9 = vld [vmem:[%s24898_s1 + $0x40] ss:$8 sps:$4 sm:$0xff]  }
  0x5e   : > { %s26025_s22 = smov (!%p556_p2, %s20439_s22), 1  ;;  %v19414_v10 = vld [vmem:[%s24898_s1 + $0x54] ss:$8 sps:$4 sm:$0xff]   ;;  %v19416_v11 = vld [vmem:[%s24898_s1 + $0x50] ss:$8 sps:$4 sm:$0xff]   ;;  %vm1830_vm0 = vcmask 1044480  }
  0x5f   : > { %s19353_s30 = smul.u32 80, %s26025_s22  ;;  %v19417_v12 = vld [vmem:[%s24898_s1 + $0x64] ss:$8 sps:$4 sm:$0xff]   ;;  %v19419_v14 = vld [vmem:[%s24898_s1 + $0x60] ss:$8 sps:$4 sm:$0xff]   ;;  %vm2282_vm7 = vcmask 1045504  }
  0x60   : > { %1602 = vmatpush1.bf16.msra.mxu0 %v19404_v3  ;;  %v19420_v15 = vld [vmem:[%s24898_s1 + $0x74] ss:$8 sps:$4 sm:$0xff]   ;;  %v19422_v16 = vld [vmem:[%s24898_s1 + $0x70] ss:$8 sps:$4 sm:$0xff]   ;;  %v19423_v17 = vld [vmem:[%s24898_s1 + $0x84] ss:$8 sps:$4 sm:$0xff]  }
  0x61   : > { %1603 = vmatprep.subr.bf16.mxu0 %v19405_v4  ;;  %v19425_v18 = vld [vmem:[%s24898_s1 + $0x80] ss:$8 sps:$4 sm:$0xff]   ;;  %v19426_v19 = vld [vmem:[%s24898_s1 + $0x94] ss:$8 sps:$4 sm:$0xff]   ;;  %v19428_v20 = vld [vmem:[%s24898_s1 + $0x90] ss:$8 sps:$4 sm:$0xff]  }
  0x62   : > { %s20591_s0 = scalar_lea.vmem %s25145_s29, %s19353_s30  ;;  %v19429_v21 = vld [vmem:[%s24898_s1 + $0xa4] ss:$8 sps:$4 sm:$0xff]   ;;  %v19431_v22 = vld [vmem:[%s24898_s1 + $0xa0] ss:$8 sps:$4 sm:$0xff]   ;;  %v19432_v23 = vld [vmem:[%s24898_s1 + $0xb4] ss:$8 sps:$4 sm:$0xff]  }
  0x63   : > { %v19449_v13 = vld [vmem:[%s20591_s0 + $0x4] ss:$40 sps:$4 sm:$0xff]   ;;  %v19434_v24 = vld [vmem:[%s24898_s1 + $0xb0] ss:$8 sps:$4 sm:$0xff]   ;;  %v19437_v26 = vld [vmem:[%s24898_s1 + $0xc0] ss:$8 sps:$4 sm:$0xff]  }
  0x64   : > { %1604 = vmatpush1.bf16.msra.mxu0 %v19407_v5  ;;  %1631 = vmatprep.mubr.bf16.mxu0 %v19449_v13  ;;  %v19435_v25 = vld [vmem:[%s24898_s1 + $0xc4] ss:$8 sps:$4 sm:$0xff]   ;;  %v19438_v27 = vld [vmem:[%s24898_s1 + $0xd4] ss:$8 sps:$4 sm:$0xff]   ;;  %v19440_v28 = vld [vmem:[%s24898_s1 + $0xd0] ss:$8 sps:$4 sm:$0xff]  }
  0x65   : > { %1605 = vmatprep.subr.bf16.mxu0 %v19408_v6  ;;  %v19441_v29 = vld [vmem:[%s24898_s1 + $0xe4] ss:$8 sps:$4 sm:$0xff]   ;;  %v19443_v30 = vld [vmem:[%s24898_s1 + $0xe0] ss:$8 sps:$4 sm:$0xff]   ;;  %v19444_v31 = vld [vmem:[%s24898_s1 + $0xf4] ss:$8 sps:$4 sm:$0xff]  }
  0x66   : > { %v19446_v32 = vld [vmem:[%s24898_s1 + $0xf0] ss:$8 sps:$4 sm:$0xff]   ;;  %v19452_v33 = vld [vmem:[%s24898_s1 + $0x104] ss:$8 sps:$4 sm:$0xff]   ;;  %v19447_v34 = vld [vmem:[%s20591_s0] ss:$40 sps:$4 sm:$0xff]  }
  0x67   : > { %v19450_v35 = vld [vmem:[%s24898_s1 + $0x100] ss:$8 sps:$4 sm:$0xff]   ;;  %v19500_v36 = vld [vmem:[%s20591_s0 + $0xc] ss:$40 sps:$4 sm:$0xff]   ;;  %v19453_v38 = vld [vmem:[%s24898_s1 + $0x110] ss:$8 sps:$4 sm:$0xff]  }
  0x68   : > { %1606 = vmatpush1.bf16.msra.mxu0 %v19410_v7  ;;  %v19455_v37 = vld [vmem:[%s24898_s1 + $0x114] ss:$8 sps:$4 sm:$0xff]   ;;  %v19458_v39 = vld [vmem:[%s24898_s1 + $0x124] ss:$8 sps:$4 sm:$0xff]   ;;  %v19456_v40 = vld [vmem:[%s24898_s1 + $0x120] ss:$8 sps:$4 sm:$0xff]  }
  0x69   : > { %1607 = vmatprep.subr.bf16.mxu0 %v19411_v8  ;;  %v19461_v41 = vld [vmem:[%s24898_s1 + $0x134] ss:$8 sps:$4 sm:$0xff]   ;;  %v19459_v42 = vld [vmem:[%s24898_s1 + $0x130] ss:$8 sps:$4 sm:$0xff]   ;;  %v19464_v43 = vld [vmem:[%s24898_s1 + $0x144] ss:$8 sps:$4 sm:$0xff]  }
  0x6a   : > { %v19462_v44 = vld [vmem:[%s24898_s1 + $0x140] ss:$8 sps:$4 sm:$0xff]   ;;  %v19467_v45 = vld [vmem:[%s24898_s1 + $0x154] ss:$8 sps:$4 sm:$0xff]   ;;  %v19465_v46 = vld [vmem:[%s24898_s1 + $0x150] ss:$8 sps:$4 sm:$0xff]  }
  0x6b   : > { %v19470_v47 = vld [vmem:[%s24898_s1 + $0x164] ss:$8 sps:$4 sm:$0xff]   ;;  %v19468_v48 = vld [vmem:[%s24898_s1 + $0x160] ss:$8 sps:$4 sm:$0xff]   ;;  %v19473_v49 = vld [vmem:[%s24898_s1 + $0x174] ss:$8 sps:$4 sm:$0xff]  }
  0x6c   : > { %1608 = vmatpush1.bf16.msra.mxu0 %v19413_v9  ;;  %v19471_v50 = vld [vmem:[%s24898_s1 + $0x170] ss:$8 sps:$4 sm:$0xff]   ;;  %v19476_v51 = vld [vmem:[%s24898_s1 + $0x184] ss:$8 sps:$4 sm:$0xff]   ;;  %v19474_v52 = vld [vmem:[%s24898_s1 + $0x180] ss:$8 sps:$4 sm:$0xff]  }
  0x6d   : > { %1609 = vmatprep.subr.bf16.mxu0 %v19414_v10  ;;  %v19479_v53 = vld [vmem:[%s24898_s1 + $0x194] ss:$8 sps:$4 sm:$0xff]   ;;  %v19477_v54 = vld [vmem:[%s24898_s1 + $0x190] ss:$8 sps:$4 sm:$0xff]   ;;  %v19482_v55 = vld [vmem:[%s24898_s1 + $0x1a4] ss:$8 sps:$4 sm:$0xff]  }
  0x6e   : > { %v19480_v56 = vld [vmem:[%s24898_s1 + $0x1a0] ss:$8 sps:$4 sm:$0xff]   ;;  %v19485_v57 = vld [vmem:[%s24898_s1 + $0x1b4] ss:$8 sps:$4 sm:$0xff]   ;;  %v19483_v58 = vld [vmem:[%s24898_s1 + $0x1b0] ss:$8 sps:$4 sm:$0xff]  }
  0x6f   : > { %v19488_v59 = vld [vmem:[%s24898_s1 + $0x1c4] ss:$8 sps:$4 sm:$0xff]   ;;  %v19486_v60 = vld [vmem:[%s24898_s1 + $0x1c0] ss:$8 sps:$4 sm:$0xff]   ;;  %v19491_v61 = vld [vmem:[%s24898_s1 + $0x1d4] ss:$8 sps:$4 sm:$0xff]  }
  0x70   : > { %1610 = vmatpush1.bf16.msra.mxu0 %v19416_v11  ;;  %v19489_v62 = vld [vmem:[%s24898_s1 + $0x1d0] ss:$8 sps:$4 sm:$0xff]   ;;  %v19494_v63 = vld [vmem:[%s24898_s1 + $0x1e4] ss:$8 sps:$4 sm:$0xff]   ;;  %v19492_v0 = vld [vmem:[%s24898_s1 + $0x1e0] ss:$8 sps:$4 sm:$0xff]  }
  0x71   : > { %1611 = vmatprep.subr.bf16.mxu0 %v19417_v12  ;;  %v19497_v1 = vld [vmem:[%s24898_s1 + $0x1f4] ss:$8 sps:$4 sm:$0xff]   ;;  %v19495_v2 = vld [vmem:[%s24898_s1 + $0x1f0] ss:$8 sps:$4 sm:$0xff]   ;;  %v19503_v3 = vld [vmem:[%s24898_s1 + $0x204] ss:$8 sps:$4 sm:$0xff]  }
  0x72   : > { %v19498_v4 = vld [vmem:[%s20591_s0 + $0x8] ss:$40 sps:$4 sm:$0xff]   ;;  %v19551_v6 = vld [vmem:[%s20591_s0 + $0x14] ss:$40 sps:$4 sm:$0xff]   ;;  %v19509_v9 = vld [vmem:[%s24898_s1 + $0x224] ss:$8 sps:$4 sm:$0xff]  }
  0x73   : > { %v19501_v5 = vld [vmem:[%s24898_s1 + $0x200] ss:$8 sps:$4 sm:$0xff]   ;;  %v19506_v7 = vld [vmem:[%s24898_s1 + $0x214] ss:$8 sps:$4 sm:$0xff]   ;;  %v19504_v8 = vld [vmem:[%s24898_s1 + $0x210] ss:$8 sps:$4 sm:$0xff]  }
  0x74   : > { %1612 = vmatpush1.bf16.msra.mxu0 %v19419_v14  ;;  %v19507_v10 = vld [vmem:[%s24898_s1 + $0x220] ss:$8 sps:$4 sm:$0xff]   ;;  %v19512_v11 = vld [vmem:[%s24898_s1 + $0x234] ss:$8 sps:$4 sm:$0xff]   ;;  %v19510_v12 = vld [vmem:[%s24898_s1 + $0x230] ss:$8 sps:$4 sm:$0xff]  }
  0x75   : > { %1613 = vmatprep.subr.bf16.mxu0 %v19420_v15  ;;  %v19515_v13 = vld [vmem:[%s24898_s1 + $0x244] ss:$8 sps:$4 sm:$0xff]   ;;  %v19513_v14 = vld [vmem:[%s24898_s1 + $0x240] ss:$8 sps:$4 sm:$0xff]   ;;  %v19518_v15 = vld [vmem:[%s24898_s1 + $0x254] ss:$8 sps:$4 sm:$0xff]  }
  0x76   : > { %vm1965_vm1 = vsmask.f32 7424  ;;  %vm2483_vm9 = vcmask 1043456   ;;  %vm2717_vm10 = vsmask.f32 5376  ;;  %vm2901_vm11 = vcmask 1041408  }
  0x77   : > { %vm3724_vm12 = vcmask 130048   ;;  %s25611_s18 = sld [smem:[#allocation134_spill]]  ;;  %s26021_s12 = sld [smem:[#allocation135_spill]] }
  0x78   : > { %1614 = vmatpush1.bf16.msra.mxu0 %v19422_v16  ;;  %v19516_v16 = vld [vmem:[%s24898_s1 + $0x250] ss:$8 sps:$4 sm:$0xff]   ;;  %s16821_s28 = sshll.u32 %s26025_s22, 10  ;;  %s26022_s30 = sld [smem:[#allocation136_spill]] }
  0x79   : > { %1615 = vmatprep.subr.bf16.mxu0 %v19423_v17  ;;  %v19521_v17 = vld [vmem:[%s24898_s1 + $0x264] ss:$8 sps:$4 sm:$0xff]  }
  0x7c   : > { %1616 = vmatpush1.bf16.msra.mxu0 %v19425_v18  ;;  %v19519_v18 = vld [vmem:[%s24898_s1 + $0x260] ss:$8 sps:$4 sm:$0xff]  }
  0x7d   : > { %1617 = vmatprep.subr.bf16.mxu0 %v19426_v19  ;;  %v19524_v19 = vld [vmem:[%s24898_s1 + $0x274] ss:$8 sps:$4 sm:$0xff]  }
  0x7e   : > { %s24764_s14 = scalar_lea.vmem %s26022_s30, %s16821_s28 }
  0x80   : > { %1618 = vmatpush1.bf16.msra.mxu0 %v19428_v20  ;;  %v19522_v20 = vld [vmem:[%s24898_s1 + $0x270] ss:$8 sps:$4 sm:$0xff]  }
  0x81   : > { %1619 = vmatprep.subr.bf16.mxu0 %v19429_v21  ;;  %v19527_v21 = vld [vmem:[%s24898_s1 + $0x284] ss:$8 sps:$4 sm:$0xff]  }
  0x84   : > { %1620 = vmatpush1.bf16.msra.mxu0 %v19431_v22  ;;  %v19525_v22 = vld [vmem:[%s24898_s1 + $0x280] ss:$8 sps:$4 sm:$0xff]  }
  0x85   : > { %1621 = vmatprep.subr.bf16.mxu0 %v19432_v23  ;;  %v19530_v23 = vld [vmem:[%s24898_s1 + $0x294] ss:$8 sps:$4 sm:$0xff]  }
  0x88   : > { %1622 = vmatpush1.bf16.msra.mxu0 %v19434_v24  ;;  %v19528_v24 = vld [vmem:[%s24898_s1 + $0x290] ss:$8 sps:$4 sm:$0xff]  }
  0x89   : > { %1623 = vmatprep.subr.bf16.mxu0 %v19435_v25  ;;  %v19533_v25 = vld [vmem:[%s24898_s1 + $0x2a4] ss:$8 sps:$4 sm:$0xff]  }
  0x8c   : > { %1624 = vmatpush1.bf16.msra.mxu0 %v19437_v26  ;;  %v19531_v26 = vld [vmem:[%s24898_s1 + $0x2a0] ss:$8 sps:$4 sm:$0xff]  }
  0x8d   : > { %1625 = vmatprep.subr.bf16.mxu0 %v19438_v27  ;;  %v19536_v27 = vld [vmem:[%s24898_s1 + $0x2b4] ss:$8 sps:$4 sm:$0xff]  }
  0x90   : > { %1626 = vmatpush1.bf16.msra.mxu0 %v19440_v28  ;;  %v19534_v28 = vld [vmem:[%s24898_s1 + $0x2b0] ss:$8 sps:$4 sm:$0xff]  }
  0x91   : > { %1627 = vmatprep.subr.bf16.mxu0 %v19441_v29  ;;  %v19539_v29 = vld [vmem:[%s24898_s1 + $0x2c4] ss:$8 sps:$4 sm:$0xff]  }
  0x94   : > { %1628 = vmatpush1.bf16.msra.mxu0 %v19443_v30  ;;  %v19537_v30 = vld [vmem:[%s24898_s1 + $0x2c0] ss:$8 sps:$4 sm:$0xff]  }
  0x95   : > { %1629 = vmatprep.subr.bf16.mxu0 %v19444_v31  ;;  %v19542_v31 = vld [vmem:[%s24898_s1 + $0x2d4] ss:$8 sps:$4 sm:$0xff]  }
  0x98   : > { %1630 = vmatpush1.bf16.msra.mxu0 %v19446_v32  ;;  %v19540_v32 = vld [vmem:[%s24898_s1 + $0x2d0] ss:$8 sps:$4 sm:$0xff]  }
  0x99   : > { %1642 = vmatprep.subr.bf16.mxu0 %v19452_v33  ;;  %v19545_v33 = vld [vmem:[%s24898_s1 + $0x2e4] ss:$8 sps:$4 sm:$0xff]  }
  0x9b   : > { %1632 = vmatmul.mubr.bf16.vlgmr.msra.gmra.mrb[0].mxu0 %v19447_v34  ;;  %v19543_v34 = vld [vmem:[%s24898_s1 + $0x2e0] ss:$8 sps:$4 sm:$0xff]  }
  0x9c   : > { %1643 = vmatpush1.bf16.msra.mxu0 %v19450_v35  ;;  %1674 = vmatprep.mubr.bf16.mxu0 %v19500_v36  ;;  %v19548_v35 = vld [vmem:[%s24898_s1 + $0x2f4] ss:$8 sps:$4 sm:$0xff]   ;;  %v19546_v36 = vld [vmem:[%s24898_s1 + $0x2f0] ss:$8 sps:$4 sm:$0xff]  }
  0x9d   : > { %1644 = vmatprep.subr.bf16.mxu0 %v19455_v37  ;;  %v19554_v37 = vld [vmem:[%s24898_s1 + $0x304] ss:$8 sps:$4 sm:$0xff]  }
  0xa0   : > { %1645 = vmatpush1.bf16.msra.mxu0 %v19453_v38  ;;  %v19549_v38 = vld [vmem:[%s20591_s0 + $0x10] ss:$40 sps:$4 sm:$0xff]  }
  0xa1   : > { %1646 = vmatprep.subr.bf16.mxu0 %v19458_v39  ;;  %v19552_v39 = vld [vmem:[%s24898_s1 + $0x300] ss:$8 sps:$4 sm:$0xff]  }
  0xa4   : > { %1647 = vmatpush1.bf16.msra.mxu0 %v19456_v40  ;;  %v19557_v40 = vld [vmem:[%s24898_s1 + $0x314] ss:$8 sps:$4 sm:$0xff]  }
  0xa5   : > { %1648 = vmatprep.subr.bf16.mxu0 %v19461_v41  ;;  %v19602_v41 = vld [vmem:[%s20591_s0 + $0x1c] ss:$40 sps:$4 sm:$0xff]  }
  0xa8   : > { %1649 = vmatpush1.bf16.msra.mxu0 %v19459_v42  ;;  %v19555_v42 = vld [vmem:[%s24898_s1 + $0x310] ss:$8 sps:$4 sm:$0xff]  }
  0xa9   : > { %1650 = vmatprep.subr.bf16.mxu0 %v19464_v43  ;;  %v19560_v43 = vld [vmem:[%s24898_s1 + $0x324] ss:$8 sps:$4 sm:$0xff]  }
  0xac   : > { %1651 = vmatpush1.bf16.msra.mxu0 %v19462_v44  ;;  %v19654_v44 = vld [vmem:[%s24900_s3 + $0xc0] sm:$0xff]  }
  0xad   : > { %1652 = vmatprep.subr.bf16.mxu0 %v19467_v45  ;;  %v19655_v45 = vld [vmem:[%s24900_s3 + $0x80] sm:$0xff]   ;;  %16822 = vmatprep.subr.bf16.mxu1 %v19654_v44  ;;  %v19656_v44 = vld [vmem:[%s24900_s3 + $0xc8] sm:$0xff]  }
  0xae   : > { %16823 = vmatpush3.bf16.msra.mxu1 %v19655_v45  ;;  %v19657_v45 = vld [vmem:[%s24900_s3 + $0x88] sm:$0xff]  }
  0xaf   : > { %16824 = vmatprep.subr.bf16.mxu1 %v19656_v44 }
  0xb0   : > { %1653 = vmatpush1.bf16.msra.mxu0 %v19465_v46  ;;  %v19558_v46 = vld [vmem:[%s24898_s1 + $0x320] ss:$8 sps:$4 sm:$0xff]  }
  0xb1   : > { %1654 = vmatprep.subr.bf16.mxu0 %v19470_v47  ;;  %v19563_v47 = vld [vmem:[%s24898_s1 + $0x334] ss:$8 sps:$4 sm:$0xff]  }
  0xb2   : > { %16825 = vmatpush3.bf16.msra.mxu1 %v19657_v45  ;;  %v19671_v45 = vld [vmem:[%s24900_s3] sm:$0xff]  }
  0xb4   : > { %1655 = vmatpush1.bf16.msra.mxu0 %v19468_v48  ;;  %v19561_v48 = vld [vmem:[%s24898_s1 + $0x330] ss:$8 sps:$4 sm:$0xff]  }
  0xb5   : > { %1656 = vmatprep.subr.bf16.mxu0 %v19473_v49  ;;  %v19566_v49 = vld [vmem:[%s24898_s1 + $0x344] ss:$8 sps:$4 sm:$0xff]  }
  0xb8   : > { %1657 = vmatpush1.bf16.msra.mxu0 %v19471_v50  ;;  %v19564_v50 = vld [vmem:[%s24898_s1 + $0x340] ss:$8 sps:$4 sm:$0xff]  }
  0xb9   : > { %1658 = vmatprep.subr.bf16.mxu0 %v19476_v51  ;;  %v19569_v51 = vld [vmem:[%s24898_s1 + $0x354] ss:$8 sps:$4 sm:$0xff]  }
  0xbc   : > { %1659 = vmatpush1.bf16.msra.mxu0 %v19474_v52  ;;  %v19567_v52 = vld [vmem:[%s24898_s1 + $0x350] ss:$8 sps:$4 sm:$0xff]  }
  0xbd   : > { %1660 = vmatprep.subr.bf16.mxu0 %v19479_v53  ;;  %v19572_v53 = vld [vmem:[%s24898_s1 + $0x364] ss:$8 sps:$4 sm:$0xff]  }
  0xc0   : > { %1661 = vmatpush1.bf16.msra.mxu0 %v19477_v54  ;;  %v19570_v54 = vld [vmem:[%s24898_s1 + $0x360] ss:$8 sps:$4 sm:$0xff]  }
  0xc1   : > { %1662 = vmatprep.subr.bf16.mxu0 %v19482_v55  ;;  %v19575_v55 = vld [vmem:[%s24898_s1 + $0x374] ss:$8 sps:$4 sm:$0xff]  }
  0xc4   : > { %1663 = vmatpush1.bf16.msra.mxu0 %v19480_v56  ;;  %v19573_v56 = vld [vmem:[%s24898_s1 + $0x370] ss:$8 sps:$4 sm:$0xff]  }
  0xc5   : > { %1664 = vmatprep.subr.bf16.mxu0 %v19485_v57  ;;  %v19578_v57 = vld [vmem:[%s24898_s1 + $0x384] ss:$8 sps:$4 sm:$0xff]  }
  0xc8   : > { %1665 = vmatpush1.bf16.msra.mxu0 %v19483_v58  ;;  %v19576_v58 = vld [vmem:[%s24898_s1 + $0x380] ss:$8 sps:$4 sm:$0xff]  }
  0xc9   : > { %1666 = vmatprep.subr.bf16.mxu0 %v19488_v59  ;;  %v19581_v59 = vld [vmem:[%s24898_s1 + $0x394] ss:$8 sps:$4 sm:$0xff]  }
  0xcc   : > { %1667 = vmatpush1.bf16.msra.mxu0 %v19486_v60  ;;  %v19579_v60 = vld [vmem:[%s24898_s1 + $0x390] ss:$8 sps:$4 sm:$0xff]  }
  0xcd   : > { %1668 = vmatprep.subr.bf16.mxu0 %v19491_v61  ;;  %v19584_v61 = vld [vmem:[%s24898_s1 + $0x3a4] ss:$8 sps:$4 sm:$0xff]  }
  0xd0   : > { %1669 = vmatpush1.bf16.msra.mxu0 %v19489_v62  ;;  %v19582_v62 = vld [vmem:[%s24898_s1 + $0x3a0] ss:$8 sps:$4 sm:$0xff]  }
  0xd1   : > { %1670 = vmatprep.subr.bf16.mxu0 %v19494_v63  ;;  %v19587_v63 = vld [vmem:[%s24898_s1 + $0x3b4] ss:$8 sps:$4 sm:$0xff]  }
  0xd4   : > { %1671 = vmatpush1.bf16.msra.mxu0 %v19492_v0  ;;  %v19585_v0 = vld [vmem:[%s24898_s1 + $0x3b0] ss:$8 sps:$4 sm:$0xff]  }
  0xd5   : > { %1672 = vmatprep.subr.bf16.mxu0 %v19497_v1  ;;  %v19590_v1 = vld [vmem:[%s24898_s1 + $0x3c4] ss:$8 sps:$4 sm:$0xff]  }
  0xd8   : > { %1673 = vmatpush1.bf16.msra.mxu0 %v19495_v2  ;;  %v19588_v2 = vld [vmem:[%s24898_s1 + $0x3c0] ss:$8 sps:$4 sm:$0xff]  }
  0xd9   : > { %1685 = vmatprep.subr.bf16.mxu0 %v19503_v3  ;;  %v19593_v3 = vld [vmem:[%s24898_s1 + $0x3d4] ss:$8 sps:$4 sm:$0xff]  }
  0xdb   : > { %1675 = vmatmul.mubr.bf16.vlgmr.msra.gmra.mrb[0].mxu0 %v19498_v4  ;;  %v19591_v4 = vld [vmem:[%s24898_s1 + $0x3d0] ss:$8 sps:$4 sm:$0xff]  }
  0xdc   : > { %1686 = vmatpush1.bf16.msra.mxu0 %v19501_v5  ;;  %1717 = vmatprep.mubr.bf16.mxu0 %v19551_v6  ;;  %v19596_v5 = vld [vmem:[%s24898_s1 + $0x3e4] ss:$8 sps:$4 sm:$0xff]   ;;  %v19594_v6 = vld [vmem:[%s24898_s1 + $0x3e0] ss:$8 sps:$4 sm:$0xff]  }
  0xdd   : > { %1687 = vmatprep.subr.bf16.mxu0 %v19506_v7  ;;  %v19599_v7 = vld [vmem:[%s24898_s1 + $0x3f4] ss:$8 sps:$4 sm:$0xff]  }
  0xe0   : > { %1688 = vmatpush1.bf16.msra.mxu0 %v19504_v8  ;;  %v19597_v8 = vld [vmem:[%s24898_s1 + $0x3f0] ss:$8 sps:$4 sm:$0xff]  }
  0xe1   : > { %1689 = vmatprep.subr.bf16.mxu0 %v19509_v9  ;;  %v19605_v9 = vld [vmem:[%s24898_s1 + $0x404] ss:$8 sps:$4 sm:$0xff]  }
  0xe4   : > { %1690 = vmatpush1.bf16.msra.mxu0 %v19507_v10  ;;  %v19600_v10 = vld [vmem:[%s20591_s0 + $0x18] ss:$40 sps:$4 sm:$0xff]  }
  0xe5   : > { %1691 = vmatprep.subr.bf16.mxu0 %v19512_v11  ;;  %v19603_v11 = vld [vmem:[%s24898_s1 + $0x400] ss:$8 sps:$4 sm:$0xff]  }
  0xe8   : > { %1692 = vmatpush1.bf16.msra.mxu0 %v19510_v12  ;;  %v19653_v12 = vld [vmem:[%s20591_s0 + $0x24] ss:$40 sps:$4 sm:$0xff]  }
  0xe9   : > { %1693 = vmatprep.subr.bf16.mxu0 %v19515_v13  ;;  %v19608_v13 = vld [vmem:[%s24898_s1 + $0x414] ss:$8 sps:$4 sm:$0xff]  }
  0xec   : > { %1694 = vmatpush1.bf16.msra.mxu0 %v19513_v14  ;;  %v19606_v14 = vld [vmem:[%s24898_s1 + $0x410] ss:$8 sps:$4 sm:$0xff]  }
  0xed   : > { %1695 = vmatprep.subr.bf16.mxu0 %v19518_v15  ;;  %v19611_v15 = vld [vmem:[%s24898_s1 + $0x424] ss:$8 sps:$4 sm:$0xff]  }
  0xf0   : > { %1696 = vmatpush1.bf16.msra.mxu0 %v19516_v16  ;;  %v19609_v16 = vld [vmem:[%s24898_s1 + $0x420] ss:$8 sps:$4 sm:$0xff]  }
  0xf1   : > { %1697 = vmatprep.subr.bf16.mxu0 %v19521_v17  ;;  %v19614_v17 = vld [vmem:[%s24898_s1 + $0x434] ss:$8 sps:$4 sm:$0xff]  }
  0xf4   : > { %1698 = vmatpush1.bf16.msra.mxu0 %v19519_v18  ;;  %v19612_v18 = vld [vmem:[%s24898_s1 + $0x430] ss:$8 sps:$4 sm:$0xff]  }
  0xf5   : > { %1699 = vmatprep.subr.bf16.mxu0 %v19524_v19  ;;  %v19617_v19 = vld [vmem:[%s24898_s1 + $0x444] ss:$8 sps:$4 sm:$0xff]  }
  0xf8   : > { %1700 = vmatpush1.bf16.msra.mxu0 %v19522_v20  ;;  %v19615_v20 = vld [vmem:[%s24898_s1 + $0x440] ss:$8 sps:$4 sm:$0xff]  }
  0xf9   : > { %1701 = vmatprep.subr.bf16.mxu0 %v19527_v21  ;;  %v19620_v21 = vld [vmem:[%s24898_s1 + $0x454] ss:$8 sps:$4 sm:$0xff]  }
  0xfc   : > { %1702 = vmatpush1.bf16.msra.mxu0 %v19525_v22  ;;  %v19618_v22 = vld [vmem:[%s24898_s1 + $0x450] ss:$8 sps:$4 sm:$0xff]  }
  0xfd   : > { %1703 = vmatprep.subr.bf16.mxu0 %v19530_v23  ;;  %v19623_v23 = vld [vmem:[%s24898_s1 + $0x464] ss:$8 sps:$4 sm:$0xff]  }
 0x100   : > { %1704 = vmatpush1.bf16.msra.mxu0 %v19528_v24  ;;  %v19621_v24 = vld [vmem:[%s24898_s1 + $0x460] ss:$8 sps:$4 sm:$0xff]  }
 0x101   : > { %1705 = vmatprep.subr.bf16.mxu0 %v19533_v25  ;;  %v19626_v25 = vld [vmem:[%s24898_s1 + $0x474] ss:$8 sps:$4 sm:$0xff]  }
 0x104   : > { %1706 = vmatpush1.bf16.msra.mxu0 %v19531_v26  ;;  %v19624_v26 = vld [vmem:[%s24898_s1 + $0x470] ss:$8 sps:$4 sm:$0xff]  }
 0x105   : > { %1707 = vmatprep.subr.bf16.mxu0 %v19536_v27  ;;  %v19629_v27 = vld [vmem:[%s24898_s1 + $0x484] ss:$8 sps:$4 sm:$0xff]  }
 0x108   : > { %1708 = vmatpush1.bf16.msra.mxu0 %v19534_v28  ;;  %v19627_v28 = vld [vmem:[%s24898_s1 + $0x480] ss:$8 sps:$4 sm:$0xff]  }
 0x109   : > { %1709 = vmatprep.subr.bf16.mxu0 %v19539_v29  ;;  %v19632_v29 = vld [vmem:[%s24898_s1 + $0x494] ss:$8 sps:$4 sm:$0xff]  }
 0x10c   : > { %1710 = vmatpush1.bf16.msra.mxu0 %v19537_v30  ;;  %v19630_v30 = vld [vmem:[%s24898_s1 + $0x490] ss:$8 sps:$4 sm:$0xff]  }
 0x10d   : > { %1711 = vmatprep.subr.bf16.mxu0 %v19542_v31  ;;  %v19635_v31 = vld [vmem:[%s24898_s1 + $0x4a4] ss:$8 sps:$4 sm:$0xff]  }
 0x110   : > { %1712 = vmatpush1.bf16.msra.mxu0 %v19540_v32  ;;  %v19633_v32 = vld [vmem:[%s24898_s1 + $0x4a0] ss:$8 sps:$4 sm:$0xff]  }
 0x111   : > { %1713 = vmatprep.subr.bf16.mxu0 %v19545_v33  ;;  %v19638_v33 = vld [vmem:[%s24898_s1 + $0x4b4] ss:$8 sps:$4 sm:$0xff]  }
 0x114   : > { %1714 = vmatpush1.bf16.msra.mxu0 %v19543_v34  ;;  %v19636_v34 = vld [vmem:[%s24898_s1 + $0x4b0] ss:$8 sps:$4 sm:$0xff]  }
 0x115   : > { %1715 = vmatprep.subr.bf16.mxu0 %v19548_v35  ;;  %v19641_v35 = vld [vmem:[%s24898_s1 + $0x4c4] ss:$8 sps:$4 sm:$0xff]  }
 0x118   : > { %1716 = vmatpush1.bf16.msra.mxu0 %v19546_v36  ;;  %v19639_v36 = vld [vmem:[%s24898_s1 + $0x4c0] ss:$8 sps:$4 sm:$0xff]  }
 0x119   : > { %1728 = vmatprep.subr.bf16.mxu0 %v19554_v37  ;;  %v19644_v37 = vld [vmem:[%s24898_s1 + $0x4d4] ss:$8 sps:$4 sm:$0xff]  }
 0x11b   : > { %1718 = vmatmul.mubr.bf16.vlgmr.msra.gmra.mrb[0].mxu0 %v19549_v38  ;;  %v19642_v38 = vld [vmem:[%s24898_s1 + $0x4d0] ss:$8 sps:$4 sm:$0xff]  }
 0x11c   : > { %1729 = vmatpush1.bf16.msra.mxu0 %v19552_v39  ;;  %1760 = vmatprep.mubr.bf16.mxu0 %v19602_v41  ;;  %v19647_v39 = vld [vmem:[%s24898_s1 + $0x4e4] ss:$8 sps:$4 sm:$0xff]   ;;  %v19650_v41 = vld [vmem:[%s24898_s1 + $0x4f4] ss:$8 sps:$4 sm:$0xff]  }
 0x11d   : > { %1730 = vmatprep.subr.bf16.mxu0 %v19557_v40  ;;  %v19645_v40 = vld [vmem:[%s24898_s1 + $0x4e0] ss:$8 sps:$4 sm:$0xff]  }
 0x120   : > { %1731 = vmatpush1.bf16.msra.mxu0 %v19555_v42  ;;  %v19648_v42 = vld [vmem:[%s24898_s1 + $0x4f0] ss:$8 sps:$4 sm:$0xff]  }
 0x121   : > { %1732 = vmatprep.subr.bf16.mxu0 %v19560_v43  ;;  %v19651_v43 = vld [vmem:[%s20591_s0 + $0x20] ss:$40 sps:$4 sm:$0xff]  }
 0x124   : > { %1733 = vmatpush1.bf16.msra.mxu0 %v19558_v46  ;;  %v19658_v46 = vld [vmem:[%s24900_s3 + $0xd0] sm:$0xff]  }
 0x125   : > { %1734 = vmatprep.subr.bf16.mxu0 %v19563_v47  ;;  %v19659_v47 = vld [vmem:[%s24900_s3 + $0x90] sm:$0xff]   ;;  %16826 = vmatprep.subr.bf16.mxu1 %v19658_v46 }
 0x126   : > { %16827 = vmatpush3.bf16.msra.mxu1 %v19659_v47  ;;  %v19772_v47 = vld [vmem:[%s24900_s3 + $0x3d8] sm:$0xff]  }
 0x128   : > { %1735 = vmatpush1.bf16.msra.mxu0 %v19561_v48  ;;  %v19660_v48 = vld [vmem:[%s24900_s3 + $0xd8] sm:$0xff]  }
 0x129   : > { %1736 = vmatprep.subr.bf16.mxu0 %v19566_v49  ;;  %v20346_v49 = vmov 0.0   ;;  %16828 = vmatprep.subr.bf16.mxu1 %v19660_v48  ;;  %v19672_v48 = vld [vmem:[%s24900_s3 + $0x48] sm:$0xff]  }
 0x12a   : > { %1818 = vst [vmem:[#allocation2] sm:$0xff] %v20346_v49  ;;  %1819 = vst [vmem:[#allocation2 + $0x8] sm:$0xff] %v20346_v49 }
 0x12b   : > { %1822 = vst [vmem:[#allocation2 + $0x20] sm:$0xff] %v20346_v49  ;;  %1823 = vst [vmem:[#allocation2 + $0x28] sm:$0xff] %v20346_v49 }
 0x12c   : > { %1737 = vmatpush1.bf16.msra.mxu0 %v19564_v50  ;;  %1824 = vst [vmem:[#allocation2 + $0x30] sm:$0x3] %v20346_v49  ;;  %1825 = vst [vmem:[#allocation2 + $0x38] sm:$0x3] %v20346_v49  ;;  %v19661_v50 = vld [vmem:[%s24900_s3 + $0x98] sm:$0xff]  }
 0x12d   : > { %1738 = vmatprep.subr.bf16.mxu0 %v19569_v51  ;;  %3802 = vst [vmem:[#allocation3] sm:$0xff] %v20346_v49  ;;  %3803 = vst [vmem:[#allocation3 + $0x8] sm:$0xff] %v20346_v49  ;;  %16829 = vmatpush3.bf16.msra.mxu1 %v19661_v50  ;;  %v19662_v51 = vld [vmem:[%s24900_s3 + $0xe0] sm:$0xff]  }
 0x12e   : > { %3804 = vst [vmem:[#allocation3 + $0x10] sm:$0xff] %v20346_v49  ;;  %3805 = vst [vmem:[#allocation3 + $0x18] sm:$0xff] %v20346_v49  ;;  %16830 = vmatprep.subr.bf16.mxu1 %v19662_v51  ;;  %v19673_v51 = vld [vmem:[%s24900_s3 + $0x8] sm:$0xff]  }
 0x12f   : > { %3806 = vst [vmem:[#allocation3 + $0x20] sm:$0xff] %v20346_v49  ;;  %3807 = vst [vmem:[#allocation3 + $0x28] sm:$0xff] %v20346_v49 }
 0x130   : > { %1739 = vmatpush1.bf16.msra.mxu0 %v19567_v52  ;;  %3808 = vst [vmem:[#allocation3 + $0x30] sm:$0xff] %v20346_v49  ;;  %3809 = vst [vmem:[#allocation3 + $0x38] sm:$0xff] %v20346_v49  ;;  %v19663_v52 = vld [vmem:[%s24900_s3 + $0xa0] sm:$0xff]  }
 0x131   : > { %1740 = vmatprep.subr.bf16.mxu0 %v19572_v53  ;;  %3810 = vst [vmem:[#allocation3 + $0x40] sm:$0xff] %v20346_v49  ;;  %3811 = vst [vmem:[#allocation3 + $0x48] sm:$0xff] %v20346_v49  ;;  %16831 = vmatpush3.bf16.msra.mxu1 %v19663_v52  ;;  %v19664_v53 = vld [vmem:[%s24900_s3 + $0xe8] sm:$0xff]   ;;  %v19674_v52 = vld [vmem:[%s24900_s3 + $0x50] sm:$0xff]  }
 0x132   : > { %3812 = vst [vmem:[#allocation3 + $0x50] sm:$0x3] %v20346_v49  ;;  %16832 = vmatprep.subr.bf16.mxu1 %v19664_v53  ;;  %v19675_v53 = vld [vmem:[%s24900_s3 + $0x10] sm:$0xff]  }
 0x134   : > { %1741 = vmatpush1.bf16.msra.mxu0 %v19570_v54  ;;  %v19665_v54 = vld [vmem:[%s24900_s3 + $0xa8] sm:$0xff]  }
 0x135   : > { %1742 = vmatprep.subr.bf16.mxu0 %v19575_v55  ;;  %v19666_v55 = vld [vmem:[%s24900_s3 + $0xf0] sm:$0xff]   ;;  %16833 = vmatpush3.bf16.msra.mxu1 %v19665_v54  ;;  %v19676_v54 = vld [vmem:[%s24900_s3 + $0x58] sm:$0xff]  }
 0x136   : > { %16834 = vmatprep.subr.bf16.mxu1 %v19666_v55  ;;  %v19677_v55 = vld [vmem:[%s24900_s3 + $0x18] sm:$0xff]  }
 0x138   : > { %1743 = vmatpush1.bf16.msra.mxu0 %v19573_v56  ;;  %v19667_v56 = vld [vmem:[%s24900_s3 + $0xb0] sm:$0xff]  }
 0x139   : > { %1744 = vmatprep.subr.bf16.mxu0 %v19578_v57  ;;  %v19668_v57 = vld [vmem:[%s24900_s3 + $0xf8] sm:$0xff]   ;;  %16835 = vmatpush3.bf16.msra.mxu1 %v19667_v56  ;;  %v19678_v56 = vld [vmem:[%s24900_s3 + $0x60] sm:$0xff]  }
 0x13a   : > { %16836 = vmatprep.subr.bf16.mxu1 %v19668_v57  ;;  %v19679_v57 = vld [vmem:[%s24900_s3 + $0x20] sm:$0xff]  }
 0x13c   : > { %1745 = vmatpush1.bf16.msra.mxu0 %v19576_v58  ;;  %v19669_v58 = vld [vmem:[%s24900_s3 + $0xb8] sm:$0xff]  }
 0x13d   : > { %1746 = vmatprep.subr.bf16.mxu0 %v19581_v59  ;;  %16837 = vmatpush3.bf16.msra.mxu1 %v19669_v58  ;;  %v19670_v59 = vld [vmem:[%s24900_s3 + $0x40] sm:$0xff]   ;;  %v19680_v58 = vld [vmem:[%s24900_s3 + $0x68] sm:$0xff]  }
 0x13e   : > { %16844 = vmatprep.subr.bf16.mxu1 %v19670_v59  ;;  %v19681_v59 = vld [vmem:[%s24900_s3 + $0x28] sm:$0xff]  }
 0x140   : > { %1747 = vmatpush1.bf16.msra.mxu0 %v19579_v60  ;;  %v739_v60 = vlaneseq }
 0x141   : > { %1748 = vmatprep.subr.bf16.mxu0 %v19584_v61 }
 0x142   : > { %v21098_v61 = vshrl.u32 %v739_v60, 7  ;;  %v19682_v60 = vld [vmem:[%s24900_s3 + $0x70] sm:$0xff]  }
 0x144   : > { %1749 = vmatpush1.bf16.msra.mxu0 %v19582_v62  ;;  %v741_v62 = vsub.s32 0, %v21098_v61 }
 0x145   : > { %1750 = vmatprep.subr.bf16.mxu0 %v19587_v63  ;;  %v737_v63 = vld [vmem:[%s24899_s2] sm:$0x3] }
 0x148   : > { %1751 = vmatpush1.bf16.msra.mxu0 %v19585_v0  ;;  %v745_v0 = vsub.s32 1, %v21098_v61 }
 0x149   : > { %1752 = vmatprep.subr.bf16.mxu0 %v19590_v1  ;;  %v742_v1 = vrot.slane %v737_v63, %v741_v62  ;;  %v19683_v62 = vld [vmem:[%s24900_s3 + $0x30] sm:$0xff]  }
 0x14c   : > { %1753 = vmatpush1.bf16.msra.mxu0 %v19588_v2  ;;  %v746_v2 = vrot.slane %v737_v63, %v745_v0  ;;  %v19684_v0 = vld [vmem:[%s24900_s3 + $0x78] sm:$0xff]  }
 0x14d   : > { %1754 = vmatprep.subr.bf16.mxu0 %v19593_v3 }
 0x150   : > { %1755 = vmatpush1.bf16.msra.mxu0 %v19591_v4 }
 0x151   : > { %1756 = vmatprep.subr.bf16.mxu0 %v19596_v5 }
 0x154   : > { %1757 = vmatpush1.bf16.msra.mxu0 %v19594_v6 }
 0x155   : > { %1758 = vmatprep.subr.bf16.mxu0 %v19599_v7 }
 0x158   : > { %1759 = vmatpush1.bf16.msra.mxu0 %v19597_v8 }
 0x159   : > { %1771 = vmatprep.subr.bf16.mxu0 %v19605_v9 }
 0x15b   : > { %1761 = vmatmul.mubr.bf16.vlgmr.msra.gmra.mrb[0].mxu0 %v19600_v10 }
 0x15c   : > { %1772 = vmatpush1.bf16.msra.mxu0 %v19603_v11  ;;  %1803 = vmatprep.mubr.bf16.mxu0 %v19653_v12 }
 0x15d   : > { %1773 = vmatprep.subr.bf16.mxu0 %v19608_v13 }
 0x160   : > { %1774 = vmatpush1.bf16.msra.mxu0 %v19606_v14 }
 0x161   : > { %1775 = vmatprep.subr.bf16.mxu0 %v19611_v15 }
 0x164   : > { %1776 = vmatpush1.bf16.msra.mxu0 %v19609_v16 }
 0x165   : > { %1777 = vmatprep.subr.bf16.mxu0 %v19614_v17 }
 0x168   : > { %1778 = vmatpush1.bf16.msra.mxu0 %v19612_v18 }
 0x169   : > { %1779 = vmatprep.subr.bf16.mxu0 %v19617_v19 }
 0x16c   : > { %1780 = vmatpush1.bf16.msra.mxu0 %v19615_v20 }
 0x16d   : > { %1781 = vmatprep.subr.bf16.mxu0 %v19620_v21  ;;  %v21112_v21 = vadd.s32 8, %v21098_v61 }
 0x170   : > { %1782 = vmatpush1.bf16.msra.mxu0 %v19618_v22 }
 0x171   : > { %1783 = vmatprep.subr.bf16.mxu0 %v19623_v23 }
 0x174   : > { %1784 = vmatpush1.bf16.msra.mxu0 %v19621_v24 }
 0x175   : > { %1785 = vmatprep.subr.bf16.mxu0 %v19626_v25 }
 0x178   : > { %1786 = vmatpush1.bf16.msra.mxu0 %v19624_v26 }
 0x179   : > { %1787 = vmatprep.subr.bf16.mxu0 %v19629_v27 }
 0x17c   : > { %1788 = vmatpush1.bf16.msra.mxu0 %v19627_v28 }
 0x17d   : > { %1789 = vmatprep.subr.bf16.mxu0 %v19632_v29 }
 0x180   : > { %1790 = vmatpush1.bf16.msra.mxu0 %v19630_v30  ;;  %v1856_v30 = vand.u32 3, %v21098_v61 }
 0x181   : > { %1791 = vmatprep.subr.bf16.mxu0 %v19635_v31  ;;  %v1863_v31 = vand.u32 3, %v21112_v21 }
 0x182   : > { %vm1880_vm2 = vcmp.ge.s32.totalorder %v1856_v30, 1  ;;  %vm2270_vm5 = vcmp.lt.s32.totalorder %v1856_v30, 3 }
 0x183   : > { %vm1881_vm3 = vcmp.ge.s32.totalorder %v1863_v31, 1  ;;  %vm2271_vm6 = vcmp.lt.s32.totalorder %v1863_v31, 3  ;;  %v19700_v31 = vld [vmem:[%s24900_s3 + $0x178] sm:$0xff]  }
 0x184   : > { %1792 = vmatpush1.bf16.msra.mxu0 %v19633_v32  ;;  %vm21122_vm4 = vmpackc.low %vm1881_vm3, %vm1880_vm2 }
 0x185   : > { %1793 = vmatprep.subr.bf16.mxu0 %v19638_v33  ;;  %vm21182_vm8 = vmpackc.low %vm2271_vm6, %vm2270_vm5 }
 0x188   : > { %1794 = vmatpush1.bf16.msra.mxu0 %v19636_v34 }
 0x189   : > { %1795 = vmatprep.subr.bf16.mxu0 %v19641_v35 }
 0x18c   : > { %1796 = vmatpush1.bf16.msra.mxu0 %v19639_v36 }
 0x18d   : > { %1797 = vmatprep.subr.bf16.mxu0 %v19644_v37 }
 0x190   : > { %1798 = vmatpush1.bf16.msra.mxu0 %v19642_v38 }
 0x191   : > { %1799 = vmatprep.subr.bf16.mxu0 %v19647_v39 }
 0x194   : > { %1800 = vmatpush1.bf16.msra.mxu0 %v19645_v40 }
 0x195   : > { %1801 = vmatprep.subr.bf16.mxu0 %v19650_v41 }
 0x198   : > { %1802 = vmatpush1.bf16.msra.mxu0 %v19648_v42 }
 0x19b   : > { %1804 = vmatmul.mubr.bf16.vlgmr.msra.gmra.mrb[0].mxu0 %v19651_v43 }
 0x26e   : > { %v1805_v3 = vpop.f32.mrb[0].mxu0 }
 0x26f   : > { %v18693_v4 = vadd.f32 %v1805_v3, %v742_v1  ;;  %v1807_v5 = vpop.f32.mrb[1].mxu0  ;;  %v19685_v3 = vld [vmem:[%s24900_s3 + $0x38] sm:$0xff]  }
 0x270   : > { %v18694_v6 = vadd.f32 %v1807_v5, %v746_v2  ;;  %v1809_v7 = vpop.f32.mrb[2].mxu0 }
 0x271   : > { %v1814_v8 = vmax.f32 %v18693_v4, 0.0  ;;  %v18695_v9 = vadd.f32 %v1809_v7, %v742_v1  ;;  %v1811_v10 = vpop.f32.mrb[3].mxu0  ;;  %v19686_v4 = vld [vmem:[%s24900_s3 + $0x140] sm:$0xff]  }
 0x272   : > { %v1815_v11 = vmax.f32 %v18694_v6, 0.0  ;;  %v18696_v12 = vadd.f32 %v1811_v10, %v746_v2 }
 0x273   : > { %v1831_v13 = vrot.slane %v1814_v8, 3  ;;  %v1816_v14 = vmax.f32 %v18695_v9, 0.0  ;;  %v19687_v9 = vld [vmem:[%s24900_s3 + $0x100] sm:$0xff]  }
 0x274   : > { %v1832_v15 = vrot.slane %v1815_v11, 3  ;;  %v1817_v16 = vmax.f32 %v18696_v12, 0.0 }
 0x275   : > { %1843 = vst [vmem:[#allocation2] sm:$0xe0] %v1831_v13  ;;  %v1833_v17 = vrot.slane %v1816_v14, 3 }
 0x276   : > { %1844 = vst [vmem:[#allocation2 + $0x8] sm:$0xe0] %v1832_v15  ;;  %v1835_v18 = vrot.slane %v1817_v16, 3  ;;  %v19690_v16 = vld [vmem:[%s24900_s3 + $0x150] sm:$0xff]  }
 0x277   : > { %v21105_v19 = vsel %vm1830_vm0, %v1831_v13, %v1833_v17  ;;  %1847 = vst [vmem:[#allocation2 + $0x20] sm:$0x1f] %v1833_v17  ;;  %v19688_v13 = vld [vmem:[%s24900_s3 + $0x148] sm:$0xff]   ;;  %v19691_v17 = vld [vmem:[%s24900_s3 + $0x110] sm:$0xff]  }
 0x278   : > { %1845 = vst [vmem:[#allocation2 + $0x10] sm:$0xff] %v21105_v19  ;;  %v21108_v20 = vsel %vm1830_vm0, %v1832_v15, %v1835_v18  ;;  %1848 = vst [vmem:[#allocation2 + $0x28] sm:$0x1f] %v1835_v18  ;;  %v19689_v15 = vld [vmem:[%s24900_s3 + $0x108] sm:$0xff]   ;;  %v19692_v18 = vld [vmem:[%s24900_s3 + $0x158] sm:$0xff]  }
 0x279   : > { %1846 = vst [vmem:[#allocation2 + $0x18] sm:$0xff] %v21108_v20  ;;  %v2287_v6 = vrot.slane %v21108_v20, 2 }
 0x27c   : > { %v1924_v22 = vld [vmem:[#allocation2] sm:$0xfe] }
 0x27d   : > { %v1925_v23 = vld [vmem:[#allocation2 + $0x8] sm:$0xfe]  ;;  %v1928_v24 = vpack.c.bf16 %v21105_v19, %v1924_v22  ;;  %v1876_v7 = vld [vmem:[#allocation2] sm:$0xff]  ;;  %v19693_v22 = vld [vmem:[%s24900_s3 + $0x118] sm:$0xff]  }
 0x27e   : > { %v1929_v25 = vpack.c.bf16 %v21108_v20, %v1925_v23  ;;  %v1926_v26 = vld [vmem:[#allocation2 + $0x20] sm:$0x1]  ;;  %v1877_v44 = vld [vmem:[#allocation2 + $0x8] sm:$0xff]  ;;  %v15528_v10 = vpack.c.bf16 %v21105_v19, %v1876_v7  ;;  %v2475_v7 = vld [vmem:[#allocation2] sm:$0xf0] }
 0x27f   : > { %v1927_v27 = vld [vmem:[#allocation2 + $0x28] sm:$0x1]  ;;  %v1930_v28 = vpack.c.bf16 %v1926_v26, %v1926_v26  ;;  %v1969_v29 = vshll.u32 %v1928_v24, 16  ;;  %v1967_v34 = vshrl.u32 %v1928_v24, 16  ;;  %v15525_v50 = vpack.c.bf16 %v21108_v20, %v1877_v44  ;;  %v2267_v1 = vld [vmem:[#allocation2 + $0x8] sm:$0xfc] }
 0x280   : > { %v1931_v32 = vpack.c.bf16 %v1927_v27, %v1927_v27  ;;  %v1981_v33 = vshll.u32 %v1929_v25, 16  ;;  %v1979_v37 = vshrl.u32 %v1929_v25, 16  ;;  %v2269_v63 = vld [vmem:[#allocation2 + $0x28] sm:$0x3]  ;;  %v2286_v5 = vrot.slane %v2267_v1, 2  ;;  %v19694_v23 = vld [vmem:[%s24900_s3 + $0x160] sm:$0xff]  }
 0x281   : > { %v1971_v35 = vrot.slane %v1969_v29, 1  ;;  %v1974_v36 = vshll.u32 %v1930_v28, 16  ;;  %v2291_v2 = vrot.slane %v2269_v63, 2  ;;  %v19695_v24 = vld [vmem:[%s24900_s3 + $0x120] sm:$0xff]   ;;  %v19696_v25 = vld [vmem:[%s24900_s3 + $0x168] sm:$0xff]   ;;  %v19698_v27 = vld [vmem:[%s24900_s3 + $0x170] sm:$0xff]  }
 0x282   : > { %v1983_v38 = vrot.slane %v1981_v33, 1  ;;  %v1986_v39 = vshll.u32 %v1931_v32, 16  ;;  %v2288_v11 = vsel %vm2282_vm7, %v2286_v5, %v2287_v6  ;;  %v19697_v26 = vld [vmem:[%s24900_s3 + $0x128] sm:$0xff]   ;;  %v2268_v28 = vld [vmem:[#allocation2 + $0x20] sm:$0x3]  ;;  %v19699_v29 = vld [vmem:[%s24900_s3 + $0x130] sm:$0xff]  }
 0x283   : > { %v1972_v40 = vor.u32 %v1971_v35, %v1967_v34  ;;  %v1976_v41 = vrot.slane %v1974_v36, 1  ;;  %v2292_v8 = vsel %vm2282_vm7, %v2287_v6, %v2291_v2  ;;  %v2478_v30 = vld [vmem:[#allocation2 + $0x28] sm:$0xf]  ;;  %v2266_v32 = vld [vmem:[#allocation2] sm:$0xfc]  ;;  %v2289_v33 = vrot.slane %v2268_v28, 2 }
 0x284   : > { %v1984_v42 = vor.u32 %v1983_v38, %v1979_v37  ;;  %v1988_v43 = vrot.slane %v1986_v39, 1  ;;  %v15579_v14 = vpack.c.bf16 %v2292_v8, %v2288_v11  ;;  %v2476_v34 = vld [vmem:[#allocation2 + $0x8] sm:$0xf0]  ;;  %v2492_v35 = vrot.slane %v2478_v30, 4  ;;  %v19701_v36 = vld [vmem:[%s24900_s3 + $0x138] sm:$0xff]   ;;  %v19702_v39 = vld [vmem:[%s24900_s3 + $0x1c0] sm:$0xff]  }
 0x285   : > { %v1977_v49 = vsel %vm1965_vm1, %v1972_v40, %v1976_v41  ;;  %v2283_v37 = vrot.slane %v2266_v32, 2  ;;  %v2284_v38 = vrot.slane %v21105_v19, 2  ;;  %v2487_v40 = vrot.slane %v2476_v34, 4  ;;  %v19713_v63 = vld [vmem:[%s24900_s3 + $0x1a8] sm:$0xff]   ;;  %v2477_v2 = vld [vmem:[#allocation2 + $0x20] sm:$0xf] }
 0x286   : > { %v1989_v46 = vsel %vm1965_vm1, %v1984_v42, %v1988_v43  ;;  %v2488_v41 = vrot.slane %v21108_v20, 4  ;;  %v19715_v5 = vld [vmem:[%s24900_s3 + $0x1b0] sm:$0xff]   ;;  %v19716_v6 = vld [vmem:[%s24900_s3 + $0x1f8] sm:$0xff]  }
 0x287   : > { %2120 = vmatprep.mubr.bf16.mxu1 %v1989_v46  ;;  %v2290_v42 = vsel %vm2282_vm7, %v2284_v38, %v2289_v33  ;;  %v2285_v44 = vsel %vm2282_vm7, %v2283_v37, %v2284_v38  ;;  %v19722_v32 = vld [vmem:[%s24900_s3 + $0x250] sm:$0xff]   ;;  %v19724_v34 = vld [vmem:[%s24900_s3 + $0x258] sm:$0xff]   ;;  %v2678_v37 = vld [vmem:[#allocation2 + $0x20] sm:$0x1f] }
 0x288   : > { %2121 = vmatmul.mubr.bf16.vlgmr.msra.gmra.mrb[0].mxu1 %v1977_v49  ;;  %v2493_v43 = vsel %vm2483_vm9, %v2488_v41, %v2492_v35  ;;  %v15582_v46 = vpack.c.bf16 %v2290_v42, %v2285_v44  ;;  %v19704_v49 = vld [vmem:[%s24900_s3 + $0x1c8] sm:$0xff]   ;;  %v19723_v33 = vld [vmem:[%s24900_s3 + $0x210] sm:$0xff]   ;;  %v19725_v35 = vld [vmem:[%s24900_s3 + $0x218] sm:$0xff]  }
 0x289   : > { %16845 = vmatpush3.bf16.msra.mxu1 %v19671_v45  ;;  %15526 = vmatprep.mubr.msk.bf16.mxu1 %vm21122_vm4, %v15525_v50  ;;  %v19703_v45 = vld [vmem:[%s24900_s3 + $0x180] sm:$0xff]   ;;  %v19729_v42 = vld [vmem:[%s24900_s3 + $0x228] sm:$0xff]   ;;  %v19730_v44 = vld [vmem:[%s24900_s3 + $0x270] sm:$0xff]  }
 0x28a   : > { %16846 = vmatprep.subr.bf16.mxu1 %v19672_v48  ;;  %v2489_v48 = vsel %vm2483_vm9, %v2487_v40, %v2488_v41  ;;  %v19727_v38 = vld [vmem:[%s24900_s3 + $0x220] sm:$0xff]   ;;  %v2682_v41 = vpack.c.bf16 %v2678_v37, %v2678_v37 }
 0x28b   : > { %v15633_v50 = vpack.c.bf16 %v2493_v43, %v2489_v48  ;;  %v2676_v40 = vld [vmem:[#allocation2] sm:$0xe0]  ;;  %v19731_v48 = vld [vmem:[%s24900_s3 + $0x230] sm:$0xff]  }
 0x28c   : > { %v2680_v43 = vpack.c.bf16 %v21105_v19, %v2676_v40  ;;  %v19756_v40 = vld [vmem:[%s24900_s3 + $0x358] sm:$0xff]  }
 0x28d   : > { %16847 = vmatpush3.bf16.msra.mxu1 %v19673_v51  ;;  %v19705_v51 = vld [vmem:[%s24900_s3 + $0x188] sm:$0xff]  }
 0x28e   : > { %16848 = vmatprep.subr.bf16.mxu1 %v19674_v52  ;;  %v19706_v52 = vld [vmem:[%s24900_s3 + $0x1d0] sm:$0xff]  }
 0x291   : > { %16849 = vmatpush3.bf16.msra.mxu1 %v19675_v53  ;;  %v19707_v53 = vld [vmem:[%s24900_s3 + $0x190] sm:$0xff]  }
 0x292   : > { %16850 = vmatprep.subr.bf16.mxu1 %v19676_v54  ;;  %v19708_v54 = vld [vmem:[%s24900_s3 + $0x1d8] sm:$0xff]  }
 0x295   : > { %16851 = vmatpush3.bf16.msra.mxu1 %v19677_v55  ;;  %v19709_v55 = vld [vmem:[%s24900_s3 + $0x198] sm:$0xff]  }
 0x296   : > { %16852 = vmatprep.subr.bf16.mxu1 %v19678_v56  ;;  %v19710_v56 = vld [vmem:[%s24900_s3 + $0x1e0] sm:$0xff]  }
 0x299   : > { %16853 = vmatpush3.bf16.msra.mxu1 %v19679_v57  ;;  %v19711_v57 = vld [vmem:[%s24900_s3 + $0x1a0] sm:$0xff]  }
 0x29a   : > { %16854 = vmatprep.subr.bf16.mxu1 %v19680_v58  ;;  %v2679_v58 = vld [vmem:[#allocation2 + $0x28] sm:$0x1f] }
 0x29d   : > { %16855 = vmatpush3.bf16.msra.mxu1 %v19681_v59  ;;  %v19712_v59 = vld [vmem:[%s24900_s3 + $0x1e8] sm:$0xff]  }
 0x29e   : > { %16856 = vmatprep.subr.bf16.mxu1 %v19682_v60  ;;  %v2677_v60 = vld [vmem:[#allocation2 + $0x8] sm:$0xe0] }
 0x29f   : > { %v2681_v1 = vpack.c.bf16 %v21108_v20, %v2677_v60  ;;  %v19734_v60 = vld [vmem:[%s24900_s3 + $0x2c0] sm:$0xff]  }
 0x2a1   : > { %16857 = vmatpush3.bf16.msra.mxu1 %v19683_v62  ;;  %v2683_v62 = vpack.c.bf16 %v2679_v58, %v2679_v58  ;;  %v2736_v8 = vshrl.u32 %v2681_v1, 16 }
 0x2a2   : > { %16858 = vmatprep.subr.bf16.mxu1 %v19684_v0  ;;  %v19714_v0 = vld [vmem:[%s24900_s3 + $0x1f0] sm:$0xff]  }
 0x2a5   : > { %16859 = vmatpush3.bf16.msra.mxu1 %v19685_v3  ;;  %v2744_v3 = vshrl.u32 %v2683_v62, 16 }
 0x2a6   : > { %16866 = vmatprep.subr.bf16.mxu1 %v19686_v4  ;;  %v2747_v4 = vshll.u32 %v2683_v62, 16 }
 0x2a7   : > { %v2746_v11 = vrot.slane %v2744_v3, 2  ;;  %v19735_v3 = vld [vmem:[%s24900_s3 + $0x280] sm:$0xff]  }
 0x2a8   : > { %15529 = vmatmul.mubr.msk.bf16.vlgmr.msra.gmra.mrb[4].mxu1 %vm21122_vm4, %v15528_v10  ;;  %v2490_v10 = vrot.slane %v2477_v2, 4 }
 0x2a9   : > { %16867 = vmatpush3.bf16.msra.mxu1 %v19687_v9  ;;  %15580 = vmatprep.mubr.msk.bf16.mxu1 %vm21182_vm8, %v15579_v14  ;;  %v2739_v9 = vshll.u32 %v2681_v1, 16  ;;  %v19717_v14 = vld [vmem:[%s24900_s3 + $0x1b8] sm:$0xff]  }
 0x2aa   : > { %16868 = vmatprep.subr.bf16.mxu1 %v19688_v13  ;;  %v2749_v13 = vrot.slane %v2747_v4, 3 }
 0x2ad   : > { %16869 = vmatpush3.bf16.msra.mxu1 %v19689_v15  ;;  %v2484_v15 = vrot.slane %v2475_v7, 4 }
 0x2ae   : > { %16870 = vmatprep.subr.bf16.mxu1 %v19690_v16  ;;  %v2485_v16 = vrot.slane %v21105_v19, 4 }
 0x2b1   : > { %16871 = vmatpush3.bf16.msra.mxu1 %v19691_v17  ;;  %v19718_v17 = vld [vmem:[%s24900_s3 + $0x240] sm:$0xff]  }
 0x2b2   : > { %16872 = vmatprep.subr.bf16.mxu1 %v19692_v18  ;;  %v2738_v18 = vrot.slane %v2736_v8, 2  ;;  %v19737_v8 = vld [vmem:[%s24900_s3 + $0x288] sm:$0xff]  }
 0x2b5   : > { %16873 = vmatpush3.bf16.msra.mxu1 %v19693_v22  ;;  %v2741_v22 = vrot.slane %v2739_v9, 3  ;;  %v19738_v9 = vld [vmem:[%s24900_s3 + $0x2d0] sm:$0xff]  }
 0x2b6   : > { %16874 = vmatprep.subr.bf16.mxu1 %v19694_v23  ;;  %v2491_v23 = vsel %vm2483_vm9, %v2485_v16, %v2490_v10  ;;  %v19739_v10 = vld [vmem:[%s24900_s3 + $0x290] sm:$0xff]  }
 0x2b7   : > { %v2742_v28 = vor.u32 %v2741_v22, %v2738_v18  ;;  %v19746_v18 = vld [vmem:[%s24900_s3 + $0x2f0] sm:$0xff]   ;;  %v2895_v22 = vld [vmem:[#allocation2 + $0x20] sm:$0x3f] }
 0x2b9   : > { %16875 = vmatpush3.bf16.msra.mxu1 %v19695_v24  ;;  %v2750_v24 = vor.u32 %v2749_v13, %v2746_v11  ;;  %v19740_v11 = vld [vmem:[%s24900_s3 + $0x2d8] sm:$0xff]  }
 0x2ba   : > { %16876 = vmatprep.subr.bf16.mxu1 %v19696_v25  ;;  %v2486_v25 = vsel %vm2483_vm9, %v2484_v15, %v2485_v16  ;;  %v19741_v13 = vld [vmem:[%s24900_s3 + $0x298] sm:$0xff]   ;;  %v19743_v15 = vld [vmem:[%s24900_s3 + $0x2a0] sm:$0xff]   ;;  %v19744_v16 = vld [vmem:[%s24900_s3 + $0x2e8] sm:$0xff]  }
 0x2bb   : > { %v2751_v30 = vsel %vm2717_vm10, %v2742_v28, %v2750_v24  ;;  %v19748_v24 = vld [vmem:[%s24900_s3 + $0x2f8] sm:$0xff]  }
 0x2bd   : > { %16877 = vmatpush3.bf16.msra.mxu1 %v19697_v26  ;;  %v19719_v26 = vld [vmem:[%s24900_s3 + $0x200] sm:$0xff]  }
 0x2be   : > { %16878 = vmatprep.subr.bf16.mxu1 %v19698_v27  ;;  %v15636_v27 = vpack.c.bf16 %v2491_v23, %v2486_v25  ;;  %v19747_v23 = vld [vmem:[%s24900_s3 + $0x2b0] sm:$0xff]   ;;  %v2893_v25 = vld [vmem:[#allocation2] sm:$0xc0] }
 0x2bf   : > { %v2902_v28 = vrot.slane %v2893_v25, 6  ;;  %v19779_v25 = vld [vmem:[%s24900_s3 + $0x3b0] sm:$0xff]  }
 0x2c1   : > { %16879 = vmatpush3.bf16.msra.mxu1 %v19699_v29  ;;  %v19720_v29 = vld [vmem:[%s24900_s3 + $0x248] sm:$0xff]  }
 0x2c2   : > { %16880 = vmatprep.subr.bf16.mxu1 %v19700_v31  ;;  %v19721_v31 = vld [vmem:[%s24900_s3 + $0x208] sm:$0xff]  }
 0x2c5   : > { %16881 = vmatpush3.bf16.msra.mxu1 %v19701_v36  ;;  %v19726_v36 = vld [vmem:[%s24900_s3 + $0x260] sm:$0xff]  }
 0x2c6   : > { %16888 = vmatprep.subr.bf16.mxu1 %v19702_v39  ;;  %v19728_v39 = vld [vmem:[%s24900_s3 + $0x268] sm:$0xff]  }
 0x2c8   : > { %15583 = vmatmul.mubr.msk.bf16.vlgmr.msra.gmra.mrb[8].mxu1 %vm21182_vm8, %v15582_v46  ;;  %v2730_v46 = vshll.u32 %v2682_v41, 16 }
 0x2c9   : > { %16889 = vmatpush3.bf16.msra.mxu1 %v19703_v45  ;;  %15634 = vmatprep.mubr.msk.bf16.mxu1 %vm21122_vm4, %v15633_v50  ;;  %v2727_v45 = vshrl.u32 %v2682_v41, 16  ;;  %v2722_v50 = vshll.u32 %v2680_v43, 16  ;;  %v19757_v41 = vld [vmem:[%s24900_s3 + $0x318] sm:$0xff]  }
 0x2ca   : > { %16890 = vmatprep.subr.bf16.mxu1 %v19704_v49  ;;  %v2719_v49 = vshrl.u32 %v2680_v43, 16  ;;  %v19759_v43 = vld [vmem:[%s24900_s3 + $0x320] sm:$0xff]  }
 0x2cc   : > { %v2721_v58 = vrot.slane %v2719_v49, 2  ;;  %v3279_v49 = vld [vmem:[#allocation2 + $0x38] sm:$0x1] }
 0x2cd   : > { %16891 = vmatpush3.bf16.msra.mxu1 %v19705_v51  ;;  %v2896_v51 = vld [vmem:[#allocation2 + $0x28] sm:$0x3f] }
 0x2ce   : > { %16892 = vmatprep.subr.bf16.mxu1 %v19706_v52  ;;  %v19732_v52 = vld [vmem:[%s24900_s3 + $0x278] sm:$0xff]  }
 0x2d1   : > { %16893 = vmatpush3.bf16.msra.mxu1 %v19707_v53  ;;  %v2729_v53 = vrot.slane %v2727_v45, 2  ;;  %v19760_v45 = vld [vmem:[%s24900_s3 + $0x368] sm:$0xff]  }
 0x2d2   : > { %16894 = vmatprep.subr.bf16.mxu1 %v19708_v54  ;;  %v2732_v54 = vrot.slane %v2730_v46, 3 }
 0x2d5   : > { %16895 = vmatpush3.bf16.msra.mxu1 %v19709_v55  ;;  %v2894_v55 = vld [vmem:[#allocation2 + $0x8] sm:$0xc0] }
 0x2d6   : > { %16896 = vmatprep.subr.bf16.mxu1 %v19710_v56  ;;  %v2910_v56 = vrot.slane %v2896_v51, 6  ;;  %v2905_v62 = vrot.slane %v2894_v55, 6  ;;  %v3283_v51 = vpack.c.bf16 %v3279_v49, %v3279_v49  ;;  %v19787_v49 = vld [vmem:[%s24900_s3 + $0x410] sm:$0xff]  }
 0x2d9   : > { %16897 = vmatpush3.bf16.msra.mxu1 %v19711_v57  ;;  %v19733_v57 = vld [vmem:[%s24900_s3 + $0x238] sm:$0xff]  }
 0x2da   : > { %16898 = vmatprep.subr.bf16.mxu1 %v19712_v59  ;;  %v2724_v59 = vrot.slane %v2722_v50, 3  ;;  %v19762_v50 = vld [vmem:[%s24900_s3 + $0x370] sm:$0xff]  }
 0x2dc   : > { %v2725_v2 = vor.u32 %v2724_v59, %v2721_v58  ;;  %v19766_v58 = vld [vmem:[%s24900_s3 + $0x3c0] sm:$0xff]  }
 0x2dd   : > { %16899 = vmatpush3.bf16.msra.mxu1 %v19713_v63  ;;  %v2906_v63 = vrot.slane %v21108_v20, 6 }
 0x2de   : > { %16900 = vmatprep.subr.bf16.mxu1 %v19714_v0  ;;  %v2733_v0 = vor.u32 %v2732_v54, %v2729_v53  ;;  %v19763_v53 = vld [vmem:[%s24900_s3 + $0x330] sm:$0xff]   ;;  %v19764_v54 = vld [vmem:[%s24900_s3 + $0x378] sm:$0xff]  }
 0x2df   : > { %v2911_v1 = vsel %vm2901_vm11, %v2906_v63, %v2910_v56  ;;  %v2907_v4 = vsel %vm2901_vm11, %v2905_v62, %v2906_v63  ;;  %v3337_v56 = vshll.u32 %v3283_v51, 16  ;;  %v19789_v51 = vld [vmem:[%s24900_s3 + $0x418] sm:$0xff]  }
 0x2e0   : > { %v15735_v7 = vpack.c.bf16 %v2911_v1, %v2907_v4  ;;  %v19769_v4 = vld [vmem:[%s24900_s3 + $0x388] sm:$0xff]  }
 0x2e1   : > { %16901 = vmatpush3.bf16.msra.mxu1 %v19715_v5  ;;  %v19736_v5 = vld [vmem:[%s24900_s3 + $0x2c8] sm:$0xff]   ;;  %v3339_v63 = vrot.slane %v3337_v56, 1  ;;  %v19794_v56 = vld [vmem:[%s24900_s3 + $0x470] sm:$0xff]  }
 0x2e2   : > { %16902 = vmatprep.subr.bf16.mxu1 %v19716_v6  ;;  %v2734_v6 = vsel %vm2717_vm10, %v2725_v2, %v2733_v0  ;;  %v19767_v0 = vld [vmem:[%s24900_s3 + $0x380] sm:$0xff]   ;;  %v19768_v2 = vld [vmem:[%s24900_s3 + $0x3c8] sm:$0xff]  }
 0x2e5   : > { %16903 = vmatpush3.bf16.msra.mxu1 %v19717_v14  ;;  %v19742_v14 = vld [vmem:[%s24900_s3 + $0x2e0] sm:$0xff]  }
 0x2e6   : > { %16910 = vmatprep.subr.bf16.mxu1 %v19718_v17  ;;  %v19745_v17 = vld [vmem:[%s24900_s3 + $0x2a8] sm:$0xff]  }
 0x2e8   : > { %15637 = vmatmul.mubr.msk.bf16.vlgmr.msra.gmra.mrb[12].mxu1 %vm21122_vm4, %v15636_v27  ;;  %v19749_v27 = vld [vmem:[%s24900_s3 + $0x2b8] sm:$0xff]  }
 0x2e9   : > { %16911 = vmatpush3.bf16.msra.mxu1 %v19719_v26  ;;  %2882 = vmatprep.mubr.bf16.mxu1 %v2751_v30  ;;  %v2908_v26 = vrot.slane %v2895_v22, 6  ;;  %v19750_v30 = vld [vmem:[%s24900_s3 + $0x340] sm:$0xff]  }
 0x2ea   : > { %16912 = vmatprep.subr.bf16.mxu1 %v19720_v29  ;;  %v2903_v29 = vrot.slane %v21105_v19, 6 }
 0x2ed   : > { %16913 = vmatpush3.bf16.msra.mxu1 %v19721_v31  ;;  %v2909_v31 = vsel %vm2901_vm11, %v2903_v29, %v2908_v26  ;;  %v3483_v26 = vld [vmem:[#allocation2 + $0x18] sm:$0xfc] }
 0x2ee   : > { %16914 = vmatprep.subr.bf16.mxu1 %v19722_v32  ;;  %v21405_v32 = vld [vmem:[#allocation2 + $0x28] sm:$0xff] }
 0x2ef   : > { %v15789_v37 = vpack.c.bf16 %v21405_v32, %v21108_v20  ;;  %v19755_v20 = vld [vmem:[%s24900_s3 + $0x310] sm:$0xff]  }
 0x2f1   : > { %16915 = vmatpush3.bf16.msra.mxu1 %v19723_v33  ;;  %v2904_v33 = vsel %vm2901_vm11, %v2902_v28, %v2903_v29  ;;  %v19780_v29 = vld [vmem:[%s24900_s3 + $0x3f8] sm:$0xff]  }
 0x2f2   : > { %16916 = vmatprep.subr.bf16.mxu1 %v19724_v34  ;;  %v19751_v34 = vld [vmem:[%s24900_s3 + $0x300] sm:$0xff]  }
 0x2f5   : > { %16917 = vmatpush3.bf16.msra.mxu1 %v19725_v35  ;;  %v15738_v35 = vpack.c.bf16 %v2909_v31, %v2904_v33 }
 0x2f6   : > { %16918 = vmatprep.subr.bf16.mxu1 %v19726_v36  ;;  %v19752_v36 = vld [vmem:[%s24900_s3 + $0x348] sm:$0xff]  }
 0x2f9   : > { %16919 = vmatpush3.bf16.msra.mxu1 %v19727_v38  ;;  %v19753_v38 = vld [vmem:[%s24900_s3 + $0x308] sm:$0xff]  }
 0x2fa   : > { %16920 = vmatprep.subr.bf16.mxu1 %v19728_v39  ;;  %v19754_v39 = vld [vmem:[%s24900_s3 + $0x350] sm:$0xff]  }
 0x2fd   : > { %16921 = vmatpush3.bf16.msra.mxu1 %v19729_v42  ;;  %v19758_v42 = vld [vmem:[%s24900_s3 + $0x360] sm:$0xff]  }
 0x2fe   : > { %16922 = vmatprep.subr.bf16.mxu1 %v19730_v44  ;;  %v3275_v44 = vld [vmem:[#allocation2 + $0x18] sm:$0xfe] }
 0x2ff   : > { %v3281_v46 = vpack.c.bf16 %v21405_v32, %v3275_v44 }
 0x301   : > { %16923 = vmatpush3.bf16.msra.mxu1 %v19731_v48  ;;  %v19761_v48 = vld [vmem:[%s24900_s3 + $0x328] sm:$0xff]   ;;  %v3330_v59 = vshrl.u32 %v3281_v46, 16 }
 0x302   : > { %16924 = vmatprep.subr.bf16.mxu1 %v19732_v52  ;;  %v3332_v52 = vshll.u32 %v3281_v46, 16  ;;  %v19785_v46 = vld [vmem:[%s24900_s3 + $0x408] sm:$0xff]  }
 0x304   : > { %v3334_v55 = vrot.slane %v3332_v52, 1  ;;  %v19790_v52 = vld [vmem:[%s24900_s3 + $0x460] sm:$0xff]  }
 0x305   : > { %16925 = vmatpush3.bf16.msra.mxu1 %v19733_v57  ;;  %v19765_v57 = vld [vmem:[%s24900_s3 + $0x338] sm:$0xff]  }
 0x306   : > { %16932 = vmatprep.subr.bf16.mxu1 %v19734_v60  ;;  %v21463_v60 = vld [vmem:[#allocation2 + $0x20] sm:$0xff]  ;;  %v3335_v62 = vor.u32 %v3334_v55, %v3330_v59  ;;  %v19793_v55 = vld [vmem:[%s24900_s3 + $0x428] sm:$0xff]  }
 0x307   : > { %v15792_v1 = vpack.c.bf16 %v21463_v60, %v21105_v19  ;;  %v19770_v19 = vld [vmem:[%s24900_s3 + $0x3d0] sm:$0xff]  }
 0x308   : > { %2883 = vmatmul.mubr.bf16.vlgmr.msra.gmra.mrb[16].mxu1 %v2734_v6  ;;  %v19773_v6 = vld [vmem:[%s24900_s3 + $0x398] sm:$0xff]  }
 0x309   : > { %16933 = vmatpush3.bf16.msra.mxu1 %v19735_v3  ;;  %15736 = vmatprep.mubr.msk.bf16.mxu1 %vm21182_vm8, %v15735_v7  ;;  %v3340_v3 = vsel %vm1965_vm1, %v3335_v62, %v3339_v63  ;;  %v19774_v7 = vld [vmem:[%s24900_s3 + $0x3e0] sm:$0xff]   ;;  %v3482_v62 = vld [vmem:[#allocation2 + $0x10] sm:$0xfc] }
 0x30a   : > { %16934 = vmatprep.subr.bf16.mxu1 %v19736_v5  ;;  %v19771_v5 = vld [vmem:[%s24900_s3 + $0x390] sm:$0xff]  }
 0x30d   : > { %16935 = vmatpush3.bf16.msra.mxu1 %v19737_v8  ;;  %v3274_v8 = vld [vmem:[#allocation2 + $0x10] sm:$0xfe] }
 0x30e   : > { %16936 = vmatprep.subr.bf16.mxu1 %v19738_v9  ;;  %v19775_v9 = vld [vmem:[%s24900_s3 + $0x3a0] sm:$0xff]  }
 0x311   : > { %16937 = vmatpush3.bf16.msra.mxu1 %v19739_v10  ;;  %v19776_v10 = vld [vmem:[%s24900_s3 + $0x3e8] sm:$0xff]  }
 0x312   : > { %16938 = vmatprep.subr.bf16.mxu1 %v19740_v11  ;;  %v3280_v11 = vpack.c.bf16 %v21463_v60, %v3274_v8  ;;  %v19797_v8 = vld [vmem:[%s24900_s3 + $0x438] sm:$0xff]  }
 0x315   : > { %16939 = vmatpush3.bf16.msra.mxu1 %v19741_v13  ;;  %v3278_v13 = vld [vmem:[#allocation2 + $0x30] sm:$0x1] }
 0x316   : > { %16940 = vmatprep.subr.bf16.mxu1 %v19742_v14  ;;  %v19777_v14 = vld [vmem:[%s24900_s3 + $0x3a8] sm:$0xff]  }
 0x319   : > { %16941 = vmatpush3.bf16.msra.mxu1 %v19743_v15  ;;  %v19778_v15 = vld [vmem:[%s24900_s3 + $0x3f0] sm:$0xff]  }
 0x31a   : > { %16942 = vmatprep.subr.bf16.mxu1 %v19744_v16 }
 0x31d   : > { %16943 = vmatpush3.bf16.msra.mxu1 %v19745_v17  ;;  %v3282_v17 = vpack.c.bf16 %v3278_v13, %v3278_v13 }
 0x31e   : > { %16944 = vmatprep.subr.bf16.mxu1 %v19746_v18  ;;  %v3320_v18 = vshll.u32 %v3280_v11, 16 }
 0x31f   : > { %v3325_v33 = vshll.u32 %v3282_v17, 16 }
 0x320   : > { %v3322_v31 = vrot.slane %v3320_v18, 1 }
 0x321   : > { %16945 = vmatpush3.bf16.msra.mxu1 %v19747_v23 }
 0x322   : > { %16946 = vmatprep.subr.bf16.mxu1 %v19748_v24 }
 0x325   : > { %16947 = vmatpush3.bf16.msra.mxu1 %v19749_v27  ;;  %v3485_v27 = vld [vmem:[#allocation2 + $0x38] sm:$0x3] }
 0x326   : > { %16954 = vmatprep.subr.bf16.mxu1 %v19750_v30 }
 0x328   : > { %15739 = vmatmul.mubr.msk.bf16.vlgmr.msra.gmra.mrb[20].mxu1 %vm21182_vm8, %v15738_v35  ;;  %v3495_v35 = vrot.slane %v3483_v26, 2 }
 0x329   : > { %16955 = vmatpush3.bf16.msra.mxu1 %v19751_v34  ;;  %15790 = vmatprep.mubr.msk.bf16.mxu1 %vm21122_vm4, %v15789_v37  ;;  %v3496_v34 = vrot.slane %v21405_v32, 2  ;;  %v19781_v37 = vld [vmem:[%s24900_s3 + $0x3b8] sm:$0xff]   ;;  %v19783_v32 = vld [vmem:[%s24900_s3 + $0x400] sm:$0xff]  }
 0x32a   : > { %16956 = vmatprep.subr.bf16.mxu1 %v19752_v36  ;;  %v3500_v36 = vrot.slane %v3485_v27, 2 }
 0x32d   : > { %16957 = vmatpush3.bf16.msra.mxu1 %v19753_v38  ;;  %v3318_v38 = vshrl.u32 %v3280_v11, 16 }
 0x32e   : > { %16958 = vmatprep.subr.bf16.mxu1 %v19754_v39  ;;  %v19782_v39 = vld [vmem:[%s24900_s3 + $0x440] sm:$0xff]  }
 0x331   : > { %16959 = vmatpush3.bf16.msra.mxu1 %v19755_v20  ;;  %v3323_v20 = vor.u32 %v3322_v31, %v3318_v38 }
 0x332   : > { %16960 = vmatprep.subr.bf16.mxu1 %v19756_v40  ;;  %v3327_v40 = vrot.slane %v3325_v33, 1 }
 0x334   : > { %v3328_v44 = vsel %vm1965_vm1, %v3323_v20, %v3327_v40 }
 0x335   : > { %16961 = vmatpush3.bf16.msra.mxu1 %v19757_v41  ;;  %v3497_v41 = vsel %vm2282_vm7, %v3495_v35, %v3496_v34 }
 0x336   : > { %16962 = vmatprep.subr.bf16.mxu1 %v19758_v42  ;;  %v3501_v42 = vsel %vm2282_vm7, %v3496_v34, %v3500_v36 }
 0x339   : > { %16963 = vmatpush3.bf16.msra.mxu1 %v19759_v43  ;;  %v19784_v43 = vld [vmem:[%s24900_s3 + $0x448] sm:$0xff]  }
 0x33a   : > { %16964 = vmatprep.subr.bf16.mxu1 %v19760_v45  ;;  %v15891_v45 = vpack.c.bf16 %v3501_v42, %v3497_v41 }
 0x33d   : > { %16965 = vmatpush3.bf16.msra.mxu1 %v19761_v48  ;;  %v19786_v48 = vld [vmem:[%s24900_s3 + $0x450] sm:$0xff]  }
 0x33e   : > { %16966 = vmatprep.subr.bf16.mxu1 %v19762_v50  ;;  %v19788_v50 = vld [vmem:[%s24900_s3 + $0x458] sm:$0xff]  }
 0x341   : > { %16967 = vmatpush3.bf16.msra.mxu1 %v19763_v53  ;;  %v19791_v53 = vld [vmem:[%s24900_s3 + $0x420] sm:$0xff]  }
 0x342   : > { %16968 = vmatprep.subr.bf16.mxu1 %v19764_v54  ;;  %v19792_v54 = vld [vmem:[%s24900_s3 + $0x468] sm:$0xff]  }
 0x345   : > { %16969 = vmatpush3.bf16.msra.mxu1 %v19765_v57 }
 0x346   : > { %16976 = vmatprep.subr.bf16.mxu1 %v19766_v58  ;;  %v3484_v58 = vld [vmem:[#allocation2 + $0x30] sm:$0x3] }
 0x348   : > { %15793 = vmatmul.mubr.msk.bf16.vlgmr.msra.gmra.mrb[24].mxu1 %vm21122_vm4, %v15792_v1  ;;  %v19795_v1 = vld [vmem:[%s24900_s3 + $0x430] sm:$0xff]  }
 0x349   : > { %16977 = vmatpush3.bf16.msra.mxu1 %v19767_v0  ;;  %3471 = vmatprep.mubr.bf16.mxu1 %v3340_v3  ;;  %v19796_v3 = vld [vmem:[%s24900_s3 + $0x478] sm:$0xff]  }
 0x34a   : > { %16978 = vmatprep.subr.bf16.mxu1 %v19768_v2 }
 0x34d   : > { %16979 = vmatpush3.bf16.msra.mxu1 %v19769_v4  ;;  %v3498_v4 = vrot.slane %v3484_v58, 2 }
 0x34e   : > { %16980 = vmatprep.subr.bf16.mxu1 %v19770_v19  ;;  %v3493_v19 = vrot.slane %v21463_v60, 2 }
 0x351   : > { %16981 = vmatpush3.bf16.msra.mxu1 %v19771_v5 }
 0x352   : > { %16982 = vmatprep.subr.bf16.mxu1 %v19772_v47 }
 0x355   : > { %16983 = vmatpush3.bf16.msra.mxu1 %v19773_v6  ;;  %v3492_v6 = vrot.slane %v3482_v62, 2 }
 0x356   : > { %16984 = vmatprep.subr.bf16.mxu1 %v19774_v7 }
 0x359   : > { %16985 = vmatpush3.bf16.msra.mxu1 %v19775_v9  ;;  %v3494_v9 = vsel %vm2282_vm7, %v3492_v6, %v3493_v19 }
 0x35a   : > { %16986 = vmatprep.subr.bf16.mxu1 %v19776_v10  ;;  %v3499_v10 = vsel %vm2282_vm7, %v3493_v19, %v3498_v4  ;;  %v15896_v19 = vld [vmem:[%s24901_s4] ss:$0 sm:$0xff] }
 0x35b   : > { %v16838_v16 = vpop.f32.mrb[0].mxu1  ;;  %v15894_v11 = vpack.c.bf16 %v3499_v10, %v3494_v9 }
 0x35c   : > { %v16839_v22 = vpop.f32.mrb[1].mxu1 }
 0x35d   : > { %v21507_v23 = vadd.f32 %v16839_v22, %v16838_v16  ;;  %16987 = vmatpush3.bf16.msra.mxu1 %v19777_v14  ;;  %v16841_v24 = vpop.f32.mrb[2].mxu1 }
 0x35e   : > { %v16842_v28 = vpop.f32.mrb[3].mxu1  ;;  %16988 = vmatprep.subr.bf16.mxu1 %v19778_v15 }
 0x35f   : > { %v16843_v30 = vadd.f32 %v16842_v28, %v16841_v24 }
 0x361   : > { %16989 = vmatpush3.bf16.msra.mxu1 %v19779_v25 }
 0x362   : > { %16990 = vmatprep.subr.bf16.mxu1 %v19780_v29 }
 0x365   : > { %16991 = vmatpush3.bf16.msra.mxu1 %v19781_v37 }
 0x366   : > { %16998 = vmatprep.subr.bf16.mxu1 %v19782_v39  ;;  %v19798_v39 = vld [vmem:[%s24902_s5] sm:$0xff]  }
 0x368   : > { %3472 = vmatmul.mubr.bf16.vlgmr.msra.gmra.mrb[28].mxu1 %v3328_v44 }
 0x369   : > { %16999 = vmatpush3.bf16.msra.mxu1 %v19783_v32  ;;  %15892 = vmatprep.mubr.msk.bf16.mxu1 %vm21182_vm8, %v15891_v45 }
 0x36a   : > { %17000 = vmatprep.subr.bf16.mxu1 %v19784_v43 }
 0x36d   : > { %17001 = vmatpush3.bf16.msra.mxu1 %v19785_v46 }
 0x36e   : > { %17002 = vmatprep.subr.bf16.mxu1 %v19786_v48 }
 0x371   : > { %17003 = vmatpush3.bf16.msra.mxu1 %v19787_v49 }
 0x372   : > { %17004 = vmatprep.subr.bf16.mxu1 %v19788_v50 }
 0x375   : > { %17005 = vmatpush3.bf16.msra.mxu1 %v19789_v51 }
 0x376   : > { %17006 = vmatprep.subr.bf16.mxu1 %v19790_v52 }
 0x379   : > { %17007 = vmatpush3.bf16.msra.mxu1 %v19791_v53 }
 0x37a   : > { %17008 = vmatprep.subr.bf16.mxu1 %v19792_v54 }
 0x37b   : > { %v16860_v57 = vpop.f32.mrb[4].mxu1 }
 0x37c   : > { %v16861_v59 = vpop.f32.mrb[5].mxu1 }
 0x37d   : > { %v16862_v63 = vadd.f32 %v16861_v59, %v16860_v57  ;;  %v16863_v0 = vpop.f32.mrb[6].mxu1  ;;  %17009 = vmatpush3.bf16.msra.mxu1 %v19793_v55 }
 0x37e   : > { %v16864_v2 = vpop.f32.mrb[7].mxu1  ;;  %17010 = vmatprep.subr.bf16.mxu1 %v19794_v56 }
 0x37f   : > { %v2260_v5 = vadd.f32 %v16862_v63, %v21507_v23  ;;  %v16865_v47 = vadd.f32 %v16864_v2, %v16863_v0 }
 0x381   : > { %v2263_v7 = vadd.f32 %v16865_v47, %v16843_v30  ;;  %17011 = vmatpush3.bf16.msra.mxu1 %v19795_v1 }
 0x382   : > { %17012 = vmatprep.subr.bf16.mxu1 %v19796_v3 }
 0x385   : > { %17013 = vmatpush3.bf16.msra.mxu1 %v19797_v8 }
 0x388   : > { %15895 = vmatmul.mubr.msk.bf16.vlgmr.msra.gmra.mrb[32].mxu1 %vm21182_vm8, %v15894_v11 }
 0x389   : > { %17569 = vmatprep.mubr.msk.bf16.mxu1 %vm3724_vm12, %v19798_v39  ;;  %v3838_v39 = vand.u32 7, %v21112_v21 }
 0x38b   : > { %vm21667_vm14 = vcmp.ge.s32.totalorder %v3838_v39, 1  ;;  %vm21846_vm9 = vcmp.lt.s32.totalorder %v3838_v39, 7 }
 0x39b   : > { %v16882_v60 = vpop.f32.mrb[8].mxu1 }
 0x39c   : > { %v16883_v13 = vpop.f32.mrb[9].mxu1 }
 0x39d   : > { %v16884_v14 = vadd.f32 %v16883_v13, %v16882_v60  ;;  %v16885_v15 = vpop.f32.mrb[10].mxu1  ;;  %v19802_v13 = vld [vmem:[%s24903_s6 + $0x40] sm:$0xff]  }
 0x39e   : > { %v16886_v16 = vpop.f32.mrb[11].mxu1 }
 0x39f   : > { %v2473_v17 = vadd.f32 %v16884_v14, %v2260_v5  ;;  %v16887_v18 = vadd.f32 %v16886_v16, %v16885_v15  ;;  %v19799_v14 = vld [vmem:[%s24902_s5 + $0x8] sm:$0xff]   ;;  %v19800_v15 = vld [vmem:[%s24902_s5 + $0x10] sm:$0xff]  }
 0x3a0   : > { %v19803_v16 = vld [vmem:[%s24903_s6 + $0x48] sm:$0xff]  }
 0x3a1   : > { %v2474_v22 = vadd.f32 %v16887_v18, %v2263_v7  ;;  %v19801_v18 = vld [vmem:[%s24902_s5 + $0x18] sm:$0xff]  }
 0x3bb   : > { %v16904_v23 = vpop.f32.mrb[12].mxu1 }
 0x3bc   : > { %v16905_v24 = vpop.f32.mrb[13].mxu1 }
 0x3bd   : > { %v16906_v25 = vadd.f32 %v16905_v24, %v16904_v23  ;;  %v16907_v26 = vpop.f32.mrb[14].mxu1  ;;  %v19806_v23 = vld [vmem:[%s24903_s6 + $0x60] sm:$0xff]   ;;  %v19807_v24 = vld [vmem:[%s24903_s6 + $0x68] sm:$0xff]  }
 0x3be   : > { %v16908_v27 = vpop.f32.mrb[15].mxu1 }
 0x3bf   : > { %v2674_v28 = vadd.f32 %v16906_v25, %v2473_v17  ;;  %v16909_v29 = vadd.f32 %v16908_v27, %v16907_v26  ;;  %v19804_v17 = vld [vmem:[%s24903_s6 + $0x50] sm:$0xff]   ;;  %v19809_v26 = vld [vmem:[%s24903_s6 + $0x78] sm:$0xff]   ;;  %v19810_v27 = vld [vmem:[%s24903_s6] sm:$0xff]  }
 0x3c0   : > { %v19808_v25 = vld [vmem:[%s24903_s6 + $0x70] sm:$0xff]  }
 0x3c1   : > { %v2675_v30 = vadd.f32 %v16909_v29, %v2474_v22  ;;  %v19805_v22 = vld [vmem:[%s24903_s6 + $0x58] sm:$0xff]  }
 0x3db   : > { %v16926_v31 = vpop.f32.mrb[16].mxu1 }
 0x3dc   : > { %v16927_v33 = vpop.f32.mrb[17].mxu1 }
 0x3dd   : > { %v16928_v12 = vadd.f32 %v16927_v33, %v16926_v31  ;;  %v16929_v34 = vpop.f32.mrb[18].mxu1 }
 0x3de   : > { %v16930_v35 = vpop.f32.mrb[19].mxu1 }
 0x3df   : > { %v2891_v36 = vadd.f32 %v16928_v12, %v2674_v28  ;;  %v16931_v37 = vadd.f32 %v16930_v35, %v16929_v34  ;;  %v3983_v28 = vld [vmem:[#allocation3 + $0x1] sm:$0xff] }
 0x3e0   : > { %v19823_v34 = vld [vmem:[%s24903_s6 + $0xa8] sm:$0xff]  }
 0x3e1   : > { %v2892_v38 = vadd.f32 %v16931_v37, %v2675_v30  ;;  %v25191_v37 = vmov 0 }
 0x3fb   : > { %v16948_v20 = vpop.f32.mrb[20].mxu1 }
 0x3fc   : > { %v16949_v40 = vpop.f32.mrb[21].mxu1 }
 0x3fd   : > { %v16950_v41 = vadd.f32 %v16949_v40, %v16948_v20  ;;  %v16951_v42 = vpop.f32.mrb[22].mxu1  ;;  %v19812_v40 = vld [vmem:[%s24903_s6 + $0x10] sm:$0xff]  }
 0x3fe   : > { %v16952_v32 = vpop.f32.mrb[23].mxu1 }
 0x3ff   : > { %v3092_v43 = vadd.f32 %v16950_v41, %v2891_v36  ;;  %v16953_v44 = vadd.f32 %v16952_v32, %v16951_v42  ;;  %v19811_v36 = vld [vmem:[%s24903_s6 + $0x8] sm:$0xff]  }
 0x401   : > { %v3093_v45 = vadd.f32 %v16953_v44, %v2892_v38  ;;  %v3831_v38 = vand.u32 7, %v21098_v61 }
 0x403   : > { %vm21661_vm13 = vcmp.ge.s32.totalorder %v3831_v38, 1  ;;  %vm21840_vm8 = vcmp.lt.s32.totalorder %v3831_v38, 7 }
 0x404   : > { %vm21697_vm15 = vmpackc.low %vm21667_vm14, %vm21661_vm13 }
 0x405   : > { %vm21868_vm11 = vmpackc.low %vm21846_vm9, %vm21840_vm8 }
 0x41b   : > { %v16970_v46 = vpop.f32.mrb[24].mxu1 }
 0x41c   : > { %v16971_v48 = vpop.f32.mrb[25].mxu1 }
 0x41d   : > { %v16972_v49 = vadd.f32 %v16971_v48, %v16970_v46  ;;  %v16973_v50 = vpop.f32.mrb[26].mxu1 }
 0x41e   : > { %v16974_v51 = vpop.f32.mrb[27].mxu1 }
 0x41f   : > { %v3272_v52 = vadd.f32 %v16972_v49, %v3092_v43  ;;  %v16975_v53 = vadd.f32 %v16974_v51, %v16973_v50  ;;  %v19857_v51 = vld [vmem:[%s24903_s6 + $0x1b8] sm:$0xff]  }
 0x421   : > { %v3273_v54 = vadd.f32 %v16975_v53, %v3093_v45 }
 0x43b   : > { %v16992_v55 = vpop.f32.mrb[28].mxu1 }
 0x43c   : > { %v16993_v56 = vpop.f32.mrb[29].mxu1 }
 0x43d   : > { %v16994_v57 = vadd.f32 %v16993_v56, %v16992_v55  ;;  %v16995_v58 = vpop.f32.mrb[30].mxu1  ;;  %v19822_v56 = vld [vmem:[%s24903_s6 + $0xa0] sm:$0xff]  }
 0x43e   : > { %v16996_v59 = vpop.f32.mrb[31].mxu1 }
 0x43f   : > { %v3480_v62 = vadd.f32 %v16994_v57, %v3272_v52  ;;  %v16997_v63 = vadd.f32 %v16996_v59, %v16995_v58  ;;  %v19813_v52 = vld [vmem:[%s24903_s6 + $0x18] sm:$0xff]   ;;  %v19814_v58 = vld [vmem:[%s24903_s6 + $0x20] sm:$0xff]  }
 0x440   : > { %v19821_v57 = vld [vmem:[%s24903_s6 + $0x98] sm:$0xff]  }
 0x441   : > { %v3481_v0 = vadd.f32 %v16997_v63, %v3273_v54  ;;  %v21706_v54 = vld [vmem:[#allocation3] sm:$0xff]  ;;  %v19864_v63 = vld [vmem:[%s24903_s6 + $0x1f0] sm:$0xff]  }
 0x45b   : > { %v17014_v1 = vpop.f32.mrb[32].mxu1 }
 0x45c   : > { %v17015_v2 = vpop.f32.mrb[33].mxu1 }
 0x45d   : > { %v17016_v3 = vadd.f32 %v17015_v2, %v17014_v1  ;;  %v17017_v4 = vpop.f32.mrb[34].mxu1 }
 0x45e   : > { %v17018_v5 = vpop.f32.mrb[35].mxu1 }
 0x45f   : > { %v3682_v47 = vadd.f32 %v17016_v3, %v3480_v62  ;;  %v17019_v6 = vadd.f32 %v17018_v5, %v17017_v4  ;;  %v19816_v4 = vld [vmem:[%s24903_s6 + $0x30] sm:$0xff]   ;;  %v21742_v5 = vadd.s32 24, %v21098_v61 }
 0x461   : > { %v3691_v7 = vadd.f32 %v15896_v19, %v3682_v47  ;;  %v3683_v8 = vadd.f32 %v17019_v6, %v3481_v0  ;;  %v19815_v0 = vld [vmem:[%s24903_s6 + $0x28] sm:$0xff]   ;;  %25156 = vst [vmem:[#allocation15_spill] sm:$0xff] %v21742_v5  ;;  %v21745_v47 = vadd.s32 32, %v21098_v61  ;;  %v21748_v6 = vadd.s32 40, %v21098_v61 }
 0x463   : > { %v3692_v9 = vadd.f32 %v15896_v19, %v3683_v8  ;;  %v3693_v10 = vmax.f32 %v3691_v7, 0.0  ;;  %v21739_v19 = vadd.s32 16, %v21098_v61  ;;  %25157 = vst [vmem:[#allocation16_spill] sm:$0xff] %v21745_v47  ;;  %25158 = vst [vmem:[#allocation17_spill] sm:$0xff] %v21748_v6  ;;  %v19817_v7 = vld [vmem:[%s24903_s6 + $0x38] sm:$0xff]  }
 0x465   : > { %v3694_v11 = vmax.f32 %v3692_v9, 0.0  ;;  %v3845_v8 = vand.u32 7, %v21739_v19  ;;  %v3852_v9 = vand.u32 7, %v21742_v5  ;;  %v19831_v5 = vld [vmem:[%s24903_s6 + $0xe8] sm:$0xff]  }
 0x467   : > { %v3703_v60 = vpack.c.bf16 %v3694_v11, %v3693_v10  ;;  %v3859_v10 = vand.u32 7, %v21745_v47  ;;  %v3866_v11 = vand.u32 7, %v21748_v6  ;;  %vm21757_vm0 = vcmp.ge.s32.totalorder %v3845_v8, 1  ;;  %v19830_v47 = vld [vmem:[%s24903_s6 + $0xe0] sm:$0xff]  }
 0x468   : > { %vm21761_vm1 = vcmp.ge.s32.totalorder %v3852_v9, 1 }
 0x469   : > { %17567 = vmatprep.subr.bf16.mxu1 %v3703_v60  ;;  %vm21778_vm2 = vcmp.ge.s32.totalorder %v3859_v10, 1  ;;  %vm21782_vm3 = vcmp.ge.s32.totalorder %v3866_v11, 1  ;;  %vm21792_vm4 = vmpackc.low %vm21761_vm1, %vm21757_vm0 }
 0x46a   : > { %17568 = vmatpush3.bf16.msra.mxu1 %v3703_v60  ;;  %vm21806_vm5 = vmpackc.low %vm21782_vm3, %vm21778_vm2 }
 0x46b   : > { %17577 = vmatprep.subr.bf16.mxu1 %v19802_v13 }
 0x46d   : > { %17570 = vmatmul.mubr.msk.bf16.vlgmr.msra.gmra.mrb[36].mxu1 %vm3724_vm12, %v19799_v14  ;;  %v19818_v14 = vld [vmem:[%s24903_s6 + $0x80] sm:$0xff]  }
 0x46e   : > { %17573 = vmatprep.mubr.msk.bf16.mxu1 %vm3724_vm12, %v19800_v15  ;;  %17578 = vmatpush3.bf16.msra.mxu1 %v19802_v13  ;;  %v21769_v15 = vadd.s32 48, %v21098_v61  ;;  %v19892_v13 = vld [vmem:[#allocation7 + $0x90] sm:$0xff]  }
 0x46f   : > { %17579 = vmatprep.subr.bf16.mxu1 %v19803_v16 }
 0x470   : > { %25163 = vst [vmem:[#allocation18_spill] sm:$0xff] %v21769_v15 }
 0x472   : > { %17580 = vmatpush3.bf16.msra.mxu1 %v19803_v16  ;;  %v21772_v16 = vadd.s32 56, %v21098_v61 }
 0x473   : > { %17581 = vmatprep.subr.bf16.mxu1 %v19804_v17 }
 0x474   : > { %25164 = vst [vmem:[#allocation19_spill] sm:$0xff] %v21772_v16 }
 0x475   : > { %17574 = vmatmul.mubr.msk.bf16.gmra.mrb[40].mxu1 %vm3724_vm12, %v19801_v18  ;;  %vm21893_vm12 = vcmp.lt.s32.totalorder %v3845_v8, 7  ;;  %v19874_v8 = vld [vmem:[#allocation7 + $0x20] sm:$0xff]  }
 0x476   : > { %17582 = vmatpush3.bf16.msra.mxu1 %v19804_v17  ;;  %17793 = vmatprep.subr.bf16.mxu0 %v19874_v8 }
 0x477   : > { %17583 = vmatprep.subr.bf16.mxu1 %v19805_v22  ;;  %17794 = vmatpush3.bf16.msra.mxu0 %v19874_v8 }
 0x47a   : > { %17584 = vmatpush3.bf16.msra.mxu1 %v19805_v22  ;;  %v25165_v22 = vmov 0 }
 0x47b   : > { %17585 = vmatprep.subr.bf16.mxu1 %v19806_v23  ;;  %v25166_v22 = vsel %vm21778_vm2, 4294967295, %v25165_v22 }
 0x47e   : > { %17586 = vmatpush3.bf16.msra.mxu1 %v19806_v23  ;;  %v25167_v23 = vmov 0 }
 0x47f   : > { %17587 = vmatprep.subr.bf16.mxu1 %v19807_v24  ;;  %v25168_v23 = vsel %vm21782_vm3, 4294967295, %v25167_v23 }
 0x482   : > { %17588 = vmatpush3.bf16.msra.mxu1 %v19807_v24 }
 0x483   : > { %17589 = vmatprep.subr.bf16.mxu1 %v19808_v25 }
 0x486   : > { %17590 = vmatpush3.bf16.msra.mxu1 %v19808_v25  ;;  %v19861_v25 = vld [vmem:[%s24903_s6 + $0x1d8] sm:$0xff]  }
 0x487   : > { %17591 = vmatprep.subr.bf16.mxu1 %v19809_v26 }
 0x48a   : > { %17592 = vmatpush3.bf16.msra.mxu1 %v19809_v26 }
 0x48b   : > { %17601 = vmatprep.subr.bf16.mxu1 %v19810_v27 }
 0x540   : > { %v21624_v29 = vpop.f32.mrb[36].mxu1 }
 0x541   : > { %3815 = vst [vmem:[#allocation3 + $0x19] sm:$0xff] %v21624_v29  ;;  %v21627_v30 = vpop.f32.mrb[37].mxu1 }
 0x542   : > { %3813 = vst [vmem:[#allocation3 + $0x9] sm:$0xff] %v21627_v30  ;;  %v21630_v31 = vpop.f32.mrb[38].mxu1  ;;  %v3991_v33 = vpack.c.bf16 %v21627_v30, %v3983_v28  ;;  %v19862_v28 = vld [vmem:[%s24903_s6 + $0x1e0] sm:$0xff]  }
 0x543   : > { %3816 = vst [vmem:[#allocation3 + $0x21] sm:$0xff] %v21630_v31  ;;  %v21634_v12 = vpop.f32.mrb[39].mxu1 }
 0x544   : > { %3814 = vst [vmem:[#allocation3 + $0x11] sm:$0xff] %v21634_v12  ;;  %17593 = vmatprep.mubr.bf16.mxu1 %v3991_v33  ;;  %v21641_v35 = vpack.c.bf16 %v21624_v29, %v21634_v12  ;;  %v19819_v33 = vld [vmem:[%s24903_s6 + $0x88] sm:$0xff]  }
 0x546   : > { %17594 = vmatmul.mubr.bf16.vlgmr.msra.gmra.mrb[44].mxu1 %v21641_v35 }
 0x547   : > { %17602 = vmatpush3.bf16.msra.mxu1 %v19810_v27 }
 0x548   : > { %v21651_v20 = vpop.f32.mrb[40].mxu1  ;;  %17603 = vmatprep.subr.bf16.mxu1 %v19811_v36 }
 0x549   : > { %3819 = vst [vmem:[#allocation3 + $0x39] sm:$0xff] %v21651_v20  ;;  %v21657_v41 = vpop.f32.mrb[41].mxu1  ;;  %v21678_v45 = vld [vmem:[#allocation3 + $0x8] sm:$0xff] }
 0x54a   : > { %3817 = vst [vmem:[#allocation3 + $0x29] sm:$0xff] %v21657_v41  ;;  %v21672_v43 = vpop.f32.mrb[42].mxu1  ;;  %v21676_v44 = vpack.c.bf16 %v21657_v41, %v21630_v31  ;;  %v15938_v55 = vpack.c.bf16 %v21678_v45, %v21706_v54  ;;  %v21720_v59 = vld [vmem:[#allocation3 + $0x1a] sm:$0xff]  ;;  %v4238_v39 = vld [vmem:[#allocation3 + $0x2] sm:$0xff] }
 0x54b   : > { %3820 = vst [vmem:[#allocation3 + $0x41] sm:$0xff] %v21672_v43  ;;  %v21681_v46 = vpop.f32.mrb[43].mxu1  ;;  %17604 = vmatpush3.bf16.msra.mxu1 %v19811_v36  ;;  %v21683_v48 = vld [vmem:[#allocation3 + $0xa] sm:$0xff]  ;;  %v21704_v53 = vld [vmem:[#allocation3 + $0x12] sm:$0xff]  ;;  %v21800_v27 = vld [vmem:[#allocation3 + $0x20] sm:$0xff]  ;;  %v3873_v36 = vand.u32 7, %v21769_v15 }
 0x54c   : > { %3818 = vst [vmem:[#allocation3 + $0x31] sm:$0xff] %v21681_v46  ;;  %17597 = vmatprep.mubr.bf16.mxu1 %v21676_v44  ;;  %17605 = vmatprep.subr.bf16.mxu1 %v19812_v40  ;;  %v21691_v50 = vpack.c.bf16 %v21651_v20, %v21681_v46  ;;  %v21774_v17 = vld [vmem:[#allocation3 + $0x10] sm:$0xff]  ;;  %v21776_v18 = vld [vmem:[#allocation3 + $0x18] sm:$0xff]  ;;  %v15974_v49 = vpack.c.bf16 %v21683_v48, %v4238_v39  ;;  %v25187_v39 = vmov 0 }
 0x54d   : > { %v21798_v26 = vpack.c.bf16 %v21776_v18, %v21774_v17  ;;  %vm21825_vm6 = vcmp.ge.s32.totalorder %v3873_v36, 1  ;;  %v19828_v15 = vld [vmem:[%s24903_s6 + $0xd0] sm:$0xff]  }
 0x54e   : > { %17598 = vmatmul.mubr.bf16.gmra.mrb[48].mxu1 %v21691_v50 }
 0x54f   : > { %17606 = vmatpush3.bf16.msra.mxu1 %v19812_v40  ;;  %17617 = vmatprep.mubr.msk.bf16.mxu1 %vm21697_vm15, %v15938_v55  ;;  %v3880_v40 = vand.u32 7, %v21772_v16  ;;  %v25173_v55 = vmov 0 }
 0x550   : > { %17607 = vmatprep.subr.bf16.mxu1 %v19813_v52  ;;  %v25174_v55 = vsel %vm21825_vm6, 4294967295, %v25173_v55 }
 0x551   : > { %v21722_v62 = vld [vmem:[#allocation3 + $0x22] sm:$0xff]  ;;  %vm21829_vm7 = vcmp.ge.s32.totalorder %v3880_v40, 1 }
 0x552   : > { %v21786_v24 = vld [vmem:[#allocation3 + $0x28] sm:$0xff]  ;;  %vm21856_vm10 = vmpackc.low %vm21829_vm7, %vm21825_vm6  ;;  %vm21904_vm6 = vcmp.lt.s32.totalorder %v3859_v10, 7  ;;  %v21956_v6 = vld [vmem:[#allocation3 + $0x3a] sm:$0xff] }
 0x553   : > { %17608 = vmatpush3.bf16.msra.mxu1 %v19813_v52  ;;  %v21729_v1 = vld [vmem:[#allocation3 + $0x2a] sm:$0xff]  ;;  %v21731_v2 = vld [vmem:[#allocation3 + $0x32] sm:$0xff]  ;;  %v21817_v52 = vpack.c.bf16 %v21786_v24, %v21800_v27 }
 0x554   : > { %17609 = vmatprep.subr.bf16.mxu1 %v19814_v58  ;;  %v21850_v3 = vld [vmem:[#allocation3 + $0x30] sm:$0xff]  ;;  %v19875_v10 = vld [vmem:[#allocation7 + $0x28] sm:$0xff]  }
 0x555   : > { %17795 = vmatprep.subr.bf16.mxu0 %v19875_v10 }
 0x556   : > { %17796 = vmatpush3.bf16.msra.mxu0 %v19875_v10 }
 0x557   : > { %17610 = vmatpush3.bf16.msra.mxu1 %v19814_v58  ;;  %v25175_v58 = vmov 0 }
 0x558   : > { %17611 = vmatprep.subr.bf16.mxu1 %v19815_v0  ;;  %v25176_v58 = vsel %vm21829_vm7, 4294967295, %v25175_v58  ;;  %vm21897_vm7 = vcmp.lt.s32.totalorder %v3852_v9, 7  ;;  %v21922_v9 = vpack.c.bf16 %v21720_v59, %v21704_v53 }
 0x559   : > { %v25188_v39 = vsel %vm21897_vm7, 4294967295, %v25187_v39  ;;  %vm21916_vm3 = vmpackc.low %vm21897_vm7, %vm21893_vm12 }
 0x55b   : > { %17612 = vmatpush3.bf16.msra.mxu1 %v19815_v0  ;;  %v19820_v0 = vld [vmem:[%s24903_s6 + $0x90] sm:$0xff]  }
 0x55c   : > { %17613 = vmatprep.subr.bf16.mxu1 %v19816_v4 }
 0x55f   : > { %17614 = vmatpush3.bf16.msra.mxu1 %v19816_v4  ;;  %v21836_v4 = vld [vmem:[#allocation3 + $0x38] sm:$0xff] }
 0x560   : > { %17615 = vmatprep.subr.bf16.mxu1 %v19817_v7  ;;  %v21862_v38 = vpack.c.bf16 %v21836_v4, %v21850_v3 }
 0x563   : > { %17616 = vmatpush3.bf16.msra.mxu1 %v19817_v7 }
 0x564   : > { %17625 = vmatprep.subr.bf16.mxu1 %v19818_v14 }
 0x566   : > { %17618 = vmatmul.mubr.msk.bf16.vlgmr.msra.gmra.mrb[44].mxu1 %vm21792_vm4, %v21798_v26 }
 0x567   : > { %17621 = vmatprep.mubr.msk.bf16.mxu1 %vm21806_vm5, %v21817_v52  ;;  %17626 = vmatpush3.bf16.msra.mxu1 %v19818_v14  ;;  %v25179_v14 = vmov 0 }
 0x568   : > { %17627 = vmatprep.subr.bf16.mxu1 %v19819_v33  ;;  %v25180_v14 = vsel %vm21846_vm9, 4294967295, %v25179_v14  ;;  %vm21908_vm9 = vcmp.lt.s32.totalorder %v3866_v11, 7  ;;  %v19827_v11 = vld [vmem:[%s24903_s6 + $0xc8] sm:$0xff]  }
 0x569   : > { %v25192_v37 = vsel %vm21908_vm9, 4294967295, %v25191_v37  ;;  %vm21928_vm2 = vmpackc.low %vm21908_vm9, %vm21904_vm6  ;;  %vm21945_vm9 = vcmp.lt.s32.totalorder %v3873_v36, 7  ;;  %v19877_v36 = vld [vmem:[#allocation7 + $0x38] sm:$0xff]  }
 0x56b   : > { %17628 = vmatpush3.bf16.msra.mxu1 %v19819_v33  ;;  %v19873_v33 = vld [vmem:[%s24903_s6 + $0x238] sm:$0xff]  }
 0x56c   : > { %17629 = vmatprep.subr.bf16.mxu1 %v19820_v0 }
 0x56e   : > { %17622 = vmatmul.mubr.msk.bf16.gmra.mrb[48].mxu1 %vm21856_vm10, %v21862_v38 }
 0x56f   : > { %17630 = vmatpush3.bf16.msra.mxu1 %v19820_v0  ;;  %17641 = vmatprep.mubr.msk.bf16.mxu1 %vm21868_vm11, %v15974_v49  ;;  %v19824_v0 = vld [vmem:[%s24903_s6 + $0xb0] sm:$0xff]   ;;  %v19825_v49 = vld [vmem:[%s24903_s6 + $0xb8] sm:$0xff]  }
 0x570   : > { %17631 = vmatprep.subr.bf16.mxu1 %v19821_v57 }
 0x573   : > { %17632 = vmatpush3.bf16.msra.mxu1 %v19821_v57 }
 0x574   : > { %17633 = vmatprep.subr.bf16.mxu1 %v19822_v56 }
 0x577   : > { %17634 = vmatpush3.bf16.msra.mxu1 %v19822_v56  ;;  %v19826_v56 = vld [vmem:[%s24903_s6 + $0xc0] sm:$0xff]  }
 0x578   : > { %17635 = vmatprep.subr.bf16.mxu1 %v19823_v34 }
 0x57b   : > { %17636 = vmatpush3.bf16.msra.mxu1 %v19823_v34  ;;  %v25189_v34 = vmov 0 }
 0x57c   : > { %17637 = vmatprep.subr.bf16.mxu1 %v19824_v0  ;;  %v25190_v34 = vsel %vm21904_vm6, 4294967295, %v25189_v34  ;;  %vm21949_vm6 = vcmp.lt.s32.totalorder %v3880_v40, 7  ;;  %v21968_v40 = vpack.c.bf16 %v21956_v6, %v21731_v2 }
 0x57d   : > { %vm21962_vm7 = vmpackc.low %vm21949_vm6, %vm21945_vm9 }
 0x57f   : > { %17638 = vmatpush3.bf16.msra.mxu1 %v19824_v0  ;;  %v21937_v0 = vpack.c.bf16 %v21729_v1, %v21722_v62 }
 0x580   : > { %17639 = vmatprep.subr.bf16.mxu1 %v19825_v49 }
 0x583   : > { %17640 = vmatpush3.bf16.msra.mxu1 %v19825_v49 }
 0x584   : > { %17649 = vmatprep.subr.bf16.mxu1 %v19826_v56 }
 0x586   : > { %17642 = vmatmul.mubr.msk.bf16.vlgmr.msra.gmra.mrb[44].mxu1 %vm21916_vm3, %v21922_v9 }
 0x587   : > { %17645 = vmatprep.mubr.msk.bf16.mxu1 %vm21928_vm2, %v21937_v0  ;;  %17650 = vmatpush3.bf16.msra.mxu1 %v19826_v56  ;;  %v19829_v56 = vld [vmem:[%s24903_s6 + $0xd8] sm:$0xff]  }
 0x588   : > { %17651 = vmatprep.subr.bf16.mxu1 %v19827_v11 }
 0x58b   : > { %17652 = vmatpush3.bf16.msra.mxu1 %v19827_v11  ;;  %v16010_v11 = vpack.c.bf16 %v21774_v17, %v21678_v45  ;;  %v19832_v45 = vld [vmem:[%s24903_s6 + $0xf0] sm:$0xff]   ;;  %v19834_v17 = vld [vmem:[%s24903_s6 + $0x100] sm:$0xff]  }
 0x58c   : > { %17653 = vmatprep.subr.bf16.mxu1 %v19828_v15 }
 0x58e   : > { %17646 = vmatmul.mubr.msk.bf16.gmra.mrb[48].mxu1 %vm21962_vm7, %v21968_v40 }
 0x58f   : > { %17654 = vmatpush3.bf16.msra.mxu1 %v19828_v15  ;;  %17665 = vmatprep.mubr.msk.bf16.mxu1 %vm21697_vm15, %v16010_v11  ;;  %v19833_v15 = vld [vmem:[%s24903_s6 + $0xf8] sm:$0xff]  }
 0x590   : > { %17655 = vmatprep.subr.bf16.mxu1 %v19829_v56 }
 0x593   : > { %17656 = vmatpush3.bf16.msra.mxu1 %v19829_v56  ;;  %v16016_v56 = vpack.c.bf16 %v21850_v3, %v21786_v24  ;;  %v19837_v3 = vld [vmem:[%s24903_s6 + $0x118] sm:$0xff]   ;;  %v25203_v24 = vpack.c.bf16 %v21634_v12, %v21627_v30  ;;  %v19842_v12 = vld [vmem:[%s24903_s6 + $0x140] sm:$0xff]  }
 0x594   : > { %17657 = vmatprep.subr.bf16.mxu1 %v19830_v47  ;;  %v19841_v30 = vld [vmem:[%s24903_s6 + $0x138] sm:$0xff]  }
 0x597   : > { %17658 = vmatpush3.bf16.msra.mxu1 %v19830_v47  ;;  %v16013_v47 = vpack.c.bf16 %v21800_v27, %v21776_v18  ;;  %v19836_v18 = vld [vmem:[%s24903_s6 + $0x110] sm:$0xff]   ;;  %v22009_v27 = vld [vmem:[#allocation3 + $0x40] sm:$0xff] }
 0x598   : > { %17659 = vmatprep.subr.bf16.mxu1 %v19831_v5  ;;  %v16019_v11 = vpack.c.bf16 %v22009_v27, %v21836_v4  ;;  %v19839_v4 = vld [vmem:[%s24903_s6 + $0x128] sm:$0xff]  }
 0x59b   : > { %17660 = vmatpush3.bf16.msra.mxu1 %v19831_v5  ;;  %v19835_v5 = vld [vmem:[%s24903_s6 + $0x108] sm:$0xff]  }
 0x59c   : > { %17661 = vmatprep.subr.bf16.mxu1 %v19832_v45 }
 0x59f   : > { %17662 = vmatpush3.bf16.msra.mxu1 %v19832_v45  ;;  %v19838_v45 = vld [vmem:[%s24903_s6 + $0x120] sm:$0xff]  }
 0x5a0   : > { %17663 = vmatprep.subr.bf16.mxu1 %v19833_v15 }
 0x5a3   : > { %17664 = vmatpush3.bf16.msra.mxu1 %v19833_v15  ;;  %v19840_v15 = vld [vmem:[%s24903_s6 + $0x130] sm:$0xff]  }
 0x5a4   : > { %17673 = vmatprep.subr.bf16.mxu1 %v19834_v17 }
 0x5a6   : > { %17666 = vmatmul.mubr.msk.bf16.vlgmr.msra.gmra.mrb[44].mxu1 %vm21792_vm4, %v16013_v47  ;;  %v25204_v47 = vpack.c.bf16 %v21630_v31, %v21624_v29  ;;  %v25206_v29 = vpack.c.bf16 %v21672_v43, %v21651_v20  ;;  %v25207_v31 = vpack.c.bf16 %v21704_v53, %v21683_v48  ;;  %v19848_v20 = vld [vmem:[%s24903_s6 + $0x170] sm:$0xff]   ;;  %v19849_v48 = vld [vmem:[%s24903_s6 + $0x178] sm:$0xff]   ;;  %v19850_v53 = vld [vmem:[%s24903_s6 + $0x180] sm:$0xff]  }
 0x5a7   : > { %17669 = vmatprep.mubr.msk.bf16.mxu1 %vm21806_vm5, %v16016_v56  ;;  %17674 = vmatpush3.bf16.msra.mxu1 %v19834_v17  ;;  %v19843_v17 = vld [vmem:[%s24903_s6 + $0x148] sm:$0xff]   ;;  %v19844_v56 = vld [vmem:[%s24903_s6 + $0x150] sm:$0xff]  }
 0x5a8   : > { %17675 = vmatprep.subr.bf16.mxu1 %v19835_v5 }
 0x5ab   : > { %17676 = vmatpush3.bf16.msra.mxu1 %v19835_v5  ;;  %v25205_v5 = vpack.c.bf16 %v21681_v46, %v21657_v41  ;;  %v19846_v41 = vld [vmem:[%s24903_s6 + $0x160] sm:$0xff]   ;;  %v19847_v46 = vld [vmem:[%s24903_s6 + $0x168] sm:$0xff]  }
 0x5ac   : > { %17677 = vmatprep.subr.bf16.mxu1 %v19836_v18 }
 0x5ae   : > { %17670 = vmatmul.mubr.msk.bf16.gmra.mrb[48].mxu1 %vm21856_vm10, %v16019_v11  ;;  %v19851_v11 = vld [vmem:[%s24903_s6 + $0x188] sm:$0xff]  }
 0x5af   : > { %17678 = vmatpush3.bf16.msra.mxu1 %v19836_v18  ;;  %17689 = vmatprep.mubr.bf16.mxu1 %v25203_v24  ;;  %v19845_v18 = vld [vmem:[%s24903_s6 + $0x158] sm:$0xff]   ;;  %v25209_v24 = vpack.c.bf16 %v21731_v2, %v21729_v1  ;;  %v19854_v1 = vld [vmem:[%s24903_s6 + $0x1a0] sm:$0xff]   ;;  %v19855_v2 = vld [vmem:[%s24903_s6 + $0x1a8] sm:$0xff]  }
 0x5b0   : > { %17679 = vmatprep.subr.bf16.mxu1 %v19837_v3 }
 0x5b3   : > { %17680 = vmatpush3.bf16.msra.mxu1 %v19837_v3  ;;  %v25208_v3 = vpack.c.bf16 %v21722_v62, %v21720_v59  ;;  %v19853_v62 = vld [vmem:[%s24903_s6 + $0x198] sm:$0xff]  }
 0x5b4   : > { %17681 = vmatprep.subr.bf16.mxu1 %v19838_v45 }
 0x5b7   : > { %17682 = vmatpush3.bf16.msra.mxu1 %v19838_v45  ;;  %v19852_v45 = vld [vmem:[%s24903_s6 + $0x190] sm:$0xff]  }
 0x5b8   : > { %17683 = vmatprep.subr.bf16.mxu1 %v19839_v4 }
 0x5bb   : > { %17684 = vmatpush3.bf16.msra.mxu1 %v19839_v4  ;;  %v22090_v4 = vld [vmem:[#allocation3 + $0x42] sm:$0xff] }
 0x5bc   : > { %17685 = vmatprep.subr.bf16.mxu1 %v19840_v15  ;;  %v16079_v59 = vpack.c.bf16 %v22090_v4, %v21956_v6  ;;  %v19856_v6 = vld [vmem:[%s24903_s6 + $0x1b0] sm:$0xff]  }
 0x5bf   : > { %17686 = vmatpush3.bf16.msra.mxu1 %v19840_v15  ;;  %v19859_v15 = vld [vmem:[%s24903_s6 + $0x1c8] sm:$0xff]  }
 0x5c0   : > { %17687 = vmatprep.subr.bf16.mxu1 %v19841_v30 }
 0x5c3   : > { %17688 = vmatpush3.bf16.msra.mxu1 %v19841_v30  ;;  %v19860_v30 = vld [vmem:[%s24903_s6 + $0x1d0] sm:$0xff]  }
 0x5c4   : > { %17697 = vmatprep.subr.bf16.mxu1 %v19842_v12 }
 0x5c6   : > { %17690 = vmatmul.mubr.bf16.vlgmr.msra.gmra.mrb[44].mxu1 %v25204_v47  ;;  %v19868_v47 = vld [vmem:[%s24903_s6 + $0x210] sm:$0xff]  }
 0x5c7   : > { %17693 = vmatprep.mubr.bf16.mxu1 %v25205_v5  ;;  %17698 = vmatpush3.bf16.msra.mxu1 %v19842_v12  ;;  %v4893_v12 = vld [vmem:[#allocation3 + $0x48] sm:$0xff] }
 0x5c8   : > { %17699 = vmatprep.subr.bf16.mxu1 %v19843_v17  ;;  %v5051_v5 = vld [vmem:[#allocation3 + $0x49] sm:$0xff] }
 0x5cb   : > { %17700 = vmatpush3.bf16.msra.mxu1 %v19843_v17  ;;  %v16115_v17 = vpack.c.bf16 %v4893_v12, %v22009_v27  ;;  %v19867_v27 = vld [vmem:[%s24903_s6 + $0x208] sm:$0xff]  }
 0x5cc   : > { %17701 = vmatprep.subr.bf16.mxu1 %v19844_v56 }
 0x5ce   : > { %17694 = vmatmul.mubr.bf16.gmra.mrb[48].mxu1 %v25206_v29 }
 0x5cf   : > { %17702 = vmatpush3.bf16.msra.mxu1 %v19844_v56  ;;  %17713 = vmatprep.mubr.msk.bf16.mxu1 %vm21868_vm11, %v25207_v31  ;;  %v5055_v56 = vpack.c.bf16 %v5051_v5, %v21672_v43  ;;  %v19871_v43 = vld [vmem:[%s24903_s6 + $0x228] sm:$0xff]   ;;  %v16177_v31 = vld [vmem:[%s24904_s7] ss:$0 sm:$0xff] }
 0x5d0   : > { %17703 = vmatprep.subr.bf16.mxu1 %v19845_v18  ;;  %v19879_v5 = vld [vmem:[#allocation7 + $0x8] sm:$0xff]  }
 0x5d3   : > { %17704 = vmatpush3.bf16.msra.mxu1 %v19845_v18  ;;  %v19869_v18 = vld [vmem:[%s24903_s6 + $0x218] sm:$0xff]  }
 0x5d4   : > { %17705 = vmatprep.subr.bf16.mxu1 %v19846_v41 }
 0x5d7   : > { %17706 = vmatpush3.bf16.msra.mxu1 %v19846_v41 }
 0x5d8   : > { %17707 = vmatprep.subr.bf16.mxu1 %v19847_v46 }
 0x5db   : > { %17708 = vmatpush3.bf16.msra.mxu1 %v19847_v46 }
 0x5dc   : > { %17709 = vmatprep.subr.bf16.mxu1 %v19848_v20 }
 0x5df   : > { %17710 = vmatpush3.bf16.msra.mxu1 %v19848_v20 }
 0x5e0   : > { %17711 = vmatprep.subr.bf16.mxu1 %v19849_v48 }
 0x5e3   : > { %17712 = vmatpush3.bf16.msra.mxu1 %v19849_v48 }
 0x5e4   : > { %17721 = vmatprep.subr.bf16.mxu1 %v19850_v53 }
 0x5e6   : > { %17714 = vmatmul.mubr.msk.bf16.vlgmr.msra.gmra.mrb[44].mxu1 %vm21916_vm3, %v25208_v3 }
 0x5e7   : > { %17717 = vmatprep.mubr.msk.bf16.mxu1 %vm21928_vm2, %v25209_v24  ;;  %17722 = vmatpush3.bf16.msra.mxu1 %v19850_v53 }
 0x5e8   : > { %17723 = vmatprep.subr.bf16.mxu1 %v19851_v11 }
 0x5eb   : > { %17724 = vmatpush3.bf16.msra.mxu1 %v19851_v11 }
 0x5ec   : > { %17725 = vmatprep.subr.bf16.mxu1 %v19852_v45 }
 0x5ee   : > { %17718 = vmatmul.mubr.msk.bf16.gmra.mrb[48].mxu1 %vm21962_vm7, %v16079_v59 }
 0x5ef   : > { %17726 = vmatpush3.bf16.msra.mxu1 %v19852_v45  ;;  %17737 = vmatprep.mubr.msk.bf16.mxu1 %vm21697_vm15, %v21798_v26  ;;  %v19858_v26 = vld [vmem:[%s24903_s6 + $0x1c0] sm:$0xff]   ;;  %vm25028_vm15 = vcmask 523264  }
 0x5f0   : > { %17727 = vmatprep.subr.bf16.mxu1 %v19853_v62  ;;  %5379 = vst.msk [vmem:[#allocation4 + $0x18] sm:$0xff] %vm25028_vm15, %v21706_v54  ;;  %5380 = vst.msk [vmem:[#allocation4 + $0x20] sm:$0xff] %vm25028_vm15, %v21706_v54 }
 0x5f1   : > { %5376 = vst.msk [vmem:[#allocation4] sm:$0xff] %vm25028_vm15, %v21706_v54  ;;  %5377 = vst.msk [vmem:[#allocation4 + $0x8] sm:$0xff] %vm25028_vm15, %v21706_v54 }
 0x5f2   : > { %5378 = vst.msk [vmem:[#allocation4 + $0x10] sm:$0xff] %vm25028_vm15, %v21706_v54  ;;  %5381 = vst.msk [vmem:[#allocation4 + $0x28] sm:$0xff] %vm25028_vm15, %v21706_v54 }
 0x5f3   : > { %17728 = vmatpush3.bf16.msra.mxu1 %v19853_v62  ;;  %5382 = vst.msk [vmem:[#allocation4 + $0x30] sm:$0xff] %vm25028_vm15, %v21706_v54  ;;  %5383 = vst.msk [vmem:[#allocation4 + $0x38] sm:$0xff] %vm25028_vm15, %v21706_v54 }
 0x5f4   : > { %17729 = vmatprep.subr.bf16.mxu1 %v19854_v1  ;;  %5384 = vst.msk [vmem:[#allocation4 + $0x40] sm:$0xff] %vm25028_vm15, %v21706_v54  ;;  %5385 = vst.msk [vmem:[#allocation4 + $0x48] sm:$0xff] %vm25028_vm15, %v21706_v54 }
 0x5f5   : > { %6945 = vst.msk [vmem:[#allocation5] sm:$0xff] %vm25028_vm15, %v21706_v54  ;;  %6946 = vst.msk [vmem:[#allocation5 + $0x8] sm:$0xff] %vm25028_vm15, %v21706_v54 }
 0x5f6   : > { %6947 = vst.msk [vmem:[#allocation5 + $0x10] sm:$0xff] %vm25028_vm15, %v21706_v54  ;;  %6948 = vst.msk [vmem:[#allocation5 + $0x18] sm:$0xff] %vm25028_vm15, %v21706_v54 }
 0x5f7   : > { %17730 = vmatpush3.bf16.msra.mxu1 %v19854_v1  ;;  %6949 = vst.msk [vmem:[#allocation5 + $0x20] sm:$0xff] %vm25028_vm15, %v21706_v54  ;;  %6950 = vst.msk [vmem:[#allocation5 + $0x28] sm:$0xff] %vm25028_vm15, %v21706_v54 }
 0x5f8   : > { %17731 = vmatprep.subr.bf16.mxu1 %v19855_v2  ;;  %6951 = vst.msk [vmem:[#allocation5 + $0x30] sm:$0xff] %vm25028_vm15, %v21706_v54  ;;  %6952 = vst.msk [vmem:[#allocation5 + $0x38] sm:$0xff] %vm25028_vm15, %v21706_v54  ;;  %v5424_v12 = vld [vmem:[#allocation4 + $0x1] sm:$0xff] }
 0x5f9   : > { %6953 = vst.msk [vmem:[#allocation5 + $0x40] sm:$0xff] %vm25028_vm15, %v21706_v54  ;;  %6954 = vst.msk [vmem:[#allocation5 + $0x48] sm:$0xff] %vm25028_vm15, %v21706_v54 }
 0x5fa   : > { %6955 = vst.msk [vmem:[#allocation5 + $0x50] sm:$0xff] %vm25028_vm15, %v21706_v54  ;;  %6956 = vst.msk [vmem:[#allocation5 + $0x58] sm:$0xff] %vm25028_vm15, %v21706_v54 }
 0x5fb   : > { %17732 = vmatpush3.bf16.msra.mxu1 %v19855_v2  ;;  %6957 = vst.msk [vmem:[#allocation5 + $0x60] sm:$0xff] %vm25028_vm15, %v21706_v54  ;;  %6958 = vst.msk [vmem:[#allocation5 + $0x68] sm:$0xff] %vm25028_vm15, %v21706_v54 }
 0x5fc   : > { %17733 = vmatprep.subr.bf16.mxu1 %v19856_v6  ;;  %6959 = vst.msk [vmem:[#allocation5 + $0x70] sm:$0xff] %vm25028_vm15, %v21706_v54  ;;  %6960 = vst.msk [vmem:[#allocation5 + $0x78] sm:$0xff] %vm25028_vm15, %v21706_v54 }
 0x5fd   : > { %6961 = vst.msk [vmem:[#allocation5 + $0x80] sm:$0xff] %vm25028_vm15, %v21706_v54  ;;  %6962 = vst.msk [vmem:[#allocation5 + $0x88] sm:$0xff] %vm25028_vm15, %v21706_v54 }
 0x5fe   : > { %6963 = vst.msk [vmem:[#allocation5 + $0x90] sm:$0xff] %vm25028_vm15, %v21706_v54  ;;  %6964 = vst.msk [vmem:[#allocation5 + $0x98] sm:$0xff] %vm25028_vm15, %v21706_v54 }
 0x5ff   : > { %17734 = vmatpush3.bf16.msra.mxu1 %v19856_v6  ;;  %6965 = vst.msk [vmem:[#allocation5 + $0xa0] sm:$0xff] %vm25028_vm15, %v21706_v54  ;;  %6966 = vst.msk [vmem:[#allocation5 + $0xa8] sm:$0xff] %vm25028_vm15, %v21706_v54 }
 0x600   : > { %17735 = vmatprep.subr.bf16.mxu1 %v19857_v51  ;;  %6967 = vst.msk [vmem:[#allocation5 + $0xb0] sm:$0xff] %vm25028_vm15, %v21706_v54  ;;  %6968 = vst.msk [vmem:[#allocation5 + $0xb8] sm:$0xff] %vm25028_vm15, %v21706_v54 }
 0x601   : > { %6969 = vst.msk [vmem:[#allocation5 + $0xc0] sm:$0xff] %vm25028_vm15, %v21706_v54  ;;  %6970 = vst.msk [vmem:[#allocation5 + $0xc8] sm:$0xff] %vm25028_vm15, %v21706_v54 }
 0x602   : > { %6971 = vst.msk [vmem:[#allocation5 + $0xd0] sm:$0xff] %vm25028_vm15, %v21706_v54  ;;  %6972 = vst.msk [vmem:[#allocation5 + $0xd8] sm:$0xff] %vm25028_vm15, %v21706_v54 }
 0x603   : > { %17736 = vmatpush3.bf16.msra.mxu1 %v19857_v51  ;;  %6973 = vst.msk [vmem:[#allocation5 + $0xe0] sm:$0xff] %vm25028_vm15, %v21706_v54  ;;  %6974 = vst.msk [vmem:[#allocation5 + $0xe8] sm:$0xff] %vm25028_vm15, %v21706_v54 }
 0x604   : > { %17745 = vmatprep.subr.bf16.mxu1 %v19858_v26  ;;  %6975 = vst.msk [vmem:[#allocation5 + $0xf0] sm:$0xff] %vm25028_vm15, %v21706_v54  ;;  %6976 = vst.msk [vmem:[#allocation5 + $0xf8] sm:$0xff] %vm25028_vm15, %v21706_v54 }
 0x605   : > { %6977 = vst.msk [vmem:[#allocation5 + $0x100] sm:$0xff] %vm25028_vm15, %v21706_v54  ;;  %6978 = vst.msk [vmem:[#allocation5 + $0x108] sm:$0xff] %vm25028_vm15, %v21706_v54 }
 0x606   : > { %17738 = vmatmul.mubr.msk.bf16.vlgmr.msra.gmra.mrb[44].mxu1 %vm21792_vm4, %v21817_v52  ;;  %v19863_v52 = vld [vmem:[%s24903_s6 + $0x1e8] sm:$0xff]   ;;  %6979 = vst.msk [vmem:[#allocation5 + $0x110] sm:$0xff] %vm25028_vm15, %v21706_v54  ;;  %6980 = vst.msk [vmem:[#allocation5 + $0x118] sm:$0xff] %vm25028_vm15, %v21706_v54  ;;  %vm25211_vm4 = vnez %v25168_v23 }
 0x607   : > { %17741 = vmatprep.mubr.msk.bf16.mxu1 %vm21806_vm5, %v21862_v38  ;;  %17746 = vmatpush3.bf16.msra.mxu1 %v19858_v26  ;;  %v19866_v38 = vld [vmem:[%s24903_s6 + $0x200] sm:$0xff]   ;;  %vm25212_vm5 = vnez %v25180_v14 }
 0x608   : > { %17747 = vmatprep.subr.bf16.mxu1 %v19859_v15 }
 0x60b   : > { %17748 = vmatpush3.bf16.msra.mxu1 %v19859_v15 }
 0x60c   : > { %17749 = vmatprep.subr.bf16.mxu1 %v19860_v30 }
 0x60e   : > { %17742 = vmatmul.mubr.msk.bf16.gmra.mrb[48].mxu1 %vm21856_vm10, %v16115_v17  ;;  %vm25214_vm10 = vnez %v25190_v34  ;;  %v19900_v34 = vld [vmem:[#allocation7 + $0xd0] sm:$0xff]  }
 0x60f   : > { %17750 = vmatpush3.bf16.msra.mxu1 %v19860_v30  ;;  %17761 = vmatprep.mubr.bf16.mxu1 %v21641_v35  ;;  %v19865_v35 = vld [vmem:[%s24903_s6 + $0x1f8] sm:$0xff]  }
 0x610   : > { %17751 = vmatprep.subr.bf16.mxu1 %v19861_v25 }
 0x613   : > { %17752 = vmatpush3.bf16.msra.mxu1 %v19861_v25 }
 0x614   : > { %17753 = vmatprep.subr.bf16.mxu1 %v19862_v28 }
 0x617   : > { %17754 = vmatpush3.bf16.msra.mxu1 %v19862_v28 }
 0x618   : > { %17755 = vmatprep.subr.bf16.mxu1 %v19863_v52 }
 0x61b   : > { %17756 = vmatpush3.bf16.msra.mxu1 %v19863_v52 }
 0x61c   : > { %17757 = vmatprep.subr.bf16.mxu1 %v19864_v63 }
 0x61f   : > { %17758 = vmatpush3.bf16.msra.mxu1 %v19864_v63 }
 0x620   : > { %17759 = vmatprep.subr.bf16.mxu1 %v19865_v35 }
 0x623   : > { %17760 = vmatpush3.bf16.msra.mxu1 %v19865_v35 }
 0x624   : > { %17769 = vmatprep.subr.bf16.mxu1 %v19866_v38 }
 0x626   : > { %17762 = vmatmul.mubr.bf16.vlgmr.msra.gmra.mrb[44].mxu1 %v21676_v44  ;;  %v19870_v44 = vld [vmem:[%s24903_s6 + $0x220] sm:$0xff]  }
 0x627   : > { %17765 = vmatprep.mubr.bf16.mxu1 %v21691_v50  ;;  %17770 = vmatpush3.bf16.msra.mxu1 %v19866_v38  ;;  %v19872_v50 = vld [vmem:[%s24903_s6 + $0x230] sm:$0xff]  }
 0x628   : > { %17771 = vmatprep.subr.bf16.mxu1 %v19867_v27 }
 0x62b   : > { %17772 = vmatpush3.bf16.msra.mxu1 %v19867_v27 }
 0x62c   : > { %17773 = vmatprep.subr.bf16.mxu1 %v19868_v47 }
 0x62e   : > { %17766 = vmatmul.mubr.bf16.gmra.mrb[48].mxu1 %v5055_v56 }
 0x62f   : > { %17774 = vmatpush3.bf16.msra.mxu1 %v19868_v47  ;;  %17785 = vmatprep.mubr.msk.bf16.mxu1 %vm21868_vm11, %v21922_v9  ;;  %v5201_v9 = vld [vmem:[#allocation3 + $0x4a] sm:$0xff]  ;;  %vm25215_vm11 = vnez %v25192_v37 }
 0x630   : > { %17775 = vmatprep.subr.bf16.mxu1 %v19869_v18  ;;  %v16175_v29 = vpack.c.bf16 %v5201_v9, %v22090_v4 }
 0x633   : > { %17776 = vmatpush3.bf16.msra.mxu1 %v19869_v18 }
 0x634   : > { %17777 = vmatprep.subr.bf16.mxu1 %v19870_v44 }
 0x637   : > { %17778 = vmatpush3.bf16.msra.mxu1 %v19870_v44  ;;  %v5396_v44 = vld [vmem:[#allocation4] sm:$0xff] }
 0x638   : > { %17779 = vmatprep.subr.bf16.mxu1 %v19871_v43 }
 0x63b   : > { %17780 = vmatpush3.bf16.msra.mxu1 %v19871_v43 }
 0x63c   : > { %17781 = vmatprep.subr.bf16.mxu1 %v19872_v50 }
 0x63f   : > { %17782 = vmatpush3.bf16.msra.mxu1 %v19872_v50  ;;  %v19880_v50 = vld [vmem:[#allocation7 + $0x10] sm:$0xff]  }
 0x640   : > { %17783 = vmatprep.subr.bf16.mxu1 %v19873_v33 }
 0x643   : > { %17784 = vmatpush3.bf16.msra.mxu1 %v19873_v33 }
 0x646   : > { %17786 = vmatmul.mubr.msk.bf16.vlgmr.msra.gmra.mrb[44].mxu1 %vm21916_vm3, %v21937_v0  ;;  %v19876_v0 = vld [vmem:[#allocation7 + $0x30] sm:$0xff]   ;;  %vm25210_vm3 = vnez %v25166_v22 }
 0x647   : > { %17789 = vmatprep.mubr.msk.bf16.mxu1 %vm21928_vm2, %v21968_v40  ;;  %17797 = vmatprep.subr.bf16.mxu0 %v19876_v0  ;;  %v19878_v40 = vld [vmem:[#allocation7] sm:$0xff]   ;;  %vm5386_vm2 = vcmask 517120  }
 0x648   : > { %17798 = vmatpush3.bf16.msra.mxu0 %v19876_v0  ;;  %5387 = vst.msk [vmem:[#allocation4 + $0x50] sm:$0x3] %vm5386_vm2, %v21706_v54  ;;  %6981 = vst.msk [vmem:[#allocation5 + $0x120] sm:$0x3] %vm5386_vm2, %v21706_v54  ;;  %vm25216_vm2 = vnez %v25174_v55  ;;  %v19908_v55 = vld [vmem:[#allocation7 + $0x110] sm:$0xff]  }
 0x649   : > { %17799 = vmatprep.subr.bf16.mxu0 %v19877_v36 }
 0x64c   : > { %17800 = vmatpush3.bf16.msra.mxu0 %v19877_v36  ;;  %v5404_v36 = vsel %vm21661_vm13, %v5396_v44, 0.0 }
 0x64d   : > { %17809 = vmatprep.subr.bf16.mxu0 %v19878_v40 }
 0x64e   : > { %17790 = vmatmul.mubr.msk.bf16.gmra.mrb[48].mxu1 %vm21962_vm7, %v16175_v29  ;;  %vm25213_vm7 = vnez %v25188_v39 }
 0x719   : > { %v17787_v41 = vpop.f32.mrb[44].mxu1 }
 0x71a   : > { %v5361_v46 = vadd.f32 %v17787_v41, %v16177_v31  ;;  %v5313_v20 = vpop.f32.mrb[45].mxu1 }
 0x71b   : > { %v5359_v48 = vadd.f32 %v16177_v31, %v5313_v20  ;;  %v17788_v53 = vpop.f32.mrb[46].mxu1  ;;  %v19881_v20 = vld [vmem:[#allocation7 + $0x18] sm:$0xff]  }
 0x71c   : > { %v5369_v11 = vmax.f32 %v5361_v46, 0.0  ;;  %v5362_v3 = vadd.f32 %v17788_v53, %v16177_v31  ;;  %v5316_v24 = vpop.f32.mrb[47].mxu1 }
 0x71d   : > { %v5367_v45 = vmax.f32 %v5359_v48, 0.0  ;;  %v5360_v4 = vadd.f32 %v16177_v31, %v5316_v24 }
 0x71e   : > { %5390 = vst.msk [vmem:[#allocation4 + $0x19] sm:$0xff] %vm25028_vm15, %v5369_v11  ;;  %v5370_v59 = vmax.f32 %v5362_v3, 0.0 }
 0x71f   : > { %5388 = vst.msk [vmem:[#allocation4 + $0x9] sm:$0xff] %vm25028_vm15, %v5367_v45  ;;  %v5368_v54 = vmax.f32 %v5360_v4, 0.0  ;;  %v19882_v4 = vld [vmem:[#allocation7 + $0x40] sm:$0xff]  }
 0x720   : > { %5391 = vst.msk [vmem:[#allocation4 + $0x21] sm:$0xff] %vm25028_vm15, %v5370_v59 }
 0x721   : > { %5389 = vst.msk [vmem:[#allocation4 + $0x11] sm:$0xff] %vm25028_vm15, %v5368_v54  ;;  %v17791_v62 = vpop.f32.mrb[48].mxu1 }
 0x722   : > { %v5365_v1 = vadd.f32 %v17791_v62, %v16177_v31  ;;  %v5329_v2 = vpop.f32.mrb[49].mxu1 }
 0x723   : > { %v5363_v6 = vadd.f32 %v16177_v31, %v5329_v2  ;;  %v17792_v51 = vpop.f32.mrb[50].mxu1 }
 0x724   : > { %v5373_v26 = vmax.f32 %v5365_v1, 0.0  ;;  %v5366_v15 = vadd.f32 %v17792_v51, %v16177_v31  ;;  %v5332_v30 = vpop.f32.mrb[51].mxu1 }
 0x725   : > { %v5371_v17 = vmax.f32 %v5363_v6, 0.0  ;;  %v5364_v25 = vadd.f32 %v16177_v31, %v5332_v30  ;;  %v22296_v27 = vld [vmem:[#allocation4 + $0x19] sm:$0xff] }
 0x726   : > { %5394 = vst.msk [vmem:[#allocation4 + $0x39] sm:$0xff] %vm25028_vm15, %v5373_v26  ;;  %v5374_v28 = vmax.f32 %v5366_v15, 0.0  ;;  %v22289_v52 = vld [vmem:[#allocation4 + $0x9] sm:$0xff] }
 0x727   : > { %5392 = vst.msk [vmem:[#allocation4 + $0x29] sm:$0xff] %vm25028_vm15, %v5371_v17  ;;  %v5372_v63 = vmax.f32 %v5364_v25, 0.0  ;;  %v5432_v35 = vpack.c.bf16 %v22289_v52, %v5424_v12  ;;  %v22310_v43 = vld [vmem:[#allocation4 + $0x8] sm:$0xff]  ;;  %v22343_v53 = vld [vmem:[#allocation4 + $0x20] sm:$0xff] }
 0x728   : > { %5395 = vst.msk [vmem:[#allocation4 + $0x41] sm:$0xff] %vm25028_vm15, %v5374_v28  ;;  %v22294_v38 = vld [vmem:[#allocation4 + $0x11] sm:$0xff]  ;;  %v22318_v29 = vld [vmem:[#allocation4 + $0x21] sm:$0xff]  ;;  %v6201_v2 = vsel %vm21757_vm0, %v22343_v53, 0.0 }
 0x729   : > { %5393 = vst.msk [vmem:[#allocation4 + $0x31] sm:$0xff] %vm25028_vm15, %v5372_v63  ;;  %17801 = vmatprep.mubr.msk.bf16.mxu0 %vm25028_vm15, %v5432_v35  ;;  %v22302_v47 = vpack.c.bf16 %v22296_v27, %v22294_v38  ;;  %v22304_v56 = vld [vmem:[#allocation4 + $0x10] sm:$0xff]  ;;  %v22306_v18 = vld [vmem:[#allocation4 + $0x18] sm:$0xff] }
 0x72a   : > { %v6199_v33 = vsel %vm21661_vm13, %v22304_v56, 0.0  ;;  %v6200_v9 = vsel %vm21667_vm14, %v22306_v18, 0.0  ;;  %v22345_v11 = vld [vmem:[#allocation4 + $0x12] sm:$0xff]  ;;  %v5406_v59 = vsel %vm21757_vm0, %v22304_v56, 0.0  ;;  %v5407_v54 = vsel %vm21761_vm1, %v22306_v18, 0.0  ;;  %v22362_v62 = vld [vmem:[#allocation4 + $0x1a] sm:$0xff] }
 0x72b   : > { %17802 = vmatmul.mubr.msk.bf16.vlgmr.msra.gmra.mrb[4].mxu0 %vm25028_vm15, %v22302_v47  ;;  %v22322_v10 = vpack.c.bf16 %v6200_v9, %v6199_v33  ;;  %v6467_v6 = vsel %vm21840_vm8, %v22345_v11, 0.0  ;;  %v5413_v35 = vpack.c.bf16 %v5407_v54, %v5406_v59  ;;  %v6468_v44 = vsel %vm25212_vm5, %v22362_v62, 0.0  ;;  %v19883_v33 = vld [vmem:[#allocation7 + $0x48] sm:$0xff]  }
 0x72c   : > { %17810 = vmatpush3.bf16.msra.mxu0 %v19878_v40  ;;  %v5405_v40 = vsel %vm21667_vm14, %v22310_v43, 0.0  ;;  %v22403_v9 = vpack.c.bf16 %v6468_v44, %v6467_v6  ;;  %v19884_v6 = vld [vmem:[#allocation7 + $0x50] sm:$0xff]   ;;  %v5795_v32 = vsel %vm21757_vm0, %v22306_v18, 0.0 }
 0x72d   : > { %17811 = vmatprep.subr.bf16.mxu0 %v19879_v5  ;;  %v22335_v41 = vld [vmem:[#allocation4 + $0x39] sm:$0xff]  ;;  %v5412_v48 = vpack.c.bf16 %v5405_v40, %v5404_v36 }
 0x72e   : > { %v22320_v8 = vld [vmem:[#allocation4 + $0x29] sm:$0xff] }
 0x72f   : > { %v22326_v0 = vpack.c.bf16 %v22320_v8, %v22318_v29  ;;  %v22349_v3 = vld [vmem:[#allocation4 + $0x28] sm:$0xff]  ;;  %v22376_v15 = vld [vmem:[#allocation4 + $0x3a] sm:$0xff] }
 0x730   : > { %17812 = vmatpush3.bf16.msra.mxu0 %v19879_v5  ;;  %v22333_v31 = vld [vmem:[#allocation4 + $0x31] sm:$0xff]  ;;  %v22364_v1 = vld [vmem:[#allocation4 + $0x22] sm:$0xff]  ;;  %v6202_v30 = vsel %vm21761_vm1, %v22349_v3, 0.0  ;;  %v5409_v25 = vsel %vm25211_vm4, %v22349_v3, 0.0  ;;  %v5408_v5 = vsel %vm25210_vm3, %v22343_v53, 0.0  ;;  %v6067_v37 = vsel %vm21945_vm9, %v22376_v15, 0.0 }
 0x731   : > { %17805 = vmatprep.mubr.msk.bf16.mxu0 %vm25028_vm15, %v22326_v0  ;;  %v22341_v46 = vpack.c.bf16 %v22335_v41, %v22333_v31  ;;  %17813 = vmatprep.subr.bf16.mxu0 %v19880_v50  ;;  %v22351_v24 = vld [vmem:[#allocation4 + $0x30] sm:$0xff]  ;;  %v22353_v45 = vld [vmem:[#allocation4 + $0x38] sm:$0xff]  ;;  %v22390_v28 = vpack.c.bf16 %v6202_v30, %v6201_v2  ;;  %v22476_v60 = vld [vmem:[#allocation4 + $0x40] sm:$0xff]  ;;  %v6064_v7 = vsel %vm25213_vm7, %v22364_v1, 0.0 }
 0x732   : > { %v22372_v51 = vld [vmem:[#allocation4 + $0x2a] sm:$0xff]  ;;  %v22374_v26 = vld [vmem:[#allocation4 + $0x32] sm:$0xff]  ;;  %v6203_v12 = vsel %vm25210_vm3, %v22351_v24, 0.0  ;;  %v6204_v17 = vsel %vm25211_vm4, %v22353_v45, 0.0  ;;  %v5410_v30 = vsel %vm25216_vm2, %v22351_v24, 0.0  ;;  %vm25217_vm3 = vnez %v25176_v58  ;;  %v6060_v39 = vld [vmem:[#allocation4 + $0x42] sm:$0xff] }
 0x733   : > { %17806 = vmatmul.mubr.msk.bf16.gmra.mrb[8].mxu0 %vm25028_vm15, %v22341_v46  ;;  %v22392_v63 = vpack.c.bf16 %v6204_v17, %v6203_v12  ;;  %v6470_v36 = vsel %vm25213_vm7, %v22372_v51, 0.0  ;;  %v6471_v40 = vsel %vm25214_vm10, %v22374_v26, 0.0  ;;  %v22420_v2 = vld [vmem:[#allocation4 + $0xa] sm:$0xff]  ;;  %v5411_v12 = vsel %vm25217_vm3, %v22353_v45, 0.0  ;;  %v5647_v17 = vld [vmem:[#allocation4 + $0x2] sm:$0xff] }
 0x734   : > { %17814 = vmatpush3.bf16.msra.mxu0 %v19880_v50  ;;  %17817 = vmatprep.mubr.msk.bf16.mxu0 %vm25028_vm15, %v5412_v48  ;;  %v6469_v50 = vsel %vm21893_vm12, %v22364_v1, 0.0  ;;  %v5414_v48 = vpack.c.bf16 %v5409_v25, %v5408_v5  ;;  %v5656_v25 = vsel %vm25212_vm5, %v22420_v2, 0.0  ;;  %v19885_v5 = vld [vmem:[#allocation7 + $0x58] sm:$0xff]   ;;  %v5798_v42 = vsel %vm25211_vm4, %v22351_v24, 0.0  ;;  %v19894_v24 = vld [vmem:[#allocation7 + $0xa0] sm:$0xff]  }
 0x735   : > { %17815 = vmatprep.subr.bf16.mxu0 %v19881_v20  ;;  %v22414_v59 = vpack.c.bf16 %v6470_v36, %v6469_v50  ;;  %v19886_v50 = vld [vmem:[#allocation7 + $0x60] sm:$0xff]   ;;  %v5657_v36 = vsel %vm21893_vm12, %v22345_v11, 0.0  ;;  %v5799_v23 = vsel %vm25216_vm2, %v22353_v45, 0.0  ;;  %v5932_v45 = vpack.c.bf16 %v22318_v29, %v22296_v27 }
 0x736   : > { %v6062_v27 = vsel %vm25212_vm5, %v22345_v11, 0.0  ;;  %v6065_v14 = vsel %vm25214_vm10, %v22372_v51, 0.0  ;;  %v6063_v11 = vsel %vm21893_vm12, %v22362_v62, 0.0  ;;  %v6068_v57 = vsel %vm21949_vm6, %v6060_v39, 0.0  ;;  %v6336_v58 = vld [vmem:[#allocation4 + $0x49] sm:$0xff] }
 0x738   : > { %17816 = vmatpush3.bf16.msra.mxu0 %v19881_v20  ;;  %v6472_v20 = vsel %vm25215_vm11, %v22376_v15, 0.0 }
 0x739   : > { %17825 = vmatprep.subr.bf16.mxu0 %v19882_v4  ;;  %v22416_v54 = vpack.c.bf16 %v6472_v20, %v6471_v40  ;;  %v5660_v40 = vsel %vm25215_vm11, %v22372_v51, 0.0  ;;  %v19902_v51 = vld [vmem:[#allocation7 + $0xe0] sm:$0xff]  }
 0x73b   : > { %17818 = vmatmul.mubr.msk.bf16.vlgmr.msra.gmra.mrb[4].mxu0 %vm25028_vm15, %v5413_v35  ;;  %v5415_v35 = vpack.c.bf16 %v5411_v12, %v5410_v30  ;;  %v19888_v12 = vld [vmem:[#allocation7 + $0x70] sm:$0xff]  }
 0x73c   : > { %17821 = vmatprep.mubr.msk.bf16.mxu0 %vm25028_vm15, %v5414_v48  ;;  %17826 = vmatpush3.bf16.msra.mxu0 %v19882_v4  ;;  %v5655_v4 = vsel %vm21840_vm8, %v5647_v17, 0.0  ;;  %v5659_v48 = vsel %vm25214_vm10, %v22364_v1, 0.0  ;;  %v5661_v17 = vsel %vm21945_vm9, %v22374_v26, 0.0  ;;  %v19901_v1 = vld [vmem:[#allocation7 + $0xd8] sm:$0xff]  }
 0x73d   : > { %17827 = vmatprep.subr.bf16.mxu0 %v19883_v33  ;;  %v5663_v44 = vpack.c.bf16 %v5656_v25, %v5655_v4  ;;  %v5665_v30 = vpack.c.bf16 %v5660_v40, %v5659_v48  ;;  %v5662_v25 = vsel %vm21949_vm6, %v22376_v15, 0.0  ;;  %v19891_v40 = vld [vmem:[#allocation7 + $0x88] sm:$0xff]   ;;  %v6198_v15 = vld [vmem:[#allocation4 + $0x48] sm:$0xff] }
 0x73e   : > { %v5666_v4 = vpack.c.bf16 %v5662_v25, %v5661_v17  ;;  %v19895_v48 = vld [vmem:[#allocation7 + $0xa8] sm:$0xff]  }
 0x73f   : > { %v19899_v17 = vld [vmem:[#allocation7 + $0xc8] sm:$0xff]  }
 0x740   : > { %17828 = vmatpush3.bf16.msra.mxu0 %v19883_v33  ;;  %v5658_v33 = vsel %vm25213_vm7, %v22362_v62, 0.0  ;;  %v6072_v62 = vpack.c.bf16 %v6068_v57, %v6067_v37  ;;  %v19917_v37 = vld [vmem:[%s24907_s10 + $0x38] sm:$0xff]   ;;  %v19918_v57 = vld [vmem:[%s24907_s10 + $0x40] sm:$0xff]  }
 0x741   : > { %17829 = vmatprep.subr.bf16.mxu0 %v19884_v6  ;;  %v5664_v20 = vpack.c.bf16 %v5658_v33, %v5657_v36  ;;  %v19890_v36 = vld [vmem:[#allocation7 + $0x80] sm:$0xff]  }
 0x743   : > { %17822 = vmatmul.mubr.msk.bf16.gmra.mrb[8].mxu0 %vm25028_vm15, %v5415_v35  ;;  %v5794_v35 = vsel %vm21667_vm14, %v22304_v56, 0.0  ;;  %v5796_v56 = vsel %vm21761_vm1, %v22343_v53, 0.0  ;;  %v19893_v53 = vld [vmem:[#allocation7 + $0x98] sm:$0xff]  }
 0x744   : > { %17830 = vmatpush3.bf16.msra.mxu0 %v19884_v6  ;;  %17833 = vmatprep.mubr.msk.bf16.mxu0 %vm25028_vm15, %v5663_v44  ;;  %v19887_v6 = vld [vmem:[#allocation7 + $0x68] sm:$0xff]   ;;  %v19889_v44 = vld [vmem:[#allocation7 + $0x78] sm:$0xff]  }
 0x745   : > { %17831 = vmatprep.subr.bf16.mxu0 %v19885_v5 }
 0x748   : > { %17832 = vmatpush3.bf16.msra.mxu0 %v19885_v5  ;;  %v5793_v5 = vsel %vm21661_vm13, %v22310_v43, 0.0  ;;  %v5802_v43 = vpack.c.bf16 %v5796_v56, %v5795_v32  ;;  %vm25218_vm13 = vnez %v25166_v22  ;;  %v5800_v22 = vsel %vm25217_vm3, %v22476_v60, 0.0 }
 0x749   : > { %17841 = vmatprep.subr.bf16.mxu0 %v19886_v50  ;;  %v5797_v33 = vsel %vm25218_vm13, %v22349_v3, 0.0  ;;  %v5804_v18 = vpack.c.bf16 %v5800_v22, %v5799_v23  ;;  %v5931_v3 = vpack.c.bf16 %v22294_v38, %v22289_v52  ;;  %v19896_v52 = vld [vmem:[#allocation7 + $0xb0] sm:$0xff]   ;;  %v22495_v38 = vld [vmem:[#allocation4 + $0x41] sm:$0xff] }
 0x74a   : > { %v5934_v29 = vpack.c.bf16 %v22495_v38, %v22335_v41  ;;  %v6066_v41 = vsel %vm25215_vm11, %v22374_v26, 0.0  ;;  %v19903_v26 = vld [vmem:[#allocation7 + $0xe8] sm:$0xff]  }
 0x74b   : > { %17834 = vmatmul.mubr.msk.bf16.vlgmr.msra.gmra.mrb[4].mxu0 %vm25028_vm15, %v5664_v20  ;;  %v5803_v20 = vpack.c.bf16 %v5798_v42, %v5797_v33  ;;  %v6071_v25 = vpack.c.bf16 %v6066_v41, %v6065_v14  ;;  %v19911_v14 = vld [vmem:[%s24907_s10 + $0x8] sm:$0xff]   ;;  %v19912_v41 = vld [vmem:[%s24907_s10 + $0x10] sm:$0xff]  }
 0x74c   : > { %17837 = vmatprep.mubr.msk.bf16.mxu0 %vm25028_vm15, %v5665_v30  ;;  %17842 = vmatpush3.bf16.msra.mxu0 %v19886_v50  ;;  %v5801_v50 = vpack.c.bf16 %v5794_v35, %v5793_v5  ;;  %v6061_v30 = vsel %vm21840_vm8, %v22420_v2, 0.0  ;;  %v6070_v2 = vpack.c.bf16 %v6064_v7, %v6063_v11  ;;  %v19904_v35 = vld [vmem:[#allocation7 + $0xf0] sm:$0xff]   ;;  %v19926_v7 = vld [vmem:[%s24908_s11 + $0x20] sm:$0xff]   ;;  %v19927_v11 = vld [vmem:[%s24908_s11 + $0x28] sm:$0xff]  }
 0x74d   : > { %17843 = vmatprep.subr.bf16.mxu0 %v19887_v6 }
 0x750   : > { %17844 = vmatpush3.bf16.msra.mxu0 %v19887_v6  ;;  %v5933_v6 = vpack.c.bf16 %v22333_v31, %v22320_v8  ;;  %v19897_v8 = vld [vmem:[#allocation7 + $0xb8] sm:$0xff]   ;;  %v6069_v31 = vpack.c.bf16 %v6062_v27, %v6061_v30 }
 0x751   : > { %17845 = vmatprep.subr.bf16.mxu0 %v19888_v12 }
 0x753   : > { %17838 = vmatmul.mubr.msk.bf16.gmra.mrb[8].mxu0 %vm25028_vm15, %v5666_v4  ;;  %v6205_v4 = vsel %vm25216_vm2, %v22476_v60, 0.0 }
 0x754   : > { %17846 = vmatpush3.bf16.msra.mxu0 %v19888_v12  ;;  %17849 = vmatprep.mubr.msk.bf16.mxu0 %vm25028_vm15, %v5801_v50  ;;  %v19898_v12 = vld [vmem:[#allocation7 + $0xc0] sm:$0xff]   ;;  %v6340_v50 = vpack.c.bf16 %v6336_v58, %v22495_v38 }
 0x755   : > { %17847 = vmatprep.subr.bf16.mxu0 %v19889_v44 }
 0x758   : > { %17848 = vmatpush3.bf16.msra.mxu0 %v19889_v44  ;;  %v19905_v44 = vld [vmem:[#allocation7 + $0xf8] sm:$0xff]  }
 0x759   : > { %17857 = vmatprep.subr.bf16.mxu0 %v19890_v36 }
 0x75b   : > { %17850 = vmatmul.mubr.msk.bf16.vlgmr.msra.gmra.mrb[4].mxu0 %vm25028_vm15, %v5802_v43 }
 0x75c   : > { %17853 = vmatprep.mubr.msk.bf16.mxu0 %vm25028_vm15, %v5803_v20  ;;  %17858 = vmatpush3.bf16.msra.mxu0 %v19890_v36 }
 0x75d   : > { %17859 = vmatprep.subr.bf16.mxu0 %v19891_v40 }
 0x760   : > { %17860 = vmatpush3.bf16.msra.mxu0 %v19891_v40 }
 0x761   : > { %17861 = vmatprep.subr.bf16.mxu0 %v19892_v13 }
 0x763   : > { %17854 = vmatmul.mubr.msk.bf16.gmra.mrb[8].mxu0 %vm25028_vm15, %v5804_v18 }
 0x764   : > { %17862 = vmatpush3.bf16.msra.mxu0 %v19892_v13  ;;  %17865 = vmatprep.mubr.msk.bf16.mxu0 %vm25028_vm15, %v5931_v3 }
 0x765   : > { %17863 = vmatprep.subr.bf16.mxu0 %v19893_v53 }
 0x768   : > { %17864 = vmatpush3.bf16.msra.mxu0 %v19893_v53 }
 0x769   : > { %17873 = vmatprep.subr.bf16.mxu0 %v19894_v24 }
 0x76b   : > { %17866 = vmatmul.mubr.msk.bf16.vlgmr.msra.gmra.mrb[4].mxu0 %vm25028_vm15, %v5932_v45 }
 0x76c   : > { %17869 = vmatprep.mubr.msk.bf16.mxu0 %vm25028_vm15, %v5933_v6  ;;  %17874 = vmatpush3.bf16.msra.mxu0 %v19894_v24 }
 0x76d   : > { %17875 = vmatprep.subr.bf16.mxu0 %v19895_v48 }
 0x770   : > { %17876 = vmatpush3.bf16.msra.mxu0 %v19895_v48 }
 0x771   : > { %17877 = vmatprep.subr.bf16.mxu0 %v19896_v52 }
 0x773   : > { %17870 = vmatmul.mubr.msk.bf16.gmra.mrb[8].mxu0 %vm25028_vm15, %v5934_v29 }
 0x774   : > { %17878 = vmatpush3.bf16.msra.mxu0 %v19896_v52  ;;  %17881 = vmatprep.mubr.msk.bf16.mxu0 %vm25028_vm15, %v6069_v31 }
 0x775   : > { %17879 = vmatprep.subr.bf16.mxu0 %v19897_v8 }
 0x778   : > { %17880 = vmatpush3.bf16.msra.mxu0 %v19897_v8 }
 0x779   : > { %17889 = vmatprep.subr.bf16.mxu0 %v19898_v12 }
 0x77b   : > { %17882 = vmatmul.mubr.msk.bf16.vlgmr.msra.gmra.mrb[4].mxu0 %vm25028_vm15, %v6070_v2  ;;  %v19928_v2 = vld [vmem:[%s24908_s11 + $0x30] sm:$0xff]  }
 0x77c   : > { %17885 = vmatprep.mubr.msk.bf16.mxu0 %vm25028_vm15, %v6071_v25  ;;  %17890 = vmatpush3.bf16.msra.mxu0 %v19898_v12  ;;  %v19914_v25 = vld [vmem:[%s24907_s10 + $0x20] sm:$0xff]  }
 0x77d   : > { %17891 = vmatprep.subr.bf16.mxu0 %v19899_v17 }
 0x780   : > { %17892 = vmatpush3.bf16.msra.mxu0 %v19899_v17  ;;  %v19913_v17 = vld [vmem:[%s24907_s10 + $0x18] sm:$0xff]  }
 0x781   : > { %17893 = vmatprep.subr.bf16.mxu0 %v19900_v34 }
 0x783   : > { %17886 = vmatmul.mubr.msk.bf16.gmra.mrb[8].mxu0 %vm25028_vm15, %v6072_v62  ;;  %v19919_v62 = vld [vmem:[%s24907_s10 + $0x48] sm:$0xff]  }
 0x784   : > { %17894 = vmatpush3.bf16.msra.mxu0 %v19900_v34  ;;  %17897 = vmatprep.mubr.msk.bf16.mxu0 %vm25028_vm15, %v22322_v10  ;;  %v6206_v10 = vsel %vm25217_vm3, %v6198_v15, 0.0  ;;  %v19916_v34 = vld [vmem:[%s24907_s10 + $0x30] sm:$0xff]   ;;  %v19923_v15 = vld [vmem:[%s24907_s10 + $0x68] sm:$0xff]  }
 0x785   : > { %17895 = vmatprep.subr.bf16.mxu0 %v19901_v1  ;;  %v6210_v5 = vpack.c.bf16 %v6206_v10, %v6205_v4  ;;  %v19925_v4 = vld [vmem:[%s24907_s10 + $0x78] sm:$0xff]  }
 0x786   : > { %v19929_v10 = vld [vmem:[%s24908_s11 + $0x38] sm:$0xff]  }
 0x788   : > { %17896 = vmatpush3.bf16.msra.mxu0 %v19901_v1  ;;  %v19920_v1 = vld [vmem:[%s24907_s10 + $0x50] sm:$0xff]  }
 0x789   : > { %17905 = vmatprep.subr.bf16.mxu0 %v19902_v51 }
 0x78b   : > { %17898 = vmatmul.mubr.msk.bf16.vlgmr.msra.gmra.mrb[4].mxu0 %vm25028_vm15, %v22390_v28  ;;  %v19906_v28 = vld [vmem:[#allocation7 + $0x100] sm:$0xff]  }
 0x78c   : > { %17901 = vmatprep.mubr.msk.bf16.mxu0 %vm25028_vm15, %v22392_v63  ;;  %17906 = vmatpush3.bf16.msra.mxu0 %v19902_v51  ;;  %v19907_v63 = vld [vmem:[#allocation7 + $0x108] sm:$0xff]   ;;  %v19921_v51 = vld [vmem:[%s24907_s10 + $0x58] sm:$0xff]  }
 0x78d   : > { %17907 = vmatprep.subr.bf16.mxu0 %v19903_v26 }
 0x790   : > { %17908 = vmatpush3.bf16.msra.mxu0 %v19903_v26  ;;  %v19922_v26 = vld [vmem:[%s24907_s10 + $0x60] sm:$0xff]  }
 0x791   : > { %17909 = vmatprep.subr.bf16.mxu0 %v19904_v35 }
 0x793   : > { %17902 = vmatmul.mubr.msk.bf16.gmra.mrb[8].mxu0 %vm25028_vm15, %v6210_v5  ;;  %v7606_v5 = vld [vmem:[#allocation5 + $0x1] sm:$0xff] }
 0x794   : > { %17910 = vmatpush3.bf16.msra.mxu0 %v19904_v35  ;;  %17913 = vmatprep.mubr.msk.bf16.mxu0 %vm25028_vm15, %v22302_v47  ;;  %v19909_v47 = vld [vmem:[#allocation7 + $0x118] sm:$0xff]   ;;  %v19924_v35 = vld [vmem:[%s24907_s10 + $0x70] sm:$0xff]  }
 0x795   : > { %17911 = vmatprep.subr.bf16.mxu0 %v19905_v44 }
 0x798   : > { %17912 = vmatpush3.bf16.msra.mxu0 %v19905_v44  ;;  %v7607_v44 = vld [vmem:[#allocation5 + $0x9] sm:$0xff] }
 0x799   : > { %17921 = vmatprep.subr.bf16.mxu0 %v19906_v28 }
 0x79b   : > { %17914 = vmatmul.mubr.msk.bf16.vlgmr.msra.gmra.mrb[4].mxu0 %vm25028_vm15, %v22326_v0  ;;  %v6466_v0 = vld [vmem:[#allocation4 + $0x4a] sm:$0xff] }
 0x79c   : > { %17917 = vmatprep.mubr.msk.bf16.mxu0 %vm25028_vm15, %v22341_v46  ;;  %17922 = vmatpush3.bf16.msra.mxu0 %v19906_v28  ;;  %v6473_v46 = vsel %vm21945_vm9, %v6060_v39, 0.0  ;;  %v6474_v36 = vsel %vm21949_vm6, %v6466_v0, 0.0  ;;  %v19915_v39 = vld [vmem:[%s24907_s10 + $0x28] sm:$0xff]   ;;  %v7638_v28 = vpack.c.bf16 %v7607_v44, %v7606_v5  ;;  %v7042_v0 = vand.u32 15, %v21098_v61 }
 0x79d   : > { %17923 = vmatprep.subr.bf16.mxu0 %v19907_v63  ;;  %v6478_v32 = vpack.c.bf16 %v6474_v36, %v6473_v46  ;;  %v7056_v46 = vand.u32 15, %v21739_v19  ;;  %v19931_v19 = vld [vmem:[%s24908_s11 + $0x8] sm:$0xff]  }
 0x79e   : > { %vm22647_vm14 = vcmp.ge.s32.totalorder %v7042_v0, 1 }
 0x79f   : > { %vm22660_vm0 = vcmp.ge.s32.totalorder %v7056_v46, 1 }
 0x7a0   : > { %17924 = vmatpush3.bf16.msra.mxu0 %v19907_v63  ;;  %v19930_v63 = vld [vmem:[%s24908_s11] sm:$0xff]  }
 0x7a1   : > { %17925 = vmatprep.subr.bf16.mxu0 %v19908_v55 }
 0x7a3   : > { %17918 = vmatmul.mubr.msk.bf16.gmra.mrb[8].mxu0 %vm25028_vm15, %v6340_v50 }
 0x7a4   : > { %17926 = vmatpush3.bf16.msra.mxu0 %v19908_v55  ;;  %17929 = vmatprep.mubr.msk.bf16.mxu0 %vm25028_vm15, %v22403_v9  ;;  %v19910_v9 = vld [vmem:[%s24907_s10] sm:$0xff]  }
 0x7a5   : > { %17927 = vmatprep.subr.bf16.mxu0 %v19909_v47 }
 0x7a8   : > { %17928 = vmatpush3.bf16.msra.mxu0 %v19909_v47 }
 0x7ab   : > { %17930 = vmatmul.mubr.msk.bf16.vlgmr.msra.gmra.mrb[4].mxu0 %vm25028_vm15, %v22414_v59  ;;  %v16250_v59 = vld [vmem:[%s24906_s9] ss:$0 sm:$0xff] }
 0x7ac   : > { %17933 = vmatprep.mubr.msk.bf16.mxu0 %vm25028_vm15, %v22416_v54 }
 0x7b3   : > { %17934 = vmatmul.mubr.msk.bf16.gmra.mrb[8].mxu0 %vm25028_vm15, %v6478_v32  ;;  %v25219_v32 = vmov 0 }
 0x7b4   : > { %17945 = vmatprep.mubr.msk.bf16.mxu0 %vm25028_vm15, %v19910_v9  ;;  %v25220_v32 = vsel %vm22647_vm14, 4294967295, %v25219_v32  ;;  %v7049_v9 = vand.u32 15, %v21112_v21 }
 0x7b5   : > { %25221 = vst [vmem:[#allocation20_spill] sm:$0xff] %v25220_v32 }
 0x7b6   : > { %vm22676_vm1 = vcmp.lt.s32.totalorder %v7049_v9, 15 }
 0x87e   : > { %v17931_v54 = vpop.f32.mrb[4].mxu0 }
 0x87f   : > { %v6606_v56 = vadd.f32 %v17931_v54, %v16250_v59  ;;  %v6558_v49 = vpop.f32.mrb[5].mxu0 }
 0x880   : > { %v6604_v42 = vadd.f32 %v16250_v59, %v6558_v49  ;;  %v17932_v43 = vpop.f32.mrb[6].mxu0 }
 0x881   : > { %v6607_v16 = vadd.f32 %v17932_v43, %v16250_v59  ;;  %v6561_v33 = vpop.f32.mrb[7].mxu0  ;;  %v6614_v20 = vmax.f32 %v6606_v56, 0.0  ;;  %v25222_v56 = vld [vmem:[#allocation15_spill] sm:$0xff] }
 0x882   : > { %v6605_v40 = vadd.f32 %v16250_v59, %v6561_v33  ;;  %v6612_v13 = vmax.f32 %v6604_v42, 0.0  ;;  %v7063_v49 = vand.u32 15, %v25222_v56 }
 0x883   : > { %v6615_v60 = vmax.f32 %v6607_v16, 0.0 }
 0x884   : > { %v6613_v23 = vmax.f32 %v6605_v40, 0.0  ;;  %vm22708_vm6 = vcmp.lt.s32.totalorder %v7063_v49, 15 }
 0x885   : > { %v6653_v22 = vpack.c.bf16 %v6615_v60, %v6614_v20 }
 0x886   : > { %v6652_v18 = vpack.c.bf16 %v6613_v23, %v6612_v13  ;;  %v17935_v53 = vpop.f32.mrb[8].mxu0  ;;  %v25225_v23 = vld [vmem:[#allocation16_spill] sm:$0xff] }
 0x887   : > { %v6610_v3 = vadd.f32 %v17935_v53, %v16250_v59  ;;  %v6574_v24 = vpop.f32.mrb[9].mxu0 }
 0x888   : > { %v6608_v45 = vadd.f32 %v16250_v59, %v6574_v24  ;;  %v17936_v48 = vpop.f32.mrb[10].mxu0  ;;  %17937 = vmatprep.subr.bf16.mxu0 %v6652_v18 }
 0x889   : > { %v6611_v6 = vadd.f32 %v17936_v48, %v16250_v59  ;;  %v6577_v52 = vpop.f32.mrb[11].mxu0  ;;  %17938 = vmatpush3.bf16.msra.mxu0 %v6652_v18  ;;  %v6618_v30 = vmax.f32 %v6610_v3, 0.0  ;;  %v25227_v3 = vmov 0 }
 0x88a   : > { %v6609_v38 = vadd.f32 %v16250_v59, %v6577_v52  ;;  %17939 = vmatprep.subr.bf16.mxu0 %v6653_v22  ;;  %v6616_v29 = vmax.f32 %v6608_v45, 0.0  ;;  %v25228_v3 = vsel %vm22676_vm1, 4294967295, %v25227_v3 }
 0x88b   : > { %v6619_v27 = vmax.f32 %v6611_v6, 0.0  ;;  %v25232_v6 = vld [vmem:[#allocation17_spill] sm:$0xff] }
 0x88c   : > { %v6617_v8 = vmax.f32 %v6609_v38, 0.0  ;;  %v7077_v52 = vand.u32 15, %v25232_v6  ;;  %v22795_v6 = vld [vmem:[%s24908_s11 + $0x40] sm:$0xff]  }
 0x88d   : > { %v6655_v31 = vpack.c.bf16 %v6619_v27, %v6618_v30  ;;  %17940 = vmatpush3.bf16.msra.mxu0 %v6653_v22  ;;  %v7070_v22 = vand.u32 15, %v25225_v23 }
 0x88e   : > { %v6654_v12 = vpack.c.bf16 %v6617_v8, %v6616_v29  ;;  %vm22721_vm9 = vcmp.lt.s32.totalorder %v7077_v52, 15  ;;  %v7017_v52 = vadd.s32 88, %v21098_v61 }
 0x88f   : > { %vm22717_vm8 = vcmp.ge.s32.totalorder %v7070_v22, 1  ;;  %v25259_v22 = vmov 0 }
 0x890   : > { %17941 = vmatprep.subr.bf16.mxu0 %v6654_v12 }
 0x891   : > { %17942 = vmatpush3.bf16.msra.mxu0 %v6654_v12  ;;  %v25236_v12 = vmov 0 }
 0x892   : > { %17943 = vmatprep.subr.bf16.mxu0 %v6655_v31  ;;  %v25237_v12 = vsel %vm22708_vm6, 4294967295, %v25236_v12 }
 0x893   : > { %25238 = vst [vmem:[#allocation25_spill] sm:$0xff] %v25237_v12 }
 0x895   : > { %17944 = vmatpush3.bf16.msra.mxu0 %v6655_v31 }
 0x896   : > { %17977 = vmatprep.subr.bf16.mxu0 %v19926_v7 }
 0x898   : > { %17946 = vmatmul.mubr.msk.bf16.vlgmr.msra.gmra.mrb[12].mxu0 %vm25028_vm15, %v19911_v14 }
 0x899   : > { %17949 = vmatprep.mubr.msk.bf16.mxu0 %vm25028_vm15, %v19912_v41  ;;  %17978 = vmatpush3.bf16.msra.mxu0 %v19926_v7  ;;  %v25239_v7 = vld [vmem:[#allocation18_spill] sm:$0xff] }
 0x89a   : > { %17979 = vmatprep.subr.bf16.mxu0 %v19927_v11  ;;  %v7084_v14 = vand.u32 15, %v25239_v7 }
 0x89c   : > { %vm22750_vm12 = vcmp.ge.s32.totalorder %v7084_v14, 1  ;;  %v25265_v14 = vmov 0 }
 0x89d   : > { %17980 = vmatpush3.bf16.msra.mxu0 %v19927_v11  ;;  %v19932_v11 = vld [vmem:[%s24908_s11 + $0x10] sm:$0xff]  }
 0x89e   : > { %17981 = vmatprep.subr.bf16.mxu0 %v19928_v2 }
 0x8a0   : > { %17950 = vmatmul.mubr.msk.bf16.gmra.mrb[16].mxu0 %vm25028_vm15, %v19913_v17 }
 0x8a1   : > { %17953 = vmatprep.mubr.msk.bf16.mxu0 %vm25028_vm15, %v19914_v25  ;;  %17982 = vmatpush3.bf16.msra.mxu0 %v19928_v2  ;;  %v7014_v2 = vadd.s32 64, %v21098_v61  ;;  %v25242_v25 = vmov 0 }
 0x8a2   : > { %17983 = vmatprep.subr.bf16.mxu0 %v19929_v10  ;;  %v25243_v25 = vsel %vm22721_vm9, 4294967295, %v25242_v25 }
 0x8a3   : > { %25244 = vst [vmem:[#allocation18_spill] sm:$0xff] %v25243_v25  ;;  %v7098_v46 = vand.u32 15, %v7014_v2 }
 0x8a5   : > { %17984 = vmatpush3.bf16.msra.mxu0 %v19929_v10  ;;  %v7015_v10 = vadd.s32 72, %v21098_v61  ;;  %vm22799_vm4 = vcmp.ge.s32.totalorder %v7098_v46, 1 }
 0x8a6   : > { %18017 = vmatprep.subr.bf16.mxu0 %v19930_v63 }
 0x8a8   : > { %17954 = vmatmul.mubr.msk.bf16.gmra.mrb[20].mxu0 %vm25028_vm15, %v19915_v39 }
 0x8a9   : > { %17957 = vmatprep.mubr.msk.bf16.mxu0 %vm25028_vm15, %v19916_v34 }
 0x8b0   : > { %17958 = vmatmul.mubr.msk.bf16.gmra.mrb[24].mxu0 %vm25028_vm15, %v19917_v37  ;;  %v7016_v37 = vadd.s32 80, %v21098_v61 }
 0x8b1   : > { %17961 = vmatprep.mubr.msk.bf16.mxu0 %vm25028_vm15, %v19918_v57 }
 0x8b8   : > { %17962 = vmatmul.mubr.msk.bf16.gmra.mrb[28].mxu0 %vm25028_vm15, %v19919_v62  ;;  %v25246_v62 = vld [vmem:[#allocation19_spill] sm:$0xff] }
 0x8b9   : > { %17965 = vmatprep.mubr.msk.bf16.mxu0 %vm25028_vm15, %v19920_v1  ;;  %v7091_v1 = vand.u32 15, %v25246_v62 }
 0x8bb   : > { %vm22788_vm3 = vcmp.lt.s32.totalorder %v7091_v1, 15 }
 0x8bc   : > { %v25260_v22 = vsel %vm22788_vm3, 4294967295, %v25259_v22 }
 0x8bd   : > { %25261 = vst [vmem:[#allocation36_spill] sm:$0xff] %v25260_v22  ;;  %v7031_v22 = vadd.s32 200, %v21098_v61 }
 0x8c0   : > { %17966 = vmatmul.mubr.msk.bf16.gmra.mrb[32].mxu0 %vm25028_vm15, %v19921_v51 }
 0x8c1   : > { %17969 = vmatprep.mubr.msk.bf16.mxu0 %vm25028_vm15, %v19922_v26 }
 0x8c8   : > { %17970 = vmatmul.mubr.msk.bf16.gmra.mrb[36].mxu0 %vm25028_vm15, %v19923_v15 }
 0x8c9   : > { %17973 = vmatprep.mubr.msk.bf16.mxu0 %vm25028_vm15, %v19924_v35  ;;  %v19933_v35 = vld [vmem:[%s24908_s11 + $0x18] sm:$0xff]  }
 0x8d0   : > { %17974 = vmatmul.mubr.msk.bf16.gmra.mrb[40].mxu0 %vm25028_vm15, %v19925_v4 }
 0x8d1   : > { %17985 = vmatprep.mubr.msk.bf16.mxu0 %vm25028_vm15, %v7638_v28 }
 0x96b   : > { %v17947_v55 = vpop.f32.mrb[12].mxu0 }
 0x96c   : > { %6984 = vst.msk [vmem:[#allocation5 + $0x21] sm:$0xff] %vm25028_vm15, %v17947_v55  ;;  %v6818_v58 = vpop.f32.mrb[13].mxu0 }
 0x96d   : > { %6982 = vst.msk [vmem:[#allocation5 + $0x11] sm:$0xff] %vm25028_vm15, %v6818_v58  ;;  %v17948_v50 = vpop.f32.mrb[14].mxu0 }
 0x96e   : > { %6985 = vst.msk [vmem:[#allocation5 + $0x29] sm:$0xff] %vm25028_vm15, %v17948_v50  ;;  %v6821_v47 = vpop.f32.mrb[15].mxu0  ;;  %v25248_v50 = vmov 0 }
 0x96f   : > { %6983 = vst.msk [vmem:[#allocation5 + $0x19] sm:$0xff] %vm25028_vm15, %v6821_v47  ;;  %v25249_v50 = vsel %vm22750_vm12, 4294967295, %v25248_v50 }
 0x970   : > { %25250 = vst [vmem:[#allocation27_spill] sm:$0xff] %v25249_v50 }
 0x973   : > { %v17951_v36 = vpop.f32.mrb[16].mxu0  ;;  %v7610_v53 = vld [vmem:[#allocation5 + $0x21] sm:$0xff] }
 0x974   : > { %6988 = vst.msk [vmem:[#allocation5 + $0x41] sm:$0xff] %vm25028_vm15, %v17951_v36  ;;  %v6834_v59 = vpop.f32.mrb[17].mxu0  ;;  %v22653_v54 = vld [vmem:[#allocation5 + $0x10] sm:$0xff] }
 0x975   : > { %6986 = vst.msk [vmem:[#allocation5 + $0x31] sm:$0xff] %vm25028_vm15, %v6834_v59  ;;  %v17952_v42 = vpop.f32.mrb[18].mxu0  ;;  %v7608_v43 = vld [vmem:[#allocation5 + $0x11] sm:$0xff]  ;;  %v7611_v16 = vld [vmem:[#allocation5 + $0x29] sm:$0xff]  ;;  %v8611_v13 = vsel %vm22647_vm14, %v22653_v54, 0.0 }
 0x976   : > { %6989 = vst.msk [vmem:[#allocation5 + $0x49] sm:$0xff] %vm25028_vm15, %v17952_v42  ;;  %v6837_v21 = vpop.f32.mrb[19].mxu0  ;;  %v7609_v40 = vld [vmem:[#allocation5 + $0x19] sm:$0xff]  ;;  %v22688_v38 = vpack.c.bf16 %v7611_v16, %v7610_v53  ;;  %v22690_v30 = vld [vmem:[#allocation5 + $0x28] sm:$0xff]  ;;  %v7112_v42 = vand.u32 15, %v7016_v37 }
 0x977   : > { %v22665_v20 = vld [vmem:[#allocation5 + $0x18] sm:$0xff]  ;;  %v22667_v60 = vld [vmem:[#allocation5 + $0x20] sm:$0xff]  ;;  %6987 = vst.msk [vmem:[#allocation5 + $0x39] sm:$0xff] %vm25028_vm15, %v6837_v21  ;;  %v22674_v18 = vpack.c.bf16 %v7609_v40, %v7608_v43  ;;  %v7105_v21 = vand.u32 15, %v7015_v10 }
 0x978   : > { %v22680_v24 = vld [vmem:[#allocation5 + $0x12] sm:$0xff]  ;;  %v22682_v45 = vld [vmem:[#allocation5 + $0x1a] sm:$0xff]  ;;  %v22685_v48 = vpack.c.bf16 %v22665_v20, %v8611_v13  ;;  %25233 = vst [vmem:[#allocation17_spill] sm:$0xff] %v22688_v38  ;;  %v8613_v27 = vsel %vm22660_vm0, %v22667_v60, 0.0  ;;  %v22736_v4 = vld [vmem:[#allocation5 + $0x22] sm:$0xff]  ;;  %vm22805_vm5 = vcmp.ge.s32.totalorder %v7112_v42, 1 }
 0x979   : > { %25226 = vst [vmem:[#allocation15_spill] sm:$0xff] %v22674_v18  ;;  %25229 = vst [vmem:[#allocation16_spill] sm:$0xff] %v22680_v24  ;;  %v9288_v29 = vsel %vm22676_vm1, %v22682_v45, 0.0  ;;  %17986 = vmatmul.mubr.msk.bf16.vlgmr.msra.gmra.mrb[44].mxu0 %vm25028_vm15, %v22674_v18  ;;  %v22701_v8 = vpack.c.bf16 %v22690_v30, %v8613_v27  ;;  %v25266_v14 = vsel %vm22805_vm5, 4294967295, %v25265_v14  ;;  %vm22815_vm7 = vcmp.lt.s32.totalorder %v7105_v21, 15 }
 0x97a   : > { %25230 = vst [vmem:[#allocation21_spill] sm:$0xff] %v22682_v45  ;;  %25231 = vst [vmem:[#allocation22_spill] sm:$0xff] %v22685_v48  ;;  %v22704_v31 = vpack.c.bf16 %v9288_v29, %v22680_v24  ;;  %17989 = vmatprep.mubr.msk.bf16.mxu0 %vm25028_vm15, %v22688_v38  ;;  %18018 = vmatpush3.bf16.msra.mxu0 %v19930_v63  ;;  %v25262_v29 = vmov 0 }
 0x97b   : > { %25234 = vst [vmem:[#allocation23_spill] sm:$0xff] %v22701_v8  ;;  %v17955_v41 = vpop.f32.mrb[20].mxu0  ;;  %18019 = vmatprep.subr.bf16.mxu0 %v19931_v19  ;;  %25247 = vst [vmem:[#allocation19_spill] sm:$0xff] %v22736_v4  ;;  %v7614_v0 = vld [vmem:[#allocation5 + $0x41] sm:$0xff]  ;;  %v25263_v29 = vsel %vm22799_vm4, 4294967295, %v25262_v29 }
 0x97c   : > { %25235 = vst [vmem:[#allocation24_spill] sm:$0xff] %v22704_v31  ;;  %6992 = vst.msk [vmem:[#allocation5 + $0x61] sm:$0xff] %vm25028_vm15, %v17955_v41  ;;  %v6850_v39 = vpop.f32.mrb[21].mxu0  ;;  %v22726_v34 = vld [vmem:[#allocation5 + $0x30] sm:$0xff]  ;;  %v7020_v41 = vadd.s32 112, %v21098_v61 }
 0x97d   : > { %v22729_v57 = vld [vmem:[#allocation5 + $0x2a] sm:$0xff]  ;;  %6990 = vst.msk [vmem:[#allocation5 + $0x51] sm:$0xff] %vm25028_vm15, %v6850_v39  ;;  %v17956_v51 = vpop.f32.mrb[22].mxu0  ;;  %v8615_v55 = vsel %vm22717_vm8, %v22726_v34, 0.0  ;;  %25264 = vst [vmem:[#allocation37_spill] sm:$0xff] %v25263_v29  ;;  %v22813_v1 = vld [vmem:[#allocation5 + $0x42] sm:$0xff] }
 0x97e   : > { %25245 = vst [vmem:[#allocation26_spill] sm:$0xff] %v22729_v57  ;;  %v7612_v26 = vld [vmem:[#allocation5 + $0x31] sm:$0xff]  ;;  %v7615_v15 = vld [vmem:[#allocation5 + $0x49] sm:$0xff]  ;;  %6993 = vst.msk [vmem:[#allocation5 + $0x69] sm:$0xff] %vm25028_vm15, %v17956_v51  ;;  %v6853_v5 = vpop.f32.mrb[23].mxu0  ;;  %18020 = vmatpush3.bf16.msra.mxu0 %v19931_v19  ;;  %v9290_v58 = vsel %vm22708_vm6, %v22729_v57, 0.0 }
 0x97f   : > { %v7613_v44 = vld [vmem:[#allocation5 + $0x39] sm:$0xff]  ;;  %6991 = vst.msk [vmem:[#allocation5 + $0x59] sm:$0xff] %vm25028_vm15, %v6853_v5  ;;  %18021 = vmatprep.subr.bf16.mxu0 %v19932_v11  ;;  %v22764_v56 = vpack.c.bf16 %v7615_v15, %v7614_v0  ;;  %v22766_v49 = vld [vmem:[#allocation5 + $0x48] sm:$0xff]  ;;  %v22772_v16 = vpack.c.bf16 %v9290_v58, %v22736_v4  ;;  %v7018_v19 = vadd.s32 96, %v21098_v61  ;;  %25267 = vst [vmem:[#allocation38_spill] sm:$0xff] %v25266_v14  ;;  %v25270_v51 = vmov 0 }
 0x980   : > { %v22740_v28 = vld [vmem:[#allocation5 + $0x38] sm:$0xff]  ;;  %v22742_v63 = vld [vmem:[#allocation5 + $0x40] sm:$0xff]  ;;  %v22755_v47 = vpack.c.bf16 %v7613_v44, %v7612_v26  ;;  %25269 = vst [vmem:[#allocation40_spill] sm:$0xff] %v22813_v1  ;;  %v25271_v51 = vsel %vm22815_vm7, 4294967295, %v25270_v51  ;;  %v7034_v4 = vadd.s32 224, %v21098_v61  ;;  %v7035_v57 = vadd.s32 232, %v21098_v61 }
 0x981   : > { %v22757_v36 = vld [vmem:[#allocation5 + $0x32] sm:$0xff]  ;;  %v22759_v9 = vld [vmem:[#allocation5 + $0x3a] sm:$0xff]  ;;  %v22762_v59 = vpack.c.bf16 %v22740_v28, %v8615_v55  ;;  %25255 = vst [vmem:[#allocation32_spill] sm:$0xff] %v22764_v56  ;;  %v8617_v43 = vsel %vm22750_vm12, %v22742_v63, 0.0  ;;  %25256 = vst [vmem:[#allocation33_spill] sm:$0xff] %v22772_v16  ;;  %v7126_v62 = vand.u32 15, %v7018_v19 }
 0x982   : > { %25251 = vst [vmem:[#allocation28_spill] sm:$0xff] %v22755_v47  ;;  %25252 = vst [vmem:[#allocation29_spill] sm:$0xff] %v22757_v36  ;;  %17990 = vmatmul.mubr.msk.bf16.gmra.mrb[48].mxu0 %vm25028_vm15, %v22755_v47  ;;  %v22778_v40 = vpack.c.bf16 %v22766_v49, %v8617_v43  ;;  %v9292_v13 = vsel %vm22721_vm9, %v22759_v9, 0.0  ;;  %v7019_v43 = vadd.s32 104, %v21098_v61 }
 0x983   : > { %25253 = vst [vmem:[#allocation30_spill] sm:$0xff] %v22759_v9  ;;  %25254 = vst [vmem:[#allocation31_spill] sm:$0xff] %v22762_v59  ;;  %17993 = vmatprep.mubr.msk.bf16.mxu0 %vm25028_vm15, %v22764_v56  ;;  %18022 = vmatpush3.bf16.msra.mxu0 %v19932_v11  ;;  %v22786_v23 = vpack.c.bf16 %v9292_v13, %v22757_v36  ;;  %v17959_v53 = vpop.f32.mrb[24].mxu0  ;;  %v7618_v0 = vld [vmem:[#allocation5 + $0x61] sm:$0xff]  ;;  %vm22866_vm10 = vcmp.ge.s32.totalorder %v7126_v62, 1 }
 0x984   : > { %25257 = vst [vmem:[#allocation34_spill] sm:$0xff] %v22778_v40  ;;  %18023 = vmatprep.subr.bf16.mxu0 %v19933_v35  ;;  %6996 = vst.msk [vmem:[#allocation5 + $0x81] sm:$0xff] %vm25028_vm15, %v17959_v53  ;;  %v6866_v27 = vpop.f32.mrb[25].mxu0  ;;  %v22803_v7 = vld [vmem:[#allocation5 + $0x50] sm:$0xff]  ;;  %v7140_v53 = vand.u32 15, %v7020_v41 }
 0x985   : > { %25258 = vst [vmem:[#allocation35_spill] sm:$0xff] %v22786_v23  ;;  %v22810_v11 = vld [vmem:[#allocation5 + $0x4a] sm:$0xff]  ;;  %6994 = vst.msk [vmem:[#allocation5 + $0x71] sm:$0xff] %vm25028_vm15, %v6866_v27  ;;  %v17960_v2 = vpop.f32.mrb[26].mxu0  ;;  %v8619_v44 = vsel %vm22799_vm4, %v22803_v7, 0.0  ;;  %v22886_v31 = vld [vmem:[#allocation5 + $0x62] sm:$0xff] }
 0x986   : > { %25268 = vst [vmem:[#allocation39_spill] sm:$0xff] %v22810_v11  ;;  %v7616_v39 = vld [vmem:[#allocation5 + $0x51] sm:$0xff]  ;;  %v7619_v37 = vld [vmem:[#allocation5 + $0x69] sm:$0xff]  ;;  %25272 = vst [vmem:[#allocation41_spill] sm:$0xff] %v25271_v51  ;;  %v6869_v26 = vpop.f32.mrb[27].mxu0  ;;  %v9294_v55 = vsel %vm22788_vm3, %v22810_v11, 0.0 }
 0x987   : > { %6997 = vst.msk [vmem:[#allocation5 + $0x89] sm:$0xff] %vm25028_vm15, %v17960_v2  ;;  %v7617_v15 = vld [vmem:[#allocation5 + $0x59] sm:$0xff]  ;;  %18024 = vmatpush3.bf16.msra.mxu0 %v19933_v35  ;;  %6995 = vst.msk [vmem:[#allocation5 + $0x79] sm:$0xff] %vm25028_vm15, %v6869_v26  ;;  %v7119_v35 = vand.u32 15, %v7017_v52  ;;  %v22842_v21 = vpack.c.bf16 %v7619_v37, %v7618_v0  ;;  %v22844_v13 = vld [vmem:[#allocation5 + $0x68] sm:$0xff]  ;;  %v22850_v52 = vpack.c.bf16 %v9294_v55, %v22813_v1  ;;  %v7022_v2 = vadd.s32 128, %v21098_v61 }
 0x988   : > { %v22820_v10 = vld [vmem:[#allocation5 + $0x58] sm:$0xff]  ;;  %v22822_v5 = vld [vmem:[#allocation5 + $0x60] sm:$0xff]  ;;  %v22831_v58 = vpack.c.bf16 %v7617_v15, %v7616_v39  ;;  %18057 = vmatprep.subr.bf16.mxu0 %v22795_v6  ;;  %v25281_v15 = vmov 0  ;;  %v7021_v55 = vadd.s32 120, %v21098_v61  ;;  %vm22874_vm11 = vcmp.ge.s32.totalorder %v7140_v53, 1  ;;  %25291 = vst [vmem:[#allocation54_spill] sm:$0xff] %v22886_v31 }
 0x989   : > { %v22834_v46 = vld [vmem:[#allocation5 + $0x52] sm:$0xff]  ;;  %v22836_v42 = vld [vmem:[#allocation5 + $0x5a] sm:$0xff]  ;;  %v22840_v19 = vpack.c.bf16 %v22820_v10, %v8619_v44  ;;  %25277 = vst [vmem:[#allocation46_spill] sm:$0xff] %v22842_v21  ;;  %v8621_v27 = vsel %vm22805_vm5, %v22822_v5, 0.0  ;;  %25278 = vst [vmem:[#allocation47_spill] sm:$0xff] %v22850_v52  ;;  %v25282_v15 = vsel %vm22866_vm10, 4294967295, %v25281_v15 }
 0x98a   : > { %25273 = vst [vmem:[#allocation42_spill] sm:$0xff] %v22831_v58  ;;  %25274 = vst [vmem:[#allocation43_spill] sm:$0xff] %v22834_v46  ;;  %17994 = vmatmul.mubr.msk.bf16.gmra.mrb[52].mxu0 %vm25028_vm15, %v22831_v58  ;;  %v22856_v39 = vpack.c.bf16 %v22844_v13, %v8621_v27  ;;  %v9296_v37 = vsel %vm22815_vm7, %v22836_v42, 0.0  ;;  %v7133_v44 = vand.u32 15, %v7019_v43  ;;  %v25284_v52 = vmov 0 }
 0x98b   : > { %25275 = vst [vmem:[#allocation44_spill] sm:$0xff] %v22836_v42  ;;  %25276 = vst [vmem:[#allocation45_spill] sm:$0xff] %v22840_v19  ;;  %17997 = vmatprep.mubr.msk.bf16.mxu0 %vm25028_vm15, %v22842_v21  ;;  %v22864_v41 = vpack.c.bf16 %v9296_v37, %v22834_v46  ;;  %v17963_v26 = vpop.f32.mrb[28].mxu0  ;;  %v25285_v52 = vsel %vm22874_vm11, 4294967295, %v25284_v52  ;;  %v7024_v37 = vadd.s32 144, %v21098_v61  ;;  %vm22879_vm2 = vcmp.lt.s32.totalorder %v7119_v35, 15 }
 0x98c   : > { %25279 = vst [vmem:[#allocation48_spill] sm:$0xff] %v22856_v39  ;;  %25283 = vst [vmem:[#allocation50_spill] sm:$0xff] %v25282_v15  ;;  %v6882_v0 = vpop.f32.mrb[29].mxu0  ;;  %v22872_v27 = vld [vmem:[#allocation5 + $0x70] sm:$0xff]  ;;  %v7154_v16 = vand.u32 15, %v7022_v2  ;;  %v7023_v53 = vadd.s32 136, %v21098_v61 }
 0x98d   : > { %25280 = vst [vmem:[#allocation49_spill] sm:$0xff] %v22864_v41  ;;  %7000 = vst.msk [vmem:[#allocation5 + $0xa1] sm:$0xff] %vm25028_vm15, %v17963_v26  ;;  %v25287_v41 = vmov 0  ;;  %v22883_v62 = vld [vmem:[#allocation5 + $0x6a] sm:$0xff]  ;;  %v17964_v43 = vpop.f32.mrb[30].mxu0  ;;  %v7622_v38 = vld [vmem:[#allocation5 + $0x81] sm:$0xff] }
 0x98e   : > { %25286 = vst [vmem:[#allocation51_spill] sm:$0xff] %v25285_v52  ;;  %v25288_v41 = vsel %vm22879_vm2, 4294967295, %v25287_v41  ;;  %25290 = vst [vmem:[#allocation53_spill] sm:$0xff] %v22883_v62  ;;  %v7620_v23 = vld [vmem:[#allocation5 + $0x71] sm:$0xff]  ;;  %v7623_v26 = vld [vmem:[#allocation5 + $0x89] sm:$0xff]  ;;  %v6885_v21 = vpop.f32.mrb[31].mxu0 }
 0x98f   : > { %25289 = vst [vmem:[#allocation52_spill] sm:$0xff] %v25288_v41  ;;  %6998 = vst.msk [vmem:[#allocation5 + $0x91] sm:$0xff] %vm25028_vm15, %v6882_v0  ;;  %v7621_v58 = vld [vmem:[#allocation5 + $0x79] sm:$0xff]  ;;  %v8623_v0 = vsel %vm22866_vm10, %v22872_v27, 0.0  ;;  %v9298_v2 = vsel %vm22879_vm2, %v22883_v62, 0.0  ;;  %vm22903_vm13 = vcmp.lt.s32.totalorder %v7133_v44, 15  ;;  %v22914_v59 = vpack.c.bf16 %v7623_v26, %v7622_v38 }
 0x990   : > { %7001 = vst.msk [vmem:[#allocation5 + $0xa9] sm:$0xff] %vm25028_vm15, %v17964_v43  ;;  %v22890_v35 = vld [vmem:[#allocation5 + $0x78] sm:$0xff]  ;;  %v22892_v56 = vld [vmem:[#allocation5 + $0x80] sm:$0xff]  ;;  %6999 = vst.msk [vmem:[#allocation5 + $0x99] sm:$0xff] %vm25028_vm15, %v6885_v21  ;;  %v22901_v47 = vpack.c.bf16 %v7621_v58, %v7620_v23  ;;  %v25293_v43 = vmov 0  ;;  %v7147_v18 = vand.u32 15, %v7021_v55  ;;  %v22922_v58 = vpack.c.bf16 %v9298_v2, %v22886_v31 }
 0x991   : > { %v25294_v43 = vsel %vm22903_vm13, 4294967295, %v25293_v43  ;;  %v22907_v39 = vld [vmem:[#allocation5 + $0x72] sm:$0xff]  ;;  %v22909_v19 = vld [vmem:[#allocation5 + $0x7a] sm:$0xff]  ;;  %v22912_v40 = vpack.c.bf16 %v22890_v35, %v8623_v0  ;;  %25299 = vst [vmem:[#allocation60_spill] sm:$0xff] %v22914_v59  ;;  %v22916_v8 = vld [vmem:[#allocation5 + $0x88] sm:$0xff]  ;;  %v7168_v21 = vand.u32 15, %v7024_v37 }
 0x992   : > { %25292 = vst [vmem:[#allocation55_spill] sm:$0xff] %v22901_v47  ;;  %25295 = vst [vmem:[#allocation56_spill] sm:$0xff] %v25294_v43  ;;  %v8625_v23 = vsel %vm22874_vm11, %v22892_v56, 0.0  ;;  %17998 = vmatmul.mubr.msk.bf16.gmra.mrb[56].mxu0 %vm25028_vm15, %v22901_v47  ;;  %v7026_v44 = vadd.s32 160, %v21098_v61  ;;  %v7161_v55 = vand.u32 15, %v7023_v53  ;;  %v9300_v38 = vsel %vm22903_vm13, %v22909_v19, 0.0 }
 0x993   : > { %25296 = vst [vmem:[#allocation57_spill] sm:$0xff] %v22907_v39  ;;  %25297 = vst [vmem:[#allocation58_spill] sm:$0xff] %v22909_v19  ;;  %v22928_v0 = vpack.c.bf16 %v22916_v8, %v8625_v23  ;;  %18001 = vmatprep.mubr.msk.bf16.mxu0 %vm25028_vm15, %v22914_v59  ;;  %v22936_v37 = vpack.c.bf16 %v9300_v38, %v22907_v39  ;;  %v17967_v26 = vpop.f32.mrb[32].mxu0  ;;  %vm22938_vm2 = vcmp.ge.s32.totalorder %v7154_v16, 1  ;;  %v25303_v2 = vmov 0  ;;  %v22958_v48 = vld [vmem:[#allocation5 + $0x82] sm:$0xff] }
 0x994   : > { %25298 = vst [vmem:[#allocation59_spill] sm:$0xff] %v22912_v40  ;;  %25300 = vst [vmem:[#allocation61_spill] sm:$0xff] %v22922_v58  ;;  %v25304_v2 = vsel %vm22938_vm2, 4294967295, %v25303_v2  ;;  %v7025_v53 = vadd.s32 152, %v21098_v61  ;;  %v6898_v23 = vpop.f32.mrb[33].mxu0  ;;  %vm22946_vm7 = vcmp.ge.s32.totalorder %v7168_v21, 1 }
 0x995   : > { %25301 = vst [vmem:[#allocation62_spill] sm:$0xff] %v22928_v0  ;;  %25302 = vst [vmem:[#allocation63_spill] sm:$0xff] %v22936_v37  ;;  %v25306_v47 = vmov 0  ;;  %v7028_v59 = vadd.s32 176, %v21098_v61  ;;  %vm22951_vm13 = vcmp.lt.s32.totalorder %v7147_v18, 15  ;;  %v25309_v38 = vmov 0 }
 0x996   : > { %25305 = vst [vmem:[#allocation64_spill] sm:$0xff] %v25304_v2  ;;  %7004 = vst.msk [vmem:[#allocation5 + $0xc1] sm:$0xff] %vm25028_vm15, %v17967_v26  ;;  %v22944_v58 = vld [vmem:[#allocation5 + $0x90] sm:$0xff]  ;;  %v25307_v47 = vsel %vm22946_vm7, 4294967295, %v25306_v47  ;;  %v25310_v38 = vsel %vm22951_vm13, 4294967295, %v25309_v38  ;;  %v17968_v37 = vpop.f32.mrb[34].mxu0 }
 0x997   : > { %25308 = vst [vmem:[#allocation65_spill] sm:$0xff] %v25307_v47  ;;  %25311 = vst [vmem:[#allocation66_spill] sm:$0xff] %v25310_v38  ;;  %v22955_v16 = vld [vmem:[#allocation5 + $0x8a] sm:$0xff]  ;;  %v7182_v40 = vand.u32 15, %v7026_v44  ;;  %vm22960_vm3 = vcmp.lt.s32.totalorder %v7161_v55, 15  ;;  %v25314_v21 = vmov 0 }
 0x998   : > { %25312 = vst [vmem:[#allocation67_spill] sm:$0xff] %v22955_v16  ;;  %7002 = vst.msk [vmem:[#allocation5 + $0xb1] sm:$0xff] %vm25028_vm15, %v6898_v23  ;;  %v7624_v0 = vld [vmem:[#allocation5 + $0x91] sm:$0xff]  ;;  %v7627_v26 = vld [vmem:[#allocation5 + $0xa9] sm:$0xff]  ;;  %v25315_v21 = vsel %vm22960_vm3, 4294967295, %v25314_v21  ;;  %v6901_v18 = vpop.f32.mrb[35].mxu0 }
 0x999   : > { %25313 = vst [vmem:[#allocation68_spill] sm:$0xff] %v22958_v48  ;;  %25316 = vst [vmem:[#allocation69_spill] sm:$0xff] %v25315_v21  ;;  %v7625_v39 = vld [vmem:[#allocation5 + $0x99] sm:$0xff]  ;;  %v8627_v23 = vsel %vm22938_vm2, %v22944_v58, 0.0  ;;  %v9302_v44 = vsel %vm22951_vm13, %v22955_v16, 0.0  ;;  %v7626_v46 = vld [vmem:[#allocation5 + $0xa1] sm:$0xff] }
 0x99a   : > { %7005 = vst.msk [vmem:[#allocation5 + $0xc9] sm:$0xff] %vm25028_vm15, %v17968_v37  ;;  %v22965_v19 = vld [vmem:[#allocation5 + $0x98] sm:$0xff]  ;;  %v22967_v31 = vld [vmem:[#allocation5 + $0xa0] sm:$0xff]  ;;  %7003 = vst.msk [vmem:[#allocation5 + $0xb9] sm:$0xff] %vm25028_vm15, %v6901_v18  ;;  %v22976_v55 = vpack.c.bf16 %v7625_v39, %v7624_v0  ;;  %v7175_v37 = vand.u32 15, %v7025_v53  ;;  %v7027_v41 = vadd.s32 168, %v21098_v61  ;;  %v22986_v1 = vpack.c.bf16 %v7627_v26, %v7626_v46 }
 0x99b   : > { %v22978_v43 = vld [vmem:[#allocation5 + $0x92] sm:$0xff]  ;;  %v22980_v62 = vld [vmem:[#allocation5 + $0x9a] sm:$0xff]  ;;  %v22984_v42 = vpack.c.bf16 %v22965_v19, %v8627_v23  ;;  %v22988_v36 = vld [vmem:[#allocation5 + $0xa8] sm:$0xff]  ;;  %v7196_v16 = vand.u32 15, %v7028_v59  ;;  %v8629_v39 = vsel %vm22946_vm7, %v22967_v31, 0.0  ;;  %v22994_v0 = vpack.c.bf16 %v9302_v44, %v22958_v48  ;;  %v17971_v26 = vpop.f32.mrb[36].mxu0 }
 0x99c   : > { %25317 = vst [vmem:[#allocation70_spill] sm:$0xff] %v22976_v55  ;;  %25318 = vst [vmem:[#allocation71_spill] sm:$0xff] %v22978_v43  ;;  %18002 = vmatmul.mubr.msk.bf16.gmra.mrb[60].mxu0 %vm25028_vm15, %v22976_v55  ;;  %v7030_v53 = vadd.s32 192, %v21098_v61  ;;  %v23000_v18 = vpack.c.bf16 %v22988_v36, %v8629_v39  ;;  %v9304_v46 = vsel %vm22960_vm3, %v22980_v62, 0.0  ;;  %vm23010_vm13 = vcmp.ge.s32.totalorder %v7182_v40, 1  ;;  %v6914_v39 = vpop.f32.mrb[37].mxu0 }
 0x99d   : > { %25319 = vst [vmem:[#allocation72_spill] sm:$0xff] %v22980_v62  ;;  %25320 = vst [vmem:[#allocation73_spill] sm:$0xff] %v22984_v42  ;;  %18005 = vmatprep.mubr.msk.bf16.mxu0 %vm25028_vm15, %v22986_v1  ;;  %v23008_v59 = vpack.c.bf16 %v9304_v46, %v22978_v43  ;;  %v25325_v23 = vmov 0  ;;  %v7189_v44 = vand.u32 15, %v7027_v41  ;;  %vm23017_vm9 = vcmp.ge.s32.totalorder %v7196_v16, 1  ;;  %v17972_v41 = vpop.f32.mrb[38].mxu0 }
 0x99e   : > { %25321 = vst [vmem:[#allocation74_spill] sm:$0xff] %v22986_v1  ;;  %25322 = vst [vmem:[#allocation75_spill] sm:$0xff] %v22994_v0  ;;  %v25326_v23 = vsel %vm23010_vm13, 4294967295, %v25325_v23  ;;  %v25328_v55 = vmov 0  ;;  %vm23021_vm3 = vcmp.lt.s32.totalorder %v7175_v37, 15  ;;  %v25330_v1 = vmov 0 }
 0x99f   : > { %25323 = vst [vmem:[#allocation76_spill] sm:$0xff] %v23000_v18  ;;  %25324 = vst [vmem:[#allocation77_spill] sm:$0xff] %v23008_v59  ;;  %v23015_v0 = vld [vmem:[#allocation5 + $0xb0] sm:$0xff]  ;;  %v25329_v55 = vsel %vm23017_vm9, 4294967295, %v25328_v55  ;;  %v25331_v1 = vsel %vm23021_vm3, 4294967295, %v25330_v1  ;;  %v7029_v40 = vadd.s32 184, %v21098_v61 }
 0x9a0   : > { %25327 = vst [vmem:[#allocation78_spill] sm:$0xff] %v25326_v23  ;;  %7008 = vst.msk [vmem:[#allocation5 + $0xe1] sm:$0xff] %vm25028_vm15, %v17971_v26  ;;  %v23025_v46 = vld [vmem:[#allocation5 + $0xaa] sm:$0xff]  ;;  %v7210_v18 = vand.u32 15, %v7030_v53  ;;  %v7032_v42 = vadd.s32 208, %v21098_v61  ;;  %v23030_v16 = vld [vmem:[#allocation5 + $0xa2] sm:$0xff] }
 0x9a1   : > { %25332 = vst [vmem:[#allocation79_spill] sm:$0xff] %v25331_v1  ;;  %25333 = vst [vmem:[#allocation80_spill] sm:$0xff] %v23025_v46  ;;  %v7628_v59 = vld [vmem:[#allocation5 + $0xb1] sm:$0xff]  ;;  %v7631_v26 = vld [vmem:[#allocation5 + $0xc9] sm:$0xff]  ;;  %v6917_v37 = vpop.f32.mrb[39].mxu0  ;;  %v9306_v53 = vsel %vm23021_vm3, %v23025_v46, 0.0 }
 0x9a2   : > { %7006 = vst.msk [vmem:[#allocation5 + $0xd1] sm:$0xff] %vm25028_vm15, %v6914_v39  ;;  %25334 = vst [vmem:[#allocation81_spill] sm:$0xff] %v23030_v16  ;;  %v7629_v43 = vld [vmem:[#allocation5 + $0xb9] sm:$0xff]  ;;  %v8631_v39 = vsel %vm23010_vm13, %v23015_v0, 0.0  ;;  %v7630_v38 = vld [vmem:[#allocation5 + $0xc1] sm:$0xff]  ;;  %vm23046_vm6 = vcmp.lt.s32.totalorder %v7189_v44, 15  ;;  %v23066_v44 = vpack.c.bf16 %v9306_v53, %v23030_v16 }
 0x9a3   : > { %7009 = vst.msk [vmem:[#allocation5 + $0xe9] sm:$0xff] %vm25028_vm15, %v17972_v41  ;;  %v23033_v62 = vld [vmem:[#allocation5 + $0xb8] sm:$0xff]  ;;  %v23035_v48 = vld [vmem:[#allocation5 + $0xc0] sm:$0xff]  ;;  %7007 = vst.msk [vmem:[#allocation5 + $0xd9] sm:$0xff] %vm25028_vm15, %v6917_v37  ;;  %v23044_v21 = vpack.c.bf16 %v7629_v43, %v7628_v59  ;;  %v25336_v41 = vmov 0  ;;  %v23058_v1 = vpack.c.bf16 %v7631_v26, %v7630_v38  ;;  %v7203_v43 = vand.u32 15, %v7029_v40 }
 0x9a4   : > { %v25337_v41 = vsel %vm23046_vm6, 4294967295, %v25336_v41  ;;  %v23050_v51 = vld [vmem:[#allocation5 + $0xb2] sm:$0xff]  ;;  %v23052_v11 = vld [vmem:[#allocation5 + $0xba] sm:$0xff]  ;;  %v23056_v9 = vpack.c.bf16 %v23033_v62, %v8631_v39  ;;  %v23060_v46 = vld [vmem:[#allocation5 + $0xc8] sm:$0xff]  ;;  %v8633_v59 = vsel %vm23017_vm9, %v23035_v48, 0.0  ;;  %25343 = vst [vmem:[#allocation88_spill] sm:$0xff] %v23066_v44 }
 0x9a5   : > { %25335 = vst [vmem:[#allocation82_spill] sm:$0xff] %v23044_v21  ;;  %25338 = vst [vmem:[#allocation83_spill] sm:$0xff] %v25337_v41  ;;  %18006 = vmatmul.mubr.msk.bf16.gmra.mrb[64].mxu0 %vm25028_vm15, %v23044_v21  ;;  %v7224_v37 = vand.u32 15, %v7032_v42  ;;  %v23072_v39 = vpack.c.bf16 %v23060_v46, %v8633_v59  ;;  %v9308_v38 = vsel %vm23046_vm6, %v23052_v11, 0.0  ;;  %v17975_v26 = vpop.f32.mrb[40].mxu0  ;;  %v7217_v53 = vand.u32 15, %v7031_v22 }
 0x9a6   : > { %25339 = vst [vmem:[#allocation84_spill] sm:$0xff] %v23050_v51  ;;  %25340 = vst [vmem:[#allocation85_spill] sm:$0xff] %v23052_v11  ;;  %18009 = vmatprep.mubr.msk.bf16.mxu0 %vm25028_vm15, %v23058_v1  ;;  %v23080_v40 = vpack.c.bf16 %v9308_v38, %v23050_v51  ;;  %v6930_v42 = vpop.f32.mrb[41].mxu0  ;;  %vm23083_vm3 = vcmp.ge.s32.totalorder %v7210_v18, 1  ;;  %v25346_v44 = vmov 0  ;;  %vm23089_vm1 = vcmp.lt.s32.totalorder %v7203_v43, 15 }
 0x9a7   : > { %25341 = vst [vmem:[#allocation86_spill] sm:$0xff] %v23056_v9  ;;  %25342 = vst [vmem:[#allocation87_spill] sm:$0xff] %v23058_v1  ;;  %v25347_v44 = vsel %vm23083_vm3, 4294967295, %v25346_v44  ;;  %v25348_v21 = vmov 0  ;;  %v7033_v38 = vadd.s32 216, %v21098_v61  ;;  %v17976_v22 = vpop.f32.mrb[42].mxu0 }
 0x9a8   : > { %25344 = vst [vmem:[#allocation89_spill] sm:$0xff] %v23072_v39  ;;  %25345 = vst [vmem:[#allocation90_spill] sm:$0xff] %v23080_v40  ;;  %v25349_v21 = vsel %vm23089_vm1, 4294967295, %v25348_v21  ;;  %vm23097_vm6 = vcmp.ge.s32.totalorder %v7224_v37, 1  ;;  %v25352_v18 = vmov 0  ;;  %v7238_v1 = vand.u32 15, %v7034_v4 }
 0x9a9   : > { %7012 = vst.msk [vmem:[#allocation5 + $0x101] sm:$0xff] %vm25028_vm15, %v17975_v26  ;;  %v23087_v59 = vld [vmem:[#allocation5 + $0xd0] sm:$0xff]  ;;  %25350 = vst [vmem:[#allocation91_spill] sm:$0xff] %v25349_v21  ;;  %v25353_v18 = vsel %vm23097_vm6, 4294967295, %v25352_v18  ;;  %v23101_v9 = vld [vmem:[#allocation5 + $0xc2] sm:$0xff]  ;;  %v6933_v43 = vpop.f32.mrb[43].mxu0 }
 0x9aa   : > { %v23093_v39 = vld [vmem:[#allocation5 + $0xca] sm:$0xff]  ;;  %7010 = vst.msk [vmem:[#allocation5 + $0xf1] sm:$0xff] %vm25028_vm15, %v6930_v42  ;;  %25354 = vst [vmem:[#allocation93_spill] sm:$0xff] %v23101_v9  ;;  %v7633_v51 = vld [vmem:[#allocation5 + $0xd9] sm:$0xff]  ;;  %v8635_v42 = vsel %vm23083_vm3, %v23087_v59, 0.0  ;;  %vm23117_vm9 = vcmp.lt.s32.totalorder %v7217_v53, 15 }
 0x9ab   : > { %25351 = vst [vmem:[#allocation92_spill] sm:$0xff] %v23093_v39  ;;  %v7632_v40 = vld [vmem:[#allocation5 + $0xd1] sm:$0xff]  ;;  %v7635_v26 = vld [vmem:[#allocation5 + $0xe9] sm:$0xff]  ;;  %7013 = vst.msk [vmem:[#allocation5 + $0x109] sm:$0xff] %vm25028_vm15, %v17976_v22  ;;  %v9310_v37 = vsel %vm23089_vm1, %v23093_v39, 0.0  ;;  %v25356_v22 = vmov 0 }
 0x9ac   : > { %v23104_v11 = vld [vmem:[#allocation5 + $0xd8] sm:$0xff]  ;;  %v23106_v16 = vld [vmem:[#allocation5 + $0xe0] sm:$0xff]  ;;  %7011 = vst.msk [vmem:[#allocation5 + $0xf9] sm:$0xff] %vm25028_vm15, %v6933_v43  ;;  %v23115_v4 = vpack.c.bf16 %v7633_v51, %v7632_v40  ;;  %v25357_v22 = vsel %vm23117_vm9, 4294967295, %v25356_v22  ;;  %v23131_v43 = vld [vmem:[#allocation5 + $0xe8] sm:$0xff]  ;;  %v7231_v51 = vand.u32 15, %v7033_v38  ;;  %v23137_v53 = vpack.c.bf16 %v9310_v37, %v23101_v9 }
 0x9ad   : > { %v7634_v41 = vld [vmem:[#allocation5 + $0xe1] sm:$0xff]  ;;  %v23121_v24 = vld [vmem:[#allocation5 + $0xd2] sm:$0xff]  ;;  %v23127_v12 = vpack.c.bf16 %v23104_v11, %v8635_v42  ;;  %v8637_v40 = vsel %vm23097_vm6, %v23106_v16, 0.0  ;;  %v7245_v37 = vand.u32 15, %v7035_v57  ;;  %vm23154_vm1 = vcmp.ge.s32.totalorder %v7238_v1, 1 }
 0x9ae   : > { %25355 = vst [vmem:[#allocation94_spill] sm:$0xff] %v23115_v4  ;;  %25358 = vst [vmem:[#allocation95_spill] sm:$0xff] %v23121_v24  ;;  %v23123_v25 = vld [vmem:[#allocation5 + $0xda] sm:$0xff]  ;;  %v23129_v21 = vpack.c.bf16 %v7635_v26, %v7634_v41  ;;  %18010 = vmatmul.mubr.msk.bf16.gmra.mrb[68].mxu0 %vm25028_vm15, %v23115_v4  ;;  %v23142_v45 = vpack.c.bf16 %v23131_v43, %v8637_v40  ;;  %v7423_v26 = vld [vmem:[#allocation5 + $0x8] sm:$0xff]  ;;  %vm23160_vm3 = vcmp.lt.s32.totalorder %v7231_v51, 15  ;;  %v25367_v4 = vmov 0 }
 0x9af   : > { %25359 = vst [vmem:[#allocation96_spill] sm:$0xff] %v23123_v25  ;;  %25360 = vst [vmem:[#allocation97_spill] sm:$0xff] %v23127_v12  ;;  %v7422_v39 = vld [vmem:[#allocation5] sm:$0xff]  ;;  %v9312_v41 = vsel %vm23117_vm9, %v23123_v25, 0.0  ;;  %v25368_v4 = vsel %vm23160_vm3, 4294967295, %v25367_v4  ;;  %v25372_v9 = vmov 0 }
 0x9b0   : > { %25361 = vst [vmem:[#allocation98_spill] sm:$0xff] %v23129_v21  ;;  %25362 = vst [vmem:[#allocation99_spill] sm:$0xff] %v23137_v53  ;;  %18013 = vmatprep.mubr.msk.bf16.mxu0 %vm25028_vm15, %v23129_v21  ;;  %v23150_v38 = vpack.c.bf16 %v9312_v41, %v23121_v24  ;;  %v7550_v42 = vsel %vm22647_vm14, %v7422_v39, 0.0  ;;  %v25365_v53 = vmov 0  ;;  %v23166_v41 = vld [vmem:[#allocation5 + $0xe2] sm:$0xff]  ;;  %vm23186_vm15 = vcmp.lt.s32.totalorder %v7245_v37, 15 }
 0x9b1   : > { %25363 = vst [vmem:[#allocation100_spill] sm:$0xff] %v23142_v45  ;;  %v25366_v53 = vsel %vm23154_vm1, 4294967295, %v25365_v53  ;;  %v23158_v40 = vld [vmem:[#allocation5 + $0xf0] sm:$0xff]  ;;  %v7582_v32 = vpack.c.bf16 %v7423_v26, %v7550_v42  ;;  %v25373_v9 = vsel %vm23186_vm15, 4294967295, %v25372_v9  ;;  %vm25376_vm14 = vcmask 523264  }
 0x9b2   : > { %25364 = vst [vmem:[#allocation101_spill] sm:$0xff] %v23150_v38  ;;  %v23164_v45 = vld [vmem:[#allocation5 + $0xea] sm:$0xff]  ;;  %v8639_v39 = vsel %vm23154_vm1, %v23158_v40, 0.0  ;;  %v9667_v24 = vsel %vm23097_vm6, %v23158_v40, 0.0 }
 0x9b3   : > { %25369 = vst [vmem:[#allocation102_spill] sm:$0xff] %v23164_v45  ;;  %v7636_v21 = vld [vmem:[#allocation5 + $0xf1] sm:$0xff]  ;;  %v9314_v57 = vsel %vm23160_vm3, %v23164_v45, 0.0  ;;  %v7637_v1 = vld [vmem:[#allocation5 + $0xf9] sm:$0xff]  ;;  %v23208_v37 = vld [vmem:[#allocation5 + $0x108] sm:$0xff] }
 0x9b4   : > { %v23174_v38 = vld [vmem:[#allocation5 + $0xf8] sm:$0xff]  ;;  %v23179_v12 = vpack.c.bf16 %v9314_v57, %v23166_v41  ;;  %v23184_v25 = vpack.c.bf16 %v7637_v1, %v7636_v21  ;;  %v23195_v42 = vld [vmem:[#allocation5 + $0x100] sm:$0xff]  ;;  %v23213_v1 = vld [vmem:[#allocation5 + $0x10a] sm:$0xff] }
 0x9b5   : > { %v23176_v51 = vld [vmem:[#allocation5 + $0xf2] sm:$0xff]  ;;  %v23190_v45 = vld [vmem:[#allocation5 + $0xfa] sm:$0xff]  ;;  %v23193_v26 = vpack.c.bf16 %v23174_v38, %v8639_v39  ;;  %25374 = vst [vmem:[#allocation105_spill] sm:$0xff] %v23195_v42  ;;  %v23198_v57 = vpack.c.bf16 %v23174_v38, %v9667_v24  ;;  %v9669_v21 = vsel %vm23154_vm1, %v23195_v42, 0.0  ;;  %vm25378_vm3 = vmmov %vm25376_vm14  ;;  %v7552_v42 = vsel %vm22660_vm0, %v22653_v54, 0.0 }
 0x9b6   : > { %25370 = vst [vmem:[#allocation103_spill] sm:$0xff] %v23179_v12  ;;  %25371 = vst [vmem:[#allocation104_spill] sm:$0xff] %v23184_v25  ;;  %v9316_v12 = vsel %vm23186_vm15, %v23190_v45, 0.0  ;;  %18014 = vmatmul.mubr.msk.bf16.gmra.mrb[72].mxu0 %vm25376_vm14, %v23184_v25  ;;  %v23216_v24 = vld [vmem:[#allocation5 + $0x102] sm:$0xff]  ;;  %v10346_v25 = vsel %vm23186_vm15, %v23213_v1, 0.0 }
 0x9b7   : > { %25375 = vst [vmem:[#allocation106_spill] sm:$0xff] %v23198_v57  ;;  %v23211_v39 = vpack.c.bf16 %v9316_v12, %v23176_v51  ;;  %18025 = vmatprep.mubr.msk.bf16.mxu0 %vm25378_vm3, %v7582_v32  ;;  %v23219_v57 = vpack.c.bf16 %v23208_v37, %v9669_v21  ;;  %v7554_v12 = vsel %vm22717_vm8, %v22667_v60, 0.0  ;;  %v7583_v32 = vpack.c.bf16 %v22665_v20, %v7552_v42  ;;  %v19935_v21 = vld [vmem:[%s24908_s11 + $0x48] sm:$0xff]   ;;  %vm25380_vm14 = vmmov %vm25378_vm3  ;;  %v19936_v54 = vld [vmem:[%s24908_s11 + $0x50] sm:$0xff]  }
 0x9b8   : > { %v7556_v20 = vsel %vm22750_vm12, %v22726_v34, 0.0  ;;  %v7558_v60 = vsel %vm22799_vm4, %v22742_v63, 0.0  ;;  %v19938_v34 = vld [vmem:[%s24908_s11 + $0x60] sm:$0xff]   ;;  %v7562_v63 = vsel %vm22866_vm10, %v22822_v5, 0.0  ;;  %vm25383_vm10 = vmmov %vm25378_vm3 }
 0x9b9   : > { %25377 = vst [vmem:[#allocation107_spill] sm:$0xff] %v23211_v39  ;;  %25379 = vst [vmem:[#allocation108_spill] sm:$0xff] %v23219_v57  ;;  %v23231_v39 = vpack.c.bf16 %v10346_v25, %v23216_v24  ;;  %v7584_v57 = vpack.c.bf16 %v22690_v30, %v7554_v12  ;;  %v7585_v30 = vpack.c.bf16 %v22740_v28, %v7556_v20  ;;  %v19937_v25 = vld [vmem:[%s24908_s11 + $0x58] sm:$0xff]   ;;  %v7560_v28 = vsel %vm22805_vm5, %v22803_v7, 0.0  ;;  %v25398_v20 = vld [vmem:[#allocation21_spill] sm:$0xff] }
 0x9ba   : > { %v7588_v42 = vpack.c.bf16 %v22844_v13, %v7562_v63  ;;  %v7566_v7 = vsel %vm22938_vm2, %v22892_v56, 0.0  ;;  %vm25384_vm5 = vmmov %vm25378_vm3  ;;  %v7570_v13 = vsel %vm23010_vm13, %v22967_v31, 0.0 }
 0x9bb   : > { %v7590_v12 = vpack.c.bf16 %v22916_v8, %v7566_v7  ;;  %v7592_v56 = vpack.c.bf16 %v22988_v36, %v7570_v13  ;;  %vm25388_vm13 = vmmov %vm25378_vm3  ;;  %v7036_v36 = vadd.s32 240, %v21098_v61  ;;  %v25407_v7 = vld [vmem:[#allocation30_spill] sm:$0xff]  ;;  %v25411_v13 = vld [vmem:[#allocation41_spill] sm:$0xff] }
 0x9be   : > { %18026 = vmatmul.mubr.msk.bf16.vlgmr.msra.gmra.mrb[44].mxu0 %vm25380_vm14, %v7583_v32  ;;  %vm25381_vm14 = vmmov %vm25378_vm3  ;;  %v7252_v32 = vand.u32 15, %v7036_v36  ;;  %v25416_v36 = vld [vmem:[#allocation44_spill] sm:$0xff] }
 0x9bf   : > { %18029 = vmatprep.mubr.msk.bf16.mxu0 %vm25378_vm3, %v7584_v57  ;;  %18058 = vmatpush3.bf16.msra.mxu0 %v22795_v6  ;;  %v7586_v6 = vpack.c.bf16 %v22766_v49, %v7558_v60  ;;  %v7587_v49 = vpack.c.bf16 %v22820_v10, %v7560_v28  ;;  %v7564_v57 = vsel %vm22874_vm11, %v22872_v27, 0.0  ;;  %v7568_v10 = vsel %vm22946_vm7, %v22944_v58, 0.0  ;;  %vm25389_vm7 = vmmov %vm25378_vm3  ;;  %v25399_v60 = vld [vmem:[#allocation25_spill] sm:$0xff] }
 0x9c0   : > { %18059 = vmatprep.subr.bf16.mxu0 %v19935_v21  ;;  %v7589_v5 = vpack.c.bf16 %v22890_v35, %v7564_v57  ;;  %v7591_v27 = vpack.c.bf16 %v22965_v19, %v7568_v10  ;;  %v7576_v19 = vsel %vm23097_vm6, %v23087_v59, 0.0  ;;  %vm25400_vm6 = vnez %v25399_v60  ;;  %v19940_v57 = vld [vmem:[%s24908_s11 + $0x70] sm:$0xff]  }
 0x9c1   : > { %v25410_v10 = vld [vmem:[#allocation39_spill] sm:$0xff] }
 0x9c3   : > { %18060 = vmatpush3.bf16.msra.mxu0 %v19935_v21  ;;  %v8130_v21 = vld [vmem:[#allocation5 + $0xa] sm:$0xff] }
 0x9c4   : > { %18061 = vmatprep.subr.bf16.mxu0 %v19936_v54 }
 0x9c6   : > { %18030 = vmatmul.mubr.msk.bf16.gmra.mrb[48].mxu0 %vm25381_vm14, %v7585_v30  ;;  %vm25382_vm14 = vmmov %vm25378_vm3  ;;  %v8260_v30 = vsel %vm25400_vm6, %v25398_v20, 0.0 }
 0x9c7   : > { %18033 = vmatprep.mubr.msk.bf16.mxu0 %vm25378_vm3, %v7586_v6  ;;  %18062 = vmatpush3.bf16.msra.mxu0 %v19936_v54  ;;  %v8129_v54 = vld [vmem:[#allocation5 + $0x2] sm:$0xff]  ;;  %v25402_v6 = vld [vmem:[#allocation18_spill] sm:$0xff] }
 0x9c8   : > { %18063 = vmatprep.subr.bf16.mxu0 %v19937_v25 }
 0x9cb   : > { %18064 = vmatpush3.bf16.msra.mxu0 %v19937_v25  ;;  %v25401_v25 = vld [vmem:[#allocation26_spill] sm:$0xff] }
 0x9cc   : > { %18097 = vmatprep.subr.bf16.mxu0 %v19938_v34 }
 0x9ce   : > { %18034 = vmatmul.mubr.msk.bf16.gmra.mrb[52].mxu0 %vm25382_vm14, %v7587_v49  ;;  %vm25385_vm14 = vmmov %vm25378_vm3  ;;  %v19939_v49 = vld [vmem:[%s24908_s11 + $0x68] sm:$0xff]  }
 0x9cf   : > { %18037 = vmatprep.mubr.msk.bf16.mxu0 %vm25378_vm3, %v7588_v42 }
 0x9d6   : > { %18038 = vmatmul.mubr.msk.bf16.gmra.mrb[56].mxu0 %vm25383_vm10, %v7589_v5  ;;  %vm25386_vm10 = vnez %v25329_v55  ;;  %v25408_v5 = vld [vmem:[#allocation36_spill] sm:$0xff] }
 0x9d7   : > { %18041 = vmatprep.mubr.msk.bf16.mxu0 %vm25384_vm5, %v7590_v12  ;;  %v7572_v8 = vsel %vm25386_vm10, %v23015_v0, 0.0  ;;  %vm25387_vm5 = vnez %v25347_v44  ;;  %v7578_v0 = vsel %vm23154_vm1, %v23106_v16, 0.0 }
 0x9d8   : > { %v7574_v35 = vsel %vm25387_vm5, %v23035_v48, 0.0  ;;  %v7593_v58 = vpack.c.bf16 %v23033_v62, %v7572_v8  ;;  %v7595_v48 = vpack.c.bf16 %v23104_v11, %v7576_v19  ;;  %v7596_v62 = vpack.c.bf16 %v23131_v43, %v7578_v0  ;;  %v25417_v19 = vld [vmem:[#allocation52_spill] sm:$0xff] }
 0x9d9   : > { %v7594_v31 = vpack.c.bf16 %v23060_v46, %v7574_v35  ;;  %v25391_v46 = vmov 0  ;;  %v25414_v35 = vld [vmem:[#allocation40_spill] sm:$0xff] }
 0x9de   : > { %18042 = vmatmul.mubr.msk.bf16.gmra.mrb[60].mxu0 %vm25385_vm14, %v7591_v27  ;;  %vm25390_vm14 = vmmov %vm25378_vm3 }
 0x9df   : > { %18045 = vmatprep.mubr.msk.bf16.mxu0 %vm25378_vm3, %v7592_v56  ;;  %v25413_v56 = vld [vmem:[#allocation29_spill] sm:$0xff] }
 0x9e6   : > { %18046 = vmatmul.mubr.msk.bf16.gmra.mrb[64].mxu0 %vm25388_vm13, %v7593_v58  ;;  %vm23310_vm13 = vcmp.ge.s32.totalorder %v7252_v32, 1  ;;  %v25419_v32 = vld [vmem:[#allocation53_spill] sm:$0xff] }
 0x9e7   : > { %18049 = vmatprep.mubr.msk.bf16.mxu0 %vm25389_vm7, %v7594_v31  ;;  %v25392_v46 = vsel %vm23310_vm13, 4294967295, %v25391_v46  ;;  %vm25394_vm7 = vmmov %vm25378_vm3  ;;  %v7580_v59 = vsel %vm23310_vm13, %v23158_v40, 0.0  ;;  %vm25395_vm3 = vnez %v25228_v3  ;;  %v25404_v40 = vld [vmem:[#allocation16_spill] sm:$0xff]  ;;  %v19942_v31 = vld [vmem:[%s24908_s11 + $0x80] sm:$0xff]  }
 0x9e8   : > { %25393 = vst [vmem:[#allocation109_spill] sm:$0xff] %v25392_v46  ;;  %v8258_v16 = vsel %vm25395_vm3, %v8130_v21, 0.0  ;;  %v7597_v11 = vpack.c.bf16 %v23174_v38, %v7580_v59  ;;  %vm25396_vm1 = vmmov %vm25394_vm7  ;;  %v8290_v63 = vpack.c.bf16 %v8260_v30, %v25404_v40  ;;  %v25405_v38 = vld [vmem:[#allocation19_spill] sm:$0xff]  ;;  %v25431_v40 = vld [vmem:[#allocation57_spill] sm:$0xff] }
 0x9e9   : > { %v8289_v43 = vpack.c.bf16 %v8258_v16, %v8129_v54  ;;  %vm25406_vm3 = vmmov %vm25396_vm1  ;;  %v25422_v21 = vld [vmem:[#allocation43_spill] sm:$0xff]  ;;  %v25423_v54 = vld [vmem:[#allocation54_spill] sm:$0xff] }
 0x9ea   : > { %v25428_v30 = vld [vmem:[#allocation67_spill] sm:$0xff]  ;;  %vm25434_vm5 = vmmov %vm25396_vm1 }
 0x9ee   : > { %18050 = vmatmul.mubr.msk.bf16.gmra.mrb[68].mxu0 %vm25390_vm14, %v7595_v48  ;;  %vm25397_vm14 = vmmov %vm25396_vm1  ;;  %v25420_v48 = vld [vmem:[#allocation56_spill] sm:$0xff] }
 0x9ef   : > { %18053 = vmatprep.mubr.msk.bf16.mxu0 %vm25394_vm7, %v7596_v62  ;;  %vm25403_vm7 = vnez %v25402_v6 }
 0x9f0   : > { %v8262_v28 = vsel %vm25403_vm7, %v25401_v25, 0.0  ;;  %vm25412_vm7 = vnez %v25411_v13  ;;  %v25429_v25 = vld [vmem:[#allocation69_spill] sm:$0xff] }
 0x9f1   : > { %v8291_v42 = vpack.c.bf16 %v8262_v28, %v25405_v38  ;;  %v8266_v27 = vsel %vm25412_vm7, %v25410_v10, 0.0  ;;  %vm25418_vm7 = vnez %v25417_v19  ;;  %v25439_v10 = vld [vmem:[#allocation83_spill] sm:$0xff] }
 0x9f2   : > { %v8293_v58 = vpack.c.bf16 %v8266_v27, %v25414_v35  ;;  %v8268_v0 = vsel %vm25418_vm7, %v25416_v36, 0.0  ;;  %vm25430_vm7 = vnez %v25429_v25  ;;  %v25446_v36 = vld [vmem:[#allocation91_spill] sm:$0xff] }
 0x9f3   : > { %v8294_v59 = vpack.c.bf16 %v8268_v0, %v25422_v21  ;;  %v8274_v28 = vsel %vm25430_vm7, %v25428_v30, 0.0  ;;  %vm25443_vm7 = vmmov %vm25434_vm5  ;;  %v25449_v21 = vld [vmem:[#allocation84_spill] sm:$0xff] }
 0x9f6   : > { %18054 = vmatmul.mubr.msk.bf16.gmra.mrb[72].mxu0 %vm25396_vm1, %v7597_v11  ;;  %v25425_v11 = vld [vmem:[#allocation58_spill] sm:$0xff] }
 0x9f7   : > { %18065 = vmatprep.mubr.msk.bf16.mxu0 %vm25397_vm14, %v8289_v43  ;;  %vm25409_vm14 = vnez %v25408_v5  ;;  %v25426_v43 = vld [vmem:[#allocation66_spill] sm:$0xff] }
 0x9f8   : > { %v8264_v12 = vsel %vm25409_vm14, %v25407_v7, 0.0  ;;  %vm25421_vm14 = vnez %v25420_v48  ;;  %vm25427_vm6 = vnez %v25426_v43 }
 0x9f9   : > { %v8292_v8 = vpack.c.bf16 %v8264_v12, %v25413_v56  ;;  %v8270_v62 = vsel %vm25421_vm14, %v25419_v32, 0.0  ;;  %v8272_v20 = vsel %vm25427_vm6, %v25425_v11, 0.0  ;;  %vm25433_vm14 = vmmov %vm25396_vm1  ;;  %v25438_v12 = vld [vmem:[#allocation80_spill] sm:$0xff]  ;;  %v25441_v56 = vld [vmem:[#allocation71_spill] sm:$0xff]  ;;  %v7037_v11 = vadd.s32 248, %v21098_v61 }
 0x9fa   : > { %v8295_v16 = vpack.c.bf16 %v8270_v62, %v25423_v54  ;;  %vm25444_vm6 = vmmov %vm25434_vm5  ;;  %v25448_v32 = vld [vmem:[#allocation92_spill] sm:$0xff]  ;;  %v25450_v54 = vld [vmem:[#allocation93_spill] sm:$0xff] }
 0x9fb   : > { %v8282_v62 = vsel %vm23117_vm9, %v25448_v32, 0.0  ;;  %v25473_v32 = vld [vmem:[#allocation62_spill] sm:$0xff] }
 0x9fe   : > { %18066 = vmatmul.mubr.msk.bf16.vlgmr.msra.gmra.mrb[44].mxu0 %vm25406_vm3, %v8290_v63  ;;  %vm25415_vm3 = vmmov %vm25396_vm1  ;;  %v8296_v63 = vpack.c.bf16 %v8272_v20, %v25431_v40  ;;  %v25452_v20 = vld [vmem:[#allocation96_spill] sm:$0xff] }
 0x9ff   : > { %18069 = vmatprep.mubr.msk.bf16.mxu0 %vm25396_vm1, %v8291_v42  ;;  %18098 = vmatpush3.bf16.msra.mxu0 %v19938_v34  ;;  %v19941_v34 = vld [vmem:[%s24908_s11 + $0x78] sm:$0xff]  }
 0xa00   : > { %18099 = vmatprep.subr.bf16.mxu0 %v19939_v49  ;;  %v25435_v42 = vld [vmem:[#allocation72_spill] sm:$0xff] }
 0xa03   : > { %18100 = vmatpush3.bf16.msra.mxu0 %v19939_v49  ;;  %v25432_v49 = vld [vmem:[#allocation68_spill] sm:$0xff] }
 0xa04   : > { %18101 = vmatprep.subr.bf16.mxu0 %v19940_v57  ;;  %v8297_v38 = vpack.c.bf16 %v8274_v28, %v25432_v49  ;;  %v25454_v28 = vld [vmem:[#allocation102_spill] sm:$0xff]  ;;  %v25455_v49 = vld [vmem:[#allocation95_spill] sm:$0xff] }
 0xa05   : > { %v8286_v40 = vsel %vm23186_vm15, %v25454_v28, 0.0 }
 0xa06   : > { %18070 = vmatmul.mubr.msk.bf16.gmra.mrb[48].mxu0 %vm25415_vm3, %v8292_v8  ;;  %vm25424_vm3 = vmmov %vm25396_vm1 }
 0xa07   : > { %18073 = vmatprep.mubr.msk.bf16.mxu0 %vm25396_vm1, %v8293_v58  ;;  %18102 = vmatpush3.bf16.msra.mxu0 %v19940_v57  ;;  %v25436_v57 = vld [vmem:[#allocation79_spill] sm:$0xff]  ;;  %v25445_v58 = vld [vmem:[#allocation85_spill] sm:$0xff] }
 0xa08   : > { %18103 = vmatprep.subr.bf16.mxu0 %v19941_v34 }
 0xa0b   : > { %18104 = vmatpush3.bf16.msra.mxu0 %v19941_v34  ;;  %v25442_v34 = vld [vmem:[#allocation81_spill] sm:$0xff] }
 0xa0c   : > { %18137 = vmatprep.subr.bf16.mxu0 %v19942_v31 }
 0xa0e   : > { %18074 = vmatmul.mubr.msk.bf16.gmra.mrb[52].mxu0 %vm25424_vm3, %v8294_v59  ;;  %vm25437_vm3 = vnez %v25436_v57 }
 0xa0f   : > { %18077 = vmatprep.mubr.msk.bf16.mxu0 %vm25396_vm1, %v8295_v16  ;;  %v8276_v7 = vsel %vm25437_vm3, %v25435_v42, 0.0  ;;  %vm25440_vm1 = vnez %v25439_v10  ;;  %v8301_v16 = vpack.c.bf16 %v8282_v62, %v25450_v54  ;;  %v8303_v42 = vpack.c.bf16 %v8286_v40, %v23166_v41  ;;  %v19943_v41 = vld [vmem:[%s24908_s11 + $0x88] sm:$0xff]   ;;  %v25475_v62 = vld [vmem:[#allocation73_spill] sm:$0xff]  ;;  %v25489_v40 = vld [vmem:[#allocation15_spill] sm:$0xff] }
 0xa10   : > { %v8278_v27 = vsel %vm25440_vm1, %v25438_v12, 0.0  ;;  %v8298_v8 = vpack.c.bf16 %v8276_v7, %v25441_v56  ;;  %vm25451_vm1 = vmmov %vm25434_vm5  ;;  %v25457_v7 = vmov 0  ;;  %v25463_v56 = vld [vmem:[#allocation23_spill] sm:$0xff]  ;;  %v25481_v54 = vld [vmem:[#allocation89_spill] sm:$0xff] }
 0xa11   : > { %v8299_v35 = vpack.c.bf16 %v8278_v27, %v25442_v34  ;;  %vm25460_vm15 = vmmov %vm25451_vm1  ;;  %v25461_v27 = vld [vmem:[#allocation22_spill] sm:$0xff] }
 0xa12   : > { %v25466_v34 = vld [vmem:[#allocation34_spill] sm:$0xff]  ;;  %vm25474_vm9 = vmmov %vm25451_vm1 }
 0xa13   : > { %vm25482_vm3 = vmmov %vm25451_vm1 }
 0xa16   : > { %18078 = vmatmul.mubr.msk.bf16.gmra.mrb[56].mxu0 %vm25433_vm14, %v8296_v63  ;;  %vm25447_vm14 = vnez %v25446_v36  ;;  %v7259_v63 = vand.u32 15, %v7037_v11  ;;  %v25485_v11 = vld [vmem:[#allocation100_spill] sm:$0xff] }
 0xa17   : > { %18081 = vmatprep.mubr.msk.bf16.mxu0 %vm25434_vm5, %v8297_v38  ;;  %v8280_v0 = vsel %vm25447_vm14, %v25445_v58, 0.0  ;;  %v25470_v58 = vld [vmem:[#allocation48_spill] sm:$0xff]  ;;  %vm25480_vm14 = vmmov %vm25451_vm1 }
 0xa18   : > { %v8300_v59 = vpack.c.bf16 %v8280_v0, %v25449_v21  ;;  %v25472_v0 = vld [vmem:[#allocation59_spill] sm:$0xff]  ;;  %v25477_v21 = vld [vmem:[#allocation76_spill] sm:$0xff] }
 0xa1e   : > { %18082 = vmatmul.mubr.msk.bf16.gmra.mrb[60].mxu0 %vm25443_vm7, %v8298_v8  ;;  %vm25456_vm7 = vmmov %vm25451_vm1  ;;  %v25465_v8 = vld [vmem:[#allocation31_spill] sm:$0xff] }
 0xa1f   : > { %18085 = vmatprep.mubr.msk.bf16.mxu0 %vm25444_vm6, %v8299_v35  ;;  %vm25453_vm6 = vnez %v25368_v4  ;;  %v25468_v35 = vld [vmem:[#allocation45_spill] sm:$0xff] }
 0xa20   : > { %v8284_v30 = vsel %vm25453_vm6, %v25452_v20, 0.0  ;;  %vm25462_vm6 = vmmov %vm25451_vm1  ;;  %v25487_v20 = vld [vmem:[#allocation105_spill] sm:$0xff] }
 0xa21   : > { %v8302_v38 = vpack.c.bf16 %v8284_v30, %v25455_v49  ;;  %v8641_v30 = vsel %vm23310_vm13, %v25487_v20, 0.0  ;;  %v25491_v49 = vld [vmem:[#allocation17_spill] sm:$0xff]  ;;  %v19953_v20 = vld [vmem:[%s24908_s11 + $0xd8] sm:$0xff]  }
 0xa22   : > { %v8658_v28 = vpack.c.bf16 %v23208_v37, %v8641_v30  ;;  %v19949_v37 = vld [vmem:[%s24908_s11 + $0xb8] sm:$0xff]   ;;  %v25523_v30 = vld [vmem:[#allocation47_spill] sm:$0xff] }
 0xa26   : > { %18086 = vmatmul.mubr.msk.bf16.gmra.mrb[64].mxu0 %vm25434_vm5, %v8300_v59  ;;  %vm23405_vm5 = vcmp.lt.s32.totalorder %v7259_v63, 15  ;;  %v25479_v59 = vld [vmem:[#allocation86_spill] sm:$0xff] }
 0xa27   : > { %18089 = vmatprep.mubr.msk.bf16.mxu0 %vm25451_vm1, %v8301_v16  ;;  %v25458_v7 = vsel %vm23405_vm5, 4294967295, %v25457_v7  ;;  %v8288_v61 = vsel %vm23405_vm5, %v23190_v45, 0.0  ;;  %v19944_v45 = vld [vmem:[%s24908_s11 + $0x90] sm:$0xff]   ;;  %v25483_v16 = vld [vmem:[#allocation97_spill] sm:$0xff]  ;;  %v19947_v63 = vld [vmem:[%s24908_s11 + $0xa8] sm:$0xff]  }
 0xa28   : > { %25459 = vst [vmem:[#allocation21_spill] sm:$0xff] %v25458_v7  ;;  %v8304_v12 = vpack.c.bf16 %v8288_v61, %v23176_v51  ;;  %v19945_v51 = vld [vmem:[%s24908_s11 + $0x98] sm:$0xff]   ;;  %v25497_v61 = vld [vmem:[#allocation42_spill] sm:$0xff] }
 0xa2e   : > { %18090 = vmatmul.mubr.msk.bf16.gmra.mrb[68].mxu0 %vm25456_vm7, %v8302_v38  ;;  %vm25464_vm7 = vmmov %vm25451_vm1  ;;  %v25493_v38 = vld [vmem:[#allocation28_spill] sm:$0xff] }
 0xa2f   : > { %18093 = vmatprep.mubr.msk.bf16.mxu0 %vm25451_vm1, %v8303_v42  ;;  %v25495_v42 = vld [vmem:[#allocation32_spill] sm:$0xff] }
 0xa36   : > { %18094 = vmatmul.mubr.msk.bf16.gmra.mrb[72].mxu0 %vm25460_vm15, %v8304_v12  ;;  %vm25467_vm15 = vmmov %vm25451_vm1  ;;  %v19950_v12 = vld [vmem:[%s24908_s11 + $0xc0] sm:$0xff]  }
 0xa37   : > { %18105 = vmatprep.mubr.msk.bf16.mxu0 %vm25462_vm6, %v25461_v27  ;;  %vm25469_vm6 = vmmov %vm25451_vm1  ;;  %v25498_v27 = vld [vmem:[#allocation46_spill] sm:$0xff] }
 0xa3e   : > { %18106 = vmatmul.mubr.msk.bf16.vlgmr.msra.gmra.mrb[44].mxu0 %vm25464_vm7, %v25463_v56  ;;  %vm25471_vm7 = vmmov %vm25451_vm1  ;;  %v25502_v56 = vld [vmem:[#allocation60_spill] sm:$0xff] }
 0xa3f   : > { %18109 = vmatprep.mubr.msk.bf16.mxu0 %vm25451_vm1, %v25465_v8  ;;  %18138 = vmatpush3.bf16.msra.mxu0 %v19942_v31  ;;  %v19946_v31 = vld [vmem:[%s24908_s11 + $0xa0] sm:$0xff]   ;;  %v25504_v8 = vld [vmem:[#allocation70_spill] sm:$0xff] }
 0xa40   : > { %18139 = vmatprep.subr.bf16.mxu0 %v19943_v41 }
 0xa43   : > { %18140 = vmatpush3.bf16.msra.mxu0 %v19943_v41  ;;  %v25500_v41 = vld [vmem:[#allocation55_spill] sm:$0xff] }
 0xa44   : > { %18141 = vmatprep.subr.bf16.mxu0 %v19944_v45 }
 0xa46   : > { %18110 = vmatmul.mubr.msk.bf16.gmra.mrb[48].mxu0 %vm25467_vm15, %v25466_v34  ;;  %vm25476_vm15 = vmmov %vm25451_vm1  ;;  %v25510_v34 = vld [vmem:[#allocation87_spill] sm:$0xff] }
 0xa47   : > { %18113 = vmatprep.mubr.msk.bf16.mxu0 %vm25469_vm6, %v25468_v35  ;;  %18142 = vmatpush3.bf16.msra.mxu0 %v19944_v45  ;;  %vm25478_vm6 = vmmov %vm25451_vm1  ;;  %v25506_v45 = vld [vmem:[#allocation74_spill] sm:$0xff] }
 0xa48   : > { %18143 = vmatprep.subr.bf16.mxu0 %v19945_v51  ;;  %v25511_v35 = vld [vmem:[#allocation94_spill] sm:$0xff] }
 0xa4b   : > { %18144 = vmatpush3.bf16.msra.mxu0 %v19945_v51  ;;  %v25508_v51 = vld [vmem:[#allocation82_spill] sm:$0xff] }
 0xa4c   : > { %18177 = vmatprep.subr.bf16.mxu0 %v19946_v31 }
 0xa4e   : > { %18114 = vmatmul.mubr.msk.bf16.gmra.mrb[52].mxu0 %vm25471_vm7, %v25470_v58  ;;  %vm25484_vm7 = vmmov %vm25451_vm1  ;;  %v25515_v58 = vld [vmem:[#allocation104_spill] sm:$0xff] }
 0xa4f   : > { %18117 = vmatprep.mubr.msk.bf16.mxu0 %vm25451_vm1, %v25472_v0  ;;  %v8964_v0 = vld [vmem:[#allocation5 + $0x109] sm:$0xff] }
 0xa56   : > { %18118 = vmatmul.mubr.msk.bf16.gmra.mrb[56].mxu0 %vm25474_vm9, %v25473_v32  ;;  %vm25486_vm9 = vmmov %vm25451_vm1  ;;  %v8963_v32 = vld [vmem:[#allocation5 + $0x101] sm:$0xff] }
 0xa57   : > { %18121 = vmatprep.mubr.msk.bf16.mxu0 %vm25476_vm15, %v25475_v62  ;;  %vm25488_vm15 = vmmov %vm25451_vm1  ;;  %v23504_v62 = vpack.c.bf16 %v8964_v0, %v8963_v32  ;;  %v9613_v0 = vld [vmem:[#allocation5 + $0x40] sm:$0xff]  ;;  %v9612_v32 = vld [vmem:[#allocation5 + $0x38] sm:$0xff] }
 0xa5e   : > { %18122 = vmatmul.mubr.msk.bf16.gmra.mrb[60].mxu0 %vm25478_vm6, %v25477_v21  ;;  %vm25494_vm6 = vmmov %vm25451_vm1  ;;  %v25518_v21 = vld [vmem:[#allocation24_spill] sm:$0xff] }
 0xa5f   : > { %18125 = vmatprep.mubr.msk.bf16.mxu0 %vm25480_vm14, %v25479_v59  ;;  %vm25490_vm14 = vmmov %vm25451_vm1  ;;  %v19951_v59 = vld [vmem:[%s24908_s11 + $0xc8] sm:$0xff]  }
 0xa66   : > { %18126 = vmatmul.mubr.msk.bf16.gmra.mrb[64].mxu0 %vm25482_vm3, %v25481_v54  ;;  %vm25492_vm3 = vmmov %vm25451_vm1  ;;  %v25520_v54 = vld [vmem:[#allocation33_spill] sm:$0xff] }
 0xa67   : > { %18129 = vmatprep.mubr.msk.bf16.mxu0 %vm25484_vm7, %v25483_v16  ;;  %vm25496_vm7 = vmmov %vm25451_vm1  ;;  %v25522_v16 = vld [vmem:[#allocation35_spill] sm:$0xff] }
 0xa6e   : > { %18130 = vmatmul.mubr.msk.bf16.gmra.mrb[68].mxu0 %vm25451_vm1, %v25485_v11  ;;  %v19952_v11 = vld [vmem:[%s24908_s11 + $0xd0] sm:$0xff]  }
 0xa6f   : > { %18133 = vmatprep.mubr.msk.bf16.mxu0 %vm25486_vm9, %v23193_v26  ;;  %v19948_v26 = vld [vmem:[%s24908_s11 + $0xb0] sm:$0xff]   ;;  %vm25499_vm9 = vmmov %vm25451_vm1 }
 0xa76   : > { %18134 = vmatmul.mubr.msk.bf16.gmra.mrb[72].mxu0 %vm25488_vm15, %v8658_v28  ;;  %vm25501_vm15 = vmmov %vm25451_vm1  ;;  %v25525_v28 = vld [vmem:[#allocation49_spill] sm:$0xff] }
 0xa77   : > { %18145 = vmatprep.mubr.msk.bf16.mxu0 %vm25490_vm14, %v25489_v40  ;;  %vm25503_vm14 = vmmov %vm25451_vm1  ;;  %v19954_v40 = vld [vmem:[%s24908_s11 + $0xe0] sm:$0xff]  }
 0xa7e   : > { %18146 = vmatmul.mubr.msk.bf16.vlgmr.msra.gmra.mrb[44].mxu0 %vm25492_vm3, %v25491_v49  ;;  %vm25505_vm3 = vmmov %vm25451_vm1  ;;  %v25529_v49 = vld [vmem:[#allocation63_spill] sm:$0xff] }
 0xa7f   : > { %18149 = vmatprep.mubr.msk.bf16.mxu0 %vm25494_vm6, %v25493_v38  ;;  %18178 = vmatpush3.bf16.msra.mxu0 %v19946_v31  ;;  %vm25507_vm6 = vmmov %vm25451_vm1  ;;  %v25513_v31 = vld [vmem:[#allocation98_spill] sm:$0xff]  ;;  %v25531_v38 = vld [vmem:[#allocation75_spill] sm:$0xff] }
 0xa80   : > { %18179 = vmatprep.subr.bf16.mxu0 %v19947_v63 }
 0xa83   : > { %18180 = vmatpush3.bf16.msra.mxu0 %v19947_v63  ;;  %v25527_v63 = vld [vmem:[#allocation61_spill] sm:$0xff] }
 0xa84   : > { %18181 = vmatprep.subr.bf16.mxu0 %v19948_v26 }
 0xa86   : > { %18150 = vmatmul.mubr.msk.bf16.gmra.mrb[48].mxu0 %vm25496_vm7, %v25495_v42  ;;  %vm25509_vm7 = vmmov %vm25451_vm1  ;;  %v25536_v42 = vld [vmem:[#allocation90_spill] sm:$0xff] }
 0xa87   : > { %18153 = vmatprep.mubr.msk.bf16.mxu0 %vm25451_vm1, %v25497_v61  ;;  %18182 = vmatpush3.bf16.msra.mxu0 %v19948_v26  ;;  %v25533_v26 = vld [vmem:[#allocation77_spill] sm:$0xff]  ;;  %v25538_v61 = vld [vmem:[#allocation99_spill] sm:$0xff] }
 0xa88   : > { %18183 = vmatprep.subr.bf16.mxu0 %v19949_v37 }
 0xa8b   : > { %18184 = vmatpush3.bf16.msra.mxu0 %v19949_v37  ;;  %v25535_v37 = vld [vmem:[#allocation88_spill] sm:$0xff] }
 0xa8c   : > { %18217 = vmatprep.subr.bf16.mxu0 %v19950_v12 }
 0xa8e   : > { %18154 = vmatmul.mubr.msk.bf16.gmra.mrb[52].mxu0 %vm25499_vm9, %v25498_v27  ;;  %vm25512_vm9 = vmmov %vm25451_vm1  ;;  %v25542_v27 = vld [vmem:[#allocation103_spill] sm:$0xff] }
 0xa8f   : > { %18157 = vmatprep.mubr.msk.bf16.mxu0 %vm25501_vm15, %v25500_v41  ;;  %vm25514_vm15 = vmmov %vm25451_vm1  ;;  %v25544_v41 = vld [vmem:[#allocation107_spill] sm:$0xff] }
 0xa96   : > { %18158 = vmatmul.mubr.msk.bf16.gmra.mrb[56].mxu0 %vm25503_vm14, %v25502_v56  ;;  %vm25516_vm14 = vmmov %vm25451_vm1  ;;  %v9609_v56 = vld [vmem:[#allocation5 + $0x20] sm:$0xff] }
 0xa97   : > { %18161 = vmatprep.mubr.msk.bf16.mxu0 %vm25505_vm3, %v25504_v8  ;;  %vm25517_vm3 = vmmov %vm25451_vm1  ;;  %v9318_v8 = vsel %vm23405_vm5, %v23213_v1, 0.0  ;;  %v9645_v1 = vsel %vm22717_vm8, %v9613_v0, 0.0 }
 0xa9e   : > { %18162 = vmatmul.mubr.msk.bf16.gmra.mrb[60].mxu0 %vm25507_vm6, %v25506_v45  ;;  %vm25519_vm6 = vmmov %vm25451_vm1  ;;  %v25546_v45 = vld [vmem:[#allocation20_spill] sm:$0xff] }
 0xa9f   : > { %18165 = vmatprep.mubr.msk.bf16.mxu0 %vm25509_vm7, %v25508_v51  ;;  %vm25521_vm7 = vmmov %vm25451_vm1 }
 0xaa6   : > { %18166 = vmatmul.mubr.msk.bf16.gmra.mrb[64].mxu0 %vm25451_vm1, %v25510_v34  ;;  %v9334_v34 = vpack.c.bf16 %v9318_v8, %v23216_v24  ;;  %v19955_v24 = vld [vmem:[%s24908_s11 + $0xe8] sm:$0xff]  }
 0xaa7   : > { %18169 = vmatprep.mubr.msk.bf16.mxu0 %vm25512_vm9, %v25511_v35  ;;  %vm25524_vm9 = vmmov %vm25451_vm1  ;;  %v9610_v35 = vld [vmem:[#allocation5 + $0x28] sm:$0xff] }
 0xaae   : > { %18170 = vmatmul.mubr.msk.bf16.gmra.mrb[68].mxu0 %vm25514_vm15, %v25513_v31  ;;  %vm25526_vm15 = vmmov %vm25451_vm1 }
 0xaaf   : > { %18173 = vmatprep.mubr.msk.bf16.mxu0 %vm25516_vm14, %v25515_v58  ;;  %vm25528_vm14 = vmmov %vm25451_vm1  ;;  %v9611_v58 = vld [vmem:[#allocation5 + $0x30] sm:$0xff] }
 0xab6   : > { %18174 = vmatmul.mubr.msk.bf16.gmra.mrb[72].mxu0 %vm25517_vm3, %v23504_v62  ;;  %vm25530_vm3 = vmmov %vm25451_vm1 }
 0xab7   : > { %18185 = vmatprep.mubr.msk.bf16.mxu0 %vm25519_vm6, %v25518_v21  ;;  %vm25532_vm6 = vmmov %vm25451_vm1  ;;  %v9643_v21 = vsel %vm22660_vm0, %v9611_v58, 0.0  ;;  %v9624_v58 = vld [vmem:[#allocation5 + $0x98] sm:$0xff] }
 0xabe   : > { %18186 = vmatmul.mubr.msk.bf16.vlgmr.msra.gmra.mrb[44].mxu0 %vm25521_vm7, %v25520_v54  ;;  %vm25534_vm7 = vmmov %vm25451_vm1  ;;  %v9614_v54 = vld [vmem:[#allocation5 + $0x48] sm:$0xff] }
 0xabf   : > { %18189 = vmatprep.mubr.msk.bf16.mxu0 %vm25451_vm1, %v25522_v16  ;;  %18218 = vmatpush3.bf16.msra.mxu0 %v19950_v12  ;;  %v25540_v12 = vld [vmem:[#allocation101_spill] sm:$0xff]  ;;  %v9675_v16 = vpack.c.bf16 %v9614_v54, %v9645_v1  ;;  %v9626_v1 = vld [vmem:[#allocation5 + $0xa8] sm:$0xff] }
 0xac0   : > { %18219 = vmatprep.subr.bf16.mxu0 %v19951_v59  ;;  %v9627_v54 = vld [vmem:[#allocation5 + $0xb0] sm:$0xff] }
 0xac3   : > { %18220 = vmatpush3.bf16.msra.mxu0 %v19951_v59  ;;  %v9674_v59 = vpack.c.bf16 %v9612_v32, %v9643_v21 }
 0xac4   : > { %18221 = vmatprep.subr.bf16.mxu0 %v19952_v11 }
 0xac6   : > { %18190 = vmatmul.mubr.msk.bf16.gmra.mrb[48].mxu0 %vm25524_vm9, %v25523_v30  ;;  %vm25537_vm9 = vmmov %vm25451_vm1  ;;  %v19956_v30 = vld [vmem:[%s24908_s11 + $0xf0] sm:$0xff]  }
 0xac7   : > { %18193 = vmatprep.mubr.msk.bf16.mxu0 %vm25526_vm15, %v25525_v28  ;;  %18222 = vmatpush3.bf16.msra.mxu0 %v19952_v11  ;;  %vm25539_vm15 = vmmov %vm25451_vm1  ;;  %v9615_v11 = vld [vmem:[#allocation5 + $0x50] sm:$0xff]  ;;  %v9616_v28 = vld [vmem:[#allocation5 + $0x58] sm:$0xff] }
 0xac8   : > { %18223 = vmatprep.subr.bf16.mxu0 %v19953_v20 }
 0xacb   : > { %18224 = vmatpush3.bf16.msra.mxu0 %v19953_v20  ;;  %v9617_v20 = vld [vmem:[#allocation5 + $0x60] sm:$0xff] }
 0xacc   : > { %18257 = vmatprep.subr.bf16.mxu0 %v19954_v40 }
 0xace   : > { %18194 = vmatmul.mubr.msk.bf16.gmra.mrb[52].mxu0 %vm25528_vm14, %v25527_v63  ;;  %vm25541_vm14 = vmmov %vm25451_vm1  ;;  %v9647_v63 = vsel %vm22750_vm12, %v9615_v11, 0.0 }
 0xacf   : > { %18197 = vmatprep.mubr.msk.bf16.mxu0 %vm25530_vm3, %v25529_v49  ;;  %vm25543_vm3 = vmmov %vm25451_vm1  ;;  %v9649_v49 = vsel %vm22799_vm4, %v9617_v20, 0.0 }
 0xad6   : > { %18198 = vmatmul.mubr.msk.bf16.gmra.mrb[56].mxu0 %vm25532_vm6, %v25531_v38  ;;  %vm25545_vm6 = vmmov %vm25451_vm1  ;;  %v9676_v38 = vpack.c.bf16 %v9616_v28, %v9647_v63  ;;  %v9630_v28 = vld [vmem:[#allocation5 + $0xc8] sm:$0xff] }
 0xad7   : > { %18201 = vmatprep.mubr.msk.bf16.mxu0 %vm25534_vm7, %v25533_v26  ;;  %vm25547_vm7 = vnez %v25546_v45  ;;  %v9618_v26 = vld [vmem:[#allocation5 + $0x68] sm:$0xff] }
 0xad8   : > { %v9641_v51 = vsel %vm25547_vm7, %v9609_v56, 0.0 }
 0xad9   : > { %v9673_v31 = vpack.c.bf16 %v9610_v35, %v9641_v51  ;;  %v9622_v51 = vld [vmem:[#allocation5 + $0x88] sm:$0xff]  ;;  %v9623_v35 = vld [vmem:[#allocation5 + $0x90] sm:$0xff] }
 0xada   : > { %v9655_v0 = vsel %vm22874_vm11, %v9623_v35, 0.0  ;;  %v9964_v35 = vld [vmem:[#allocation5 + $0x29] sm:$0xff] }
 0xadb   : > { %v9680_v21 = vpack.c.bf16 %v9624_v58, %v9655_v0  ;;  %v9963_v58 = vld [vmem:[#allocation5 + $0x21] sm:$0xff] }
 0xadc   : > { %v9995_v0 = vpack.c.bf16 %v9964_v35, %v9963_v58  ;;  %v9984_v58 = vld [vmem:[#allocation5 + $0xc9] sm:$0xff] }
 0xade   : > { %18202 = vmatmul.mubr.msk.bf16.gmra.mrb[60].mxu0 %vm25451_vm1, %v25535_v37  ;;  %v9677_v37 = vpack.c.bf16 %v9618_v26, %v9649_v49  ;;  %v9631_v49 = vld [vmem:[#allocation5 + $0xd0] sm:$0xff]  ;;  %v9632_v26 = vld [vmem:[#allocation5 + $0xd8] sm:$0xff] }
 0xadf   : > { %18205 = vmatprep.mubr.msk.bf16.mxu0 %vm25537_vm9, %v25536_v42  ;;  %vm25548_vm9 = vmmov %vm25451_vm1  ;;  %v9619_v42 = vld [vmem:[#allocation5 + $0x70] sm:$0xff] }
 0xae6   : > { %18206 = vmatmul.mubr.msk.bf16.gmra.mrb[64].mxu0 %vm25539_vm15, %v25538_v61  ;;  %vm25549_vm15 = vmmov %vm25451_vm1  ;;  %v9621_v61 = vld [vmem:[#allocation5 + $0x80] sm:$0xff] }
 0xae7   : > { %18209 = vmatprep.mubr.msk.bf16.mxu0 %vm25541_vm14, %v25540_v12  ;;  %vm25550_vm14 = vmmov %vm25451_vm1  ;;  %v19958_v12 = vld [vmem:[%s24908_s11 + $0x100] sm:$0xff]  }
 0xaee   : > { %18210 = vmatmul.mubr.msk.bf16.gmra.mrb[68].mxu0 %vm25543_vm3, %v25542_v27  ;;  %vm25551_vm3 = vmmov %vm25451_vm1  ;;  %v9620_v27 = vld [vmem:[#allocation5 + $0x78] sm:$0xff] }
 0xaef   : > { %18213 = vmatprep.mubr.msk.bf16.mxu0 %vm25545_vm6, %v25544_v41  ;;  %vm25552_vm6 = vmmov %vm25451_vm1 }
 0xaf6   : > { %18214 = vmatmul.mubr.msk.bf16.gmra.mrb[72].mxu0 %vm25451_vm1, %v9334_v34  ;;  %vm25553_vm1 = vnez %v25266_v14 }
 0xaf7   : > { %18225 = vmatprep.mubr.msk.bf16.mxu0 %vm25548_vm9, %v9673_v31  ;;  %v9651_v41 = vsel %vm25553_vm1, %v9619_v42, 0.0  ;;  %vm25554_vm9 = vnez %v25282_v15  ;;  %v9625_v31 = vld [vmem:[#allocation5 + $0xa0] sm:$0xff] }
 0xaf8   : > { %v9653_v56 = vsel %vm25554_vm9, %v9621_v61, 0.0  ;;  %v9678_v8 = vpack.c.bf16 %v9620_v27, %v9651_v41  ;;  %v9657_v32 = vsel %vm22938_vm2, %v9625_v31, 0.0  ;;  %vm25560_vm2 = vmmov %vm25551_vm3  ;;  %v9634_v61 = vld [vmem:[#allocation5 + $0xe8] sm:$0xff]  ;;  %v25565_v41 = vld [vmem:[#allocation106_spill] sm:$0xff] }
 0xaf9   : > { %v9679_v34 = vpack.c.bf16 %v9622_v51, %v9653_v56  ;;  %vm25561_vm11 = vmmov %vm25560_vm2  ;;  %v9639_v56 = vld [vmem:[#allocation5 + $0x110] sm:$0xff]  ;;  %v9640_v51 = vld [vmem:[#allocation5 + $0x118] sm:$0xff] }
 0xafe   : > { %18226 = vmatmul.mubr.msk.bf16.vlgmr.msra.gmra.mrb[44].mxu0 %vm25549_vm15, %v9674_v59  ;;  %vm25555_vm15 = vmmov %vm25551_vm3  ;;  %v9681_v59 = vpack.c.bf16 %v9626_v1, %v9657_v32  ;;  %v9966_v32 = vld [vmem:[#allocation5 + $0x39] sm:$0xff]  ;;  %v9965_v1 = vld [vmem:[#allocation5 + $0x31] sm:$0xff] }
 0xaff   : > { %18229 = vmatprep.mubr.msk.bf16.mxu0 %vm25550_vm14, %v9675_v16  ;;  %18258 = vmatpush3.bf16.msra.mxu0 %v19954_v40  ;;  %v19957_v40 = vld [vmem:[%s24908_s11 + $0xf8] sm:$0xff]   ;;  %vm25556_vm14 = vmmov %vm25551_vm3  ;;  %v9628_v16 = vld [vmem:[#allocation5 + $0xb8] sm:$0xff] }
 0xb00   : > { %18259 = vmatprep.subr.bf16.mxu0 %v19955_v24 }
 0xb03   : > { %18260 = vmatpush3.bf16.msra.mxu0 %v19955_v24  ;;  %v9629_v24 = vld [vmem:[#allocation5 + $0xc0] sm:$0xff] }
 0xb04   : > { %18261 = vmatprep.subr.bf16.mxu0 %v19956_v30 }
 0xb06   : > { %18230 = vmatmul.mubr.msk.bf16.gmra.mrb[48].mxu0 %vm25551_vm3, %v9676_v38  ;;  %v9633_v38 = vld [vmem:[#allocation5 + $0xe0] sm:$0xff] }
 0xb07   : > { %18233 = vmatprep.mubr.msk.bf16.mxu0 %vm25552_vm6, %v9677_v37  ;;  %18262 = vmatpush3.bf16.msra.mxu0 %v19956_v30  ;;  %vm25557_vm6 = vmmov %vm25551_vm3 }
 0xb08   : > { %18263 = vmatprep.subr.bf16.mxu0 %v19957_v40 }
 0xb0b   : > { %18264 = vmatpush3.bf16.msra.mxu0 %v19957_v40  ;;  %v9663_v40 = vsel %vm25386_vm10, %v9631_v49, 0.0  ;;  %v9971_v49 = vld [vmem:[#allocation5 + $0x61] sm:$0xff] }
 0xb0c   : > { %18297 = vmatprep.subr.bf16.mxu0 %v19958_v12  ;;  %v9684_v42 = vpack.c.bf16 %v9632_v26, %v9663_v40  ;;  %v9976_v40 = vld [vmem:[#allocation5 + $0x89] sm:$0xff] }
 0xb0e   : > { %18234 = vmatmul.mubr.msk.bf16.gmra.mrb[52].mxu0 %vm25555_vm15, %v9678_v8  ;;  %vm25558_vm15 = vnez %v25307_v47  ;;  %v25566_v8 = vld [vmem:[#allocation108_spill] sm:$0xff] }
 0xb0f   : > { %18237 = vmatprep.mubr.msk.bf16.mxu0 %vm25556_vm14, %v9679_v34  ;;  %v9659_v11 = vsel %vm25558_vm15, %v9627_v54, 0.0  ;;  %vm25559_vm14 = vnez %v25326_v23  ;;  %v9671_v34 = vsel %vm23310_vm13, %v9639_v56, 0.0  ;;  %v9967_v54 = vld [vmem:[#allocation5 + $0x41] sm:$0xff]  ;;  %v9980_v56 = vld [vmem:[#allocation5 + $0xa9] sm:$0xff]  ;;  %vm25580_vm13 = vmmov %vm25560_vm2 }
 0xb10   : > { %v9661_v20 = vsel %vm25559_vm14, %v9629_v24, 0.0  ;;  %v9682_v30 = vpack.c.bf16 %v9628_v16, %v9659_v11  ;;  %vm25564_vm14 = vmmov %vm25560_vm2  ;;  %v9688_v31 = vpack.c.bf16 %v9640_v51, %v9671_v34  ;;  %v19959_v24 = vld [vmem:[%s24908_s11 + $0x108] sm:$0xff]   ;;  %v19960_v11 = vld [vmem:[%s24908_s11 + $0x110] sm:$0xff]  }
 0xb11   : > { %v9683_v63 = vpack.c.bf16 %v9630_v28, %v9661_v20  ;;  %v9970_v20 = vld [vmem:[#allocation5 + $0x59] sm:$0xff]  ;;  %v9969_v28 = vld [vmem:[#allocation5 + $0x51] sm:$0xff]  ;;  %v9979_v34 = vld [vmem:[#allocation5 + $0xa1] sm:$0xff] }
 0xb12   : > { %v10003_v35 = vpack.c.bf16 %v9980_v56, %v9979_v34 }
 0xb16   : > { %18238 = vmatmul.mubr.msk.bf16.gmra.mrb[56].mxu0 %vm25551_vm3, %v9680_v21  ;;  %vm25562_vm3 = vnez %v25347_v44  ;;  %v9968_v21 = vld [vmem:[#allocation5 + $0x49] sm:$0xff] }
 0xb17   : > { %18241 = vmatprep.mubr.msk.bf16.mxu0 %vm25557_vm6, %v9681_v59  ;;  %v9665_v37 = vsel %vm25562_vm3, %v9633_v38, 0.0  ;;  %vm25563_vm6 = vmmov %vm25560_vm2  ;;  %v9996_v59 = vpack.c.bf16 %v9966_v32, %v9965_v1  ;;  %v9997_v16 = vpack.c.bf16 %v9968_v21, %v9967_v54  ;;  %v19961_v38 = vld [vmem:[%s24908_s11 + $0x118] sm:$0xff]  }
 0xb18   : > { %v9685_v27 = vpack.c.bf16 %v9634_v61, %v9665_v37  ;;  %vm25568_vm3 = vmmov %vm25560_vm2  ;;  %v9973_v37 = vld [vmem:[#allocation5 + $0x71] sm:$0xff]  ;;  %v9975_v61 = vld [vmem:[#allocation5 + $0x81] sm:$0xff] }
 0xb19   : > { %v9983_v21 = vld [vmem:[#allocation5 + $0xc1] sm:$0xff]  ;;  %v9988_v54 = vld [vmem:[#allocation5 + $0xe9] sm:$0xff] }
 0xb1a   : > { %v10005_v1 = vpack.c.bf16 %v9984_v58, %v9983_v21  ;;  %v10291_v58 = vld [vmem:[#allocation5 + $0x52] sm:$0xff] }
 0xb1e   : > { %18242 = vmatmul.mubr.msk.bf16.gmra.mrb[60].mxu0 %vm25560_vm2, %v9682_v30  ;;  %v9972_v30 = vld [vmem:[#allocation5 + $0x69] sm:$0xff] }
 0xb1f   : > { %18245 = vmatprep.mubr.msk.bf16.mxu0 %vm25561_vm11, %v9683_v63  ;;  %vm25567_vm11 = vmmov %vm25560_vm2  ;;  %v9998_v63 = vpack.c.bf16 %v9970_v20, %v9969_v28  ;;  %v9999_v26 = vpack.c.bf16 %v9972_v30, %v9971_v49  ;;  %v9990_v30 = vld [vmem:[#allocation5 + $0xf9] sm:$0xff]  ;;  %v9989_v28 = vld [vmem:[#allocation5 + $0xf1] sm:$0xff] }
 0xb20   : > { %v9993_v49 = vld [vmem:[#allocation5 + $0x111] sm:$0xff] }
 0xb26   : > { %18246 = vmatmul.mubr.msk.bf16.gmra.mrb[64].mxu0 %vm25563_vm6, %v9684_v42  ;;  %vm25569_vm6 = vmmov %vm25560_vm2 }
 0xb27   : > { %18249 = vmatprep.mubr.msk.bf16.mxu0 %vm25564_vm14, %v9685_v27  ;;  %vm25570_vm14 = vmmov %vm25560_vm2  ;;  %v10001_v27 = vpack.c.bf16 %v9976_v40, %v9975_v61  ;;  %v10288_v61 = vld [vmem:[#allocation5 + $0x3a] sm:$0xff] }
 0xb2e   : > { %18250 = vmatmul.mubr.msk.bf16.gmra.mrb[68].mxu0 %vm25560_vm2, %v25565_v41  ;;  %v9978_v41 = vld [vmem:[#allocation5 + $0x99] sm:$0xff] }
 0xb2f   : > { %18253 = vmatprep.mubr.msk.bf16.mxu0 %vm25567_vm11, %v25566_v8  ;;  %vm25572_vm11 = vmmov %vm25560_vm2  ;;  %v9977_v8 = vld [vmem:[#allocation5 + $0x91] sm:$0xff] }
 0xb30   : > { %v10002_v51 = vpack.c.bf16 %v9978_v41, %v9977_v8  ;;  %v10287_v41 = vld [vmem:[#allocation5 + $0x32] sm:$0xff] }
 0xb36   : > { %18254 = vmatmul.mubr.msk.bf16.gmra.mrb[72].mxu0 %vm25568_vm3, %v9688_v31  ;;  %vm25571_vm3 = vmmov %vm25560_vm2  ;;  %v9982_v31 = vld [vmem:[#allocation5 + $0xb9] sm:$0xff] }
 0xb37   : > { %18265 = vmatprep.mubr.msk.bf16.mxu0 %vm25569_vm6, %v9995_v0  ;;  %vm25573_vm6 = vmmov %vm25560_vm2  ;;  %v9981_v0 = vld [vmem:[#allocation5 + $0xb1] sm:$0xff] }
 0xb38   : > { %v10004_v32 = vpack.c.bf16 %v9982_v31, %v9981_v0  ;;  %v10294_v31 = vld [vmem:[#allocation5 + $0x6a] sm:$0xff] }
 0xb3e   : > { %18266 = vmatmul.mubr.msk.bf16.vlgmr.msra.gmra.mrb[44].mxu0 %vm25570_vm14, %v9996_v59  ;;  %vm25574_vm14 = vmmov %vm25560_vm2  ;;  %v9986_v59 = vld [vmem:[#allocation5 + $0xd9] sm:$0xff] }
 0xb3f   : > { %18269 = vmatprep.mubr.msk.bf16.mxu0 %vm25560_vm2, %v9997_v16  ;;  %18298 = vmatpush3.bf16.msra.mxu0 %v19958_v12  ;;  %v9974_v12 = vld [vmem:[#allocation5 + $0x79] sm:$0xff] }
 0xb40   : > { %18299 = vmatprep.subr.bf16.mxu0 %v19959_v24  ;;  %v10000_v42 = vpack.c.bf16 %v9974_v12, %v9973_v37  ;;  %v10285_v37 = vld [vmem:[#allocation5 + $0x22] sm:$0xff] }
 0xb43   : > { %18300 = vmatpush3.bf16.msra.mxu0 %v19959_v24  ;;  %v9985_v24 = vld [vmem:[#allocation5 + $0xd1] sm:$0xff] }
 0xb44   : > { %18301 = vmatprep.subr.bf16.mxu0 %v19960_v11  ;;  %v10006_v16 = vpack.c.bf16 %v9986_v59, %v9985_v24  ;;  %v10298_v24 = vld [vmem:[#allocation5 + $0x8a] sm:$0xff] }
 0xb46   : > { %18270 = vmatmul.mubr.msk.bf16.gmra.mrb[48].mxu0 %vm25571_vm3, %v9998_v63  ;;  %vm25575_vm3 = vmmov %vm25560_vm2  ;;  %v10008_v63 = vpack.c.bf16 %v9990_v30, %v9989_v28  ;;  %v10297_v28 = vld [vmem:[#allocation5 + $0x82] sm:$0xff] }
 0xb47   : > { %18273 = vmatprep.mubr.msk.bf16.mxu0 %vm25572_vm11, %v9999_v26  ;;  %18302 = vmatpush3.bf16.msra.mxu0 %v19960_v11  ;;  %vm25576_vm11 = vmmov %vm25560_vm2  ;;  %v9987_v11 = vld [vmem:[#allocation5 + $0xe1] sm:$0xff]  ;;  %v10286_v26 = vld [vmem:[#allocation5 + $0x2a] sm:$0xff] }
 0xb48   : > { %18303 = vmatprep.subr.bf16.mxu0 %v19961_v38  ;;  %v10007_v20 = vpack.c.bf16 %v9988_v54, %v9987_v11  ;;  %v10296_v54 = vld [vmem:[#allocation5 + $0x7a] sm:$0xff] }
 0xb4b   : > { %18304 = vmatpush3.bf16.msra.mxu0 %v19961_v38  ;;  %v9994_v38 = vld [vmem:[#allocation5 + $0x119] sm:$0xff] }
 0xb4c   : > { %v10010_v12 = vpack.c.bf16 %v9994_v38, %v9993_v49  ;;  %v10300_v49 = vld [vmem:[#allocation5 + $0x9a] sm:$0xff]  ;;  %v10302_v38 = vld [vmem:[#allocation5 + $0xaa] sm:$0xff] }
 0xb4e   : > { %18274 = vmatmul.mubr.msk.bf16.gmra.mrb[52].mxu0 %vm25573_vm6, %v10000_v42  ;;  %vm25577_vm6 = vmmov %vm25560_vm2 }
 0xb4f   : > { %18277 = vmatprep.mubr.msk.bf16.mxu0 %vm25574_vm14, %v10001_v27  ;;  %vm25578_vm14 = vmmov %vm25560_vm2  ;;  %v10290_v27 = vld [vmem:[#allocation5 + $0x4a] sm:$0xff] }
 0xb56   : > { %18278 = vmatmul.mubr.msk.bf16.gmra.mrb[56].mxu0 %vm25560_vm2, %v10002_v51  ;;  %v10289_v51 = vld [vmem:[#allocation5 + $0x42] sm:$0xff] }
 0xb57   : > { %18281 = vmatprep.mubr.msk.bf16.mxu0 %vm25575_vm3, %v10003_v35  ;;  %vm25579_vm3 = vmmov %vm25560_vm2  ;;  %v10292_v35 = vld [vmem:[#allocation5 + $0x5a] sm:$0xff] }
 0xb58   : > { %vm25586_vm10 = vmmov %vm25579_vm3 }
 0xb59   : > { %vm25589_vm15 = vmmov %vm25579_vm3 }
 0xb5a   : > { %vm25590_vm9 = vmmov %vm25579_vm3 }
 0xb5b   : > { %vm25594_vm1 = vmmov %vm25590_vm9 }
 0xb5e   : > { %18282 = vmatmul.mubr.msk.bf16.gmra.mrb[60].mxu0 %vm25576_vm11, %v10004_v32  ;;  %vm25581_vm11 = vnez %v25228_v3 }
 0xb5f   : > { %18285 = vmatprep.mubr.msk.bf16.mxu0 %vm25577_vm6, %v10005_v1  ;;  %v10318_v40 = vsel %vm25581_vm11, %v10286_v26, 0.0  ;;  %vm25582_vm6 = vmmov %vm25560_vm2  ;;  %v10293_v1 = vld [vmem:[#allocation5 + $0x62] sm:$0xff]  ;;  %v10299_v26 = vld [vmem:[#allocation5 + $0x92] sm:$0xff] }
 0xb60   : > { %v10349_v42 = vpack.c.bf16 %v10318_v40, %v10285_v37 }
 0xb66   : > { %18286 = vmatmul.mubr.msk.bf16.gmra.mrb[64].mxu0 %vm25578_vm14, %v10006_v16  ;;  %vm25583_vm14 = vmmov %vm25560_vm2  ;;  %v10295_v16 = vld [vmem:[#allocation5 + $0x72] sm:$0xff] }
 0xb67   : > { %18289 = vmatprep.mubr.msk.bf16.mxu0 %vm25560_vm2, %v10007_v20  ;;  %vm25584_vm2 = vnez %v25399_v60 }
 0xb68   : > { %v10320_v56 = vsel %vm25584_vm2, %v10288_v61, 0.0 }
 0xb69   : > { %v10350_v8 = vpack.c.bf16 %v10320_v56, %v10287_v41  ;;  %v10306_v41 = vld [vmem:[#allocation5 + $0xca] sm:$0xff]  ;;  %v10303_v56 = vld [vmem:[#allocation5 + $0xb2] sm:$0xff] }
 0xb6e   : > { %18290 = vmatmul.mubr.msk.bf16.gmra.mrb[68].mxu0 %vm25579_vm3, %v10008_v63 }
 0xb6f   : > { %18293 = vmatprep.mubr.msk.bf16.mxu0 %vm25580_vm13, %v23504_v62  ;;  %vm25585_vm13 = vnez %v25402_v6 }
 0xb70   : > { %v10322_v62 = vsel %vm25585_vm13, %v10290_v27, 0.0  ;;  %v10304_v27 = vld [vmem:[#allocation5 + $0xba] sm:$0xff] }
 0xb71   : > { %v10351_v34 = vpack.c.bf16 %v10322_v62, %v10289_v51 }
 0xb76   : > { %18294 = vmatmul.mubr.msk.bf16.gmra.mrb[72].mxu0 %vm25582_vm6, %v10010_v12  ;;  %vm25587_vm6 = vnez %v25408_v5 }
 0xb77   : > { %18305 = vmatprep.mubr.msk.bf16.mxu0 %vm25583_vm14, %v10349_v42  ;;  %v10324_v0 = vsel %vm25587_vm6, %v10292_v35, 0.0  ;;  %vm25588_vm14 = vnez %v25411_v13  ;;  %v10301_v42 = vld [vmem:[#allocation5 + $0xa2] sm:$0xff] }
 0xb78   : > { %v10326_v32 = vsel %vm25588_vm14, %v10294_v31, 0.0  ;;  %v10352_v21 = vpack.c.bf16 %v10324_v0, %v10291_v58  ;;  %vm25593_vm14 = vmmov %vm25590_vm9  ;;  %v10308_v31 = vld [vmem:[#allocation5 + $0xda] sm:$0xff]  ;;  %v10310_v58 = vld [vmem:[#allocation5 + $0xea] sm:$0xff] }
 0xb79   : > { %v10353_v59 = vpack.c.bf16 %v10326_v32, %v10293_v1  ;;  %v10307_v0 = vld [vmem:[#allocation5 + $0xd2] sm:$0xff] }
 0xb7e   : > { %18306 = vmatmul.mubr.msk.bf16.vlgmr.msra.gmra.mrb[44].mxu0 %vm25579_vm3, %v10350_v8  ;;  %vm25592_vm3 = vnez %v25420_v48 }
 0xb7f   : > { %18309 = vmatprep.mubr.msk.bf16.mxu0 %vm25586_vm10, %v10351_v34  ;;  %vm25591_vm10 = vnez %v25417_v19  ;;  %v10330_v20 = vsel %vm25592_vm3, %v10298_v24, 0.0  ;;  %vm25597_vm3 = vmmov %vm25594_vm1  ;;  %v10305_v34 = vld [vmem:[#allocation5 + $0xc2] sm:$0xff]  ;;  %v10312_v24 = vld [vmem:[#allocation5 + $0xfa] sm:$0xff] }
 0xb80   : > { %v10328_v11 = vsel %vm25591_vm10, %v10296_v54, 0.0  ;;  %v10355_v63 = vpack.c.bf16 %v10330_v20, %v10297_v28  ;;  %vm25598_vm10 = vmmov %vm25594_vm1  ;;  %v10315_v28 = vld [vmem:[#allocation5 + $0x112] sm:$0xff] }
 0xb81   : > { %v10354_v30 = vpack.c.bf16 %v10328_v11, %v10295_v16  ;;  %v10311_v16 = vld [vmem:[#allocation5 + $0xf2] sm:$0xff] }
 0xb86   : > { %18310 = vmatmul.mubr.msk.bf16.gmra.mrb[48].mxu0 %vm25589_vm15, %v10352_v21  ;;  %vm25596_vm15 = vnez %v25429_v25 }
 0xb87   : > { %18313 = vmatprep.mubr.msk.bf16.mxu0 %vm25590_vm9, %v10353_v59  ;;  %vm25595_vm9 = vnez %v25426_v43  ;;  %v10334_v40 = vsel %vm25596_vm15, %v10302_v38, 0.0  ;;  %vm25601_vm15 = vmmov %vm25597_vm3  ;;  %v10309_v59 = vld [vmem:[#allocation5 + $0xe2] sm:$0xff]  ;;  %v20237_v38 = vld [vmem:[#allocation3] sm:$0xff] }
 0xb88   : > { %v10332_v12 = vsel %vm25595_vm9, %v10300_v49, 0.0  ;;  %v10357_v61 = vpack.c.bf16 %v10334_v40, %v10301_v42  ;;  %vm25602_vm9 = vmmov %vm25597_vm3  ;;  %v23722_v42 = vld [vmem:[#allocation9] sm:$0xff]  }
 0xb89   : > { %v10356_v37 = vpack.c.bf16 %v10332_v12, %v10299_v26  ;;  %v19963_v26 = vld [vmem:[#allocation9 + $0x18] sm:$0xff]  }
 0xb8e   : > { %18314 = vmatmul.mubr.msk.bf16.gmra.mrb[52].mxu0 %vm25593_vm14, %v10354_v30  ;;  %vm25600_vm14 = vnez %v25439_v10  ;;  %v10316_v30 = vld [vmem:[#allocation5 + $0x11a] sm:$0xff] }
 0xb8f   : > { %18317 = vmatprep.mubr.msk.bf16.mxu0 %vm25594_vm1, %v10355_v63  ;;  %vm25599_vm1 = vnez %v25436_v57  ;;  %v10338_v8 = vsel %vm25600_vm14, %v10306_v41, 0.0  ;;  %vm25605_vm14 = vmmov %vm25602_vm9  ;;  %v10348_v63 = vsel %vm23405_vm5, %v10316_v30, 0.0  ;;  %vm25662_vm5 = vcmask 261120  }
 0xb90   : > { %v10336_v62 = vsel %vm25599_vm1, %v10304_v27, 0.0  ;;  %v10359_v35 = vpack.c.bf16 %v10338_v8, %v10305_v34  ;;  %vm25606_vm1 = vmmov %vm25602_vm9  ;;  %v10364_v49 = vpack.c.bf16 %v10348_v63, %v10315_v28 }
 0xb91   : > { %v10358_v51 = vpack.c.bf16 %v10336_v62, %v10303_v56 }
 0xb96   : > { %18318 = vmatmul.mubr.msk.bf16.gmra.mrb[56].mxu0 %vm25597_vm3, %v10356_v37  ;;  %vm25604_vm3 = vnez %v25357_v22 }
 0xb97   : > { %18321 = vmatprep.mubr.msk.bf16.mxu0 %vm25598_vm10, %v10357_v61  ;;  %vm25603_vm10 = vnez %v25446_v36  ;;  %v10342_v21 = vsel %vm25604_vm3, %v10310_v58, 0.0  ;;  %vm25081_vm3 = vcmask 261120   ;;  %v23729_v61 = vld [vmem:[%s25611_s18] ss:$0 sm:$0xff] }
 0xb98   : > { %v10340_v32 = vsel %vm25603_vm10, %v10308_v31, 0.0  ;;  %v10361_v54 = vpack.c.bf16 %v10342_v21, %v10309_v59  ;;  %vm25609_vm10 = vmmov %vm25606_vm1  ;;  %10715 = vst.msk [vmem:[#allocation6 + $0x20] sm:$0xff] %vm25081_vm3, %v20237_v38 }
 0xb99   : > { %v10360_v1 = vpack.c.bf16 %v10340_v32, %v10307_v0  ;;  %10716 = vst.msk [vmem:[#allocation6 + $0x28] sm:$0xff] %vm25081_vm3, %v20237_v38  ;;  %10711 = vst.msk [vmem:[#allocation6] sm:$0xff] %vm25081_vm3, %v20237_v38 }
 0xb9a   : > { %10712 = vst.msk [vmem:[#allocation6 + $0x8] sm:$0xff] %vm25081_vm3, %v20237_v38  ;;  %10713 = vst.msk [vmem:[#allocation6 + $0x10] sm:$0xff] %vm25081_vm3, %v20237_v38 }
 0xb9b   : > { %10714 = vst.msk [vmem:[#allocation6 + $0x18] sm:$0xff] %vm25081_vm3, %v20237_v38  ;;  %10717 = vst.msk [vmem:[#allocation6 + $0x30] sm:$0xff] %vm25081_vm3, %v20237_v38 }
 0xb9c   : > { %10718 = vst.msk [vmem:[#allocation6 + $0x38] sm:$0xff] %vm25081_vm3, %v20237_v38  ;;  %10719 = vst.msk [vmem:[#allocation6 + $0x40] sm:$0xff] %vm25081_vm3, %v20237_v38 }
 0xb9d   : > { %10720 = vst.msk [vmem:[#allocation6 + $0x48] sm:$0xff] %vm25081_vm3, %v20237_v38  ;;  %10721 = vst.msk [vmem:[#allocation6 + $0x50] sm:$0xff] %vm25081_vm3, %v20237_v38 }
 0xb9e   : > { %18322 = vmatmul.mubr.msk.bf16.gmra.mrb[60].mxu0 %vm25601_vm15, %v10358_v51  ;;  %vm25607_vm15 = vnez %v25368_v4  ;;  %10722 = vst.msk [vmem:[#allocation6 + $0x58] sm:$0xff] %vm25081_vm3, %v20237_v38  ;;  %10723 = vst.msk [vmem:[#allocation6 + $0x60] sm:$0xff] %vm25081_vm3, %v20237_v38 }
 0xb9f   : > { %18325 = vmatprep.mubr.msk.bf16.mxu0 %vm25602_vm9, %v10359_v35  ;;  %v10344_v11 = vsel %vm25607_vm15, %v10312_v24, 0.0  ;;  %vm25608_vm9 = vmmov %vm25606_vm1  ;;  %10724 = vst.msk [vmem:[#allocation6 + $0x68] sm:$0xff] %vm25081_vm3, %v20237_v38 }
 0xba0   : > { %v10362_v20 = vpack.c.bf16 %v10344_v11, %v10311_v16  ;;  %10725 = vst.msk [vmem:[#allocation6 + $0x70] sm:$0xff] %vm25081_vm3, %v20237_v38  ;;  %10726 = vst.msk [vmem:[#allocation6 + $0x78] sm:$0xff] %vm25081_vm3, %v20237_v38 }
 0xba1   : > { %10727 = vst.msk [vmem:[#allocation6 + $0x80] sm:$0xff] %vm25081_vm3, %v20237_v38  ;;  %10728 = vst.msk [vmem:[#allocation6 + $0x88] sm:$0xff] %vm25081_vm3, %v20237_v38  ;;  %v10865_v12 = vld [vmem:[#allocation6 + $0x1] sm:$0xff]  ;;  %v10866_v40 = vld [vmem:[#allocation6 + $0x9] sm:$0xff] }
 0xba2   : > { %10729 = vst.msk [vmem:[#allocation6 + $0x90] sm:$0xff] %vm25081_vm3, %v20237_v38  ;;  %10730 = vst.msk [vmem:[#allocation6 + $0x98] sm:$0xff] %vm25081_vm3, %v20237_v38  ;;  %v10897_v37 = vpack.c.bf16 %v10866_v40, %v10865_v12  ;;  %v19965_v12 = vld [vmem:[#allocation9 + $0x8] sm:$0xff]  }
 0xba3   : > { %10731 = vst.msk [vmem:[#allocation6 + $0xa0] sm:$0xff] %vm25081_vm3, %v20237_v38  ;;  %10732 = vst.msk [vmem:[#allocation6 + $0xa8] sm:$0xff] %vm25081_vm3, %v20237_v38 }
 0xba4   : > { %10733 = vst.msk [vmem:[#allocation6 + $0xb0] sm:$0xff] %vm25081_vm3, %v20237_v38  ;;  %10734 = vst.msk [vmem:[#allocation6 + $0xb8] sm:$0xff] %vm25081_vm3, %v20237_v38  ;;  %18341 = vmatprep.mubr.msk.bf16.mxu1 %vm25081_vm3, %v10897_v37 }
 0xba5   : > { %10735 = vst.msk [vmem:[#allocation6 + $0xc0] sm:$0xff] %vm25081_vm3, %v20237_v38  ;;  %10736 = vst.msk [vmem:[#allocation6 + $0xc8] sm:$0xff] %vm25081_vm3, %v20237_v38 }
 0xba6   : > { %18326 = vmatmul.mubr.msk.bf16.gmra.mrb[64].mxu0 %vm25605_vm14, %v10360_v1  ;;  %vm25610_vm14 = vmmov %vm25606_vm1  ;;  %10737 = vst.msk [vmem:[#allocation6 + $0xd0] sm:$0xff] %vm25081_vm3, %v20237_v38 }
 0xba7   : > { %18329 = vmatprep.mubr.msk.bf16.mxu0 %vm25606_vm1, %v10361_v54  ;;  %10738 = vst.msk [vmem:[#allocation6 + $0xd8] sm:$0xff] %vm25081_vm3, %v20237_v38  ;;  %10739 = vst.msk [vmem:[#allocation6 + $0xe0] sm:$0xff] %vm25081_vm3, %v20237_v38  ;;  %vm25645_vm1 = vnez %v25266_v14 }
 0xba8   : > { %10740 = vst.msk [vmem:[#allocation6 + $0xe8] sm:$0xff] %vm25081_vm3, %v20237_v38  ;;  %10741 = vst.msk [vmem:[#allocation6 + $0xf0] sm:$0xff] %vm25081_vm3, %v20237_v38 }
 0xba9   : > { %10742 = vst.msk [vmem:[#allocation6 + $0xf8] sm:$0xff] %vm25081_vm3, %v20237_v38  ;;  %10743 = vst.msk [vmem:[#allocation6 + $0x100] sm:$0xff] %vm25081_vm3, %v20237_v38 }
 0xbaa   : > { %10744 = vst.msk [vmem:[#allocation6 + $0x108] sm:$0xff] %vm25081_vm3, %v20237_v38  ;;  %10745 = vst.msk [vmem:[#allocation6 + $0x110] sm:$0xff] %vm25081_vm3, %v20237_v38 }
 0xbab   : > { %10746 = vst.msk [vmem:[#allocation6 + $0x118] sm:$0xff] %vm25081_vm3, %v20237_v38 }
 0xbae   : > { %18330 = vmatmul.mubr.msk.bf16.gmra.mrb[68].mxu0 %vm25608_vm9, %v10362_v20  ;;  %vm25655_vm9 = vnez %v25282_v15 }
 0xbaf   : > { %18333 = vmatprep.mubr.msk.bf16.mxu0 %vm25609_vm10, %v23231_v39  ;;  %v19962_v39 = vld [vmem:[#allocation9 + $0x10] sm:$0xff]   ;;  %vm25648_vm10 = vnez %v25411_v13 }
 0xbb0   : > { %18337 = vmatprep.subr.bf16.mxu1 %v19962_v39 }
 0xbb1   : > { %18338 = vmatpush3.bf16.msra.mxu1 %v19962_v39 }
 0xbb2   : > { %18339 = vmatprep.subr.bf16.mxu1 %v19963_v26 }
 0xbb5   : > { %18340 = vmatpush3.bf16.msra.mxu1 %v19963_v26 }
 0xbb6   : > { %18334 = vmatmul.mubr.msk.bf16.gmra.mrb[72].mxu0 %vm25610_vm14, %v10364_v49  ;;  %18373 = vmatprep.subr.bf16.mxu1 %v23722_v42  ;;  %vm25656_vm14 = vnez %v25417_v19 }
 0xc51   : > { %v18307_v27 = vpop.f32.mrb[44].mxu0 }
 0xc52   : > { %v10648_v41 = vadd.f32 %v18307_v27, %v23729_v61  ;;  %v10480_v56 = vpop.f32.mrb[45].mxu0 }
 0xc53   : > { %v10646_v62 = vadd.f32 %v23729_v61, %v10480_v56  ;;  %v18308_v8 = vpop.f32.mrb[46].mxu0 }
 0xc54   : > { %v10680_v51 = vmax.f32 %v10648_v41, 0.0  ;;  %v10649_v34 = vadd.f32 %v18308_v8, %v23729_v61  ;;  %v10483_v35 = vpop.f32.mrb[47].mxu0 }
 0xc55   : > { %v10678_v31 = vmax.f32 %v10646_v62, 0.0  ;;  %v10647_v58 = vadd.f32 %v23729_v61, %v10483_v35 }
 0xc56   : > { %10751 = vst.msk [vmem:[#allocation6 + $0x21] sm:$0xff] %vm25081_vm3, %v10680_v51  ;;  %v10681_v0 = vmax.f32 %v10649_v34, 0.0 }
 0xc57   : > { %10749 = vst.msk [vmem:[#allocation6 + $0x11] sm:$0xff] %vm25081_vm3, %v10678_v31  ;;  %v10679_v32 = vmax.f32 %v10647_v58, 0.0 }
 0xc58   : > { %10752 = vst.msk [vmem:[#allocation6 + $0x29] sm:$0xff] %vm25081_vm3, %v10681_v0 }
 0xc59   : > { %10750 = vst.msk [vmem:[#allocation6 + $0x19] sm:$0xff] %vm25081_vm3, %v10679_v32  ;;  %v18311_v21 = vpop.f32.mrb[48].mxu0 }
 0xc5a   : > { %v10652_v1 = vadd.f32 %v18311_v21, %v23729_v61  ;;  %v10496_v59 = vpop.f32.mrb[49].mxu0 }
 0xc5b   : > { %v10650_v54 = vadd.f32 %v23729_v61, %v10496_v59  ;;  %v18312_v24 = vpop.f32.mrb[50].mxu0 }
 0xc5c   : > { %v10684_v16 = vmax.f32 %v10652_v1, 0.0  ;;  %v10653_v11 = vadd.f32 %v18312_v24, %v23729_v61  ;;  %v10499_v20 = vpop.f32.mrb[51].mxu0 }
 0xc5d   : > { %v10682_v30 = vmax.f32 %v10650_v54, 0.0  ;;  %v10651_v28 = vadd.f32 %v23729_v61, %v10499_v20  ;;  %v10869_v8 = vld [vmem:[#allocation6 + $0x21] sm:$0xff] }
 0xc5e   : > { %10755 = vst.msk [vmem:[#allocation6 + $0x41] sm:$0xff] %vm25081_vm3, %v10684_v16  ;;  %v10685_v63 = vmax.f32 %v10653_v11, 0.0  ;;  %v23744_v49 = vld [vmem:[#allocation6 + $0x10] sm:$0xff] }
 0xc5f   : > { %10753 = vst.msk [vmem:[#allocation6 + $0x31] sm:$0xff] %vm25081_vm3, %v10682_v30  ;;  %v10683_v38 = vmax.f32 %v10651_v28, 0.0  ;;  %v10867_v39 = vld [vmem:[#allocation6 + $0x11] sm:$0xff]  ;;  %v10870_v26 = vld [vmem:[#allocation6 + $0x29] sm:$0xff]  ;;  %v11730_v41 = vsel %vm25547_vm7, %v23744_v49, 0.0 }
 0xc60   : > { %10756 = vst.msk [vmem:[#allocation6 + $0x49] sm:$0xff] %vm25081_vm3, %v10685_v63  ;;  %v10868_v40 = vld [vmem:[#allocation6 + $0x19] sm:$0xff]  ;;  %v23766_v0 = vpack.c.bf16 %v10870_v26, %v10869_v8  ;;  %v23768_v32 = vld [vmem:[#allocation6 + $0x28] sm:$0xff] }
 0xc61   : > { %v23748_v37 = vld [vmem:[#allocation6 + $0x18] sm:$0xff]  ;;  %v23750_v27 = vld [vmem:[#allocation6 + $0x20] sm:$0xff]  ;;  %10754 = vst.msk [vmem:[#allocation6 + $0x39] sm:$0xff] %vm25081_vm3, %v10683_v38  ;;  %v18315_v56 = vpop.f32.mrb[52].mxu0  ;;  %v23756_v62 = vpack.c.bf16 %v10868_v40, %v10867_v39  ;;  %25617 = vst [vmem:[#allocation30_spill] sm:$0xff] %v23768_v32 }
 0xc62   : > { %v23758_v51 = vld [vmem:[#allocation6 + $0x12] sm:$0xff]  ;;  %v23760_v34 = vld [vmem:[#allocation6 + $0x1a] sm:$0xff]  ;;  %v23763_v35 = vpack.c.bf16 %v23748_v37, %v11730_v41  ;;  %v10656_v31 = vadd.f32 %v18315_v56, %v23729_v61  ;;  %v10512_v58 = vpop.f32.mrb[53].mxu0  ;;  %25616 = vst [vmem:[#allocation19_spill] sm:$0xff] %v23766_v0  ;;  %v11732_v21 = vsel %vm22660_vm0, %v23750_v27, 0.0  ;;  %v12712_v28 = vsel %vm25547_vm7, %v23750_v27, 0.0 }
 0xc63   : > { %25612 = vst [vmem:[#allocation25_spill] sm:$0xff] %v23756_v62  ;;  %25613 = vst [vmem:[#allocation26_spill] sm:$0xff] %v23758_v51  ;;  %v10654_v1 = vadd.f32 %v23729_v61, %v10512_v58  ;;  %v18316_v59 = vpop.f32.mrb[54].mxu0  ;;  %18342 = vmatmul.mubr.msk.bf16.vlgmr.msra.gmra.mrb[52].mxu1 %vm25081_vm3, %v23756_v62  ;;  %v23777_v54 = vpack.c.bf16 %v23768_v32, %v11732_v21  ;;  %v12375_v24 = vsel %vm25581_vm11, %v23760_v34, 0.0  ;;  %v23793_v39 = vld [vmem:[#allocation9 + $0x20] sm:$0xff]  }
 0xc64   : > { %25614 = vst [vmem:[#allocation18_spill] sm:$0xff] %v23760_v34  ;;  %25615 = vst [vmem:[#allocation16_spill] sm:$0xff] %v23763_v35  ;;  %v10688_v16 = vmax.f32 %v10656_v31, 0.0  ;;  %v10657_v11 = vadd.f32 %v18316_v59, %v23729_v61  ;;  %v10515_v20 = vpop.f32.mrb[55].mxu0  ;;  %18345 = vmatprep.mubr.msk.bf16.mxu1 %vm25081_vm3, %v23766_v0  ;;  %18374 = vmatpush3.bf16.msra.mxu1 %v23722_v42  ;;  %v23787_v30 = vpack.c.bf16 %v12375_v24, %v23758_v51 }
 0xc65   : > { %25618 = vst [vmem:[#allocation36_spill] sm:$0xff] %v23777_v54  ;;  %v10686_v63 = vmax.f32 %v10654_v1, 0.0  ;;  %v10655_v38 = vadd.f32 %v23729_v61, %v10515_v20  ;;  %18375 = vmatprep.subr.bf16.mxu1 %v19965_v12  ;;  %25620 = vst [vmem:[#allocation41_spill] sm:$0xff] %v23793_v39  ;;  %v23796_v26 = vpack.c.bf16 %v23768_v32, %v12712_v28  ;;  %v10873_v20 = vld [vmem:[#allocation6 + $0x41] sm:$0xff] }
 0xc66   : > { %25619 = vst [vmem:[#allocation39_spill] sm:$0xff] %v23787_v30  ;;  %10759 = vst.msk [vmem:[#allocation6 + $0x61] sm:$0xff] %vm25081_vm3, %v10688_v16  ;;  %v10689_v40 = vmax.f32 %v10657_v11, 0.0  ;;  %v23799_v42 = vld [vmem:[#allocation6 + $0x30] sm:$0xff]  ;;  %v23829_v30 = vld [vmem:[#allocation6 + $0x22] sm:$0xff] }
 0xc67   : > { %25621 = vst [vmem:[#allocation29_spill] sm:$0xff] %v23796_v26  ;;  %25622 = vst [vmem:[#allocation40_spill] sm:$0xff] %v23799_v42  ;;  %v23801_v41 = vld [vmem:[#allocation6 + $0x2a] sm:$0xff]  ;;  %v10687_v56 = vmax.f32 %v10655_v38, 0.0  ;;  %v11734_v59 = vsel %vm22717_vm8, %v23799_v42, 0.0  ;;  %v23897_v46 = vld [vmem:[#allocation6 + $0x42] sm:$0xff] }
 0xc68   : > { %25623 = vst [vmem:[#allocation44_spill] sm:$0xff] %v23801_v41  ;;  %10757 = vst.msk [vmem:[#allocation6 + $0x51] sm:$0xff] %vm25081_vm3, %v10686_v63  ;;  %v10871_v8 = vld [vmem:[#allocation6 + $0x31] sm:$0xff]  ;;  %v10874_v31 = vld [vmem:[#allocation6 + $0x49] sm:$0xff]  ;;  %18376 = vmatpush3.bf16.msra.mxu1 %v19965_v12  ;;  %v12377_v24 = vsel %vm25584_vm2, %v23801_v41, 0.0 }
 0xc69   : > { %10760 = vst.msk [vmem:[#allocation6 + $0x69] sm:$0xff] %vm25081_vm3, %v10689_v40  ;;  %v10872_v58 = vld [vmem:[#allocation6 + $0x39] sm:$0xff]  ;;  %10758 = vst.msk [vmem:[#allocation6 + $0x59] sm:$0xff] %vm25081_vm3, %v10687_v56  ;;  %v18319_v16 = vpop.f32.mrb[56].mxu0  ;;  %18409 = vmatprep.subr.bf16.mxu1 %v23793_v39  ;;  %v23825_v40 = vpack.c.bf16 %v10874_v31, %v10873_v20  ;;  %v23827_v26 = vld [vmem:[#allocation6 + $0x48] sm:$0xff]  ;;  %v23843_v31 = vpack.c.bf16 %v12377_v24, %v23829_v30 }
 0xc6a   : > { %v23805_v21 = vld [vmem:[#allocation6 + $0x38] sm:$0xff]  ;;  %v23807_v1 = vld [vmem:[#allocation6 + $0x40] sm:$0xff]  ;;  %v23816_v11 = vpack.c.bf16 %v10872_v58, %v10871_v8  ;;  %v10660_v63 = vadd.f32 %v18319_v16, %v23729_v61  ;;  %v10528_v38 = vpop.f32.mrb[57].mxu0  ;;  %25630 = vst [vmem:[#allocation66_spill] sm:$0xff] %v23827_v26  ;;  %25631 = vst [vmem:[#allocation67_spill] sm:$0xff] %v23829_v30 }
 0xc6b   : > { %25624 = vst [vmem:[#allocation52_spill] sm:$0xff] %v23805_v21  ;;  %25625 = vst [vmem:[#allocation53_spill] sm:$0xff] %v23807_v1  ;;  %v23819_v12 = vld [vmem:[#allocation6 + $0x3a] sm:$0xff]  ;;  %v23822_v28 = vpack.c.bf16 %v23805_v21, %v11734_v59  ;;  %v23831_v56 = vld [vmem:[#allocation6 + $0x32] sm:$0xff]  ;;  %v11736_v8 = vsel %vm22750_vm12, %v23807_v1, 0.0  ;;  %v10658_v58 = vadd.f32 %v23729_v61, %v10528_v38  ;;  %v18320_v0 = vpop.f32.mrb[58].mxu0 }
 0xc6c   : > { %25626 = vst [vmem:[#allocation56_spill] sm:$0xff] %v23816_v11  ;;  %25627 = vst [vmem:[#allocation43_spill] sm:$0xff] %v23819_v12  ;;  %18346 = vmatmul.mubr.msk.bf16.gmra.mrb[56].mxu1 %vm25081_vm3, %v23816_v11  ;;  %v23840_v59 = vpack.c.bf16 %v23827_v26, %v11736_v8  ;;  %v10692_v16 = vmax.f32 %v10660_v63, 0.0  ;;  %v10661_v20 = vadd.f32 %v18320_v0, %v23729_v61  ;;  %v10531_v62 = vpop.f32.mrb[59].mxu0  ;;  %v12379_v38 = vsel %vm25585_vm13, %v23819_v12, 0.0 }
 0xc6d   : > { %25628 = vst [vmem:[#allocation54_spill] sm:$0xff] %v23822_v28  ;;  %25629 = vst [vmem:[#allocation58_spill] sm:$0xff] %v23825_v40  ;;  %18349 = vmatprep.mubr.msk.bf16.mxu1 %vm25081_vm3, %v23825_v40  ;;  %v12714_v11 = vsel %vm22660_vm0, %v23799_v42, 0.0  ;;  %v10690_v8 = vmax.f32 %v10658_v58, 0.0  ;;  %v23856_v24 = vpack.c.bf16 %v12379_v38, %v23831_v56  ;;  %v12716_v28 = vsel %vm22717_vm8, %v23807_v1, 0.0 }
 0xc6e   : > { %25632 = vst [vmem:[#allocation69_spill] sm:$0xff] %v23831_v56  ;;  %25633 = vst [vmem:[#allocation57_spill] sm:$0xff] %v23840_v59  ;;  %v10659_v59 = vadd.f32 %v23729_v61, %v10531_v62  ;;  %v23859_v0 = vpack.c.bf16 %v23805_v21, %v12714_v11  ;;  %v10693_v63 = vmax.f32 %v10661_v20, 0.0 }
 0xc6f   : > { %25634 = vst [vmem:[#allocation68_spill] sm:$0xff] %v23843_v31  ;;  %25635 = vst [vmem:[#allocation72_spill] sm:$0xff] %v23856_v24  ;;  %v23862_v31 = vld [vmem:[#allocation6 + $0x50] sm:$0xff]  ;;  %v23871_v24 = vpack.c.bf16 %v23827_v26, %v12716_v28 }
 0xc70   : > { %25636 = vst [vmem:[#allocation80_spill] sm:$0xff] %v23859_v0  ;;  %10763 = vst.msk [vmem:[#allocation6 + $0x81] sm:$0xff] %vm25081_vm3, %v10692_v16  ;;  %v23864_v40 = vld [vmem:[#allocation6 + $0x4a] sm:$0xff]  ;;  %v10691_v62 = vmax.f32 %v10659_v59, 0.0  ;;  %v10876_v11 = vld [vmem:[#allocation6 + $0x59] sm:$0xff]  ;;  %v11738_v0 = vsel %vm22799_vm4, %v23862_v31, 0.0 }
 0xc71   : > { %25637 = vst [vmem:[#allocation83_spill] sm:$0xff] %v23862_v31  ;;  %10761 = vst.msk [vmem:[#allocation6 + $0x71] sm:$0xff] %vm25081_vm3, %v10690_v8  ;;  %v10875_v58 = vld [vmem:[#allocation6 + $0x51] sm:$0xff]  ;;  %v10878_v38 = vld [vmem:[#allocation6 + $0x69] sm:$0xff]  ;;  %v12381_v59 = vsel %vm25587_vm6, %v23864_v40, 0.0  ;;  %v18323_v8 = vpop.f32.mrb[60].mxu0 }
 0xc72   : > { %25638 = vst [vmem:[#allocation71_spill] sm:$0xff] %v23871_v24  ;;  %10764 = vst.msk [vmem:[#allocation6 + $0x89] sm:$0xff] %vm25081_vm3, %v10693_v63  ;;  %v23874_v16 = vld [vmem:[#allocation6 + $0x58] sm:$0xff]  ;;  %v23876_v20 = vld [vmem:[#allocation6 + $0x60] sm:$0xff]  ;;  %v23885_v28 = vpack.c.bf16 %v10876_v11, %v10875_v58  ;;  %v10664_v35 = vadd.f32 %v18323_v8, %v23729_v61  ;;  %v10544_v7 = vpop.f32.mrb[61].mxu0  ;;  %v13361_v33 = vsel %vm25585_vm13, %v23864_v40, 0.0 }
 0xc73   : > { %25639 = vst [vmem:[#allocation81_spill] sm:$0xff] %v23874_v16  ;;  %25640 = vst [vmem:[#allocation85_spill] sm:$0xff] %v23876_v20  ;;  %v10877_v24 = vld [vmem:[#allocation6 + $0x61] sm:$0xff]  ;;  %v23890_v54 = vpack.c.bf16 %v23874_v16, %v11738_v0  ;;  %v23899_v26 = vld [vmem:[#allocation6 + $0x52] sm:$0xff]  ;;  %v10662_v58 = vadd.f32 %v23729_v61, %v10544_v7  ;;  %v18324_v11 = vpop.f32.mrb[62].mxu0  ;;  %v11401_v6 = vsel %vm25648_vm10, %v23864_v40, 0.0 }
 0xc74   : > { %10762 = vst.msk [vmem:[#allocation6 + $0x79] sm:$0xff] %vm25081_vm3, %v10691_v62  ;;  %25641 = vst [vmem:[#allocation91_spill] sm:$0xff] %v23885_v28  ;;  %v23887_v63 = vld [vmem:[#allocation6 + $0x5a] sm:$0xff]  ;;  %v23893_v51 = vpack.c.bf16 %v10878_v38, %v10877_v24  ;;  %v23895_v34 = vld [vmem:[#allocation6 + $0x68] sm:$0xff]  ;;  %v11740_v62 = vsel %vm25645_vm1, %v23876_v20, 0.0  ;;  %18350 = vmatmul.mubr.msk.bf16.gmra.mrb[60].mxu1 %vm25081_vm3, %v23885_v28  ;;  %v23911_v24 = vpack.c.bf16 %v12381_v59, %v23897_v46  ;;  %v10696_v38 = vmax.f32 %v10664_v35, 0.0 }
 0xc75   : > { %25642 = vst [vmem:[#allocation92_spill] sm:$0xff] %v23890_v54  ;;  %25644 = vst [vmem:[#allocation93_spill] sm:$0xff] %v23895_v34  ;;  %v23908_v0 = vpack.c.bf16 %v23895_v34, %v11740_v62  ;;  %v10665_v8 = vadd.f32 %v18324_v11, %v23729_v61  ;;  %v10547_v54 = vpop.f32.mrb[63].mxu0  ;;  %v12383_v7 = vsel %vm25648_vm10, %v23887_v63, 0.0  ;;  %v12718_v28 = vsel %vm22750_vm12, %v23862_v31, 0.0  ;;  %v23965_v1 = vld [vmem:[#allocation6 + $0x62] sm:$0xff] }
 0xc76   : > { %25643 = vst [vmem:[#allocation84_spill] sm:$0xff] %v23893_v51  ;;  %25647 = vst [vmem:[#allocation102_spill] sm:$0xff] %v23911_v24  ;;  %18353 = vmatprep.mubr.msk.bf16.mxu1 %vm25081_vm3, %v23893_v51  ;;  %v10694_v62 = vmax.f32 %v10662_v58, 0.0  ;;  %v23924_v59 = vpack.c.bf16 %v12383_v7, %v23899_v26  ;;  %v23927_v35 = vpack.c.bf16 %v23874_v16, %v12718_v28  ;;  %v12720_v31 = vsel %vm22799_vm4, %v23876_v20, 0.0  ;;  %v25822_v3 = vld [vmem:[#allocation67_spill] sm:$0xff] }
 0xc77   : > { %25646 = vst [vmem:[#allocation96_spill] sm:$0xff] %v23908_v0  ;;  %v10663_v0 = vadd.f32 %v23729_v61, %v10547_v54  ;;  %10767 = vst.msk [vmem:[#allocation6 + $0xa1] sm:$0xff] %vm25081_vm3, %v10696_v38  ;;  %v10697_v11 = vmax.f32 %v10665_v8, 0.0  ;;  %vm25666_vm12 = vnez %v25420_v48 }
 0xc78   : > { %25649 = vst [vmem:[#allocation95_spill] sm:$0xff] %v23924_v59  ;;  %25650 = vst [vmem:[#allocation22_spill] sm:$0xff] %v23927_v35  ;;  %v23930_v24 = vld [vmem:[#allocation6 + $0x70] sm:$0xff]  ;;  %v23939_v59 = vpack.c.bf16 %v23895_v34, %v12720_v31 }
 0xc79   : > { %25651 = vst [vmem:[#allocation23_spill] sm:$0xff] %v23930_v24  ;;  %v23932_v51 = vld [vmem:[#allocation6 + $0x6a] sm:$0xff]  ;;  %10765 = vst.msk [vmem:[#allocation6 + $0x91] sm:$0xff] %vm25081_vm3, %v10694_v62  ;;  %v10695_v54 = vmax.f32 %v10663_v0, 0.0  ;;  %v11742_v35 = vsel %vm25655_vm9, %v23930_v24, 0.0  ;;  %v18327_v62 = vpop.f32.mrb[64].mxu0 }
 0xc7a   : > { %v10879_v58 = vld [vmem:[#allocation6 + $0x71] sm:$0xff]  ;;  %v10882_v7 = vld [vmem:[#allocation6 + $0x89] sm:$0xff]  ;;  %25652 = vst [vmem:[#allocation31_spill] sm:$0xff] %v23939_v59  ;;  %10768 = vst.msk [vmem:[#allocation6 + $0xa9] sm:$0xff] %vm25081_vm3, %v10697_v11  ;;  %v12385_v0 = vsel %vm25656_vm14, %v23932_v51, 0.0  ;;  %v10668_v16 = vadd.f32 %v18327_v62, %v23729_v61  ;;  %v10560_v20 = vpop.f32.mrb[65].mxu0 }
 0xc7b   : > { %v10880_v28 = vld [vmem:[#allocation6 + $0x79] sm:$0xff]  ;;  %10766 = vst.msk [vmem:[#allocation6 + $0x99] sm:$0xff] %vm25081_vm3, %v10695_v54  ;;  %v10881_v59 = vld [vmem:[#allocation6 + $0x81] sm:$0xff]  ;;  %vm25661_vm3 = vnez %v25285_v52  ;;  %vm25665_vm4 = vmmov %vm25662_vm5 }
 0xc7c   : > { %v23942_v38 = vld [vmem:[#allocation6 + $0x78] sm:$0xff]  ;;  %v23944_v8 = vld [vmem:[#allocation6 + $0x80] sm:$0xff]  ;;  %v23953_v31 = vpack.c.bf16 %v10880_v28, %v10879_v58  ;;  %v23961_v21 = vpack.c.bf16 %v10882_v7, %v10881_v59  ;;  %v23963_v29 = vld [vmem:[#allocation6 + $0x88] sm:$0xff]  ;;  %v10666_v58 = vadd.f32 %v23729_v61, %v10560_v20  ;;  %v18328_v28 = vpop.f32.mrb[66].mxu0  ;;  %v23979_v59 = vpack.c.bf16 %v12385_v0, %v23965_v1 }
 0xc7d   : > { %25653 = vst [vmem:[#allocation34_spill] sm:$0xff] %v23942_v38  ;;  %25654 = vst [vmem:[#allocation45_spill] sm:$0xff] %v23944_v8  ;;  %v23955_v11 = vld [vmem:[#allocation6 + $0x7a] sm:$0xff]  ;;  %v23958_v34 = vpack.c.bf16 %v23942_v38, %v11742_v35  ;;  %v23967_v50 = vld [vmem:[#allocation6 + $0x72] sm:$0xff]  ;;  %v11744_v54 = vsel %vm25661_vm3, %v23944_v8, 0.0  ;;  %v10700_v7 = vmax.f32 %v10668_v16, 0.0  ;;  %v10669_v62 = vadd.f32 %v18328_v28, %v23729_v61 }
 0xc7e   : > { %25657 = vst [vmem:[#allocation48_spill] sm:$0xff] %v23953_v31  ;;  %25659 = vst [vmem:[#allocation62_spill] sm:$0xff] %v23961_v21  ;;  %18354 = vmatmul.mubr.msk.bf16.gmra.mrb[64].mxu1 %vm25662_vm5, %v23953_v31  ;;  %v23976_v35 = vpack.c.bf16 %v23963_v29, %v11744_v54  ;;  %v12387_v20 = vsel %vm25666_vm12, %v23955_v11, 0.0  ;;  %v12722_v31 = vsel %vm25645_vm1, %v23930_v24, 0.0  ;;  %v10698_v54 = vmax.f32 %v10666_v58, 0.0  ;;  %v24033_v42 = vld [vmem:[#allocation6 + $0x82] sm:$0xff] }
 0xc7f   : > { %25658 = vst [vmem:[#allocation59_spill] sm:$0xff] %v23958_v34  ;;  %25660 = vst [vmem:[#allocation73_spill] sm:$0xff] %v23963_v29  ;;  %v10563_v34 = vpop.f32.mrb[67].mxu0  ;;  %18357 = vmatprep.mubr.msk.bf16.mxu1 %vm25665_vm4, %v23961_v21  ;;  %v23992_v0 = vpack.c.bf16 %v12387_v20, %v23967_v50  ;;  %v23995_v16 = vpack.c.bf16 %v23942_v38, %v12722_v31  ;;  %v10701_v28 = vmax.f32 %v10669_v62, 0.0  ;;  %v12724_v24 = vsel %vm25655_vm9, %v23944_v8, 0.0 }
 0xc80   : > { %25663 = vst [vmem:[#allocation76_spill] sm:$0xff] %v23976_v35  ;;  %25664 = vst [vmem:[#allocation86_spill] sm:$0xff] %v23979_v59  ;;  %v10667_v35 = vadd.f32 %v23729_v61, %v10563_v34  ;;  %v23998_v59 = vld [vmem:[#allocation6 + $0x90] sm:$0xff]  ;;  %vm25686_vm12 = vnez %v25429_v25 }
 0xc81   : > { %25667 = vst [vmem:[#allocation89_spill] sm:$0xff] %v23992_v0  ;;  %25668 = vst [vmem:[#allocation97_spill] sm:$0xff] %v23995_v16  ;;  %v24000_v21 = vld [vmem:[#allocation6 + $0x8a] sm:$0xff]  ;;  %v24007_v0 = vpack.c.bf16 %v23963_v29, %v12724_v24  ;;  %v24101_v32 = vld [vmem:[#allocation6 + $0xa2] sm:$0xff] }
 0xc82   : > { %vm25669_vm5 = vmmov %vm25665_vm4  ;;  %25670 = vst [vmem:[#allocation100_spill] sm:$0xff] %v23998_v59  ;;  %v10699_v34 = vmax.f32 %v10667_v35, 0.0  ;;  %v10883_v58 = vld [vmem:[#allocation6 + $0x91] sm:$0xff]  ;;  %v10886_v20 = vld [vmem:[#allocation6 + $0xa9] sm:$0xff] }
 0xc83   : > { %10771 = vst.msk [vmem:[#allocation6 + $0xc1] sm:$0xff] %vm25669_vm5, %v10700_v7  ;;  %25671 = vst [vmem:[#allocation105_spill] sm:$0xff] %v24007_v0  ;;  %v10884_v31 = vld [vmem:[#allocation6 + $0x99] sm:$0xff]  ;;  %vm25675_vm5 = vnez %v25304_v2  ;;  %v10885_v0 = vld [vmem:[#allocation6 + $0xa1] sm:$0xff] }
 0xc84   : > { %10769 = vst.msk [vmem:[#allocation6 + $0xb1] sm:$0xff] %vm25665_vm4, %v10698_v54  ;;  %vm25672_vm1 = vmmov %vm25665_vm4  ;;  %v24010_v7 = vld [vmem:[#allocation6 + $0x98] sm:$0xff]  ;;  %v24012_v62 = vld [vmem:[#allocation6 + $0xa0] sm:$0xff]  ;;  %v11746_v16 = vsel %vm25675_vm5, %v23998_v59, 0.0  ;;  %vm25676_vm4 = vnez %v25426_v43  ;;  %v18331_v54 = vpop.f32.mrb[68].mxu0  ;;  %v24021_v24 = vpack.c.bf16 %v10884_v31, %v10883_v58  ;;  %v24029_v15 = vpack.c.bf16 %v10886_v20, %v10885_v0 }
 0xc85   : > { %10772 = vst.msk [vmem:[#allocation6 + $0xc9] sm:$0xff] %vm25672_vm1, %v10701_v28  ;;  %25673 = vst [vmem:[#allocation15_spill] sm:$0xff] %v24010_v7  ;;  %v12389_v35 = vsel %vm25676_vm4, %v24000_v21, 0.0  ;;  %v24023_v28 = vld [vmem:[#allocation6 + $0x9a] sm:$0xff]  ;;  %v24026_v29 = vpack.c.bf16 %v24010_v7, %v11746_v16  ;;  %v10672_v38 = vadd.f32 %v18331_v54, %v23729_v61  ;;  %v10576_v8 = vpop.f32.mrb[69].mxu0  ;;  %v24031_v14 = vld [vmem:[#allocation6 + $0xa8] sm:$0xff] }
 0xc86   : > { %25674 = vst [vmem:[#allocation17_spill] sm:$0xff] %v24012_v62  ;;  %vm25677_vm9 = vmmov %vm25672_vm1  ;;  %v24035_v39 = vld [vmem:[#allocation6 + $0x92] sm:$0xff]  ;;  %vm25682_vm1 = vnez %v25307_v47  ;;  %v10670_v58 = vadd.f32 %v23729_v61, %v10576_v8  ;;  %v18332_v31 = vpop.f32.mrb[70].mxu0  ;;  %v24047_v0 = vpack.c.bf16 %v12389_v35, %v24033_v42  ;;  %v12391_v8 = vsel %vm25686_vm12, %v24023_v28, 0.0 }
 0xc87   : > { %10770 = vst.msk [vmem:[#allocation6 + $0xb9] sm:$0xff] %vm25677_vm9, %v10699_v34  ;;  %25678 = vst [vmem:[#allocation28_spill] sm:$0xff] %v24021_v24  ;;  %v11748_v34 = vsel %vm25682_vm1, %v24012_v62, 0.0  ;;  %18358 = vmatmul.mubr.msk.bf16.gmra.mrb[68].mxu1 %vm25677_vm9, %v24021_v24  ;;  %v10704_v20 = vmax.f32 %v10672_v38, 0.0  ;;  %v10673_v54 = vadd.f32 %v18332_v31, %v23729_v61  ;;  %v12726_v24 = vsel %vm25661_vm3, %v23998_v59, 0.0 }
 0xc88   : > { %25679 = vst [vmem:[#allocation32_spill] sm:$0xff] %v24026_v29  ;;  %25680 = vst [vmem:[#allocation42_spill] sm:$0xff] %v24029_v15  ;;  %v24044_v16 = vpack.c.bf16 %v24031_v14, %v11748_v34  ;;  %v10579_v29 = vpop.f32.mrb[71].mxu0  ;;  %v10702_v34 = vmax.f32 %v10670_v58, 0.0  ;;  %v24060_v35 = vpack.c.bf16 %v12391_v8, %v24035_v39  ;;  %v24063_v38 = vpack.c.bf16 %v24010_v7, %v12726_v24 }
 0xc89   : > { %25681 = vst [vmem:[#allocation46_spill] sm:$0xff] %v24031_v14  ;;  %25684 = vst [vmem:[#allocation60_spill] sm:$0xff] %v24047_v0  ;;  %v10705_v31 = vmax.f32 %v10673_v54, 0.0  ;;  %v12728_v59 = vsel %vm25675_vm5, %v24012_v62, 0.0  ;;  %vm25706_vm12 = vnez %v25439_v10 }
 0xc8a   : > { %25683 = vst [vmem:[#allocation55_spill] sm:$0xff] %v24044_v16  ;;  %vm25685_vm4 = vmmov %vm25677_vm9  ;;  %v10671_v16 = vadd.f32 %v23729_v61, %v10579_v29 }
 0xc8b   : > { %18361 = vmatprep.mubr.msk.bf16.mxu1 %vm25685_vm4, %v24029_v15  ;;  %25687 = vst [vmem:[#allocation70_spill] sm:$0xff] %v24060_v35  ;;  %25688 = vst [vmem:[#allocation74_spill] sm:$0xff] %v24063_v38  ;;  %v24066_v0 = vld [vmem:[#allocation6 + $0xb0] sm:$0xff]  ;;  %v24075_v35 = vpack.c.bf16 %v24031_v14, %v12728_v59 }
 0xc8c   : > { %vm25689_vm9 = vmmov %vm25685_vm4  ;;  %25690 = vst [vmem:[#allocation82_spill] sm:$0xff] %v24066_v0  ;;  %v24068_v15 = vld [vmem:[#allocation6 + $0xaa] sm:$0xff]  ;;  %v10703_v29 = vmax.f32 %v10671_v16, 0.0 }
 0xc8d   : > { %10775 = vst.msk [vmem:[#allocation6 + $0xe1] sm:$0xff] %vm25689_vm9, %v10704_v20  ;;  %v10887_v58 = vld [vmem:[#allocation6 + $0xb1] sm:$0xff]  ;;  %v10890_v8 = vld [vmem:[#allocation6 + $0xc9] sm:$0xff]  ;;  %25691 = vst [vmem:[#allocation87_spill] sm:$0xff] %v24075_v35  ;;  %vm25695_vm9 = vnez %v25326_v23 }
 0xc8e   : > { %10773 = vst.msk [vmem:[#allocation6 + $0xd1] sm:$0xff] %vm25685_vm4, %v10702_v34  ;;  %vm25692_vm3 = vmmov %vm25685_vm4  ;;  %v10888_v24 = vld [vmem:[#allocation6 + $0xb9] sm:$0xff]  ;;  %v11750_v38 = vsel %vm25695_vm9, %v24066_v0, 0.0  ;;  %vm25696_vm4 = vnez %v25436_v57  ;;  %v18335_v34 = vpop.f32.mrb[72].mxu0  ;;  %v10889_v35 = vld [vmem:[#allocation6 + $0xc1] sm:$0xff] }
 0xc8f   : > { %10776 = vst.msk [vmem:[#allocation6 + $0xe9] sm:$0xff] %vm25692_vm3, %v10705_v31  ;;  %v24078_v20 = vld [vmem:[#allocation6 + $0xb8] sm:$0xff]  ;;  %v24080_v54 = vld [vmem:[#allocation6 + $0xc0] sm:$0xff]  ;;  %v12393_v16 = vsel %vm25696_vm4, %v24068_v15, 0.0  ;;  %vm25697_vm5 = vmmov %vm25692_vm3  ;;  %v24089_v59 = vpack.c.bf16 %v10888_v24, %v10887_v58  ;;  %v10676_v7 = vadd.f32 %v18335_v34, %v23729_v61  ;;  %v10592_v62 = vpop.f32.mrb[73].mxu0  ;;  %v24097_v2 = vpack.c.bf16 %v10890_v8, %v10889_v35 }
 0xc90   : > { %25693 = vst [vmem:[#allocation94_spill] sm:$0xff] %v24078_v20  ;;  %25694 = vst [vmem:[#allocation98_spill] sm:$0xff] %v24080_v54  ;;  %v24091_v31 = vld [vmem:[#allocation6 + $0xba] sm:$0xff]  ;;  %v24094_v14 = vpack.c.bf16 %v24078_v20, %v11750_v38  ;;  %v24099_v52 = vld [vmem:[#allocation6 + $0xc8] sm:$0xff]  ;;  %vm25702_vm3 = vnez %v25329_v55  ;;  %v10674_v58 = vadd.f32 %v23729_v61, %v10592_v62  ;;  %v18336_v24 = vpop.f32.mrb[74].mxu0  ;;  %v24115_v35 = vpack.c.bf16 %v12393_v16, %v24101_v32 }
 0xc91   : > { %10774 = vst.msk [vmem:[#allocation6 + $0xd9] sm:$0xff] %vm25697_vm5, %v10703_v29  ;;  %25698 = vst [vmem:[#allocation104_spill] sm:$0xff] %v24089_v59  ;;  %v24103_v57 = vld [vmem:[#allocation6 + $0xb2] sm:$0xff]  ;;  %v11752_v29 = vsel %vm25702_vm3, %v24080_v54, 0.0  ;;  %18362 = vmatmul.mubr.msk.bf16.gmra.mrb[72].mxu1 %vm25697_vm5, %v24089_v59  ;;  %v10708_v8 = vmax.f32 %v10676_v7, 0.0  ;;  %v10677_v34 = vadd.f32 %v18336_v24, %v23729_v61  ;;  %v12395_v62 = vsel %vm25706_vm12, %v24091_v31, 0.0 }
 0xc92   : > { %25699 = vst [vmem:[#allocation24_spill] sm:$0xff] %v24094_v14  ;;  %25700 = vst [vmem:[#allocation33_spill] sm:$0xff] %v24097_v2  ;;  %v24112_v38 = vpack.c.bf16 %v24099_v52, %v11752_v29  ;;  %v10595_v14 = vpop.f32.mrb[75].mxu0  ;;  %v12730_v59 = vsel %vm25682_vm1, %v24066_v0, 0.0  ;;  %v10706_v29 = vmax.f32 %v10674_v58, 0.0  ;;  %v24128_v16 = vpack.c.bf16 %v12395_v62, %v24103_v57  ;;  %v24142_v62 = vld [vmem:[#allocation6 + $0xc2] sm:$0xff] }
 0xc93   : > { %25701 = vst [vmem:[#allocation35_spill] sm:$0xff] %v24099_v52  ;;  %25704 = vst [vmem:[#allocation49_spill] sm:$0xff] %v24115_v35  ;;  %v24131_v7 = vpack.c.bf16 %v24078_v20, %v12730_v59  ;;  %v10709_v24 = vmax.f32 %v10677_v34, 0.0  ;;  %v12732_v0 = vsel %vm25695_vm9, %v24080_v54, 0.0  ;;  %vm25712_vm9 = vnez %v25347_v44  ;;  %v10781_v54 = vld [vmem:[#allocation6] sm:$0xff] }
 0xc94   : > { %25703 = vst [vmem:[#allocation47_spill] sm:$0xff] %v24112_v38  ;;  %vm25705_vm4 = vmmov %vm25697_vm5  ;;  %v10675_v38 = vadd.f32 %v23729_v61, %v10595_v14  ;;  %v24145_v59 = vpack.c.bf16 %v24099_v52, %v12732_v0  ;;  %v10893_v0 = vld [vmem:[#allocation6 + $0xe1] sm:$0xff] }
 0xc95   : > { %18365 = vmatprep.mubr.msk.bf16.mxu1 %vm25705_vm4, %v24097_v2  ;;  %25707 = vst [vmem:[#allocation61_spill] sm:$0xff] %v24128_v16  ;;  %25708 = vst [vmem:[#allocation63_spill] sm:$0xff] %v24131_v7  ;;  %v24134_v35 = vld [vmem:[#allocation6 + $0xd0] sm:$0xff] }
 0xc96   : > { %vm25709_vm5 = vmmov %vm25705_vm4  ;;  %v24136_v2 = vld [vmem:[#allocation6 + $0xca] sm:$0xff]  ;;  %10777 = vst.msk [vmem:[#allocation6 + $0xf1] sm:$0xff] %vm25705_vm4, %v10706_v29  ;;  %v10707_v14 = vmax.f32 %v10675_v38, 0.0  ;;  %v11754_v16 = vsel %vm25712_vm9, %v24134_v35, 0.0 }
 0xc97   : > { %10779 = vst.msk [vmem:[#allocation6 + $0x101] sm:$0xff] %vm25709_vm5, %v10708_v8  ;;  %v10891_v61 = vld [vmem:[#allocation6 + $0xd1] sm:$0xff]  ;;  %v10894_v58 = vld [vmem:[#allocation6 + $0xe9] sm:$0xff]  ;;  %25710 = vst [vmem:[#allocation75_spill] sm:$0xff] %v24145_v59 }
 0xc98   : > { %vm25711_vm5 = vmmov %vm25705_vm4  ;;  %v10892_v8 = vld [vmem:[#allocation6 + $0xd9] sm:$0xff]  ;;  %vm25713_vm4 = vnez %v25446_v36  ;;  %v24168_v20 = vpack.c.bf16 %v10894_v58, %v10893_v0  ;;  %v24170_v23 = vld [vmem:[#allocation6 + $0xe8] sm:$0xff]  ;;  %v12734_v58 = vsel %vm25702_vm3, %v24134_v35, 0.0 }
 0xc99   : > { %10780 = vst.msk [vmem:[#allocation6 + $0x109] sm:$0xff] %vm25711_vm5, %v10709_v24  ;;  %v24148_v34 = vld [vmem:[#allocation6 + $0xd8] sm:$0xff]  ;;  %v24150_v7 = vld [vmem:[#allocation6 + $0xe0] sm:$0xff]  ;;  %v12397_v38 = vsel %vm25713_vm4, %v24136_v2, 0.0  ;;  %vm25714_vm1 = vmmov %vm25711_vm5  ;;  %v24159_v29 = vpack.c.bf16 %v10892_v8, %v10891_v61  ;;  %vm25718_vm5 = vnez %v25353_v18  ;;  %vm25721_vm4 = vnez %v25357_v22 }
 0xc9a   : > { %10778 = vst.msk [vmem:[#allocation6 + $0xf9] sm:$0xff] %vm25714_vm1, %v10707_v14  ;;  %v24161_v59 = vld [vmem:[#allocation6 + $0xd2] sm:$0xff]  ;;  %v24163_v24 = vld [vmem:[#allocation6 + $0xda] sm:$0xff]  ;;  %v24166_v52 = vpack.c.bf16 %v24148_v34, %v11754_v16  ;;  %25717 = vst [vmem:[#allocation90_spill] sm:$0xff] %v24168_v20  ;;  %v11756_v47 = vsel %vm25718_vm5, %v24150_v7, 0.0  ;;  %v24176_v14 = vpack.c.bf16 %v12397_v38, %v24142_v62  ;;  %v24195_v38 = vpack.c.bf16 %v24148_v34, %v12734_v58 }
 0xc9b   : > { %25715 = vst [vmem:[#allocation77_spill] sm:$0xff] %v24159_v29  ;;  %18366 = vmatmul.mubr.msk.bf16.gmra.mrb[76].mxu1 %vm25714_vm1, %v24159_v29  ;;  %v24181_v61 = vpack.c.bf16 %v24170_v23, %v11756_v47  ;;  %v12399_v16 = vsel %vm25721_vm4, %v24163_v24, 0.0  ;;  %vm25722_vm12 = vmmov %vm25714_vm1  ;;  %v12736_v47 = vsel %vm25712_vm9, %v24150_v7, 0.0  ;;  %v10782_v0 = vld [vmem:[#allocation6 + $0x8] sm:$0xff] }
 0xc9c   : > { %25716 = vst [vmem:[#allocation88_spill] sm:$0xff] %v24166_v52  ;;  %25719 = vst [vmem:[#allocation99_spill] sm:$0xff] %v24176_v14  ;;  %18369 = vmatprep.mubr.msk.bf16.mxu1 %vm25722_vm12, %v24168_v20  ;;  %v24192_v8 = vpack.c.bf16 %v12399_v16, %v24161_v59  ;;  %v10813_v14 = vsel %vm25547_vm7, %v10781_v54, 0.0  ;;  %v24203_v29 = vpack.c.bf16 %v24170_v23, %v12736_v47  ;;  %v13357_v20 = vsel %vm25581_vm11, %v23801_v41, 0.0  ;;  %v24221_v47 = vld [vmem:[#allocation6 + $0xe2] sm:$0xff] }
 0xc9d   : > { %25720 = vst [vmem:[#allocation101_spill] sm:$0xff] %v24181_v61  ;;  %25724 = vst [vmem:[#allocation107_spill] sm:$0xff] %v24195_v38  ;;  %v13359_v16 = vsel %vm25584_vm2, %v23819_v12, 0.0  ;;  %v24211_v58 = vld [vmem:[#allocation6 + $0xf0] sm:$0xff]  ;;  %vm25728_vm12 = vnez %v25366_v53  ;;  %v10845_v12 = vpack.c.bf16 %v10782_v0, %v10813_v14  ;;  %vm25736_vm7 = vnez %v25373_v9 }
 0xc9e   : > { %25723 = vst [vmem:[#allocation103_spill] sm:$0xff] %v24192_v8  ;;  %25725 = vst [vmem:[#allocation20_spill] sm:$0xff] %v24203_v29  ;;  %v24213_v38 = vld [vmem:[#allocation6 + $0xea] sm:$0xff]  ;;  %v24216_v8 = vpack.c.bf16 %v13357_v20, %v23829_v30  ;;  %v24219_v45 = vpack.c.bf16 %v13359_v16, %v23831_v56  ;;  %v11758_v29 = vsel %vm25728_vm12, %v24211_v58, 0.0  ;;  %v10815_v56 = vsel %vm22660_vm0, %v23744_v49, 0.0 }
 0xc9f   : > { %v10895_v54 = vld [vmem:[#allocation6 + $0xf1] sm:$0xff]  ;;  %v12401_v61 = vsel %vm25607_vm15, %v24213_v38, 0.0  ;;  %v13363_v49 = vsel %vm25587_vm6, %v23887_v63, 0.0  ;;  %vm25737_vm0 = vmmov %vm25714_vm1  ;;  %v10841_v55 = vsel %vm25728_vm12, %v24150_v7, 0.0 }
 0xca0   : > { %25726 = vst [vmem:[#allocation106_spill] sm:$0xff] %v24216_v8  ;;  %25727 = vst [vmem:[#allocation108_spill] sm:$0xff] %v24219_v45  ;;  %v24234_v16 = vpack.c.bf16 %v12401_v61, %v24221_v47  ;;  %v12738_v45 = vsel %vm25718_vm5, %v24211_v58, 0.0  ;;  %v10859_v44 = vpack.c.bf16 %v24170_v23, %v10841_v55  ;;  %v25819_v23 = vld [vmem:[#allocation18_spill] sm:$0xff]  ;;  %v25874_v55 = vld [vmem:[#allocation47_spill] sm:$0xff] }
 0xca1   : > { %v10896_v52 = vld [vmem:[#allocation6 + $0xf9] sm:$0xff]  ;;  %vm25740_vm1 = vmmov %vm25737_vm0  ;;  %v11395_v7 = vsel %vm25584_vm2, %v25819_v23, 0.0 }
 0xca2   : > { %v24229_v41 = vld [vmem:[#allocation6 + $0xf8] sm:$0xff]  ;;  %25730 = vst [vmem:[#allocation111_spill] sm:$0xff] %v24234_v16  ;;  %v24239_v8 = vpack.c.bf16 %v10896_v52, %v10895_v54  ;;  %v24249_v0 = vld [vmem:[#allocation6 + $0x100] sm:$0xff]  ;;  %v10846_v54 = vpack.c.bf16 %v23748_v37, %v10815_v56  ;;  %v13367_v37 = vsel %vm25656_vm14, %v23955_v11, 0.0  ;;  %v24302_v56 = vld [vmem:[#allocation6 + $0x10a] sm:$0xff]  ;;  %vm25757_vm14 = vnez %v25446_v36 }
 0xca3   : > { %v24231_v20 = vld [vmem:[#allocation6 + $0xf2] sm:$0xff]  ;;  %v24244_v30 = vld [vmem:[#allocation6 + $0xfa] sm:$0xff]  ;;  %v24247_v14 = vpack.c.bf16 %v24229_v41, %v11758_v29  ;;  %25734 = vst [vmem:[#allocation115_spill] sm:$0xff] %v24249_v0  ;;  %v24252_v61 = vpack.c.bf16 %v24229_v41, %v12738_v45  ;;  %v12740_v52 = vsel %vm25728_vm12, %v24249_v0, 0.0  ;;  %v24268_v29 = vld [vmem:[#allocation6 + $0x108] sm:$0xff]  ;;  %v10817_v0 = vsel %vm22717_vm8, %v23750_v27, 0.0 }
 0xca4   : > { %25729 = vst [vmem:[#allocation110_spill] sm:$0xff] %v24231_v20  ;;  %25731 = vst [vmem:[#allocation112_spill] sm:$0xff] %v24239_v8  ;;  %v12403_v16 = vsel %vm25736_vm7, %v24244_v30, 0.0  ;;  %18370 = vmatmul.mubr.msk.bf16.gmra.mrb[80].mxu1 %vm25737_vm0, %v24239_v8  ;;  %v24285_v8 = vpack.c.bf16 %v13363_v49, %v23899_v26  ;;  %vm25745_vm8 = vnez %v25420_v48  ;;  %vm25746_vm0 = vnez %v25426_v43  ;;  %v19973_v23 = vld [vmem:[#allocation9 + $0x58] sm:$0xff]  }
 0xca5   : > { %25732 = vst [vmem:[#allocation113_spill] sm:$0xff] %v24244_v30  ;;  %25733 = vst [vmem:[#allocation114_spill] sm:$0xff] %v24247_v14  ;;  %v24271_v45 = vpack.c.bf16 %v12403_v16, %v24231_v20  ;;  %18377 = vmatprep.mubr.msk.bf16.mxu1 %vm25740_vm1, %v10845_v12  ;;  %v24282_v14 = vpack.c.bf16 %v13361_v33, %v23897_v46  ;;  %v13365_v16 = vsel %vm25648_vm10, %v23932_v51, 0.0  ;;  %v13369_v17 = vsel %vm25745_vm8, %v24000_v21, 0.0 }
 0xca6   : > { %25735 = vst [vmem:[#allocation116_spill] sm:$0xff] %v24252_v61  ;;  %25738 = vst [vmem:[#allocation117_spill] sm:$0xff] %v24268_v29  ;;  %v24276_v61 = vpack.c.bf16 %v24268_v29, %v12740_v52  ;;  %v24291_v12 = vpack.c.bf16 %v13365_v16, %v23965_v1  ;;  %v13371_v27 = vsel %vm25746_vm0, %v24023_v28, 0.0  ;;  %v24305_v52 = vpack.c.bf16 %v13367_v37, %v23967_v50 }
 0xca7   : > { %25739 = vst [vmem:[#allocation118_spill] sm:$0xff] %v24271_v45  ;;  %25742 = vst [vmem:[#allocation120_spill] sm:$0xff] %v24282_v14  ;;  %v24308_v33 = vpack.c.bf16 %v13369_v17, %v24033_v42  ;;  %v24311_v49 = vpack.c.bf16 %v13371_v27, %v24035_v39  ;;  %vm25751_vm1 = vnez %v25429_v25  ;;  %v25754_v14 = vld [vmem:[#allocation79_spill] sm:$0xff]  ;;  %vm25756_vm8 = vnez %v25439_v10 }
 0xca8   : > { %25741 = vst [vmem:[#allocation119_spill] sm:$0xff] %v24276_v61  ;;  %25743 = vst [vmem:[#allocation121_spill] sm:$0xff] %v24285_v8  ;;  %v13373_v16 = vsel %vm25751_vm1, %v24068_v15, 0.0  ;;  %vm25755_vm0 = vnez %v25754_v14  ;;  %v13377_v17 = vsel %vm25756_vm8, %v24136_v2, 0.0  ;;  %v13379_v27 = vsel %vm25757_vm14, %v24163_v24, 0.0  ;;  %v25761_v61 = vld [vmem:[#allocation30_spill] sm:$0xff] }
 0xca9   : > { %25744 = vst [vmem:[#allocation122_spill] sm:$0xff] %v24291_v12  ;;  %25747 = vst [vmem:[#allocation123_spill] sm:$0xff] %v24302_v56  ;;  %v24316_v12 = vld [vmem:[#allocation6 + $0x102] sm:$0xff]  ;;  %v24319_v8 = vpack.c.bf16 %v13373_v16, %v24101_v32  ;;  %v13375_v37 = vsel %vm25755_vm0, %v24091_v31, 0.0  ;;  %v24337_v16 = vpack.c.bf16 %v13379_v27, %v24161_v59  ;;  %v10847_v45 = vpack.c.bf16 %v25761_v61, %v10817_v0  ;;  %v19968_v0 = vld [vmem:[#allocation9 + $0x30] sm:$0xff]  }
 0xcaa   : > { %25748 = vst [vmem:[#allocation124_spill] sm:$0xff] %v24305_v52  ;;  %25749 = vst [vmem:[#allocation125_spill] sm:$0xff] %v24308_v33  ;;  %v24331_v33 = vpack.c.bf16 %v13375_v37, %v24103_v57  ;;  %v24334_v52 = vpack.c.bf16 %v13377_v17, %v24142_v62  ;;  %v13383_v37 = vsel %vm25607_vm15, %v24244_v30, 0.0  ;;  %v13385_v17 = vsel %vm25736_vm7, %v24302_v56, 0.0  ;;  %v25768_v61 = vld [vmem:[#allocation40_spill] sm:$0xff]  ;;  %v25772_v56 = vld [vmem:[#allocation37_spill] sm:$0xff] }
 0xcab   : > { %25750 = vst [vmem:[#allocation126_spill] sm:$0xff] %v24311_v49  ;;  %25752 = vst [vmem:[#allocation127_spill] sm:$0xff] %v24316_v12  ;;  %v19967_v49 = vld [vmem:[#allocation9 + $0x28] sm:$0xff]   ;;  %vm25763_vm14 = vcmask 261120   ;;  %v24354_v27 = vpack.c.bf16 %v13383_v37, %v24231_v20  ;;  %vm25773_vm7 = vnez %v25772_v56  ;;  %v25774_v37 = vld [vmem:[#allocation52_spill] sm:$0xff] }
 0xcac   : > { %25753 = vst [vmem:[#allocation128_spill] sm:$0xff] %v24319_v8  ;;  %25758 = vst [vmem:[#allocation79_spill] sm:$0xff] %v24331_v33  ;;  %v13381_v8 = vsel %vm25721_vm4, %v24213_v38, 0.0  ;;  %18378 = vmatmul.mubr.msk.bf16.vlgmr.msra.gmra.mrb[52].mxu1 %vm25763_vm14, %v10846_v54  ;;  %v25771_v33 = vld [vmem:[#allocation53_spill] sm:$0xff] }
 0xcad   : > { %25759 = vst [vmem:[#allocation129_spill] sm:$0xff] %v24334_v52  ;;  %25760 = vst [vmem:[#allocation130_spill] sm:$0xff] %v24337_v16  ;;  %v24344_v29 = vpack.c.bf16 %v13381_v8, %v24221_v47  ;;  %v24357_v16 = vpack.c.bf16 %v13385_v17, %v24316_v12  ;;  %v25767_v8 = vld [vmem:[#allocation41_spill] sm:$0xff]  ;;  %v10821_v54 = vsel %vm25773_vm7, %v25771_v33, 0.0  ;;  %v25775_v17 = vld [vmem:[#allocation66_spill] sm:$0xff] }
 0xcae   : > { %25764 = vst [vmem:[#allocation131_spill] sm:$0xff] %v24354_v27  ;;  %vm25766_vm4 = vmmov %vm25763_vm14  ;;  %18410 = vmatpush3.bf16.msra.mxu1 %v25767_v8  ;;  %v25778_v8 = vld [vmem:[#allocation38_spill] sm:$0xff]  ;;  %v25783_v56 = vld [vmem:[#allocation81_spill] sm:$0xff] }
 0xcaf   : > { %25762 = vst [vmem:[#allocation30_spill] sm:$0xff] %v24344_v29  ;;  %25765 = vst [vmem:[#allocation132_spill] sm:$0xff] %v24357_v16  ;;  %18381 = vmatprep.mubr.msk.bf16.mxu1 %vm25766_vm4, %v10847_v45  ;;  %18411 = vmatprep.subr.bf16.mxu1 %v19967_v49  ;;  %v25769_v29 = vld [vmem:[#allocation27_spill] sm:$0xff]  ;;  %v10849_v16 = vpack.c.bf16 %v25775_v17, %v10821_v54  ;;  %vm25779_vm8 = vnez %v25778_v8  ;;  %v25790_v54 = vld [vmem:[#allocation45_spill] sm:$0xff] }
 0xcb0   : > { %vm25770_vm15 = vnez %v25769_v29  ;;  %vm25776_vm14 = vmmov %vm25766_vm4  ;;  %v25777_v45 = vld [vmem:[#allocation83_spill] sm:$0xff]  ;;  %v25780_v29 = vld [vmem:[#allocation85_spill] sm:$0xff] }
 0xcb1   : > { %v10819_v52 = vsel %vm25770_vm15, %v25768_v61, 0.0  ;;  %v10823_v12 = vsel %vm25779_vm8, %v25777_v45, 0.0  ;;  %v25781_v61 = vld [vmem:[#allocation50_spill] sm:$0xff]  ;;  %vm25785_vm7 = vmmov %vm25766_vm4 }
 0xcb2   : > { %18412 = vmatpush3.bf16.msra.mxu1 %v19967_v49  ;;  %v10848_v27 = vpack.c.bf16 %v25774_v37, %v10819_v52  ;;  %vm25782_vm15 = vnez %v25781_v61  ;;  %v10850_v33 = vpack.c.bf16 %v25783_v56, %v10823_v12  ;;  %v25784_v49 = vld [vmem:[#allocation93_spill] sm:$0xff]  ;;  %vm25786_vm0 = vmmov %vm25766_vm4  ;;  %v25787_v52 = vld [vmem:[#allocation23_spill] sm:$0xff] }
 0xcb3   : > { %18445 = vmatprep.subr.bf16.mxu1 %v19968_v0  ;;  %v10825_v20 = vsel %vm25782_vm15, %v25780_v29, 0.0  ;;  %v25791_v37 = vld [vmem:[#allocation64_spill] sm:$0xff]  ;;  %v25793_v45 = vld [vmem:[#allocation34_spill] sm:$0xff]  ;;  %v25794_v61 = vld [vmem:[#allocation73_spill] sm:$0xff] }
 0xcb4   : > { %18382 = vmatmul.mubr.msk.bf16.gmra.mrb[56].mxu1 %vm25776_vm14, %v10848_v27  ;;  %v10851_v30 = vpack.c.bf16 %v25784_v49, %v10825_v20  ;;  %v25788_v27 = vld [vmem:[#allocation51_spill] sm:$0xff]  ;;  %vm25795_vm8 = vmmov %vm25786_vm0  ;;  %v25797_v20 = vld [vmem:[#allocation100_spill] sm:$0xff] }
 0xcb5   : > { %18385 = vmatprep.mubr.msk.bf16.mxu1 %vm25766_vm4, %v10849_v16  ;;  %vm25789_vm14 = vnez %v25788_v27  ;;  %vm25792_vm4 = vnez %v25791_v37  ;;  %vm25796_vm15 = vmmov %vm25786_vm0  ;;  %v25798_v12 = vld [vmem:[#allocation65_spill] sm:$0xff]  ;;  %v25804_v37 = vld [vmem:[#allocation46_spill] sm:$0xff] }
 0xcb6   : > { %v10827_v16 = vsel %vm25789_vm14, %v25787_v52, 0.0  ;;  %v10829_v17 = vsel %vm25792_vm4, %v25790_v54, 0.0  ;;  %v25800_v56 = vld [vmem:[#allocation17_spill] sm:$0xff]  ;;  %v25803_v52 = vld [vmem:[#allocation15_spill] sm:$0xff]  ;;  %vm25805_vm14 = vmmov %vm25795_vm8 }
 0xcb7   : > { %v10852_v8 = vpack.c.bf16 %v25793_v45, %v10827_v16  ;;  %v10853_v29 = vpack.c.bf16 %v25794_v61, %v10829_v17  ;;  %vm25806_vm4 = vmmov %vm25795_vm8  ;;  %v25807_v16 = vld [vmem:[#allocation82_spill] sm:$0xff] }
 0xcb8   : > { %v10835_v17 = vsel %vm25702_vm3, %v25807_v16, 0.0  ;;  %v25808_v45 = vld [vmem:[#allocation98_spill] sm:$0xff]  ;;  %vm25814_vm3 = vmmov %vm25806_vm4  ;;  %v19969_v16 = vld [vmem:[#allocation9 + $0x38] sm:$0xff]  }
 0xcb9   : > { %v25809_v61 = vld [vmem:[#allocation94_spill] sm:$0xff]  ;;  %vm25818_vm12 = vmmov %vm25814_vm3 }
 0xcbc   : > { %18386 = vmatmul.mubr.msk.bf16.gmra.mrb[60].mxu1 %vm25785_vm7, %v10850_v33  ;;  %vm25799_vm7 = vnez %v25798_v12  ;;  %v25801_v33 = vld [vmem:[#allocation78_spill] sm:$0xff] }
 0xcbd   : > { %18389 = vmatprep.mubr.msk.bf16.mxu1 %vm25786_vm0, %v10851_v30  ;;  %v10831_v30 = vsel %vm25799_vm7, %v25797_v20, 0.0  ;;  %vm25802_vm0 = vnez %v25801_v33  ;;  %v25810_v20 = vld [vmem:[#allocation35_spill] sm:$0xff]  ;;  %v11361_v33 = vld [vmem:[#allocation6 + $0xa] sm:$0xff] }
 0xcbe   : > { %v10833_v49 = vsel %vm25802_vm0, %v25800_v56, 0.0  ;;  %v10854_v27 = vpack.c.bf16 %v25803_v52, %v10831_v30  ;;  %v10839_v30 = vsel %vm25718_vm5, %v24134_v35, 0.0  ;;  %v11393_v18 = vsel %vm25581_vm11, %v11361_v33, 0.0  ;;  %vm25817_vm5 = vmmov %vm25814_vm3  ;;  %v25880_v33 = vld [vmem:[#allocation114_spill] sm:$0xff] }
 0xcbf   : > { %v10855_v54 = vpack.c.bf16 %v25804_v37, %v10833_v49  ;;  %v10858_v56 = vpack.c.bf16 %v24148_v34, %v10839_v30  ;;  %v25815_v49 = vld [vmem:[#allocation109_spill] sm:$0xff]  ;;  %v25820_v34 = vld [vmem:[#allocation44_spill] sm:$0xff]  ;;  %vm25823_vm11 = vmmov %vm25814_vm3 }
 0xcc0   : > { %vm25816_vm7 = vnez %v25815_v49  ;;  %v11397_v37 = vsel %vm25585_vm13, %v25820_v34, 0.0  ;;  %vm25824_vm0 = vmmov %vm25814_vm3  ;;  %v25872_v30 = vld [vmem:[#allocation24_spill] sm:$0xff] }
 0xcc1   : > { %v10843_v52 = vsel %vm25816_vm7, %v24211_v58, 0.0  ;;  %v25821_v58 = vld [vmem:[#allocation26_spill] sm:$0xff]  ;;  %vm25827_vm2 = vmmov %vm25824_vm0  ;;  %v25889_v34 = vld [vmem:[#allocation56_spill] sm:$0xff] }
 0xcc2   : > { %v10860_v53 = vpack.c.bf16 %v24229_v41, %v10843_v52  ;;  %v19970_v41 = vld [vmem:[#allocation9 + $0x40] sm:$0xff]   ;;  %vm25828_vm13 = vmmov %vm25824_vm0  ;;  %v25882_v52 = vld [vmem:[#allocation115_spill] sm:$0xff] }
 0xcc3   : > { %vm25831_vm10 = vmmov %vm25824_vm0  ;;  %v13025_v49 = vld [vmem:[#allocation6 + $0x59] sm:$0xff] }
 0xcc4   : > { %18390 = vmatmul.mubr.msk.bf16.gmra.mrb[64].mxu1 %vm25795_vm8, %v10852_v8  ;;  %v10837_v8 = vsel %vm25712_vm9, %v25808_v45, 0.0  ;;  %vm25811_vm8 = vmmov %vm25806_vm4  ;;  %v25825_v45 = vld [vmem:[#allocation43_spill] sm:$0xff] }
 0xcc5   : > { %18393 = vmatprep.mubr.msk.bf16.mxu1 %vm25796_vm15, %v10853_v29  ;;  %v10856_v29 = vpack.c.bf16 %v25809_v61, %v10835_v17  ;;  %v10857_v12 = vpack.c.bf16 %v25810_v20, %v10837_v8  ;;  %vm25812_vm15 = vmmov %vm25806_vm4  ;;  %v11426_v17 = vpack.c.bf16 %v11397_v37, %v25822_v3  ;;  %v11399_v60 = vsel %vm25587_vm6, %v25825_v45, 0.0  ;;  %v25826_v8 = vld [vmem:[#allocation69_spill] sm:$0xff]  ;;  %v25868_v20 = vld [vmem:[#allocation32_spill] sm:$0xff] }
 0xcc6   : > { %vm25813_vm9 = vmmov %vm25806_vm4  ;;  %v11427_v61 = vpack.c.bf16 %v11399_v60, %v25826_v8  ;;  %vm25830_vm6 = vnez %v25420_v48  ;;  %v19974_v37 = vld [vmem:[#allocation9 + $0x60] sm:$0xff]   ;;  %v25896_v3 = vld [vmem:[#allocation48_spill] sm:$0xff] }
 0xcc7   : > { %v11405_v5 = vsel %vm25830_vm6, %v23932_v51, 0.0  ;;  %vm25845_vm6 = vnez %v25373_v9  ;;  %v19971_v9 = vld [vmem:[#allocation9 + $0x48] sm:$0xff]   ;;  %v25904_v60 = vld [vmem:[#allocation104_spill] sm:$0xff]  ;;  %v25908_v8 = vld [vmem:[#allocation77_spill] sm:$0xff] }
 0xcc8   : > { %v11430_v40 = vpack.c.bf16 %v11405_v5, %v23965_v1  ;;  %v25851_v1 = vld [vmem:[#allocation110_spill] sm:$0xff]  ;;  %v12066_v5 = vld [vmem:[#allocation6 + $0x101] sm:$0xff] }
 0xcc9   : > { %v25902_v45 = vld [vmem:[#allocation42_spill] sm:$0xff] }
 0xccc   : > { %18394 = vmatmul.mubr.msk.bf16.gmra.mrb[68].mxu1 %vm25805_vm14, %v10854_v27  ;;  %v11360_v27 = vld [vmem:[#allocation6 + $0x2] sm:$0xff]  ;;  %vm25829_vm14 = vnez %v25417_v19  ;;  %v11409_v19 = vsel %vm25751_vm1, %v24000_v21, 0.0  ;;  %vm25838_vm1 = vmmov %vm25824_vm0 }
 0xccd   : > { %18397 = vmatprep.mubr.msk.bf16.mxu1 %vm25806_vm4, %v10855_v54  ;;  %v11424_v35 = vpack.c.bf16 %v11393_v18, %v11360_v27  ;;  %v11425_v54 = vpack.c.bf16 %v11395_v7, %v25821_v58  ;;  %vm25832_vm4 = vmmov %vm25824_vm0  ;;  %v11432_v48 = vpack.c.bf16 %v11409_v19, %v24033_v42  ;;  %v11760_v27 = vsel %vm25816_vm7, %v25882_v52, 0.0  ;;  %v25883_v18 = vld [vmem:[#allocation117_spill] sm:$0xff]  ;;  %v25887_v7 = vld [vmem:[#allocation19_spill] sm:$0xff] }
 0xcce   : > { %v25891_v58 = vld [vmem:[#allocation58_spill] sm:$0xff]  ;;  %v25917_v19 = vld [vmem:[#allocation68_spill] sm:$0xff] }
 0xccf   : > { %v12710_v52 = vld [vmem:[#allocation6 + $0x110] sm:$0xff] }
 0xcd4   : > { %18398 = vmatmul.mubr.msk.bf16.gmra.mrb[72].mxu1 %vm25811_vm8, %v10856_v29  ;;  %v11428_v29 = vpack.c.bf16 %v11401_v6, %v23897_v46  ;;  %vm25833_vm8 = vnez %v25426_v43  ;;  %v25906_v6 = vld [vmem:[#allocation33_spill] sm:$0xff] }
 0xcd5   : > { %18401 = vmatprep.mubr.msk.bf16.mxu1 %vm25812_vm15, %v10857_v12  ;;  %v11407_v46 = vsel %vm25833_vm8, %v23955_v11, 0.0  ;;  %vm25834_vm15 = vmmov %vm25824_vm0  ;;  %v25870_v12 = vld [vmem:[#allocation55_spill] sm:$0xff] }
 0xcdc   : > { %18402 = vmatmul.mubr.msk.bf16.gmra.mrb[76].mxu1 %vm25813_vm9, %v10858_v56  ;;  %vm25835_vm9 = vmmov %vm25824_vm0  ;;  %v25876_v56 = vld [vmem:[#allocation88_spill] sm:$0xff] }
 0xcdd   : > { %18405 = vmatprep.mubr.msk.bf16.mxu1 %vm25814_vm3, %v10859_v44  ;;  %vm25836_vm3 = vnez %v25754_v14  ;;  %v25866_v14 = vld [vmem:[#allocation76_spill] sm:$0xff]  ;;  %v25878_v44 = vld [vmem:[#allocation101_spill] sm:$0xff] }
 0xcde   : > { %v11411_v51 = vsel %vm25836_vm3, %v24023_v28, 0.0  ;;  %v25855_v28 = vld [vmem:[#allocation36_spill] sm:$0xff]  ;;  %vm25856_vm3 = vmmov %vm25838_vm1 }
 0xce4   : > { %18406 = vmatmul.mubr.msk.bf16.gmra.mrb[80].mxu1 %vm25817_vm5, %v10860_v53  ;;  %vm25837_vm5 = vnez %v25439_v10  ;;  %v11777_v53 = vpack.c.bf16 %v25883_v18, %v11760_v27  ;;  %v25973_v27 = vld [vmem:[#allocation119_spill] sm:$0xff] }
 0xce5   : > { %18413 = vmatprep.mubr.msk.bf16.mxu1 %vm25818_vm12, %v11424_v35  ;;  %v11413_v43 = vsel %vm25837_vm5, %v24068_v15, 0.0  ;;  %vm25839_vm12 = vmmov %vm25824_vm0  ;;  %v25885_v35 = vld [vmem:[#allocation25_spill] sm:$0xff]  ;;  %v12711_v18 = vld [vmem:[#allocation6 + $0x118] sm:$0xff] }
 0xce6   : > { %v11434_v25 = vpack.c.bf16 %v11413_v43, %v24101_v32  ;;  %vm25858_vm5 = vmmov %vm25838_vm1  ;;  %v25922_v43 = vld [vmem:[#allocation95_spill] sm:$0xff] }
 0xcec   : > { %18414 = vmatmul.mubr.msk.bf16.vlgmr.msra.gmra.mrb[52].mxu1 %vm25823_vm11, %v11425_v54  ;;  %vm25840_vm11 = vnez %v25446_v36  ;;  %v11421_v36 = vsel %vm25845_vm6, %v24213_v38, 0.0  ;;  %v25862_v38 = vld [vmem:[#allocation96_spill] sm:$0xff]  ;;  %v25893_v54 = vld [vmem:[#allocation91_spill] sm:$0xff] }
 0xced   : > { %18417 = vmatprep.mubr.msk.bf16.mxu1 %vm25824_vm0, %v11426_v17  ;;  %18446 = vmatpush3.bf16.msra.mxu1 %v19968_v0  ;;  %v11403_v0 = vsel %vm25829_vm14, %v23887_v63, 0.0  ;;  %v11431_v63 = vpack.c.bf16 %v11407_v46, %v23967_v50  ;;  %v11415_v50 = vsel %vm25840_vm11, %v24091_v31, 0.0  ;;  %vm25841_vm0 = vnez %v25357_v22  ;;  %v25848_v22 = vld [vmem:[#allocation113_spill] sm:$0xff]  ;;  %v25857_v31 = vld [vmem:[#allocation54_spill] sm:$0xff]  ;;  %vm25863_vm11 = vmmov %vm25838_vm1 }
 0xcee   : > { %18447 = vmatprep.subr.bf16.mxu1 %v19969_v16  ;;  %v11429_v13 = vpack.c.bf16 %v11403_v0, %v23899_v26  ;;  %v11433_v26 = vpack.c.bf16 %v11411_v51, %v24035_v39  ;;  %v11417_v42 = vsel %vm25841_vm0, %v24136_v2, 0.0  ;;  %v11435_v21 = vpack.c.bf16 %v11415_v50, %v24103_v57  ;;  %v25849_v57 = vld [vmem:[#allocation21_spill] sm:$0xff]  ;;  %vm25865_vm0 = vmmov %vm25838_vm1  ;;  %v25898_v17 = vld [vmem:[#allocation62_spill] sm:$0xff] }
 0xcef   : > { %v11436_v15 = vpack.c.bf16 %v11417_v42, %v24142_v62  ;;  %vm25844_vm14 = vnez %v25368_v4  ;;  %v11438_v2 = vpack.c.bf16 %v11421_v36, %v24221_v47  ;;  %vm25850_vm8 = vnez %v25849_v57  ;;  %v25853_v4 = vld [vmem:[#allocation16_spill] sm:$0xff]  ;;  %v19972_v62 = vld [vmem:[#allocation9 + $0x50] sm:$0xff]   ;;  %vm25873_vm6 = vmmov %vm25865_vm0 }
 0xcf0   : > { %v11419_v10 = vsel %vm25844_vm14, %v24163_v24, 0.0  ;;  %v11423_v39 = vsel %vm25850_vm8, %v25848_v22, 0.0  ;;  %v25860_v24 = vld [vmem:[#allocation92_spill] sm:$0xff]  ;;  %v25864_v47 = vld [vmem:[#allocation59_spill] sm:$0xff]  ;;  %vm25871_vm14 = vmmov %vm25865_vm0 }
 0xcf1   : > { %18448 = vmatpush3.bf16.msra.mxu1 %v19969_v16  ;;  %v11437_v32 = vpack.c.bf16 %v11419_v10, %v24161_v59  ;;  %v11439_v11 = vpack.c.bf16 %v11423_v39, %v25851_v1  ;;  %v25859_v59 = vld [vmem:[#allocation57_spill] sm:$0xff]  ;;  %v25894_v16 = vld [vmem:[#allocation84_spill] sm:$0xff]  ;;  %v19975_v46 = vld [vmem:[#allocation9 + $0x68] sm:$0xff]  }
 0xcf2   : > { %18481 = vmatprep.subr.bf16.mxu1 %v19970_v41  ;;  %v12067_v0 = vld [vmem:[#allocation6 + $0x109] sm:$0xff]  ;;  %v25928_v50 = vld [vmem:[#allocation60_spill] sm:$0xff]  ;;  %v25936_v10 = vld [vmem:[#allocation99_spill] sm:$0xff] }
 0xcf3   : > { %v25920_v51 = vld [vmem:[#allocation102_spill] sm:$0xff]  ;;  %v25938_v36 = vld [vmem:[#allocation103_spill] sm:$0xff]  ;;  %v20238_v22 = vld [vmem:[#allocation3] sm:$0xff] }
 0xcf4   : > { %18418 = vmatmul.mubr.msk.bf16.gmra.mrb[56].mxu1 %vm25827_vm2, %v11427_v61  ;;  %vm25842_vm2 = vmmov %vm25838_vm1  ;;  %v25910_v61 = vld [vmem:[#allocation90_spill] sm:$0xff]  ;;  %v25944_v39 = vld [vmem:[#allocation123_spill] sm:$0xff] }
 0xcf5   : > { %18421 = vmatprep.mubr.msk.bf16.mxu1 %vm25828_vm13, %v11428_v29  ;;  %vm25843_vm13 = vmmov %vm25838_vm1  ;;  %v25912_v29 = vld [vmem:[#allocation112_spill] sm:$0xff]  ;;  %v25930_v42 = vld [vmem:[#allocation70_spill] sm:$0xff]  ;;  %v12405_v1 = vsel %vm25850_vm8, %v25944_v39, 0.0 }
 0xcfc   : > { %18422 = vmatmul.mubr.msk.bf16.gmra.mrb[60].mxu1 %vm25831_vm10, %v11429_v13  ;;  %vm25846_vm10 = vmmov %vm25838_vm1  ;;  %v24569_v13 = vpack.c.bf16 %v12067_v0, %v12066_v5  ;;  %v13031_v0 = vld [vmem:[#allocation6 + $0x89] sm:$0xff]  ;;  %v13028_v5 = vld [vmem:[#allocation6 + $0x71] sm:$0xff] }
 0xcfd   : > { %18425 = vmatprep.mubr.msk.bf16.mxu1 %vm25832_vm4, %v11430_v40  ;;  %vm25847_vm4 = vmmov %vm25838_vm1  ;;  %v25915_v40 = vld [vmem:[#allocation39_spill] sm:$0xff] }
 0xd04   : > { %18426 = vmatmul.mubr.msk.bf16.gmra.mrb[64].mxu1 %vm25834_vm15, %v11431_v63  ;;  %vm25852_vm15 = vmmov %vm25838_vm1  ;;  %v25919_v63 = vld [vmem:[#allocation72_spill] sm:$0xff] }
 0xd05   : > { %18429 = vmatprep.mubr.msk.bf16.mxu1 %vm25835_vm9, %v11432_v48  ;;  %vm25854_vm9 = vmmov %vm25838_vm1  ;;  %v19976_v48 = vld [vmem:[#allocation9 + $0x70] sm:$0xff]  }
 0xd0c   : > { %18430 = vmatmul.mubr.msk.bf16.gmra.mrb[68].mxu1 %vm25838_vm1, %v11433_v26  ;;  %v25924_v26 = vld [vmem:[#allocation86_spill] sm:$0xff] }
 0xd0d   : > { %18433 = vmatprep.mubr.msk.bf16.mxu1 %vm25839_vm12, %v11434_v25  ;;  %vm25861_vm12 = vmmov %vm25838_vm1  ;;  %v25926_v25 = vld [vmem:[#allocation89_spill] sm:$0xff] }
 0xd14   : > { %18434 = vmatmul.mubr.msk.bf16.gmra.mrb[72].mxu1 %vm25842_vm2, %v11435_v21  ;;  %vm25867_vm2 = vmmov %vm25865_vm0  ;;  %v25932_v21 = vld [vmem:[#allocation49_spill] sm:$0xff] }
 0xd15   : > { %18437 = vmatprep.mubr.msk.bf16.mxu1 %vm25843_vm13, %v11436_v15  ;;  %vm25869_vm13 = vmmov %vm25865_vm0  ;;  %v25934_v15 = vld [vmem:[#allocation61_spill] sm:$0xff] }
 0xd1c   : > { %18438 = vmatmul.mubr.msk.bf16.gmra.mrb[76].mxu1 %vm25846_vm10, %v11437_v32  ;;  %vm25875_vm10 = vmmov %vm25865_vm0  ;;  %v25940_v32 = vld [vmem:[#allocation111_spill] sm:$0xff] }
 0xd1d   : > { %18441 = vmatprep.mubr.msk.bf16.mxu1 %vm25847_vm4, %v11438_v2  ;;  %vm25877_vm4 = vmmov %vm25865_vm0  ;;  %v25942_v2 = vld [vmem:[#allocation118_spill] sm:$0xff] }
 0xd24   : > { %18442 = vmatmul.mubr.msk.bf16.gmra.mrb[80].mxu1 %vm25852_vm15, %v11439_v11  ;;  %vm25879_vm15 = vmmov %vm25865_vm0  ;;  %v25945_v11 = vld [vmem:[#allocation127_spill] sm:$0xff] }
 0xd25   : > { %18449 = vmatprep.mubr.msk.bf16.mxu1 %vm25854_vm9, %v25853_v4  ;;  %vm25881_vm9 = vmmov %vm25865_vm0  ;;  %v12421_v4 = vpack.c.bf16 %v12405_v1, %v25945_v11  ;;  %v13042_v1 = vld [vmem:[#allocation6 + $0xe1] sm:$0xff] }
 0xd2c   : > { %18450 = vmatmul.mubr.msk.bf16.vlgmr.msra.gmra.mrb[52].mxu1 %vm25856_vm3, %v25855_v28  ;;  %vm25884_vm3 = vmmov %vm25865_vm0  ;;  %v19977_v28 = vld [vmem:[#allocation9 + $0x78] sm:$0xff]  }
 0xd2d   : > { %18453 = vmatprep.mubr.msk.bf16.mxu1 %vm25858_vm5, %v25857_v31  ;;  %18482 = vmatpush3.bf16.msra.mxu1 %v19970_v41  ;;  %vm25886_vm5 = vmmov %vm25865_vm0  ;;  %v25900_v41 = vld [vmem:[#allocation28_spill] sm:$0xff] }
 0xd2e   : > { %18483 = vmatprep.subr.bf16.mxu1 %v19971_v9  ;;  %v25948_v31 = vld [vmem:[#allocation80_spill] sm:$0xff] }
 0xd31   : > { %18484 = vmatpush3.bf16.msra.mxu1 %v19971_v9  ;;  %v25946_v9 = vld [vmem:[#allocation29_spill] sm:$0xff] }
 0xd32   : > { %18517 = vmatprep.subr.bf16.mxu1 %v19972_v62 }
 0xd34   : > { %18454 = vmatmul.mubr.msk.bf16.gmra.mrb[56].mxu1 %vm25838_vm1, %v25859_v59  ;;  %vm25888_vm1 = vmmov %vm25865_vm0  ;;  %v19978_v59 = vld [vmem:[#allocation9 + $0x80] sm:$0xff]  }
 0xd35   : > { %18457 = vmatprep.mubr.msk.bf16.mxu1 %vm25861_vm12, %v25860_v24  ;;  %vm25890_vm12 = vmmov %vm25865_vm0  ;;  %v25952_v24 = vld [vmem:[#allocation22_spill] sm:$0xff] }
 0xd3c   : > { %18458 = vmatmul.mubr.msk.bf16.gmra.mrb[60].mxu1 %vm25863_vm11, %v25862_v38  ;;  %vm25892_vm11 = vmmov %vm25865_vm0  ;;  %v25954_v38 = vld [vmem:[#allocation31_spill] sm:$0xff] }
 0xd3d   : > { %18461 = vmatprep.mubr.msk.bf16.mxu1 %vm25865_vm0, %v25864_v47  ;;  %v25956_v47 = vld [vmem:[#allocation97_spill] sm:$0xff] }
 0xd44   : > { %18462 = vmatmul.mubr.msk.bf16.gmra.mrb[64].mxu1 %vm25867_vm2, %v25866_v14  ;;  %vm25895_vm2 = vmmov %vm25865_vm0  ;;  %v25958_v14 = vld [vmem:[#allocation105_spill] sm:$0xff] }
 0xd45   : > { %18465 = vmatprep.mubr.msk.bf16.mxu1 %vm25869_vm13, %v25868_v20  ;;  %vm25897_vm13 = vmmov %vm25865_vm0  ;;  %v25960_v20 = vld [vmem:[#allocation74_spill] sm:$0xff] }
 0xd4c   : > { %18466 = vmatmul.mubr.msk.bf16.gmra.mrb[68].mxu1 %vm25871_vm14, %v25870_v12  ;;  %vm25899_vm14 = vmmov %vm25865_vm0  ;;  %v25962_v12 = vld [vmem:[#allocation87_spill] sm:$0xff] }
 0xd4d   : > { %18469 = vmatprep.mubr.msk.bf16.mxu1 %vm25873_vm6, %v25872_v30  ;;  %vm25901_vm6 = vmmov %vm25865_vm0  ;;  %v25964_v30 = vld [vmem:[#allocation63_spill] sm:$0xff] }
 0xd54   : > { %18470 = vmatmul.mubr.msk.bf16.gmra.mrb[72].mxu1 %vm25875_vm10, %v25874_v55  ;;  %vm25903_vm10 = vmmov %vm25865_vm0  ;;  %v25966_v55 = vld [vmem:[#allocation75_spill] sm:$0xff] }
 0xd55   : > { %18473 = vmatprep.mubr.msk.bf16.mxu1 %vm25877_vm4, %v25876_v56  ;;  %vm25905_vm4 = vmmov %vm25865_vm0  ;;  %v25968_v56 = vld [vmem:[#allocation107_spill] sm:$0xff] }
 0xd5c   : > { %18474 = vmatmul.mubr.msk.bf16.gmra.mrb[76].mxu1 %vm25879_vm15, %v25878_v44  ;;  %vm25907_vm15 = vmmov %vm25865_vm0  ;;  %v25970_v44 = vld [vmem:[#allocation20_spill] sm:$0xff] }
 0xd5d   : > { %18477 = vmatprep.mubr.msk.bf16.mxu1 %vm25881_vm9, %v25880_v33  ;;  %vm25909_vm9 = vmmov %vm25865_vm0  ;;  %v25972_v33 = vld [vmem:[#allocation116_spill] sm:$0xff] }
 0xd64   : > { %18478 = vmatmul.mubr.msk.bf16.gmra.mrb[80].mxu1 %vm25884_vm3, %v11777_v53  ;;  %vm25911_vm3 = vmmov %vm25865_vm0  ;;  %v12742_v53 = vsel %vm25816_vm7, %v12710_v52, 0.0  ;;  %v26014_v52 = vld [vmem:[#allocation30_spill] sm:$0xff] }
 0xd65   : > { %18485 = vmatprep.mubr.msk.bf16.mxu1 %vm25886_vm5, %v25885_v35  ;;  %vm25913_vm5 = vmmov %vm25865_vm0  ;;  %v13019_v35 = vld [vmem:[#allocation6 + $0x29] sm:$0xff] }
 0xd66   : > { %vm25979_vm7 = vmmov %vm25865_vm0 }
 0xd6c   : > { %18486 = vmatmul.mubr.msk.bf16.vlgmr.msra.gmra.mrb[52].mxu1 %vm25888_vm1, %v25887_v7  ;;  %vm25914_vm1 = vmmov %vm25865_vm0  ;;  %v13018_v7 = vld [vmem:[#allocation6 + $0x21] sm:$0xff] }
 0xd6d   : > { %18489 = vmatprep.mubr.msk.bf16.mxu1 %vm25890_vm12, %v25889_v34  ;;  %18518 = vmatpush3.bf16.msra.mxu1 %v19972_v62  ;;  %vm25916_vm12 = vmmov %vm25865_vm0  ;;  %v25950_v62 = vld [vmem:[#allocation71_spill] sm:$0xff]  ;;  %v13050_v34 = vpack.c.bf16 %v13019_v35, %v13018_v7 }
 0xd6e   : > { %18519 = vmatprep.subr.bf16.mxu1 %v19973_v23  ;;  %v13354_v35 = vld [vmem:[#allocation6 + $0x112] sm:$0xff] }
 0xd71   : > { %18520 = vmatpush3.bf16.msra.mxu1 %v19973_v23  ;;  %v12759_v23 = vpack.c.bf16 %v12711_v18, %v12742_v53  ;;  %v26016_v18 = vld [vmem:[#allocation131_spill] sm:$0xff]  ;;  %v26018_v53 = vld [vmem:[#allocation132_spill] sm:$0xff] }
 0xd72   : > { %18553 = vmatprep.subr.bf16.mxu1 %v19974_v37 }
 0xd74   : > { %18490 = vmatmul.mubr.msk.bf16.gmra.mrb[56].mxu1 %vm25892_vm11, %v25891_v58  ;;  %vm25918_vm11 = vmmov %vm25865_vm0  ;;  %v13023_v58 = vld [vmem:[#allocation6 + $0x49] sm:$0xff] }
 0xd75   : > { %18493 = vmatprep.mubr.msk.bf16.mxu1 %vm25865_vm0, %v25893_v54  ;;  %v13020_v54 = vld [vmem:[#allocation6 + $0x31] sm:$0xff] }
 0xd7c   : > { %18494 = vmatmul.mubr.msk.bf16.gmra.mrb[60].mxu1 %vm25895_vm2, %v25894_v16  ;;  %vm25921_vm2 = vmmov %vm25865_vm0 }
 0xd7d   : > { %18497 = vmatprep.mubr.msk.bf16.mxu1 %vm25897_vm13, %v25896_v3  ;;  %vm25923_vm13 = vmmov %vm25865_vm0  ;;  %v13022_v3 = vld [vmem:[#allocation6 + $0x41] sm:$0xff] }
 0xd84   : > { %18498 = vmatmul.mubr.msk.bf16.gmra.mrb[64].mxu1 %vm25899_vm14, %v25898_v17  ;;  %vm25925_vm14 = vmmov %vm25865_vm0  ;;  %v19979_v17 = vld [vmem:[#allocation9 + $0x88] sm:$0xff]  }
 0xd85   : > { %18501 = vmatprep.mubr.msk.bf16.mxu1 %vm25901_vm6, %v25900_v41  ;;  %vm25927_vm6 = vmmov %vm25865_vm0  ;;  %v13052_v41 = vpack.c.bf16 %v13023_v58, %v13022_v3  ;;  %v24696_v58 = vld [vmem:[%s26021_s12] ss:$0 sm:$0xff] }
 0xd8c   : > { %18502 = vmatmul.mubr.msk.bf16.gmra.mrb[68].mxu1 %vm25903_vm10, %v25902_v45  ;;  %vm25929_vm10 = vmmov %vm25865_vm0  ;;  %v13027_v45 = vld [vmem:[#allocation6 + $0x69] sm:$0xff] }
 0xd8d   : > { %18505 = vmatprep.mubr.msk.bf16.mxu1 %vm25905_vm4, %v25904_v60  ;;  %vm25931_vm4 = vmmov %vm25865_vm0  ;;  %v13024_v60 = vld [vmem:[#allocation6 + $0x51] sm:$0xff] }
 0xd94   : > { %18506 = vmatmul.mubr.msk.bf16.gmra.mrb[72].mxu1 %vm25907_vm15, %v25906_v6  ;;  %vm25933_vm15 = vmmov %vm25865_vm0  ;;  %v13053_v6 = vpack.c.bf16 %v13025_v49, %v13024_v60 }
 0xd95   : > { %18509 = vmatprep.mubr.msk.bf16.mxu1 %vm25909_vm9, %v25908_v8  ;;  %vm25935_vm9 = vmmov %vm25865_vm0  ;;  %v13026_v8 = vld [vmem:[#allocation6 + $0x61] sm:$0xff] }
 0xd9c   : > { %18510 = vmatmul.mubr.msk.bf16.gmra.mrb[76].mxu1 %vm25911_vm3, %v25910_v61  ;;  %vm25937_vm3 = vmmov %vm25865_vm0  ;;  %v13054_v61 = vpack.c.bf16 %v13027_v45, %v13026_v8 }
 0xd9d   : > { %18513 = vmatprep.mubr.msk.bf16.mxu1 %vm25913_vm5, %v25912_v29  ;;  %vm25939_vm5 = vmmov %vm25865_vm0  ;;  %v13029_v29 = vld [vmem:[#allocation6 + $0x79] sm:$0xff] }
 0xda4   : > { %18514 = vmatmul.mubr.msk.bf16.gmra.mrb[80].mxu1 %vm25914_vm1, %v24569_v13  ;;  %vm25941_vm1 = vmmov %vm25865_vm0 }
 0xda5   : > { %18521 = vmatprep.mubr.msk.bf16.mxu1 %vm25916_vm12, %v25915_v40  ;;  %vm25943_vm12 = vmmov %vm25865_vm0  ;;  %v13055_v40 = vpack.c.bf16 %v13029_v29, %v13028_v5 }
 0xdac   : > { %18522 = vmatmul.mubr.msk.bf16.vlgmr.msra.gmra.mrb[52].mxu1 %vm25918_vm11, %v25917_v19  ;;  %vm10747_vm11 = vcmask 254976  }
 0xdad   : > { %18525 = vmatprep.mubr.msk.bf16.mxu1 %vm25865_vm0, %v25919_v63  ;;  %18554 = vmatpush3.bf16.msra.mxu1 %v19974_v37  ;;  %10748 = vst.msk [vmem:[#allocation6 + $0x120] sm:$0x3] %vm10747_vm11, %v20238_v22  ;;  %vm25971_vm11 = vmmov %vm25865_vm0  ;;  %v13021_v37 = vld [vmem:[#allocation6 + $0x39] sm:$0xff]  ;;  %v13040_v22 = vld [vmem:[#allocation6 + $0xd1] sm:$0xff] }
 0xdae   : > { %18555 = vmatprep.subr.bf16.mxu1 %v19975_v46  ;;  %v13051_v16 = vpack.c.bf16 %v13021_v37, %v13020_v54  ;;  %v13033_v63 = vld [vmem:[#allocation6 + $0x99] sm:$0xff] }
 0xdaf   : > { %v19982_v37 = vld [vmem:[#allocation11 + $0x4] ss:$8 sps:$4 sm:$0xff]  }
 0xdb0   : > { %14549 = vmatprep.mubr.bf16.mxu0 %v19982_v37 }
 0xdb1   : > { %18556 = vmatpush3.bf16.msra.mxu1 %v19975_v46  ;;  %v13030_v46 = vld [vmem:[#allocation6 + $0x81] sm:$0xff] }
 0xdb2   : > { %18589 = vmatprep.subr.bf16.mxu1 %v19976_v48  ;;  %v13056_v19 = vpack.c.bf16 %v13031_v0, %v13030_v46 }
 0xdb4   : > { %18526 = vmatmul.mubr.msk.bf16.gmra.mrb[56].mxu1 %vm25921_vm2, %v25920_v51  ;;  %vm25947_vm2 = vmmov %vm25865_vm0  ;;  %v13032_v51 = vld [vmem:[#allocation6 + $0x91] sm:$0xff] }
 0xdb5   : > { %18529 = vmatprep.mubr.msk.bf16.mxu1 %vm25923_vm13, %v25922_v43  ;;  %vm25949_vm13 = vmmov %vm25865_vm0  ;;  %v13057_v43 = vpack.c.bf16 %v13033_v63, %v13032_v51 }
 0xdbc   : > { %18530 = vmatmul.mubr.msk.bf16.gmra.mrb[60].mxu1 %vm25925_vm14, %v25924_v26  ;;  %vm25951_vm14 = vmmov %vm25865_vm0  ;;  %v13034_v26 = vld [vmem:[#allocation6 + $0xa1] sm:$0xff] }
 0xdbd   : > { %18533 = vmatprep.mubr.msk.bf16.mxu1 %vm25927_vm6, %v25926_v25  ;;  %vm25953_vm6 = vmmov %vm25865_vm0 }
 0xdc4   : > { %18534 = vmatmul.mubr.msk.bf16.gmra.mrb[64].mxu1 %vm25929_vm10, %v25928_v50  ;;  %vm25955_vm10 = vmmov %vm25865_vm0  ;;  %v13037_v50 = vld [vmem:[#allocation6 + $0xb9] sm:$0xff] }
 0xdc5   : > { %18537 = vmatprep.mubr.msk.bf16.mxu1 %vm25931_vm4, %v25930_v42  ;;  %vm25957_vm4 = vmmov %vm25865_vm0  ;;  %v13039_v42 = vld [vmem:[#allocation6 + $0xc9] sm:$0xff] }
 0xdcc   : > { %18538 = vmatmul.mubr.msk.bf16.gmra.mrb[68].mxu1 %vm25933_vm15, %v25932_v21  ;;  %vm25959_vm15 = vmmov %vm25865_vm0  ;;  %v13036_v21 = vld [vmem:[#allocation6 + $0xb1] sm:$0xff] }
 0xdcd   : > { %18541 = vmatprep.mubr.msk.bf16.mxu1 %vm25935_vm9, %v25934_v15  ;;  %vm25961_vm9 = vmmov %vm25865_vm0  ;;  %v13059_v15 = vpack.c.bf16 %v13037_v50, %v13036_v21 }
 0xdd4   : > { %18542 = vmatmul.mubr.msk.bf16.gmra.mrb[72].mxu1 %vm25937_vm3, %v25936_v10  ;;  %vm25963_vm3 = vmmov %vm25865_vm0  ;;  %v13038_v10 = vld [vmem:[#allocation6 + $0xc1] sm:$0xff] }
 0xdd5   : > { %18545 = vmatprep.mubr.msk.bf16.mxu1 %vm25939_vm5, %v25938_v36  ;;  %vm25965_vm5 = vmmov %vm25865_vm0  ;;  %v13060_v36 = vpack.c.bf16 %v13039_v42, %v13038_v10 }
 0xddc   : > { %18546 = vmatmul.mubr.msk.bf16.gmra.mrb[76].mxu1 %vm25941_vm1, %v25940_v32  ;;  %vm25967_vm1 = vmmov %vm25865_vm0  ;;  %v13041_v32 = vld [vmem:[#allocation6 + $0xd9] sm:$0xff] }
 0xddd   : > { %18549 = vmatprep.mubr.msk.bf16.mxu1 %vm25943_vm12, %v25942_v2  ;;  %vm25969_vm12 = vmmov %vm25865_vm0  ;;  %v13043_v2 = vld [vmem:[#allocation6 + $0xe9] sm:$0xff]  ;;  %v13061_v39 = vpack.c.bf16 %v13041_v32, %v13040_v22 }
 0xdde   : > { %v13062_v11 = vpack.c.bf16 %v13043_v2, %v13042_v1 }
 0xde4   : > { %18550 = vmatmul.mubr.msk.bf16.gmra.mrb[80].mxu1 %vm25865_vm0, %v12421_v4  ;;  %v13045_v4 = vld [vmem:[#allocation6 + $0xf9] sm:$0xff] }
 0xde5   : > { %18557 = vmatprep.mubr.msk.bf16.mxu1 %vm25947_vm2, %v25946_v9  ;;  %vm25974_vm2 = vmmov %vm25865_vm0  ;;  %v13044_v9 = vld [vmem:[#allocation6 + $0xf1] sm:$0xff] }
 0xdec   : > { %18558 = vmatmul.mubr.msk.bf16.vlgmr.msra.gmra.mrb[52].mxu1 %vm25949_vm13, %v25948_v31  ;;  %vm25975_vm13 = vmmov %vm25865_vm0  ;;  %v13048_v31 = vld [vmem:[#allocation6 + $0x111] sm:$0xff] }
 0xded   : > { %18561 = vmatprep.mubr.msk.bf16.mxu1 %vm25951_vm14, %v25950_v62  ;;  %18590 = vmatpush3.bf16.msra.mxu1 %v19976_v48  ;;  %vm25976_vm14 = vmmov %vm25865_vm0  ;;  %v13035_v48 = vld [vmem:[#allocation6 + $0xa9] sm:$0xff]  ;;  %v13049_v62 = vld [vmem:[#allocation6 + $0x119] sm:$0xff] }
 0xdee   : > { %18591 = vmatprep.subr.bf16.mxu1 %v19977_v28  ;;  %v13058_v25 = vpack.c.bf16 %v13035_v48, %v13034_v26 }
 0xdf1   : > { %18592 = vmatpush3.bf16.msra.mxu1 %v19977_v28  ;;  %v13063_v28 = vpack.c.bf16 %v13045_v4, %v13044_v9 }
 0xdf2   : > { %18625 = vmatprep.subr.bf16.mxu1 %v19978_v59 }
 0xdf4   : > { %18562 = vmatmul.mubr.msk.bf16.gmra.mrb[56].mxu1 %vm25953_vm6, %v25952_v24  ;;  %vm25977_vm6 = vmmov %vm25865_vm0  ;;  %v25991_v24 = vld [vmem:[#allocation106_spill] sm:$0xff] }
 0xdf5   : > { %18565 = vmatprep.mubr.msk.bf16.mxu1 %vm25955_vm10, %v25954_v38  ;;  %vm25978_vm10 = vmmov %vm25865_vm0  ;;  %v25993_v38 = vld [vmem:[#allocation108_spill] sm:$0xff] }
 0xdfc   : > { %18566 = vmatmul.mubr.msk.bf16.gmra.mrb[60].mxu1 %vm25957_vm4, %v25956_v47  ;;  %vm25980_vm4 = vmmov %vm25865_vm0  ;;  %v25995_v47 = vld [vmem:[#allocation120_spill] sm:$0xff] }
 0xdfd   : > { %18569 = vmatprep.mubr.msk.bf16.mxu1 %vm25959_vm15, %v25958_v14  ;;  %vm25981_vm15 = vmmov %vm25865_vm0  ;;  %v25997_v14 = vld [vmem:[#allocation121_spill] sm:$0xff] }
 0xe04   : > { %18570 = vmatmul.mubr.msk.bf16.gmra.mrb[64].mxu1 %vm25961_vm9, %v25960_v20  ;;  %vm25982_vm9 = vmmov %vm25865_vm0  ;;  %v25999_v20 = vld [vmem:[#allocation122_spill] sm:$0xff] }
 0xe05   : > { %18573 = vmatprep.mubr.msk.bf16.mxu1 %vm25963_vm3, %v25962_v12  ;;  %vm25983_vm3 = vmmov %vm25865_vm0  ;;  %v26003_v12 = vld [vmem:[#allocation125_spill] sm:$0xff] }
 0xe0c   : > { %18574 = vmatmul.mubr.msk.bf16.gmra.mrb[68].mxu1 %vm25965_vm5, %v25964_v30  ;;  %vm25984_vm5 = vmmov %vm25865_vm0  ;;  %v26005_v30 = vld [vmem:[#allocation126_spill] sm:$0xff] }
 0xe0d   : > { %18577 = vmatprep.mubr.msk.bf16.mxu1 %vm25967_vm1, %v25966_v55  ;;  %vm25985_vm1 = vmmov %vm25865_vm0  ;;  %v26007_v55 = vld [vmem:[#allocation128_spill] sm:$0xff] }
 0xe14   : > { %18578 = vmatmul.mubr.msk.bf16.gmra.mrb[72].mxu1 %vm25969_vm12, %v25968_v56  ;;  %vm25986_vm12 = vmmov %vm25865_vm0  ;;  %v26009_v56 = vld [vmem:[#allocation79_spill] sm:$0xff] }
 0xe15   : > { %18581 = vmatprep.mubr.msk.bf16.mxu1 %vm25971_vm11, %v25970_v44  ;;  %vm25987_vm11 = vmmov %vm25865_vm0  ;;  %v26011_v44 = vld [vmem:[#allocation129_spill] sm:$0xff] }
 0xe1c   : > { %18582 = vmatmul.mubr.msk.bf16.gmra.mrb[76].mxu1 %vm25865_vm0, %v25972_v33  ;;  %v26013_v33 = vld [vmem:[#allocation130_spill] sm:$0xff] }
 0xe1d   : > { %18585 = vmatprep.mubr.msk.bf16.mxu1 %vm25974_vm2, %v25973_v27  ;;  %vm25988_vm2 = vmmov %vm25865_vm0  ;;  %v13355_v27 = vld [vmem:[#allocation6 + $0x11a] sm:$0xff] }
 0xe24   : > { %18586 = vmatmul.mubr.msk.bf16.gmra.mrb[80].mxu1 %vm25975_vm13, %v12759_v23  ;;  %vm25989_vm13 = vmmov %vm25865_vm0  ;;  %v13387_v23 = vsel %vm25850_vm8, %v13355_v27, 0.0 }
 0xe25   : > { %18593 = vmatprep.mubr.msk.bf16.mxu1 %vm25976_vm14, %v13050_v34  ;;  %vm25990_vm14 = vmmov %vm25865_vm0  ;;  %v13403_v7 = vpack.c.bf16 %v13387_v23, %v13354_v35  ;;  %v20347_v34 = vmov 0  }
 0xe26   : > { %14517 = vmatprep.subr.bf16.mxu0 %v20347_v34 }
 0xe2c   : > { %18594 = vmatmul.mubr.msk.bf16.vlgmr.msra.gmra.mrb[52].mxu1 %vm25977_vm6, %v13051_v16  ;;  %vm25992_vm6 = vmmov %vm25865_vm0 }
 0xe2d   : > { %18597 = vmatprep.mubr.msk.bf16.mxu1 %vm25978_vm10, %v13052_v41  ;;  %18626 = vmatpush3.bf16.msra.mxu1 %v19978_v59  ;;  %v13065_v59 = vpack.c.bf16 %v13049_v62, %v13048_v31  ;;  %vm25994_vm10 = vmmov %vm25865_vm0 }
 0xe2e   : > { %18627 = vmatprep.subr.bf16.mxu1 %v19979_v17 }
 0xe31   : > { %18628 = vmatpush3.bf16.msra.mxu1 %v19979_v17 }
 0xe32   : > { %18661 = vmatprep.subr.bf16.mxu1 %v20347_v34 }
 0xe34   : > { %18598 = vmatmul.mubr.msk.bf16.gmra.mrb[56].mxu1 %vm25979_vm7, %v13053_v6  ;;  %vm25996_vm7 = vmmov %vm25865_vm0 }
 0xe35   : > { %18601 = vmatprep.mubr.msk.bf16.mxu1 %vm25980_vm4, %v13054_v61  ;;  %vm25998_vm4 = vmmov %vm25865_vm0 }
 0xe3c   : > { %18602 = vmatmul.mubr.msk.bf16.gmra.mrb[60].mxu1 %vm25981_vm15, %v13055_v40  ;;  %vm26000_vm15 = vmmov %vm25865_vm0  ;;  %v20008_v40 = vld [vmem:[#allocation11 + $0x244] ss:$8 sps:$4 sm:$0xff]  }
 0xe3d   : > { %18605 = vmatprep.mubr.msk.bf16.mxu1 %vm25982_vm9, %v13056_v19  ;;  %vm26002_vm9 = vmmov %vm25865_vm0 }
 0xe44   : > { %18606 = vmatmul.mubr.msk.bf16.gmra.mrb[64].mxu1 %vm25983_vm3, %v13057_v43  ;;  %vm26004_vm3 = vmmov %vm25865_vm0 }
 0xe45   : > { %18609 = vmatprep.mubr.msk.bf16.mxu1 %vm25984_vm5, %v13058_v25  ;;  %vm26006_vm5 = vmmov %vm25865_vm0 }
 0xe4c   : > { %18610 = vmatmul.mubr.msk.bf16.gmra.mrb[68].mxu1 %vm25985_vm1, %v13059_v15  ;;  %vm26008_vm1 = vmmov %vm25865_vm0 }
 0xe4d   : > { %18613 = vmatprep.mubr.msk.bf16.mxu1 %vm25986_vm12, %v13060_v36  ;;  %vm26010_vm12 = vmmov %vm25865_vm0 }
 0xe54   : > { %18614 = vmatmul.mubr.msk.bf16.gmra.mrb[72].mxu1 %vm25987_vm11, %v13061_v39  ;;  %vm26012_vm11 = vmmov %vm25865_vm0 }
 0xe55   : > { %18617 = vmatprep.mubr.msk.bf16.mxu1 %vm25865_vm0, %v13062_v11 }
 0xe5c   : > { %18618 = vmatmul.mubr.msk.bf16.gmra.mrb[76].mxu1 %vm25988_vm2, %v13063_v28  ;;  %vm26015_vm2 = vmmov %vm25865_vm0 }
 0xe5d   : > { %18621 = vmatprep.mubr.msk.bf16.mxu1 %vm25989_vm13, %v24569_v13  ;;  %v26001_v13 = vld [vmem:[#allocation124_spill] sm:$0xff]  ;;  %vm26017_vm13 = vmmov %vm25865_vm0 }
 0xe64   : > { %18622 = vmatmul.mubr.msk.bf16.gmra.mrb[80].mxu1 %vm25990_vm14, %v13065_v59  ;;  %vm26019_vm14 = vmmov %vm25865_vm0 }
 0xe65   : > { %18629 = vmatprep.mubr.msk.bf16.mxu1 %vm25992_vm6, %v25991_v24  ;;  %vm26020_vm6 = vmmov %vm25865_vm0 }
 0xe6c   : > { %18630 = vmatmul.mubr.msk.bf16.vlgmr.msra.gmra.mrb[52].mxu1 %vm25994_vm10, %v25993_v38 }
 0xe6d   : > { %18633 = vmatprep.mubr.msk.bf16.mxu1 %vm25996_vm7, %v25995_v47 }
 0xe74   : > { %18634 = vmatmul.mubr.msk.bf16.gmra.mrb[56].mxu1 %vm25998_vm4, %v25997_v14 }
 0xe75   : > { %18637 = vmatprep.mubr.msk.bf16.mxu1 %vm26000_vm15, %v25999_v20 }
 0xe7c   : > { %18638 = vmatmul.mubr.msk.bf16.gmra.mrb[60].mxu1 %vm26002_vm9, %v26001_v13 }
 0xe7d   : > { %18641 = vmatprep.mubr.msk.bf16.mxu1 %vm26004_vm3, %v26003_v12 }
 0xe84   : > { %18642 = vmatmul.mubr.msk.bf16.gmra.mrb[64].mxu1 %vm26006_vm5, %v26005_v30 }
 0xe85   : > { %18645 = vmatprep.mubr.msk.bf16.mxu1 %vm26008_vm1, %v26007_v55 }
 0xe8c   : > { %18646 = vmatmul.mubr.msk.bf16.gmra.mrb[68].mxu1 %vm26010_vm12, %v26009_v56 }
 0xe8d   : > { %18649 = vmatprep.mubr.msk.bf16.mxu1 %vm26012_vm11, %v26011_v44 }
 0xe94   : > { %18650 = vmatmul.mubr.msk.bf16.gmra.mrb[72].mxu1 %vm25865_vm0, %v26013_v33 }
 0xe95   : > { %18653 = vmatprep.mubr.msk.bf16.mxu1 %vm26015_vm2, %v26014_v52 }
 0xe9c   : > { %18654 = vmatmul.mubr.msk.bf16.gmra.mrb[76].mxu1 %vm26017_vm13, %v26016_v18 }
 0xe9d   : > { %18657 = vmatprep.mubr.msk.bf16.mxu1 %vm26019_vm14, %v26018_v53 }
 0xea4   : > { %18658 = vmatmul.mubr.msk.bf16.gmra.mrb[80].mxu1 %vm26020_vm6, %v13403_v7 }
 0xea5   : > { %14837 = vmatprep.mubr.bf16.mxu1 %v20008_v40 }
 0xf3f   : > { %v18631_v54 = vpop.f32.mrb[52].mxu1 }
 0xf40   : > { %v13671_v16 = vadd.f32 %v18631_v54, %v24696_v58  ;;  %v13503_v57 = vpop.f32.mrb[53].mxu1 }
 0xf41   : > { %v13669_v3 = vadd.f32 %v24696_v58, %v13503_v57  ;;  %v18632_v17 = vpop.f32.mrb[54].mxu1 }
 0xf42   : > { %20172 = vtanh.f32 %v13671_v16  ;;  %v13672_v41 = vadd.f32 %v18632_v17, %v24696_v58  ;;  %v13506_v49 = vpop.f32.mrb[55].mxu1 }
 0xf43   : > { %20174 = vtanh.f32 %v13669_v3  ;;  %v13670_v45 = vadd.f32 %v24696_v58, %v13506_v49 }
 0xf44   : > { %20176 = vtanh.f32 %v13672_v41 }
 0xf45   : > { %20178 = vtanh.f32 %v13670_v45 }
 0xf47   : > { %v18635_v60 = vpop.f32.mrb[56].mxu1 }
 0xf48   : > { %v13675_v6 = vadd.f32 %v18635_v60, %v24696_v58  ;;  %v13519_v8 = vpop.f32.mrb[57].mxu1 }
 0xf49   : > { %v13673_v61 = vadd.f32 %v24696_v58, %v13519_v8  ;;  %v18636_v29 = vpop.f32.mrb[58].mxu1 }
 0xf4a   : > { %20180 = vtanh.f32 %v13675_v6  ;;  %v13676_v0 = vadd.f32 %v18636_v29, %v24696_v58  ;;  %v13522_v5 = vpop.f32.mrb[59].mxu1 }
 0xf4b   : > { %20182 = vtanh.f32 %v13673_v61  ;;  %v13674_v46 = vadd.f32 %v24696_v58, %v13522_v5 }
 0xf4c   : > { %v20173_v19 = vpop.eup %20172  ;;  %20184 = vtanh.f32 %v13676_v0 }
 0xf4d   : > { %v20175_v63 = vpop.eup %20174  ;;  %20186 = vtanh.f32 %v13674_v46 }
 0xf4e   : > { %v20177_v48 = vpop.eup %20176 }
 0xf4f   : > { %v20179_v51 = vpop.eup %20178  ;;  %v18639_v43 = vpop.f32.mrb[60].mxu1  ;;  %v13862_v26 = vpack.c.bf16 %v20177_v48, %v20173_v19 }
 0xf50   : > { %v13679_v25 = vadd.f32 %v18639_v43, %v24696_v58  ;;  %v13535_v50 = vpop.f32.mrb[61].mxu1  ;;  %v13861_v42 = vpack.c.bf16 %v20179_v51, %v20175_v63 }
 0xf51   : > { %v13677_v21 = vadd.f32 %v24696_v58, %v13535_v50  ;;  %v18640_v15 = vpop.f32.mrb[62].mxu1 }
 0xf52   : > { %20188 = vtanh.f32 %v13679_v25  ;;  %v13680_v10 = vadd.f32 %v18640_v15, %v24696_v58  ;;  %v13538_v36 = vpop.f32.mrb[63].mxu1  ;;  %14518 = vmatpush1.bf16.msra.mxu0 %v13861_v42  ;;  %18677 = vmatpush1.bf16.msra.mxu1 %v13861_v42 }
 0xf53   : > { %20190 = vtanh.f32 %v13677_v21  ;;  %v13678_v32 = vadd.f32 %v24696_v58, %v13538_v36  ;;  %14519 = vmatprep.subr.bf16.mxu0 %v20347_v34  ;;  %18662 = vmatprep.subr.bf16.mxu1 %v20347_v34 }
 0xf54   : > { %v20181_v2 = vpop.eup %20180  ;;  %20192 = vtanh.f32 %v13680_v10 }
 0xf55   : > { %v20183_v22 = vpop.eup %20182  ;;  %20194 = vtanh.f32 %v13678_v32 }
 0xf56   : > { %v20185_v39 = vpop.eup %20184  ;;  %14520 = vmatpush1.bf16.msra.mxu0 %v13862_v26  ;;  %18678 = vmatpush1.bf16.msra.mxu1 %v13862_v26 }
 0xf57   : > { %v20187_v1 = vpop.eup %20186  ;;  %v18643_v11 = vpop.f32.mrb[64].mxu1  ;;  %14521 = vmatprep.subr.bf16.mxu0 %v20347_v34  ;;  %18663 = vmatprep.subr.bf16.mxu1 %v20347_v34  ;;  %v13864_v4 = vpack.c.bf16 %v20185_v39, %v20181_v2 }
 0xf58   : > { %v13683_v9 = vadd.f32 %v18643_v11, %v24696_v58  ;;  %v13551_v28 = vpop.f32.mrb[65].mxu1  ;;  %v13863_v31 = vpack.c.bf16 %v20187_v1, %v20183_v22 }
 0xf59   : > { %v13681_v62 = vadd.f32 %v24696_v58, %v13551_v28  ;;  %v18644_v59 = vpop.f32.mrb[66].mxu1 }
 0xf5a   : > { %20196 = vtanh.f32 %v13683_v9  ;;  %v13684_v24 = vadd.f32 %v18644_v59, %v24696_v58  ;;  %v13554_v38 = vpop.f32.mrb[67].mxu1  ;;  %14522 = vmatpush1.bf16.msra.mxu0 %v13863_v31  ;;  %18679 = vmatpush1.bf16.msra.mxu1 %v13863_v31 }
 0xf5b   : > { %20198 = vtanh.f32 %v13681_v62  ;;  %v13682_v47 = vadd.f32 %v24696_v58, %v13554_v38  ;;  %14523 = vmatprep.subr.bf16.mxu0 %v20347_v34  ;;  %18664 = vmatprep.subr.bf16.mxu1 %v20347_v34 }
 0xf5c   : > { %v20189_v14 = vpop.eup %20188  ;;  %20200 = vtanh.f32 %v13684_v24 }
 0xf5d   : > { %v20191_v20 = vpop.eup %20190  ;;  %20202 = vtanh.f32 %v13682_v47 }
 0xf5e   : > { %v20193_v13 = vpop.eup %20192  ;;  %14524 = vmatpush1.bf16.msra.mxu0 %v13864_v4  ;;  %18680 = vmatpush1.bf16.msra.mxu1 %v13864_v4 }
 0xf5f   : > { %v20195_v12 = vpop.eup %20194  ;;  %v18647_v30 = vpop.f32.mrb[68].mxu1  ;;  %14525 = vmatprep.subr.bf16.mxu0 %v20347_v34  ;;  %18665 = vmatprep.subr.bf16.mxu1 %v20347_v34  ;;  %v13866_v55 = vpack.c.bf16 %v20193_v13, %v20189_v14 }
 0xf60   : > { %v13687_v56 = vadd.f32 %v18647_v30, %v24696_v58  ;;  %v13567_v44 = vpop.f32.mrb[69].mxu1  ;;  %v13865_v33 = vpack.c.bf16 %v20195_v12, %v20191_v20 }
 0xf61   : > { %v13685_v52 = vadd.f32 %v24696_v58, %v13567_v44  ;;  %v18648_v27 = vpop.f32.mrb[70].mxu1  ;;  %v19983_v44 = vld [vmem:[#allocation11 + $0x14] ss:$8 sps:$4 sm:$0xff]  }
 0xf62   : > { %20204 = vtanh.f32 %v13687_v56  ;;  %v13688_v18 = vadd.f32 %v18648_v27, %v24696_v58  ;;  %v13570_v53 = vpop.f32.mrb[71].mxu1  ;;  %14526 = vmatpush1.bf16.msra.mxu0 %v13865_v33  ;;  %18681 = vmatpush1.bf16.msra.mxu1 %v13865_v33  ;;  %v20006_v56 = vld [vmem:[#allocation11 + $0x240] ss:$8 sps:$4 sm:$0xff]   ;;  %v20012_v33 = vld [vmem:[#allocation11 + $0x254] ss:$8 sps:$4 sm:$0xff]  }
 0xf63   : > { %20206 = vtanh.f32 %v13685_v52  ;;  %v13686_v35 = vadd.f32 %v24696_v58, %v13570_v53  ;;  %14527 = vmatprep.subr.bf16.mxu0 %v20347_v34  ;;  %18666 = vmatprep.subr.bf16.mxu1 %v20347_v34  ;;  %v19985_v52 = vld [vmem:[#allocation11 + $0x10] ss:$8 sps:$4 sm:$0xff]   ;;  %v20018_v53 = vld [vmem:[#allocation11 + $0x264] ss:$8 sps:$4 sm:$0xff]  }
 0xf64   : > { %v20197_v23 = vpop.eup %20196  ;;  %20208 = vtanh.f32 %v13688_v18  ;;  %v20015_v27 = vld [vmem:[#allocation11 + $0x250] ss:$8 sps:$4 sm:$0xff]   ;;  %v19986_v18 = vld [vmem:[#allocation11 + $0x24] ss:$8 sps:$4 sm:$0xff]  }
 0xf65   : > { %v20199_v7 = vpop.eup %20198  ;;  %20210 = vtanh.f32 %v13686_v35  ;;  %v19988_v35 = vld [vmem:[#allocation11 + $0x20] ss:$8 sps:$4 sm:$0xff]  }
 0xf66   : > { %v20201_v37 = vpop.eup %20200  ;;  %14528 = vmatpush1.bf16.msra.mxu0 %v13866_v55  ;;  %18682 = vmatpush1.bf16.msra.mxu1 %v13866_v55  ;;  %v19980_v55 = vld [vmem:[#allocation11] ss:$8 sps:$4 sm:$0xff]  }
 0xf67   : > { %v20203_v54 = vpop.eup %20202  ;;  %v18651_v16 = vpop.f32.mrb[72].mxu1  ;;  %14529 = vmatprep.subr.bf16.mxu0 %v20347_v34  ;;  %18667 = vmatprep.subr.bf16.mxu1 %v20347_v34  ;;  %v13868_v57 = vpack.c.bf16 %v20201_v37, %v20197_v23  ;;  %v19989_v23 = vld [vmem:[#allocation11 + $0x34] ss:$8 sps:$4 sm:$0xff]   ;;  %v19991_v37 = vld [vmem:[#allocation11 + $0x30] ss:$8 sps:$4 sm:$0xff]  }
 0xf68   : > { %v13691_v3 = vadd.f32 %v18651_v16, %v24696_v58  ;;  %v13583_v17 = vpop.f32.mrb[73].mxu1  ;;  %v13867_v41 = vpack.c.bf16 %v20203_v54, %v20199_v7  ;;  %v20024_v7 = vld [vmem:[#allocation11 + $0x274] ss:$8 sps:$4 sm:$0xff]   ;;  %v20027_v54 = vld [vmem:[#allocation11 + $0x270] ss:$8 sps:$4 sm:$0xff]  }
 0xf69   : > { %v13689_v49 = vadd.f32 %v24696_v58, %v13583_v17  ;;  %v18652_v45 = vpop.f32.mrb[74].mxu1  ;;  %v19992_v16 = vld [vmem:[#allocation11 + $0x44] ss:$8 sps:$4 sm:$0xff]   ;;  %v20033_v17 = vld [vmem:[#allocation11 + $0x280] ss:$8 sps:$4 sm:$0xff]  }
 0xf6a   : > { %20212 = vtanh.f32 %v13691_v3  ;;  %v13692_v60 = vadd.f32 %v18652_v45, %v24696_v58  ;;  %v13586_v6 = vpop.f32.mrb[75].mxu1  ;;  %14530 = vmatpush1.bf16.msra.mxu0 %v13867_v41  ;;  %18683 = vmatpush1.bf16.msra.mxu1 %v13867_v41  ;;  %v19994_v3 = vld [vmem:[#allocation11 + $0x40] ss:$8 sps:$4 sm:$0xff]   ;;  %v19995_v41 = vld [vmem:[#allocation11 + $0x54] ss:$8 sps:$4 sm:$0xff]  }
 0xf6b   : > { %20214 = vtanh.f32 %v13689_v49  ;;  %v13690_v8 = vadd.f32 %v24696_v58, %v13586_v6  ;;  %14531 = vmatprep.subr.bf16.mxu0 %v20347_v34  ;;  %18668 = vmatprep.subr.bf16.mxu1 %v20347_v34  ;;  %v20036_v49 = vld [vmem:[#allocation11 + $0x294] ss:$8 sps:$4 sm:$0xff]   ;;  %v19997_v45 = vld [vmem:[#allocation11 + $0x50] ss:$8 sps:$4 sm:$0xff]   ;;  %v19998_v6 = vld [vmem:[#allocation11 + $0x64] ss:$8 sps:$4 sm:$0xff]  }
 0xf6c   : > { %v20205_v61 = vpop.eup %20204  ;;  %20216 = vtanh.f32 %v13692_v60  ;;  %v20039_v60 = vld [vmem:[#allocation11 + $0x290] ss:$8 sps:$4 sm:$0xff]  }
 0xf6d   : > { %v20207_v29 = vpop.eup %20206  ;;  %20218 = vtanh.f32 %v13690_v8  ;;  %v20042_v8 = vld [vmem:[#allocation11 + $0x2a4] ss:$8 sps:$4 sm:$0xff]  }
 0xf6e   : > { %v20209_v0 = vpop.eup %20208  ;;  %14532 = vmatpush1.bf16.msra.mxu0 %v13868_v57  ;;  %18684 = vmatpush1.bf16.msra.mxu1 %v13868_v57  ;;  %v20030_v57 = vld [vmem:[#allocation11 + $0x284] ss:$8 sps:$4 sm:$0xff]  }
 0xf6f   : > { %v20211_v5 = vpop.eup %20210  ;;  %v18655_v40 = vpop.f32.mrb[76].mxu1  ;;  %14533 = vmatprep.subr.bf16.mxu0 %v20347_v34  ;;  %18669 = vmatprep.subr.bf16.mxu1 %v20347_v34  ;;  %v13870_v46 = vpack.c.bf16 %v20209_v0, %v20205_v61  ;;  %v20000_v61 = vld [vmem:[#allocation11 + $0x60] ss:$8 sps:$4 sm:$0xff]   ;;  %v20001_v0 = vld [vmem:[#allocation11 + $0x74] ss:$8 sps:$4 sm:$0xff]  }
 0xf70   : > { %v13695_v19 = vadd.f32 %v18655_v40, %v24696_v58  ;;  %v13599_v63 = vpop.f32.mrb[77].mxu1  ;;  %v13869_v48 = vpack.c.bf16 %v20211_v5, %v20207_v29  ;;  %v20045_v29 = vld [vmem:[#allocation11 + $0x2a0] ss:$8 sps:$4 sm:$0xff]   ;;  %v20048_v5 = vld [vmem:[#allocation11 + $0x2b4] ss:$8 sps:$4 sm:$0xff]  }
 0xf71   : > { %v13693_v51 = vadd.f32 %v24696_v58, %v13599_v63  ;;  %v18656_v43 = vpop.f32.mrb[78].mxu1  ;;  %v20003_v40 = vld [vmem:[#allocation11 + $0x70] ss:$8 sps:$4 sm:$0xff]   ;;  %v20054_v63 = vld [vmem:[#allocation11 + $0x2c4] ss:$8 sps:$4 sm:$0xff]  }
 0xf72   : > { %20220 = vtanh.f32 %v13695_v19  ;;  %v13696_v26 = vadd.f32 %v18656_v43, %v24696_v58  ;;  %v13602_v25 = vpop.f32.mrb[79].mxu1  ;;  %14534 = vmatpush1.bf16.msra.mxu0 %v13869_v48  ;;  %18685 = vmatpush1.bf16.msra.mxu1 %v13869_v48  ;;  %v20004_v19 = vld [vmem:[#allocation11 + $0x84] ss:$8 sps:$4 sm:$0xff]   ;;  %v20009_v48 = vld [vmem:[#allocation11 + $0x80] ss:$8 sps:$4 sm:$0xff]  }
 0xf73   : > { %20222 = vtanh.f32 %v13693_v51  ;;  %v13694_v50 = vadd.f32 %v24696_v58, %v13602_v25  ;;  %14535 = vmatprep.subr.bf16.mxu0 %v20347_v34  ;;  %18670 = vmatprep.subr.bf16.mxu1 %v20347_v34  ;;  %v20057_v51 = vld [vmem:[#allocation11 + $0x2c0] ss:$8 sps:$4 sm:$0xff]   ;;  %v20010_v43 = vld [vmem:[#allocation11 + $0x94] ss:$8 sps:$4 sm:$0xff]   ;;  %v20014_v25 = vld [vmem:[#allocation11 + $0x90] ss:$8 sps:$4 sm:$0xff]  }
 0xf74   : > { %v20213_v42 = vpop.eup %20212  ;;  %20224 = vtanh.f32 %v13696_v26  ;;  %v20060_v26 = vld [vmem:[#allocation11 + $0x2d4] ss:$8 sps:$4 sm:$0xff]  }
 0xf75   : > { %v20215_v21 = vpop.eup %20214  ;;  %20226 = vtanh.f32 %v13694_v50  ;;  %v20063_v50 = vld [vmem:[#allocation11 + $0x2d0] ss:$8 sps:$4 sm:$0xff]  }
 0xf76   : > { %v20217_v15 = vpop.eup %20216  ;;  %14536 = vmatpush1.bf16.msra.mxu0 %v13870_v46  ;;  %18686 = vmatpush1.bf16.msra.mxu1 %v13870_v46  ;;  %v20051_v46 = vld [vmem:[#allocation11 + $0x2b0] ss:$8 sps:$4 sm:$0xff]  }
 0xf77   : > { %v20219_v10 = vpop.eup %20218  ;;  %v18659_v36 = vpop.f32.mrb[80].mxu1  ;;  %14537 = vmatprep.subr.bf16.mxu0 %v20347_v34  ;;  %18671 = vmatprep.subr.bf16.mxu1 %v20347_v34  ;;  %v13872_v32 = vpack.c.bf16 %v20217_v15, %v20213_v42  ;;  %v20016_v42 = vld [vmem:[#allocation11 + $0xa4] ss:$8 sps:$4 sm:$0xff]   ;;  %v20020_v15 = vld [vmem:[#allocation11 + $0xa0] ss:$8 sps:$4 sm:$0xff]  }
 0xf78   : > { %v13699_v2 = vadd.f32 %v18659_v36, %v24696_v58  ;;  %v13615_v22 = vpop.f32.mrb[81].mxu1  ;;  %v13871_v39 = vpack.c.bf16 %v20219_v10, %v20215_v21  ;;  %v20066_v21 = vld [vmem:[#allocation11 + $0x2e4] ss:$8 sps:$4 sm:$0xff]   ;;  %v20069_v10 = vld [vmem:[#allocation11 + $0x2e0] ss:$8 sps:$4 sm:$0xff]  }
 0xf79   : > { %v13697_v1 = vadd.f32 %v24696_v58, %v13615_v22  ;;  %v18660_v11 = vpop.f32.mrb[82].mxu1  ;;  %v20022_v36 = vld [vmem:[#allocation11 + $0xb4] ss:$8 sps:$4 sm:$0xff]   ;;  %v20075_v22 = vld [vmem:[#allocation11 + $0x2f0] ss:$8 sps:$4 sm:$0xff]  }
 0xf7a   : > { %20228 = vtanh.f32 %v13699_v2  ;;  %v13700_v4 = vadd.f32 %v18660_v11, %v24696_v58  ;;  %v13618_v9 = vpop.f32.mrb[83].mxu1  ;;  %14538 = vmatpush1.bf16.msra.mxu0 %v13871_v39  ;;  %18687 = vmatpush1.bf16.msra.mxu1 %v13871_v39  ;;  %v20026_v2 = vld [vmem:[#allocation11 + $0xb0] ss:$8 sps:$4 sm:$0xff]   ;;  %v20028_v39 = vld [vmem:[#allocation11 + $0xc4] ss:$8 sps:$4 sm:$0xff]  }
 0xf7b   : > { %20230 = vtanh.f32 %v13697_v1  ;;  %v13698_v28 = vadd.f32 %v24696_v58, %v13618_v9  ;;  %14539 = vmatprep.subr.bf16.mxu0 %v20347_v34  ;;  %18672 = vmatprep.subr.bf16.mxu1 %v20347_v34  ;;  %v20078_v1 = vld [vmem:[#allocation11 + $0x304] ss:$8 sps:$4 sm:$0xff]   ;;  %v20032_v11 = vld [vmem:[#allocation11 + $0xc0] ss:$8 sps:$4 sm:$0xff]   ;;  %v20034_v9 = vld [vmem:[#allocation11 + $0xd4] ss:$8 sps:$4 sm:$0xff]  }
 0xf7c   : > { %v20221_v31 = vpop.eup %20220  ;;  %20232 = vtanh.f32 %v13700_v4  ;;  %v20081_v4 = vld [vmem:[#allocation11 + $0x300] ss:$8 sps:$4 sm:$0xff]  }
 0xf7d   : > { %v20223_v62 = vpop.eup %20222  ;;  %20234 = vtanh.f32 %v13698_v28  ;;  %v20084_v28 = vld [vmem:[#allocation11 + $0x314] ss:$8 sps:$4 sm:$0xff]  }
 0xf7e   : > { %v20225_v59 = vpop.eup %20224  ;;  %14540 = vmatpush1.bf16.msra.mxu0 %v13872_v32  ;;  %18688 = vmatpush1.bf16.msra.mxu1 %v13872_v32  ;;  %v20072_v32 = vld [vmem:[#allocation11 + $0x2f4] ss:$8 sps:$4 sm:$0xff]  }
 0xf7f   : > { %v20227_v24 = vpop.eup %20226  ;;  %14541 = vmatprep.subr.bf16.mxu0 %v20347_v34  ;;  %18673 = vmatprep.subr.bf16.mxu1 %v20347_v34  ;;  %v13874_v38 = vpack.c.bf16 %v20225_v59, %v20221_v31  ;;  %v20038_v31 = vld [vmem:[#allocation11 + $0xd0] ss:$8 sps:$4 sm:$0xff]   ;;  %v20040_v59 = vld [vmem:[#allocation11 + $0xe4] ss:$8 sps:$4 sm:$0xff]  }
 0xf80   : > { %v13873_v47 = vpack.c.bf16 %v20227_v24, %v20223_v62  ;;  %v20087_v62 = vld [vmem:[#allocation11 + $0x310] ss:$8 sps:$4 sm:$0xff]   ;;  %v20090_v24 = vld [vmem:[#allocation11 + $0x324] ss:$8 sps:$4 sm:$0xff]  }
 0xf82   : > { %14542 = vmatpush1.bf16.msra.mxu0 %v13873_v47  ;;  %18689 = vmatpush1.bf16.msra.mxu1 %v13873_v47  ;;  %v20093_v47 = vld [vmem:[#allocation11 + $0x320] ss:$8 sps:$4 sm:$0xff]  }
 0xf83   : > { %14543 = vmatprep.subr.bf16.mxu0 %v20347_v34  ;;  %18674 = vmatprep.subr.bf16.mxu1 %v20347_v34 }
 0xf84   : > { %v20229_v58 = vpop.eup %20228 }
 0xf85   : > { %v20231_v14 = vpop.eup %20230 }
 0xf86   : > { %v20233_v20 = vpop.eup %20232  ;;  %14544 = vmatpush1.bf16.msra.mxu0 %v13874_v38  ;;  %18690 = vmatpush1.bf16.msra.mxu1 %v13874_v38  ;;  %v20044_v38 = vld [vmem:[#allocation11 + $0xe0] ss:$8 sps:$4 sm:$0xff]  }
 0xf87   : > { %v20235_v13 = vpop.eup %20234  ;;  %14545 = vmatprep.subr.bf16.mxu0 %v20347_v34  ;;  %18675 = vmatprep.subr.bf16.mxu1 %v20347_v34  ;;  %v13876_v12 = vpack.c.bf16 %v20233_v20, %v20229_v58  ;;  %v20046_v58 = vld [vmem:[#allocation11 + $0xf4] ss:$8 sps:$4 sm:$0xff]   ;;  %v20050_v20 = vld [vmem:[#allocation11 + $0xf0] ss:$8 sps:$4 sm:$0xff]  }
 0xf88   : > { %v13875_v30 = vpack.c.bf16 %v20235_v13, %v20231_v14  ;;  %v20096_v14 = vld [vmem:[#allocation11 + $0x334] ss:$8 sps:$4 sm:$0xff]   ;;  %v20099_v13 = vld [vmem:[#allocation11 + $0x330] ss:$8 sps:$4 sm:$0xff]  }
 0xf8a   : > { %14546 = vmatpush1.bf16.msra.mxu0 %v13875_v30  ;;  %18691 = vmatpush1.bf16.msra.mxu1 %v13875_v30  ;;  %v20102_v30 = vld [vmem:[#allocation11 + $0x344] ss:$8 sps:$4 sm:$0xff]  }
 0xf8b   : > { %14547 = vmatprep.subr.bf16.mxu0 %v20347_v34  ;;  %18676 = vmatprep.subr.bf16.mxu1 %v20347_v34  ;;  %v20021_v34 = vld [vmem:[#allocation11 + $0x260] ss:$8 sps:$4 sm:$0xff]  }
 0xf8e   : > { %14548 = vmatpush1.bf16.msra.mxu0 %v13876_v12  ;;  %18692 = vmatpush1.bf16.msra.mxu1 %v13876_v12  ;;  %v20052_v12 = vld [vmem:[#allocation11 + $0x104] ss:$8 sps:$4 sm:$0xff]  }
 0xf91   : > { %14550 = vmatmul.mubr.bf16.vlgmr.msra.gmra.mrb[76].mxu0 %v19980_v55  ;;  %14838 = vmatmul.mubr.bf16.vlgmr.msra.gmra.mrb[84].mxu1 %v20006_v56  ;;  %v20056_v55 = vld [vmem:[#allocation11 + $0x100] ss:$8 sps:$4 sm:$0xff]  }
 0xf92   : > { %14557 = vmatprep.mubr.bf16.mxu0 %v19983_v44  ;;  %14845 = vmatprep.mubr.bf16.mxu1 %v20012_v33  ;;  %v20105_v56 = vld [vmem:[#allocation11 + $0x340] ss:$8 sps:$4 sm:$0xff]   ;;  %v20058_v44 = vld [vmem:[#allocation11 + $0x114] ss:$8 sps:$4 sm:$0xff]  }
 0xf93   : > { %v20108_v33 = vld [vmem:[#allocation11 + $0x354] ss:$8 sps:$4 sm:$0xff]  }
 0xf99   : > { %14558 = vmatmul.mubr.bf16.gmra.mrb[80].mxu0 %v19985_v52  ;;  %14846 = vmatmul.mubr.bf16.gmra.mrb[88].mxu1 %v20015_v27  ;;  %v20062_v52 = vld [vmem:[#allocation11 + $0x110] ss:$8 sps:$4 sm:$0xff]  }
 0xf9a   : > { %14565 = vmatprep.mubr.bf16.mxu0 %v19986_v18  ;;  %14853 = vmatprep.mubr.bf16.mxu1 %v20018_v53  ;;  %v20111_v27 = vld [vmem:[#allocation11 + $0x350] ss:$8 sps:$4 sm:$0xff]   ;;  %v20064_v18 = vld [vmem:[#allocation11 + $0x124] ss:$8 sps:$4 sm:$0xff]  }
 0xf9b   : > { %v20114_v53 = vld [vmem:[#allocation11 + $0x364] ss:$8 sps:$4 sm:$0xff]  }
 0xfa1   : > { %14566 = vmatmul.mubr.bf16.gmra.mrb[84].mxu0 %v19988_v35  ;;  %14854 = vmatmul.mubr.bf16.gmra.mrb[92].mxu1 %v20021_v34  ;;  %v20068_v35 = vld [vmem:[#allocation11 + $0x120] ss:$8 sps:$4 sm:$0xff]  }
 0xfa2   : > { %14573 = vmatprep.mubr.bf16.mxu0 %v19989_v23  ;;  %14861 = vmatprep.mubr.bf16.mxu1 %v20024_v7  ;;  %v20117_v34 = vld [vmem:[#allocation11 + $0x360] ss:$8 sps:$4 sm:$0xff]   ;;  %v20070_v23 = vld [vmem:[#allocation11 + $0x134] ss:$8 sps:$4 sm:$0xff]  }
 0xfa3   : > { %v20120_v7 = vld [vmem:[#allocation11 + $0x374] ss:$8 sps:$4 sm:$0xff]  }
 0xfa9   : > { %14574 = vmatmul.mubr.bf16.gmra.mrb[88].mxu0 %v19991_v37  ;;  %14862 = vmatmul.mubr.bf16.gmra.mrb[96].mxu1 %v20027_v54  ;;  %v20074_v37 = vld [vmem:[#allocation11 + $0x130] ss:$8 sps:$4 sm:$0xff]  }
 0xfaa   : > { %14581 = vmatprep.mubr.bf16.mxu0 %v19992_v16  ;;  %14869 = vmatprep.mubr.bf16.mxu1 %v20030_v57  ;;  %v20123_v54 = vld [vmem:[#allocation11 + $0x370] ss:$8 sps:$4 sm:$0xff]   ;;  %v20076_v16 = vld [vmem:[#allocation11 + $0x144] ss:$8 sps:$4 sm:$0xff]  }
 0xfab   : > { %v20126_v57 = vld [vmem:[#allocation11 + $0x384] ss:$8 sps:$4 sm:$0xff]  }
 0xfb1   : > { %14582 = vmatmul.mubr.bf16.gmra.mrb[92].mxu0 %v19994_v3  ;;  %14870 = vmatmul.mubr.bf16.gmra.mrb[100].mxu1 %v20033_v17  ;;  %v20080_v3 = vld [vmem:[#allocation11 + $0x140] ss:$8 sps:$4 sm:$0xff]  }
 0xfb2   : > { %14589 = vmatprep.mubr.bf16.mxu0 %v19995_v41  ;;  %14877 = vmatprep.mubr.bf16.mxu1 %v20036_v49  ;;  %v20129_v17 = vld [vmem:[#allocation11 + $0x380] ss:$8 sps:$4 sm:$0xff]   ;;  %v20082_v41 = vld [vmem:[#allocation11 + $0x154] ss:$8 sps:$4 sm:$0xff]  }
 0xfb3   : > { %v20132_v49 = vld [vmem:[#allocation11 + $0x394] ss:$8 sps:$4 sm:$0xff]  }
 0xfb9   : > { %14590 = vmatmul.mubr.bf16.gmra.mrb[96].mxu0 %v19997_v45  ;;  %14878 = vmatmul.mubr.bf16.gmra.mrb[104].mxu1 %v20039_v60  ;;  %v20086_v45 = vld [vmem:[#allocation11 + $0x150] ss:$8 sps:$4 sm:$0xff]  }
 0xfba   : > { %14597 = vmatprep.mubr.bf16.mxu0 %v19998_v6  ;;  %14885 = vmatprep.mubr.bf16.mxu1 %v20042_v8  ;;  %v20135_v60 = vld [vmem:[#allocation11 + $0x390] ss:$8 sps:$4 sm:$0xff]   ;;  %v20088_v6 = vld [vmem:[#allocation11 + $0x164] ss:$8 sps:$4 sm:$0xff]  }
 0xfbb   : > { %v20138_v8 = vld [vmem:[#allocation11 + $0x3a4] ss:$8 sps:$4 sm:$0xff]  }
 0xfc1   : > { %14598 = vmatmul.mubr.bf16.gmra.mrb[100].mxu0 %v20000_v61  ;;  %14886 = vmatmul.mubr.bf16.gmra.mrb[108].mxu1 %v20045_v29  ;;  %v20092_v61 = vld [vmem:[#allocation11 + $0x160] ss:$8 sps:$4 sm:$0xff]  }
 0xfc2   : > { %14605 = vmatprep.mubr.bf16.mxu0 %v20001_v0  ;;  %14893 = vmatprep.mubr.bf16.mxu1 %v20048_v5  ;;  %v20141_v29 = vld [vmem:[#allocation11 + $0x3a0] ss:$8 sps:$4 sm:$0xff]   ;;  %v20094_v0 = vld [vmem:[#allocation11 + $0x174] ss:$8 sps:$4 sm:$0xff]  }
 0xfc3   : > { %v20144_v5 = vld [vmem:[#allocation11 + $0x3b4] ss:$8 sps:$4 sm:$0xff]  }
 0xfc9   : > { %14606 = vmatmul.mubr.bf16.gmra.mrb[104].mxu0 %v20003_v40  ;;  %14894 = vmatmul.mubr.bf16.gmra.mrb[112].mxu1 %v20051_v46  ;;  %v20098_v40 = vld [vmem:[#allocation11 + $0x170] ss:$8 sps:$4 sm:$0xff]  }
 0xfca   : > { %14613 = vmatprep.mubr.bf16.mxu0 %v20004_v19  ;;  %14901 = vmatprep.mubr.bf16.mxu1 %v20054_v63  ;;  %v20147_v46 = vld [vmem:[#allocation11 + $0x3b0] ss:$8 sps:$4 sm:$0xff]   ;;  %v20100_v19 = vld [vmem:[#allocation11 + $0x184] ss:$8 sps:$4 sm:$0xff]  }
 0xfcb   : > { %v20150_v63 = vld [vmem:[#allocation11 + $0x3c4] ss:$8 sps:$4 sm:$0xff]  }
 0xfd1   : > { %14614 = vmatmul.mubr.bf16.gmra.mrb[108].mxu0 %v20009_v48  ;;  %14902 = vmatmul.mubr.bf16.gmra.mrb[116].mxu1 %v20057_v51  ;;  %v20104_v48 = vld [vmem:[#allocation11 + $0x180] ss:$8 sps:$4 sm:$0xff]  }
 0xfd2   : > { %14621 = vmatprep.mubr.bf16.mxu0 %v20010_v43  ;;  %14909 = vmatprep.mubr.bf16.mxu1 %v20060_v26  ;;  %v20153_v51 = vld [vmem:[#allocation11 + $0x3c0] ss:$8 sps:$4 sm:$0xff]   ;;  %v20106_v43 = vld [vmem:[#allocation11 + $0x194] ss:$8 sps:$4 sm:$0xff]  }
 0xfd3   : > { %v20156_v26 = vld [vmem:[#allocation11 + $0x3d4] ss:$8 sps:$4 sm:$0xff]  }
 0xfd9   : > { %14622 = vmatmul.mubr.bf16.gmra.mrb[112].mxu0 %v20014_v25  ;;  %14910 = vmatmul.mubr.bf16.gmra.mrb[120].mxu1 %v20063_v50  ;;  %v20110_v25 = vld [vmem:[#allocation11 + $0x190] ss:$8 sps:$4 sm:$0xff]  }
 0xfda   : > { %14629 = vmatprep.mubr.bf16.mxu0 %v20016_v42  ;;  %14917 = vmatprep.mubr.bf16.mxu1 %v20066_v21  ;;  %v20159_v50 = vld [vmem:[#allocation11 + $0x3d0] ss:$8 sps:$4 sm:$0xff]   ;;  %v20112_v42 = vld [vmem:[#allocation11 + $0x1a4] ss:$8 sps:$4 sm:$0xff]  }
 0xfdb   : > { %v20162_v21 = vld [vmem:[#allocation11 + $0x3e4] ss:$8 sps:$4 sm:$0xff]  }
 0xfe1   : > { %14630 = vmatmul.mubr.bf16.gmra.mrb[116].mxu0 %v20020_v15  ;;  %14918 = vmatmul.mubr.bf16.gmra.mrb[124].mxu1 %v20069_v10  ;;  %v20116_v15 = vld [vmem:[#allocation11 + $0x1a0] ss:$8 sps:$4 sm:$0xff]  }
 0xfe2   : > { %14637 = vmatprep.mubr.bf16.mxu0 %v20022_v36  ;;  %14925 = vmatprep.mubr.bf16.mxu1 %v20072_v32  ;;  %v20165_v10 = vld [vmem:[#allocation11 + $0x3e0] ss:$8 sps:$4 sm:$0xff]   ;;  %v20118_v36 = vld [vmem:[#allocation11 + $0x1b4] ss:$8 sps:$4 sm:$0xff]  }
 0xfe3   : > { %v20168_v32 = vld [vmem:[#allocation11 + $0x3f4] ss:$8 sps:$4 sm:$0xff]  }
 0xfe9   : > { %14638 = vmatmul.mubr.bf16.gmra.mrb[120].mxu0 %v20026_v2  ;;  %14926 = vmatmul.mubr.bf16.gmra.mrb[128].mxu1 %v20075_v22 }
 0xfea   : > { %14645 = vmatprep.mubr.bf16.mxu0 %v20028_v39  ;;  %14933 = vmatprep.mubr.bf16.mxu1 %v20078_v1  ;;  %v20122_v1 = vld [vmem:[#allocation11 + $0x1b0] ss:$8 sps:$4 sm:$0xff]  }
 0xff1   : > { %14646 = vmatmul.mubr.bf16.gmra.mrb[124].mxu0 %v20032_v11  ;;  %14934 = vmatmul.mubr.bf16.gmra.mrb[132].mxu1 %v20081_v4  ;;  %v20171_v4 = vld [vmem:[#allocation11 + $0x3f0] ss:$8 sps:$4 sm:$0xff]  }
 0xff2   : > { %14653 = vmatprep.mubr.bf16.mxu0 %v20034_v9  ;;  %14941 = vmatprep.mubr.bf16.mxu1 %v20084_v28  ;;  %v20124_v28 = vld [vmem:[#allocation11 + $0x1c4] ss:$8 sps:$4 sm:$0xff]  }
 0xff9   : > { %14654 = vmatmul.mubr.bf16.gmra.mrb[128].mxu0 %v20038_v31  ;;  %14942 = vmatmul.mubr.bf16.gmra.mrb[136].mxu1 %v20087_v62 }
 0xffa   : > { %14661 = vmatprep.mubr.bf16.mxu0 %v20040_v59  ;;  %14949 = vmatprep.mubr.bf16.mxu1 %v20090_v24 }
0x1001   : > { %14662 = vmatmul.mubr.bf16.gmra.mrb[132].mxu0 %v20044_v38  ;;  %14950 = vmatmul.mubr.bf16.gmra.mrb[140].mxu1 %v20093_v47 }
0x1002   : > { %14669 = vmatprep.mubr.bf16.mxu0 %v20046_v58  ;;  %14957 = vmatprep.mubr.bf16.mxu1 %v20096_v14  ;;  %v20128_v58 = vld [vmem:[#allocation11 + $0x1c0] ss:$8 sps:$4 sm:$0xff]  }
0x1009   : > { %14670 = vmatmul.mubr.bf16.gmra.mrb[136].mxu0 %v20050_v20  ;;  %14958 = vmatmul.mubr.bf16.gmra.mrb[144].mxu1 %v20099_v13  ;;  %v20130_v13 = vld [vmem:[#allocation11 + $0x1d4] ss:$8 sps:$4 sm:$0xff]  }
0x100a   : > { %14677 = vmatprep.mubr.bf16.mxu0 %v20052_v12  ;;  %14965 = vmatprep.mubr.bf16.mxu1 %v20102_v30 }
0x1011   : > { %14678 = vmatmul.mubr.bf16.gmra.mrb[140].mxu0 %v20056_v55  ;;  %14966 = vmatmul.mubr.bf16.gmra.mrb[148].mxu1 %v20105_v56 }
0x1012   : > { %14685 = vmatprep.mubr.bf16.mxu0 %v20058_v44  ;;  %14973 = vmatprep.mubr.bf16.mxu1 %v20108_v33 }
0x1019   : > { %14686 = vmatmul.mubr.bf16.gmra.mrb[144].mxu0 %v20062_v52  ;;  %14974 = vmatmul.mubr.bf16.gmra.mrb[152].mxu1 %v20111_v27  ;;  %v20134_v52 = vld [vmem:[#allocation11 + $0x1d0] ss:$8 sps:$4 sm:$0xff]  }
0x101a   : > { %14693 = vmatprep.mubr.bf16.mxu0 %v20064_v18  ;;  %14981 = vmatprep.mubr.bf16.mxu1 %v20114_v53  ;;  %v20136_v53 = vld [vmem:[#allocation11 + $0x1e4] ss:$8 sps:$4 sm:$0xff]  }
0x1021   : > { %14694 = vmatmul.mubr.bf16.gmra.mrb[148].mxu0 %v20068_v35  ;;  %14982 = vmatmul.mubr.bf16.gmra.mrb[156].mxu1 %v20117_v34 }
0x1022   : > { %14701 = vmatprep.mubr.bf16.mxu0 %v20070_v23  ;;  %14989 = vmatprep.mubr.bf16.mxu1 %v20120_v7 }
0x1029   : > { %14702 = vmatmul.mubr.bf16.gmra.mrb[152].mxu0 %v20074_v37  ;;  %14990 = vmatmul.mubr.bf16.gmra.mrb[160].mxu1 %v20123_v54 }
0x102a   : > { %14709 = vmatprep.mubr.bf16.mxu0 %v20076_v16  ;;  %14997 = vmatprep.mubr.bf16.mxu1 %v20126_v57  ;;  %v20140_v16 = vld [vmem:[#allocation11 + $0x1e0] ss:$8 sps:$4 sm:$0xff]  }
0x1031   : > { %14710 = vmatmul.mubr.bf16.gmra.mrb[156].mxu0 %v20080_v3  ;;  %14998 = vmatmul.mubr.bf16.gmra.mrb[164].mxu1 %v20129_v17  ;;  %v20142_v17 = vld [vmem:[#allocation11 + $0x1f4] ss:$8 sps:$4 sm:$0xff]  }
0x1032   : > { %14717 = vmatprep.mubr.bf16.mxu0 %v20082_v41  ;;  %15005 = vmatprep.mubr.bf16.mxu1 %v20132_v49 }
0x1039   : > { %14718 = vmatmul.mubr.bf16.gmra.mrb[160].mxu0 %v20086_v45  ;;  %15006 = vmatmul.mubr.bf16.gmra.mrb[168].mxu1 %v20135_v60 }
0x103a   : > { %14725 = vmatprep.mubr.bf16.mxu0 %v20088_v6  ;;  %15013 = vmatprep.mubr.bf16.mxu1 %v20138_v8 }
0x1041   : > { %14726 = vmatmul.mubr.bf16.gmra.mrb[164].mxu0 %v20092_v61  ;;  %15014 = vmatmul.mubr.bf16.gmra.mrb[172].mxu1 %v20141_v29  ;;  %v20146_v61 = vld [vmem:[#allocation11 + $0x1f0] ss:$8 sps:$4 sm:$0xff]  }
0x1042   : > { %14733 = vmatprep.mubr.bf16.mxu0 %v20094_v0  ;;  %15021 = vmatprep.mubr.bf16.mxu1 %v20144_v5  ;;  %v20148_v5 = vld [vmem:[#allocation11 + $0x204] ss:$8 sps:$4 sm:$0xff]  }
0x1049   : > { %14734 = vmatmul.mubr.bf16.gmra.mrb[168].mxu0 %v20098_v40  ;;  %15022 = vmatmul.mubr.bf16.gmra.mrb[176].mxu1 %v20147_v46 }
0x104a   : > { %14741 = vmatprep.mubr.bf16.mxu0 %v20100_v19  ;;  %15029 = vmatprep.mubr.bf16.mxu1 %v20150_v63 }
0x1051   : > { %14742 = vmatmul.mubr.bf16.gmra.mrb[172].mxu0 %v20104_v48  ;;  %15030 = vmatmul.mubr.bf16.gmra.mrb[180].mxu1 %v20153_v51 }
0x1052   : > { %14749 = vmatprep.mubr.bf16.mxu0 %v20106_v43  ;;  %15037 = vmatprep.mubr.bf16.mxu1 %v20156_v26  ;;  %v20152_v43 = vld [vmem:[#allocation11 + $0x200] ss:$8 sps:$4 sm:$0xff]  }
0x1059   : > { %14750 = vmatmul.mubr.bf16.gmra.mrb[176].mxu0 %v20110_v25  ;;  %15038 = vmatmul.mubr.bf16.gmra.mrb[184].mxu1 %v20159_v50  ;;  %v20154_v50 = vld [vmem:[#allocation11 + $0x214] ss:$8 sps:$4 sm:$0xff]  }
0x105a   : > { %14757 = vmatprep.mubr.bf16.mxu0 %v20112_v42  ;;  %15045 = vmatprep.mubr.bf16.mxu1 %v20162_v21 }
0x1061   : > { %14758 = vmatmul.mubr.bf16.gmra.mrb[180].mxu0 %v20116_v15  ;;  %15046 = vmatmul.mubr.bf16.gmra.mrb[188].mxu1 %v20165_v10 }
0x1062   : > { %14765 = vmatprep.mubr.bf16.mxu0 %v20118_v36  ;;  %15053 = vmatprep.mubr.bf16.mxu1 %v20168_v32 }
0x1064   : > { %v14551_v2 = vpop.f32.mrb[76].mxu0  ;;  %v14839_v22 = vpop.f32.mrb[84].mxu1 }
0x1065   : > { %15062 = vst [vmem:[%s24764_s14] sm:$0xff] %v14551_v2  ;;  %v14553_v39 = vpop.f32.mrb[77].mxu0  ;;  %15134 = vst [vmem:[%s24764_s14 + $0x240] sm:$0xff] %v14839_v22  ;;  %v14841_v11 = vpop.f32.mrb[85].mxu1  ;;  %v20158_v2 = vld [vmem:[#allocation11 + $0x210] ss:$8 sps:$4 sm:$0xff]  }
0x1066   : > { %v14554_v9 = vpop.f32.mrb[78].mxu0  ;;  %v14842_v31 = vpop.f32.mrb[86].mxu1 }
0x1067   : > { %15063 = vst [vmem:[%s24764_s14 + $0x8] sm:$0xff] %v14554_v9  ;;  %v14556_v62 = vpop.f32.mrb[79].mxu0  ;;  %15135 = vst [vmem:[%s24764_s14 + $0x248] sm:$0xff] %v14842_v31  ;;  %v14844_v59 = vpop.f32.mrb[87].mxu1 }
0x1068   : > { %v20164_v59 = vld [vmem:[#allocation11 + $0x220] ss:$8 sps:$4 sm:$0xff]  }
0x1069   : > { %14766 = vmatmul.mubr.bf16.gmra.mrb[184].mxu0 %v20122_v1  ;;  %15054 = vmatmul.mubr.bf16.gmra.mrb[192].mxu1 %v20171_v4  ;;  %v20160_v1 = vld [vmem:[#allocation11 + $0x224] ss:$8 sps:$4 sm:$0xff]  }
0x106a   : > { %14773 = vmatprep.mubr.bf16.mxu0 %v20124_v28 }
0x106c   : > { %v14559_v24 = vpop.f32.mrb[80].mxu0  ;;  %v14847_v38 = vpop.f32.mrb[88].mxu1 }
0x106d   : > { %15064 = vst [vmem:[%s24764_s14 + $0x10] sm:$0xff] %v14559_v24  ;;  %v14561_v47 = vpop.f32.mrb[81].mxu0  ;;  %15136 = vst [vmem:[%s24764_s14 + $0x250] sm:$0xff] %v14847_v38  ;;  %v14849_v14 = vpop.f32.mrb[89].mxu1 }
0x106e   : > { %v14562_v20 = vpop.f32.mrb[82].mxu0  ;;  %v14850_v12 = vpop.f32.mrb[90].mxu1  ;;  %v20166_v47 = vld [vmem:[#allocation11 + $0x234] ss:$8 sps:$4 sm:$0xff]  }
0x106f   : > { %15065 = vst [vmem:[%s24764_s14 + $0x18] sm:$0xff] %v14562_v20  ;;  %v14564_v30 = vpop.f32.mrb[83].mxu0  ;;  %15137 = vst [vmem:[%s24764_s14 + $0x258] sm:$0xff] %v14850_v12  ;;  %v14852_v55 = vpop.f32.mrb[91].mxu1 }
0x1070   : > { %v20170_v55 = vld [vmem:[#allocation11 + $0x230] ss:$8 sps:$4 sm:$0xff]  }
0x1071   : > { %14774 = vmatmul.mubr.bf16.gmra.mrb[188].mxu0 %v20128_v58 }
0x1072   : > { %14781 = vmatprep.mubr.bf16.mxu0 %v20130_v13 }
0x1074   : > { %v14567_v56 = vpop.f32.mrb[84].mxu0  ;;  %v14855_v44 = vpop.f32.mrb[92].mxu1 }
0x1075   : > { %15066 = vst [vmem:[%s24764_s14 + $0x20] sm:$0xff] %v14567_v56  ;;  %v14569_v33 = vpop.f32.mrb[85].mxu0  ;;  %15138 = vst [vmem:[%s24764_s14 + $0x260] sm:$0xff] %v14855_v44  ;;  %v14857_v27 = vpop.f32.mrb[93].mxu1 }
0x1076   : > { %v14570_v18 = vpop.f32.mrb[86].mxu0  ;;  %v14858_v35 = vpop.f32.mrb[94].mxu1 }
0x1077   : > { %15067 = vst [vmem:[%s24764_s14 + $0x28] sm:$0xff] %v14570_v18  ;;  %v14572_v34 = vpop.f32.mrb[87].mxu0  ;;  %15139 = vst [vmem:[%s24764_s14 + $0x268] sm:$0xff] %v14858_v35  ;;  %v14860_v23 = vpop.f32.mrb[95].mxu1 }
0x1079   : > { %14782 = vmatmul.mubr.bf16.gmra.mrb[192].mxu0 %v20134_v52 }
0x107a   : > { %14789 = vmatprep.mubr.bf16.mxu0 %v20136_v53 }
0x107c   : > { %v14575_v7 = vpop.f32.mrb[88].mxu0  ;;  %v14863_v37 = vpop.f32.mrb[96].mxu1 }
0x107d   : > { %15068 = vst [vmem:[%s24764_s14 + $0x30] sm:$0xff] %v14575_v7  ;;  %v14577_v54 = vpop.f32.mrb[89].mxu0  ;;  %15140 = vst [vmem:[%s24764_s14 + $0x270] sm:$0xff] %v14863_v37  ;;  %v14865_v57 = vpop.f32.mrb[97].mxu1 }
0x107e   : > { %v14578_v3 = vpop.f32.mrb[90].mxu0  ;;  %v14866_v41 = vpop.f32.mrb[98].mxu1 }
0x107f   : > { %15069 = vst [vmem:[%s24764_s14 + $0x38] sm:$0xff] %v14578_v3  ;;  %v14580_v49 = vpop.f32.mrb[91].mxu0  ;;  %15141 = vst [vmem:[%s24764_s14 + $0x278] sm:$0xff] %v14866_v41  ;;  %v14868_v45 = vpop.f32.mrb[99].mxu1 }
0x1081   : > { %14790 = vmatmul.mubr.bf16.gmra.mrb[196].mxu0 %v20140_v16 }
0x1082   : > { %14797 = vmatprep.mubr.bf16.mxu0 %v20142_v17 }
0x1084   : > { %v14583_v60 = vpop.f32.mrb[92].mxu0  ;;  %v14871_v6 = vpop.f32.mrb[100].mxu1 }
0x1085   : > { %15070 = vst [vmem:[%s24764_s14 + $0x40] sm:$0xff] %v14583_v60  ;;  %v14585_v8 = vpop.f32.mrb[93].mxu0  ;;  %15142 = vst [vmem:[%s24764_s14 + $0x280] sm:$0xff] %v14871_v6  ;;  %v14873_v29 = vpop.f32.mrb[101].mxu1 }
0x1086   : > { %v14586_v0 = vpop.f32.mrb[94].mxu0  ;;  %v14874_v40 = vpop.f32.mrb[102].mxu1 }
0x1087   : > { %15071 = vst [vmem:[%s24764_s14 + $0x48] sm:$0xff] %v14586_v0  ;;  %v14588_v46 = vpop.f32.mrb[95].mxu0  ;;  %15143 = vst [vmem:[%s24764_s14 + $0x288] sm:$0xff] %v14874_v40  ;;  %v14876_v19 = vpop.f32.mrb[103].mxu1 }
0x1089   : > { %14798 = vmatmul.mubr.bf16.gmra.mrb[200].mxu0 %v20146_v61 }
0x108a   : > { %14805 = vmatprep.mubr.bf16.mxu0 %v20148_v5 }
0x108c   : > { %v14591_v63 = vpop.f32.mrb[96].mxu0  ;;  %v14879_v48 = vpop.f32.mrb[104].mxu1 }
0x108d   : > { %15072 = vst [vmem:[%s24764_s14 + $0x50] sm:$0xff] %v14591_v63  ;;  %v14593_v51 = vpop.f32.mrb[97].mxu0  ;;  %15144 = vst [vmem:[%s24764_s14 + $0x290] sm:$0xff] %v14879_v48  ;;  %v14881_v26 = vpop.f32.mrb[105].mxu1 }
0x108e   : > { %v14594_v25 = vpop.f32.mrb[98].mxu0  ;;  %v14882_v42 = vpop.f32.mrb[106].mxu1 }
0x108f   : > { %15073 = vst [vmem:[%s24764_s14 + $0x58] sm:$0xff] %v14594_v25  ;;  %v14596_v21 = vpop.f32.mrb[99].mxu0  ;;  %15145 = vst [vmem:[%s24764_s14 + $0x298] sm:$0xff] %v14882_v42  ;;  %v14884_v15 = vpop.f32.mrb[107].mxu1 }
0x1091   : > { %14806 = vmatmul.mubr.bf16.gmra.mrb[204].mxu0 %v20152_v43 }
0x1092   : > { %14813 = vmatprep.mubr.bf16.mxu0 %v20154_v50 }
0x1094   : > { %v14599_v10 = vpop.f32.mrb[100].mxu0  ;;  %v14887_v36 = vpop.f32.mrb[108].mxu1 }
0x1095   : > { %15074 = vst [vmem:[%s24764_s14 + $0x60] sm:$0xff] %v14599_v10  ;;  %v14601_v32 = vpop.f32.mrb[101].mxu0  ;;  %15146 = vst [vmem:[%s24764_s14 + $0x2a0] sm:$0xff] %v14887_v36  ;;  %v14889_v22 = vpop.f32.mrb[109].mxu1 }
0x1096   : > { %v14602_v39 = vpop.f32.mrb[102].mxu0  ;;  %v14890_v11 = vpop.f32.mrb[110].mxu1 }
0x1097   : > { %15075 = vst [vmem:[%s24764_s14 + $0x68] sm:$0xff] %v14602_v39  ;;  %v14604_v4 = vpop.f32.mrb[103].mxu0  ;;  %15147 = vst [vmem:[%s24764_s14 + $0x2a8] sm:$0xff] %v14890_v11  ;;  %v14892_v9 = vpop.f32.mrb[111].mxu1 }
0x1099   : > { %14814 = vmatmul.mubr.bf16.gmra.mrb[208].mxu0 %v20158_v2 }
0x109a   : > { %14821 = vmatprep.mubr.bf16.mxu0 %v20160_v1 }
0x109c   : > { %v14607_v28 = vpop.f32.mrb[104].mxu0  ;;  %v14895_v31 = vpop.f32.mrb[112].mxu1 }
0x109d   : > { %15076 = vst [vmem:[%s24764_s14 + $0x70] sm:$0xff] %v14607_v28  ;;  %v14609_v62 = vpop.f32.mrb[105].mxu0  ;;  %15148 = vst [vmem:[%s24764_s14 + $0x2b0] sm:$0xff] %v14895_v31  ;;  %v14897_v24 = vpop.f32.mrb[113].mxu1 }
0x109e   : > { %v14610_v38 = vpop.f32.mrb[106].mxu0  ;;  %v14898_v58 = vpop.f32.mrb[114].mxu1 }
0x109f   : > { %15077 = vst [vmem:[%s24764_s14 + $0x78] sm:$0xff] %v14610_v38  ;;  %v14612_v14 = vpop.f32.mrb[107].mxu0  ;;  %15149 = vst [vmem:[%s24764_s14 + $0x2b8] sm:$0xff] %v14898_v58  ;;  %v14900_v20 = vpop.f32.mrb[115].mxu1 }
0x10a1   : > { %14822 = vmatmul.mubr.bf16.gmra.mrb[212].mxu0 %v20164_v59 }
0x10a2   : > { %14829 = vmatprep.mubr.bf16.mxu0 %v20166_v47 }
0x10a4   : > { %v14615_v13 = vpop.f32.mrb[108].mxu0  ;;  %v14903_v12 = vpop.f32.mrb[116].mxu1 }
0x10a5   : > { %15078 = vst [vmem:[%s24764_s14 + $0x80] sm:$0xff] %v14615_v13  ;;  %v14617_v30 = vpop.f32.mrb[109].mxu0  ;;  %15150 = vst [vmem:[%s24764_s14 + $0x2c0] sm:$0xff] %v14903_v12  ;;  %v14905_v56 = vpop.f32.mrb[117].mxu1 }
0x10a6   : > { %v14618_v44 = vpop.f32.mrb[110].mxu0  ;;  %v14906_v33 = vpop.f32.mrb[118].mxu1 }
0x10a7   : > { %15079 = vst [vmem:[%s24764_s14 + $0x88] sm:$0xff] %v14618_v44  ;;  %v14620_v52 = vpop.f32.mrb[111].mxu0  ;;  %15151 = vst [vmem:[%s24764_s14 + $0x2c8] sm:$0xff] %v14906_v33  ;;  %v14908_v27 = vpop.f32.mrb[119].mxu1 }
0x10a9   : > { %14830 = vmatmul.mubr.bf16.gmra.mrb[216].mxu0 %v20170_v55 }
0x10ac   : > { %v14623_v18 = vpop.f32.mrb[112].mxu0  ;;  %v14911_v53 = vpop.f32.mrb[120].mxu1 }
0x10ad   : > { %15080 = vst [vmem:[%s24764_s14 + $0x90] sm:$0xff] %v14623_v18  ;;  %v14625_v35 = vpop.f32.mrb[113].mxu0  ;;  %15152 = vst [vmem:[%s24764_s14 + $0x2d0] sm:$0xff] %v14911_v53  ;;  %v14913_v34 = vpop.f32.mrb[121].mxu1 }
0x10ae   : > { %v14626_v23 = vpop.f32.mrb[114].mxu0  ;;  %v14914_v7 = vpop.f32.mrb[122].mxu1 }
0x10af   : > { %15081 = vst [vmem:[%s24764_s14 + $0x98] sm:$0xff] %v14626_v23  ;;  %v14628_v37 = vpop.f32.mrb[115].mxu0  ;;  %15153 = vst [vmem:[%s24764_s14 + $0x2d8] sm:$0xff] %v14914_v7  ;;  %v14916_v54 = vpop.f32.mrb[123].mxu1 }
0x10b4   : > { %v14631_v16 = vpop.f32.mrb[116].mxu0  ;;  %v14919_v57 = vpop.f32.mrb[124].mxu1 }
0x10b5   : > { %15082 = vst [vmem:[%s24764_s14 + $0xa0] sm:$0xff] %v14631_v16  ;;  %v14633_v3 = vpop.f32.mrb[117].mxu0  ;;  %15154 = vst [vmem:[%s24764_s14 + $0x2e0] sm:$0xff] %v14919_v57  ;;  %v14921_v17 = vpop.f32.mrb[125].mxu1 }
0x10b6   : > { %v14634_v41 = vpop.f32.mrb[118].mxu0  ;;  %v14922_v49 = vpop.f32.mrb[126].mxu1 }
0x10b7   : > { %15083 = vst [vmem:[%s24764_s14 + $0xa8] sm:$0xff] %v14634_v41  ;;  %v14636_v45 = vpop.f32.mrb[119].mxu0  ;;  %15155 = vst [vmem:[%s24764_s14 + $0x2e8] sm:$0xff] %v14922_v49  ;;  %v14924_v60 = vpop.f32.mrb[127].mxu1 }
0x10bc   : > { %v14639_v6 = vpop.f32.mrb[120].mxu0  ;;  %v14927_v8 = vpop.f32.mrb[128].mxu1 }
0x10bd   : > { %15084 = vst [vmem:[%s24764_s14 + $0xb0] sm:$0xff] %v14639_v6  ;;  %v14641_v61 = vpop.f32.mrb[121].mxu0  ;;  %15156 = vst [vmem:[%s24764_s14 + $0x2f0] sm:$0xff] %v14927_v8  ;;  %v14929_v29 = vpop.f32.mrb[129].mxu1 }
0x10be   : > { %v14642_v0 = vpop.f32.mrb[122].mxu0  ;;  %v14930_v5 = vpop.f32.mrb[130].mxu1 }
0x10bf   : > { %15085 = vst [vmem:[%s24764_s14 + $0xb8] sm:$0xff] %v14642_v0  ;;  %v14644_v40 = vpop.f32.mrb[123].mxu0  ;;  %15157 = vst [vmem:[%s24764_s14 + $0x2f8] sm:$0xff] %v14930_v5  ;;  %v14932_v46 = vpop.f32.mrb[131].mxu1 }
0x10c4   : > { %v14647_v19 = vpop.f32.mrb[124].mxu0  ;;  %v14935_v63 = vpop.f32.mrb[132].mxu1 }
0x10c5   : > { %15086 = vst [vmem:[%s24764_s14 + $0xc0] sm:$0xff] %v14647_v19  ;;  %v14649_v48 = vpop.f32.mrb[125].mxu0  ;;  %15158 = vst [vmem:[%s24764_s14 + $0x300] sm:$0xff] %v14935_v63  ;;  %v14937_v51 = vpop.f32.mrb[133].mxu1 }
0x10c6   : > { %v14650_v43 = vpop.f32.mrb[126].mxu0  ;;  %v14938_v26 = vpop.f32.mrb[134].mxu1 }
0x10c7   : > { %15087 = vst [vmem:[%s24764_s14 + $0xc8] sm:$0xff] %v14650_v43  ;;  %v14652_v25 = vpop.f32.mrb[127].mxu0  ;;  %15159 = vst [vmem:[%s24764_s14 + $0x308] sm:$0xff] %v14938_v26  ;;  %v14940_v50 = vpop.f32.mrb[135].mxu1 }
0x10cc   : > { %v14655_v42 = vpop.f32.mrb[128].mxu0  ;;  %v14943_v21 = vpop.f32.mrb[136].mxu1 }
0x10cd   : > { %15088 = vst [vmem:[%s24764_s14 + $0xd0] sm:$0xff] %v14655_v42  ;;  %v14657_v15 = vpop.f32.mrb[129].mxu0  ;;  %15160 = vst [vmem:[%s24764_s14 + $0x310] sm:$0xff] %v14943_v21  ;;  %v14945_v10 = vpop.f32.mrb[137].mxu1 }
0x10ce   : > { %v14658_v36 = vpop.f32.mrb[130].mxu0  ;;  %v14946_v32 = vpop.f32.mrb[138].mxu1 }
0x10cf   : > { %15089 = vst [vmem:[%s24764_s14 + $0xd8] sm:$0xff] %v14658_v36  ;;  %v14660_v2 = vpop.f32.mrb[131].mxu0  ;;  %15161 = vst [vmem:[%s24764_s14 + $0x318] sm:$0xff] %v14946_v32  ;;  %v14948_v22 = vpop.f32.mrb[139].mxu1 }
0x10d4   : > { %v14663_v39 = vpop.f32.mrb[132].mxu0  ;;  %v14951_v1 = vpop.f32.mrb[140].mxu1 }
0x10d5   : > { %15090 = vst [vmem:[%s24764_s14 + $0xe0] sm:$0xff] %v14663_v39  ;;  %v14665_v11 = vpop.f32.mrb[133].mxu0  ;;  %15162 = vst [vmem:[%s24764_s14 + $0x320] sm:$0xff] %v14951_v1  ;;  %v14953_v4 = vpop.f32.mrb[141].mxu1 }
0x10d6   : > { %v14666_v9 = vpop.f32.mrb[134].mxu0  ;;  %v14954_v28 = vpop.f32.mrb[142].mxu1 }
0x10d7   : > { %15091 = vst [vmem:[%s24764_s14 + $0xe8] sm:$0xff] %v14666_v9  ;;  %v14668_v31 = vpop.f32.mrb[135].mxu0  ;;  %15163 = vst [vmem:[%s24764_s14 + $0x328] sm:$0xff] %v14954_v28  ;;  %v14956_v62 = vpop.f32.mrb[143].mxu1 }
0x10dc   : > { %v14671_v59 = vpop.f32.mrb[136].mxu0  ;;  %v14959_v24 = vpop.f32.mrb[144].mxu1 }
0x10dd   : > { %15092 = vst [vmem:[%s24764_s14 + $0xf0] sm:$0xff] %v14671_v59  ;;  %v14673_v38 = vpop.f32.mrb[137].mxu0  ;;  %15164 = vst [vmem:[%s24764_s14 + $0x330] sm:$0xff] %v14959_v24  ;;  %v14961_v47 = vpop.f32.mrb[145].mxu1 }
0x10de   : > { %v14674_v58 = vpop.f32.mrb[138].mxu0  ;;  %v14962_v14 = vpop.f32.mrb[146].mxu1 }
0x10df   : > { %15093 = vst [vmem:[%s24764_s14 + $0xf8] sm:$0xff] %v14674_v58  ;;  %v14676_v20 = vpop.f32.mrb[139].mxu0  ;;  %15165 = vst [vmem:[%s24764_s14 + $0x338] sm:$0xff] %v14962_v14  ;;  %v14964_v13 = vpop.f32.mrb[147].mxu1 }
0x10e4   : > { %v14679_v12 = vpop.f32.mrb[140].mxu0  ;;  %v14967_v30 = vpop.f32.mrb[148].mxu1 }
0x10e5   : > { %15094 = vst [vmem:[%s24764_s14 + $0x100] sm:$0xff] %v14679_v12  ;;  %v14681_v55 = vpop.f32.mrb[141].mxu0  ;;  %15166 = vst [vmem:[%s24764_s14 + $0x340] sm:$0xff] %v14967_v30  ;;  %v14969_v56 = vpop.f32.mrb[149].mxu1 }
0x10e6   : > { %v14682_v44 = vpop.f32.mrb[142].mxu0  ;;  %v14970_v33 = vpop.f32.mrb[150].mxu1 }
0x10e7   : > { %15095 = vst [vmem:[%s24764_s14 + $0x108] sm:$0xff] %v14682_v44  ;;  %v14684_v52 = vpop.f32.mrb[143].mxu0  ;;  %15167 = vst [vmem:[%s24764_s14 + $0x348] sm:$0xff] %v14970_v33  ;;  %v14972_v27 = vpop.f32.mrb[151].mxu1 }
0x10ec   : > { %v14687_v18 = vpop.f32.mrb[144].mxu0  ;;  %v14975_v53 = vpop.f32.mrb[152].mxu1 }
0x10ed   : > { %15096 = vst [vmem:[%s24764_s14 + $0x110] sm:$0xff] %v14687_v18  ;;  %v14689_v35 = vpop.f32.mrb[145].mxu0  ;;  %15168 = vst [vmem:[%s24764_s14 + $0x350] sm:$0xff] %v14975_v53  ;;  %v14977_v34 = vpop.f32.mrb[153].mxu1 }
0x10ee   : > { %v14690_v23 = vpop.f32.mrb[146].mxu0  ;;  %v14978_v7 = vpop.f32.mrb[154].mxu1 }
0x10ef   : > { %15097 = vst [vmem:[%s24764_s14 + $0x118] sm:$0xff] %v14690_v23  ;;  %v14692_v37 = vpop.f32.mrb[147].mxu0  ;;  %15169 = vst [vmem:[%s24764_s14 + $0x358] sm:$0xff] %v14978_v7  ;;  %v14980_v54 = vpop.f32.mrb[155].mxu1 }
0x10f4   : > { %v14695_v16 = vpop.f32.mrb[148].mxu0  ;;  %v14983_v57 = vpop.f32.mrb[156].mxu1 }
0x10f5   : > { %15098 = vst [vmem:[%s24764_s14 + $0x120] sm:$0xff] %v14695_v16  ;;  %v14697_v3 = vpop.f32.mrb[149].mxu0  ;;  %15170 = vst [vmem:[%s24764_s14 + $0x360] sm:$0xff] %v14983_v57  ;;  %v14985_v17 = vpop.f32.mrb[157].mxu1 }
0x10f6   : > { %v14698_v41 = vpop.f32.mrb[150].mxu0  ;;  %v14986_v49 = vpop.f32.mrb[158].mxu1 }
0x10f7   : > { %15099 = vst [vmem:[%s24764_s14 + $0x128] sm:$0xff] %v14698_v41  ;;  %v14700_v45 = vpop.f32.mrb[151].mxu0  ;;  %15171 = vst [vmem:[%s24764_s14 + $0x368] sm:$0xff] %v14986_v49  ;;  %v14988_v60 = vpop.f32.mrb[159].mxu1 }
0x10fc   : > { %v14703_v6 = vpop.f32.mrb[152].mxu0  ;;  %v14991_v8 = vpop.f32.mrb[160].mxu1 }
0x10fd   : > { %15100 = vst [vmem:[%s24764_s14 + $0x130] sm:$0xff] %v14703_v6  ;;  %v14705_v61 = vpop.f32.mrb[153].mxu0  ;;  %15172 = vst [vmem:[%s24764_s14 + $0x370] sm:$0xff] %v14991_v8  ;;  %v14993_v29 = vpop.f32.mrb[161].mxu1 }
0x10fe   : > { %v14706_v0 = vpop.f32.mrb[154].mxu0  ;;  %v14994_v5 = vpop.f32.mrb[162].mxu1 }
0x10ff   : > { %15101 = vst [vmem:[%s24764_s14 + $0x138] sm:$0xff] %v14706_v0  ;;  %v14708_v40 = vpop.f32.mrb[155].mxu0  ;;  %15173 = vst [vmem:[%s24764_s14 + $0x378] sm:$0xff] %v14994_v5  ;;  %v14996_v46 = vpop.f32.mrb[163].mxu1 }
0x1104   : > { %v14711_v19 = vpop.f32.mrb[156].mxu0  ;;  %v14999_v63 = vpop.f32.mrb[164].mxu1 }
0x1105   : > { %15102 = vst [vmem:[%s24764_s14 + $0x140] sm:$0xff] %v14711_v19  ;;  %v14713_v48 = vpop.f32.mrb[157].mxu0  ;;  %15174 = vst [vmem:[%s24764_s14 + $0x380] sm:$0xff] %v14999_v63  ;;  %v15001_v51 = vpop.f32.mrb[165].mxu1 }
0x1106   : > { %v14714_v43 = vpop.f32.mrb[158].mxu0  ;;  %v15002_v26 = vpop.f32.mrb[166].mxu1 }
0x1107   : > { %15103 = vst [vmem:[%s24764_s14 + $0x148] sm:$0xff] %v14714_v43  ;;  %v14716_v25 = vpop.f32.mrb[159].mxu0  ;;  %15175 = vst [vmem:[%s24764_s14 + $0x388] sm:$0xff] %v15002_v26  ;;  %v15004_v50 = vpop.f32.mrb[167].mxu1 }
0x110c   : > { %v14719_v42 = vpop.f32.mrb[160].mxu0  ;;  %v15007_v21 = vpop.f32.mrb[168].mxu1 }
0x110d   : > { %15104 = vst [vmem:[%s24764_s14 + $0x150] sm:$0xff] %v14719_v42  ;;  %v14721_v15 = vpop.f32.mrb[161].mxu0  ;;  %15176 = vst [vmem:[%s24764_s14 + $0x390] sm:$0xff] %v15007_v21  ;;  %v15009_v10 = vpop.f32.mrb[169].mxu1 }
0x110e   : > { %v14722_v36 = vpop.f32.mrb[162].mxu0  ;;  %v15010_v32 = vpop.f32.mrb[170].mxu1 }
0x110f   : > { %15105 = vst [vmem:[%s24764_s14 + $0x158] sm:$0xff] %v14722_v36  ;;  %v14724_v2 = vpop.f32.mrb[163].mxu0  ;;  %15177 = vst [vmem:[%s24764_s14 + $0x398] sm:$0xff] %v15010_v32  ;;  %v15012_v22 = vpop.f32.mrb[171].mxu1 }
0x1114   : > { %v14727_v39 = vpop.f32.mrb[164].mxu0  ;;  %v15015_v1 = vpop.f32.mrb[172].mxu1 }
0x1115   : > { %15106 = vst [vmem:[%s24764_s14 + $0x160] sm:$0xff] %v14727_v39  ;;  %v14729_v11 = vpop.f32.mrb[165].mxu0  ;;  %15178 = vst [vmem:[%s24764_s14 + $0x3a0] sm:$0xff] %v15015_v1  ;;  %v15017_v4 = vpop.f32.mrb[173].mxu1 }
0x1116   : > { %v14730_v9 = vpop.f32.mrb[166].mxu0  ;;  %v15018_v28 = vpop.f32.mrb[174].mxu1 }
0x1117   : > { %15107 = vst [vmem:[%s24764_s14 + $0x168] sm:$0xff] %v14730_v9  ;;  %v14732_v31 = vpop.f32.mrb[167].mxu0  ;;  %15179 = vst [vmem:[%s24764_s14 + $0x3a8] sm:$0xff] %v15018_v28  ;;  %v15020_v62 = vpop.f32.mrb[175].mxu1 }
0x111c   : > { %v14735_v59 = vpop.f32.mrb[168].mxu0  ;;  %v15023_v24 = vpop.f32.mrb[176].mxu1 }
0x111d   : > { %15108 = vst [vmem:[%s24764_s14 + $0x170] sm:$0xff] %v14735_v59  ;;  %v14737_v38 = vpop.f32.mrb[169].mxu0  ;;  %15180 = vst [vmem:[%s24764_s14 + $0x3b0] sm:$0xff] %v15023_v24  ;;  %v15025_v47 = vpop.f32.mrb[177].mxu1 }
0x111e   : > { %v14738_v58 = vpop.f32.mrb[170].mxu0  ;;  %v15026_v14 = vpop.f32.mrb[178].mxu1 }
0x111f   : > { %15109 = vst [vmem:[%s24764_s14 + $0x178] sm:$0xff] %v14738_v58  ;;  %v14740_v20 = vpop.f32.mrb[171].mxu0  ;;  %15181 = vst [vmem:[%s24764_s14 + $0x3b8] sm:$0xff] %v15026_v14  ;;  %v15028_v13 = vpop.f32.mrb[179].mxu1 }
0x1124   : > { %v14743_v12 = vpop.f32.mrb[172].mxu0  ;;  %v15031_v30 = vpop.f32.mrb[180].mxu1 }
0x1125   : > { %15110 = vst [vmem:[%s24764_s14 + $0x180] sm:$0xff] %v14743_v12  ;;  %v14745_v55 = vpop.f32.mrb[173].mxu0  ;;  %15182 = vst [vmem:[%s24764_s14 + $0x3c0] sm:$0xff] %v15031_v30  ;;  %v15033_v56 = vpop.f32.mrb[181].mxu1 }
0x1126   : > { %v14746_v44 = vpop.f32.mrb[174].mxu0  ;;  %v15034_v33 = vpop.f32.mrb[182].mxu1 }
0x1127   : > { %15111 = vst [vmem:[%s24764_s14 + $0x188] sm:$0xff] %v14746_v44  ;;  %v14748_v52 = vpop.f32.mrb[175].mxu0  ;;  %15183 = vst [vmem:[%s24764_s14 + $0x3c8] sm:$0xff] %v15034_v33  ;;  %v15036_v27 = vpop.f32.mrb[183].mxu1 }
0x112c   : > { %v14751_v18 = vpop.f32.mrb[176].mxu0  ;;  %v15039_v53 = vpop.f32.mrb[184].mxu1 }
0x112d   : > { %15112 = vst [vmem:[%s24764_s14 + $0x190] sm:$0xff] %v14751_v18  ;;  %v14753_v35 = vpop.f32.mrb[177].mxu0  ;;  %15184 = vst [vmem:[%s24764_s14 + $0x3d0] sm:$0xff] %v15039_v53  ;;  %v15041_v34 = vpop.f32.mrb[185].mxu1 }
0x112e   : > { %v14754_v23 = vpop.f32.mrb[178].mxu0  ;;  %v15042_v7 = vpop.f32.mrb[186].mxu1 }
0x112f   : > { %15113 = vst [vmem:[%s24764_s14 + $0x198] sm:$0xff] %v14754_v23  ;;  %v14756_v37 = vpop.f32.mrb[179].mxu0  ;;  %15185 = vst [vmem:[%s24764_s14 + $0x3d8] sm:$0xff] %v15042_v7  ;;  %v15044_v54 = vpop.f32.mrb[187].mxu1 }
0x1134   : > { %v14759_v16 = vpop.f32.mrb[180].mxu0  ;;  %v15047_v57 = vpop.f32.mrb[188].mxu1 }
0x1135   : > { %15114 = vst [vmem:[%s24764_s14 + $0x1a0] sm:$0xff] %v14759_v16  ;;  %v14761_v3 = vpop.f32.mrb[181].mxu0  ;;  %15186 = vst [vmem:[%s24764_s14 + $0x3e0] sm:$0xff] %v15047_v57  ;;  %v15049_v17 = vpop.f32.mrb[189].mxu1 }
0x1136   : > { %v14762_v41 = vpop.f32.mrb[182].mxu0  ;;  %v15050_v49 = vpop.f32.mrb[190].mxu1 }
0x1137   : > { %15115 = vst [vmem:[%s24764_s14 + $0x1a8] sm:$0xff] %v14762_v41  ;;  %v14764_v45 = vpop.f32.mrb[183].mxu0  ;;  %15187 = vst [vmem:[%s24764_s14 + $0x3e8] sm:$0xff] %v15050_v49  ;;  %v15052_v60 = vpop.f32.mrb[191].mxu1 }
0x113c   : > { %v14767_v6 = vpop.f32.mrb[184].mxu0  ;;  %v15055_v8 = vpop.f32.mrb[192].mxu1 }
0x113d   : > { %15116 = vst [vmem:[%s24764_s14 + $0x1b0] sm:$0xff] %v14767_v6  ;;  %v14769_v61 = vpop.f32.mrb[185].mxu0  ;;  %15188 = vst [vmem:[%s24764_s14 + $0x3f0] sm:$0xff] %v15055_v8  ;;  %v15057_v29 = vpop.f32.mrb[193].mxu1 }
0x113e   : > { %v14770_v0 = vpop.f32.mrb[186].mxu0  ;;  %v15058_v5 = vpop.f32.mrb[194].mxu1 }
0x113f   : > { %15117 = vst [vmem:[%s24764_s14 + $0x1b8] sm:$0xff] %v14770_v0  ;;  %v14772_v40 = vpop.f32.mrb[187].mxu0  ;;  %15189 = vst [vmem:[%s24764_s14 + $0x3f8] sm:$0xff] %v15058_v5  ;;  %v15060_v46 = vpop.f32.mrb[195].mxu1 }
0x1144   : > { %v14775_v19 = vpop.f32.mrb[188].mxu0 }
0x1145   : > { %15118 = vst [vmem:[%s24764_s14 + $0x1c0] sm:$0xff] %v14775_v19  ;;  %v14777_v63 = vpop.f32.mrb[189].mxu0 }
0x1146   : > { %v14778_v48 = vpop.f32.mrb[190].mxu0 }
0x1147   : > { %15119 = vst [vmem:[%s24764_s14 + $0x1c8] sm:$0xff] %v14778_v48  ;;  %v14780_v51 = vpop.f32.mrb[191].mxu0 }
0x114c   : > { %v14783_v43 = vpop.f32.mrb[192].mxu0 }
0x114d   : > { %15120 = vst [vmem:[%s24764_s14 + $0x1d0] sm:$0xff] %v14783_v43  ;;  %v14785_v26 = vpop.f32.mrb[193].mxu0 }
0x114e   : > { %v14786_v25 = vpop.f32.mrb[194].mxu0 }
0x114f   : > { %15121 = vst [vmem:[%s24764_s14 + $0x1d8] sm:$0xff] %v14786_v25  ;;  %v14788_v50 = vpop.f32.mrb[195].mxu0 }
0x1154   : > { %v14791_v42 = vpop.f32.mrb[196].mxu0 }
0x1155   : > { %15122 = vst [vmem:[%s24764_s14 + $0x1e0] sm:$0xff] %v14791_v42  ;;  %v14793_v21 = vpop.f32.mrb[197].mxu0 }
0x1156   : > { %v14794_v15 = vpop.f32.mrb[198].mxu0 }
0x1157   : > { %15123 = vst [vmem:[%s24764_s14 + $0x1e8] sm:$0xff] %v14794_v15  ;;  %v14796_v10 = vpop.f32.mrb[199].mxu0 }
0x115c   : > { %v14799_v36 = vpop.f32.mrb[200].mxu0 }
0x115d   : > { %15124 = vst [vmem:[%s24764_s14 + $0x1f0] sm:$0xff] %v14799_v36  ;;  %v14801_v32 = vpop.f32.mrb[201].mxu0 }
0x115e   : > { %v14802_v2 = vpop.f32.mrb[202].mxu0 }
0x115f   : > { %15125 = vst [vmem:[%s24764_s14 + $0x1f8] sm:$0xff] %v14802_v2  ;;  %v14804_v22 = vpop.f32.mrb[203].mxu0 }
0x1164   : > { %v14807_v39 = vpop.f32.mrb[204].mxu0 }
0x1165   : > { %15126 = vst [vmem:[%s24764_s14 + $0x200] sm:$0xff] %v14807_v39  ;;  %v14809_v1 = vpop.f32.mrb[205].mxu0 }
0x1166   : > { %v14810_v11 = vpop.f32.mrb[206].mxu0 }
0x1167   : > { %15127 = vst [vmem:[%s24764_s14 + $0x208] sm:$0xff] %v14810_v11  ;;  %v14812_v4 = vpop.f32.mrb[207].mxu0 }
0x116c   : > { %v14815_v9 = vpop.f32.mrb[208].mxu0 }
0x116d   : > { %15128 = vst [vmem:[%s24764_s14 + $0x210] sm:$0xff] %v14815_v9  ;;  %v14817_v28 = vpop.f32.mrb[209].mxu0 }
0x116e   : > { %v14818_v31 = vpop.f32.mrb[210].mxu0 }
0x116f   : > { %15129 = vst [vmem:[%s24764_s14 + $0x218] sm:$0xff] %v14818_v31  ;;  %v14820_v62 = vpop.f32.mrb[211].mxu0 }
0x1174   : > { %v14823_v59 = vpop.f32.mrb[212].mxu0 }
0x1175   : > { %15130 = vst [vmem:[%s24764_s14 + $0x220] sm:$0xff] %v14823_v59  ;;  %v14825_v24 = vpop.f32.mrb[213].mxu0 }
0x1176   : > { %v14826_v38 = vpop.f32.mrb[214].mxu0 }
0x1177   : > { %15131 = vst [vmem:[%s24764_s14 + $0x228] sm:$0xff] %v14826_v38  ;;  %v14828_v47 = vpop.f32.mrb[215].mxu0 }
0x117c   : > { %v14831_v58 = vpop.f32.mrb[216].mxu0 }
0x117d   : > { %15132 = vst [vmem:[%s24764_s14 + $0x230] sm:$0xff] %v14831_v58  ;;  %v14833_v14 = vpop.f32.mrb[217].mxu0 }
0x117e   : > { %v14834_v20 = vpop.f32.mrb[218].mxu0 }
0x117f   : > { %15133 = vst [vmem:[%s24764_s14 + $0x238] sm:$0xff] %v14834_v20  ;;  %v14836_v13 = vpop.f32.mrb[219].mxu0 }
0x1180 PF: > { %s26023_s22 = sld [smem:[#allocation14_spill]] }
0x1186   : > { %s28_s21 = sadd.s32 1, %s26023_s22  }
0x1187   : > { %p25_p3 = scmp.ge.s32.totalorder %s28_s21, 4  }
0x1189   :  { %27 = sbr.rel (!%p25_p3) target bundleno = 7 (0x7), region = 167 }
0x1190   :  { %15211 = vsyncpa [#allocation8], 1 }
0x1191   :  { %15213 = vsyncpa [#allocation8 + $0x1], 1 }
0x1192   :  { %15214 = vsyncpa [#allocation10], 1 }

</bundles_post_ra>
